<compile_context>
chip_gen: v5e
topology: v5e:2x2
jax: 0.10.0
libtpu: 0.0.40
codegen_flags: <defaults>
</compile_context>

<pallas_src>
import jax
import jax.numpy as jnp
import numpy as np
from jax.experimental import pallas as pl
from jax.experimental.pallas import tpu as pltpu


# ---------------------------------------------------------------------------
# In-kernel building block: 3x3 SAME conv + bias + ReLU + 2x2 max-pool in the
# merged-(W,C) lane layout.  Horizontal taps / horizontal pooling / column halo
# are already folded into w_ref (built host-side), so only vertical taps and
# the vertical pool pair are handled here.
# ---------------------------------------------------------------------------
def _conv_pool_block(act, w_ref, b_ref, out_rows):
    # act:   (out_rows + 2, Win*Cin)  f32  (rows carry the 1-px vertical halo)
    # w_ref: (2, 3, Win*Cin, Wpooled*Cout) bf16; [even/odd output column, vertical tap]
    # b_ref: (1, Wpooled*Cout) f32
    # returns (out_rows // 2, Wpooled*Cout) f32
    n_out = w_ref.shape[3]
    pair = []
    for eo in range(2):                       # even / odd output columns = horizontal pool pair
        acc = None
        for dh in range(3):                   # vertical taps, accumulated in f32
            lhs = act[dh:dh + out_rows, :].astype(jnp.bfloat16)
            d = jnp.dot(lhs, w_ref[eo, dh], preferred_element_type=jnp.float32)
            acc = d if acc is None else acc + d
        pair.append(acc)
    # max-pool before bias+ReLU: legal because x -> relu(x + b) is monotone and
    # the bias is identical across the four pooled elements.
    tw = jnp.maximum(pair[0], pair[1])                               # horizontal 2x1 pool
    th = jnp.max(tw.reshape(out_rows // 2, 2, n_out), axis=1)        # vertical 2x1 pool
    return jnp.maximum(th + b_ref[...], 0.0)                         # bias + ReLU


def _fused_cnn_kernel(x_ref, mask_ref, w1_ref, b1_ref, w2_ref, b2_ref,
                      w3_ref, b3_ref, o_ref):
    xr = x_ref[0]                                   # (38, 38*3) f32, zero-padded by 3

    # conv1 + ReLU + pool: output rows 0..17 = pooled positions -1..16 (1-px halo
    # that conv2 needs).  Halo *rows* are junk -> zeroed by the mask input; halo
    # *columns* are neutralized by zero rows inside the folded conv2 weights.
    h1 = _conv_pool_block(xr, w1_ref, b1_ref, xr.shape[0] - 2)       # (18, 18*C1)
    h1 = h1 * mask_ref[...]

    # conv2 + ReLU + pool
    h2 = _conv_pool_block(h1, w2_ref, b2_ref, h1.shape[0] - 2)       # (8, 8*C2)

    # flatten in NHWC order (fc1 weight rows were permuted to match) + fc1 + ReLU
    flat = jnp.concatenate([h2[i:i + 1, :] for i in range(h2.shape[0])],
                           axis=-1)                                  # (1, 64*C2)
    y = jnp.dot(flat.astype(jnp.bfloat16), w3_ref[...],
                preferred_element_type=jnp.float32) + b3_ref[...]
    o_ref[0] = jnp.maximum(y, 0.0)


# ---------------------------------------------------------------------------
# Host-side parameter folding (one time, bit-exact re-arrangement + bf16 cast).
# ---------------------------------------------------------------------------
def init_params(key, scale_factor=1):
    """Parameters in the original PyTorch layouts."""
    c1 = int(16 * scale_factor)
    c2 = int(32 * scale_factor)
    nf = 512
    ks = jax.random.split(key, 6)
    return {
        "conv1_w": 0.1 * jax.random.normal(ks[0], (c1, 3, 3, 3), jnp.float32),   # OIHW
        "conv1_b": 0.1 * jax.random.normal(ks[1], (c1,), jnp.float32),
        "conv2_w": 0.1 * jax.random.normal(ks[2], (c2, c1, 3, 3), jnp.float32),  # OIHW
        "conv2_b": 0.1 * jax.random.normal(ks[3], (c2,), jnp.float32),
        "fc1_w": 0.05 * jax.random.normal(ks[4], (nf, c2 * 8 * 8), jnp.float32), # (N, K) NCHW-flat
        "fc1_b": 0.05 * jax.random.normal(ks[5], (nf,), jnp.float32),
    }


def fold_params(p):
    """Build the merged-lane, block-structured kernel weights (bf16)."""
    w1 = np.asarray(p["conv1_w"], np.float32)       # (C1, 3, 3, 3)
    w2 = np.asarray(p["conv2_w"], np.float32)       # (C2, C1, 3, 3)
    w3 = np.asarray(p["fc1_w"], np.float32)         # (NF, C2*64)
    c1, c2, nf = w1.shape[0], w2.shape[0], w3.shape[0]

    # conv1: input is the 32x32 image zero-padded by 3, laid out as (38, 38*3).
    # m1[eo, dh, wi*3+ic, w8*C1+oc] = W1[oc, ic, dh, dw] with wi = 2*w8 + eo + dw.
    m1 = np.zeros((2, 3, 38 * 3, 18 * c1), np.float32)
    for eo in range(2):
        for dh in range(3):
            for w8 in range(18):
                for dw in range(3):
                    wi = 2 * w8 + eo + dw
                    m1[eo, dh, wi * 3:(wi + 1) * 3,
                       w8 * c1:(w8 + 1) * c1] = w1[:, :, dh, dw].T
    # conv2: input is h1 in (18, 18*C1) layout; column q in {0, 17} is SAME
    # padding (junk in the activation) -> leave those weight rows zero.
    m2 = np.zeros((2, 3, 18 * c1, 8 * c2), np.float32)
    for eo in range(2):
        for dh in range(3):
            for w8 in range(8):
                for dw in range(3):
                    q = 2 * w8 + eo + dw
                    if 1 <= q <= 16:
                        m2[eo, dh, q * c1:(q + 1) * c1,
                           w8 * c2:(w8 + 1) * c2] = w2[:, :, dh, dw].T
    # fc1: permute K rows from torch's NCHW-flat order (c*64 + y*8 + x) to the
    # kernel's NHWC-flat order (y*8*C2 + x*C2 + c).  Bit-identical result.
    w3p = w3.reshape(nf, c2, 8, 8).transpose(0, 2, 3, 1).reshape(nf, 64 * c2).T

    # mask zeroing the pooled halo rows (pooled positions -1 and 16).
    mask = np.ones((18, 1), np.float32)
    mask[0, 0] = 0.0
    mask[17, 0] = 0.0

    bf16 = jnp.bfloat16
    return {
        "w1": jnp.asarray(m1, bf16),
        "b1": jnp.asarray(np.tile(np.asarray(p["conv1_b"], np.float32), 18)[None, :]),
        "w2": jnp.asarray(m2, bf16),
        "b2": jnp.asarray(np.tile(np.asarray(p["conv2_b"], np.float32), 8)[None, :]),
        "w3": jnp.asarray(w3p, bf16),
        "b3": jnp.asarray(np.asarray(p["fc1_b"], np.float32)[None, :]),
        "mask": jnp.asarray(mask),
    }


# ---------------------------------------------------------------------------
# Forward pass: one fused pallas_call, one grid step per image.
# ---------------------------------------------------------------------------
def adjustable_cnn_forward(x_nchw, kp):
    B, C, H, W = x_nchw.shape
    nf = kp["b3"].shape[1]

    # NCHW -> NHWC, zero-pad H/W by 3 (1 for conv1's SAME pad + 2 so the pooled
    # output already carries conv2's 1-pixel halo), merge (W, C) onto lanes.
    x = jnp.transpose(x_nchw, (0, 2, 3, 1))
    x = jnp.pad(x, ((0, 0), (3, 3), (3, 3), (0, 0)))
    x = x.reshape(B, H + 6, (W + 6) * C)                       # (B, 38, 114) f32

    out = pl.pallas_call(
        _fused_cnn_kernel,
        out_shape=jax.ShapeDtypeStruct((B, 1, nf), jnp.float32),
        grid=(B,),
        in_specs=[
            pl.BlockSpec((1,) + x.shape[1:], lambda b: (b, 0, 0)),
            pl.BlockSpec(kp["mask"].shape, lambda b: (0, 0)),
            pl.BlockSpec(kp["w1"].shape, lambda b: (0, 0, 0, 0)),
            pl.BlockSpec(kp["b1"].shape, lambda b: (0, 0)),
            pl.BlockSpec(kp["w2"].shape, lambda b: (0, 0, 0, 0)),
            pl.BlockSpec(kp["b2"].shape, lambda b: (0, 0)),
            pl.BlockSpec(kp["w3"].shape, lambda b: (0, 0)),
            pl.BlockSpec(kp["b3"].shape, lambda b: (0, 0)),
        ],
        out_specs=pl.BlockSpec((1, 1, nf), lambda b: (b, 0, 0)),
        compiler_params=pltpu.CompilerParams(
            dimension_semantics=("parallel",)),
    )(x, kp["mask"], kp["w1"], kp["b1"], kp["w2"], kp["b2"], kp["w3"], kp["b3"])
    return out.reshape(B, nf)


# Pure-JAX reference (same math via XLA, torch layouts) for a correctness check.
def reference_forward(x_nchw, params):
    def conv_block(x, w_oihw, b):
        y = jax.lax.conv_general_dilated(
            x, w_oihw, window_strides=(1, 1), padding=((1, 1), (1, 1)),
            dimension_numbers=("NCHW", "OIHW", "NCHW"))
        y = jax.nn.relu(y + b[None, :, None, None])
        return jax.lax.reduce_window(y, -jnp.inf, jax.lax.max,
                                     (1, 1, 2, 2), (1, 1, 2, 2), "VALID")

    h = conv_block(x_nchw, params["conv1_w"], params["conv1_b"])
    h = conv_block(h, params["conv2_w"], params["conv2_b"])
    flat = h.reshape(h.shape[0], -1)
    return jax.nn.relu(flat @ params["fc1_w"].T + params["fc1_b"])


if __name__ == "__main__":
    key = jax.random.PRNGKey(0)
    pkey, xkey = jax.random.split(key)
    params = init_params(pkey, scale_factor=1)
    kparams = fold_params(params)
    x = jax.random.normal(xkey, (2, 3, 32, 32), jnp.float32)    # NCHW like torch

    out = jax.jit(adjustable_cnn_forward)(x, kparams)
    out = jax.block_until_ready(out)

    ref = reference_forward(x, params)
    assert out.shape == (2, 512), out.shape
    np.testing.assert_allclose(np.asarray(out), np.asarray(ref),
                               rtol=2e-2, atol=2e-2)
    print("KERNEL_OK")
</pallas_src>

<mosaic_0001>
module attributes {stable_mosaic.version = 11 : i64} {
  func.func @_fused_cnn_kernel(%arg0: i32, %arg1: memref<1x38x114xf32, #tpu.memory_space<vmem>>, %arg2: memref<18x1xf32, #tpu.memory_space<vmem>>, %arg3: memref<2x3x114x288xbf16, #tpu.memory_space<vmem>>, %arg4: memref<1x288xf32, #tpu.memory_space<vmem>>, %arg5: memref<2x3x288x256xbf16, #tpu.memory_space<vmem>>, %arg6: memref<1x256xf32, #tpu.memory_space<vmem>>, %arg7: memref<2048x512xbf16, #tpu.memory_space<vmem>>, %arg8: memref<1x512xf32, #tpu.memory_space<vmem>>, %arg9: memref<1x1x512xf32, #tpu.memory_space<vmem>>) attributes {dimension_semantics = [#tpu.dimension_semantics<parallel>], iteration_bounds = array<i64: 2>, scalar_prefetch = 0 : i64, scratch_operands = 0 : i64, tpu.core_type = #tpu.core_type<tc>, window_params = [{transform_indices = @transform_0, window_bounds = array<i64: 1, 38, 114>}, {pipeline_mode = #tpu.pipeline_mode<synchronous>, transform_indices = @transform_1, window_bounds = array<i64: 18, 1>}, {pipeline_mode = #tpu.pipeline_mode<synchronous>, transform_indices = @transform_2, window_bounds = array<i64: 2, 3, 114, 288>}, {pipeline_mode = #tpu.pipeline_mode<synchronous>, transform_indices = @transform_3, window_bounds = array<i64: 1, 288>}, {pipeline_mode = #tpu.pipeline_mode<synchronous>, transform_indices = @transform_4, window_bounds = array<i64: 2, 3, 288, 256>}, {pipeline_mode = #tpu.pipeline_mode<synchronous>, transform_indices = @transform_5, window_bounds = array<i64: 1, 256>}, {pipeline_mode = #tpu.pipeline_mode<synchronous>, transform_indices = @transform_6, window_bounds = array<i64: 2048, 512>}, {pipeline_mode = #tpu.pipeline_mode<synchronous>, transform_indices = @transform_7, window_bounds = array<i64: 1, 512>}, {transform_indices = @transform_8, window_bounds = array<i64: 1, 1, 512>}]} {
    %c0 = arith.constant 0 : index
    %c0_0 = arith.constant 0 : index
    %c0_1 = arith.constant 0 : index
    %0 = vector.load %arg1[%c0, %c0_0, %c0_1] : memref<1x38x114xf32, #tpu.memory_space<vmem>>, vector<1x38x114xf32>
    %1 = vector.shape_cast %0 : vector<1x38x114xf32> to vector<38x114xf32>
    %2 = vector.extract_strided_slice %1 {offsets = [0, 0], sizes = [36, 114], strides = [1, 1]} : vector<38x114xf32> to vector<36x114xf32>
    %3 = arith.truncf %2 : vector<36x114xf32> to vector<36x114xbf16>
    %c0_2 = arith.constant 0 : index
    %c0_3 = arith.constant 0 : index
    %c0_4 = arith.constant 0 : index
    %c0_5 = arith.constant 0 : index
    %4 = vector.load %arg3[%c0_2, %c0_3, %c0_4, %c0_5] : memref<2x3x114x288xbf16, #tpu.memory_space<vmem>>, vector<1x1x114x288xbf16>
    %5 = vector.shape_cast %4 : vector<1x1x114x288xbf16> to vector<114x288xbf16>
    %cst = arith.constant dense<0.000000e+00> : vector<36x288xf32>
    %6 = tpu.matmul %3, %5, %cst {dimension_numbers = #tpu.dot_dimension_numbers<[1], [0], [0], [1], [0, 0, 1, 1], [], []>} : vector<36x114xbf16>, vector<114x288xbf16>, vector<36x288xf32> -> vector<36x288xf32>
    %7 = vector.extract_strided_slice %1 {offsets = [1, 0], sizes = [36, 114], strides = [1, 1]} : vector<38x114xf32> to vector<36x114xf32>
    %8 = arith.truncf %7 : vector<36x114xf32> to vector<36x114xbf16>
    %c0_6 = arith.constant 0 : index
    %c1 = arith.constant 1 : index
    %c0_7 = arith.constant 0 : index
    %c0_8 = arith.constant 0 : index
    %9 = vector.load %arg3[%c0_6, %c1, %c0_7, %c0_8] : memref<2x3x114x288xbf16, #tpu.memory_space<vmem>>, vector<1x1x114x288xbf16>
    %10 = vector.shape_cast %9 : vector<1x1x114x288xbf16> to vector<114x288xbf16>
    %cst_9 = arith.constant dense<0.000000e+00> : vector<36x288xf32>
    %11 = tpu.matmul %8, %10, %cst_9 {dimension_numbers = #tpu.dot_dimension_numbers<[1], [0], [0], [1], [0, 0, 1, 1], [], []>} : vector<36x114xbf16>, vector<114x288xbf16>, vector<36x288xf32> -> vector<36x288xf32>
    %12 = arith.addf %6, %11 : vector<36x288xf32>
    %13 = vector.extract_strided_slice %1 {offsets = [2, 0], sizes = [36, 114], strides = [1, 1]} : vector<38x114xf32> to vector<36x114xf32>
    %14 = arith.truncf %13 : vector<36x114xf32> to vector<36x114xbf16>
    %c0_10 = arith.constant 0 : index
    %c2 = arith.constant 2 : index
    %c0_11 = arith.constant 0 : index
    %c0_12 = arith.constant 0 : index
    %15 = vector.load %arg3[%c0_10, %c2, %c0_11, %c0_12] : memref<2x3x114x288xbf16, #tpu.memory_space<vmem>>, vector<1x1x114x288xbf16>
    %16 = vector.shape_cast %15 : vector<1x1x114x288xbf16> to vector<114x288xbf16>
    %cst_13 = arith.constant dense<0.000000e+00> : vector<36x288xf32>
    %17 = tpu.matmul %14, %16, %cst_13 {dimension_numbers = #tpu.dot_dimension_numbers<[1], [0], [0], [1], [0, 0, 1, 1], [], []>} : vector<36x114xbf16>, vector<114x288xbf16>, vector<36x288xf32> -> vector<36x288xf32>
    %18 = arith.addf %12, %17 : vector<36x288xf32>
    %19 = vector.extract_strided_slice %1 {offsets = [0, 0], sizes = [36, 114], strides = [1, 1]} : vector<38x114xf32> to vector<36x114xf32>
    %20 = arith.truncf %19 : vector<36x114xf32> to vector<36x114xbf16>
    %c1_14 = arith.constant 1 : index
    %c0_15 = arith.constant 0 : index
    %c0_16 = arith.constant 0 : index
    %c0_17 = arith.constant 0 : index
    %21 = vector.load %arg3[%c1_14, %c0_15, %c0_16, %c0_17] : memref<2x3x114x288xbf16, #tpu.memory_space<vmem>>, vector<1x1x114x288xbf16>
    %22 = vector.shape_cast %21 : vector<1x1x114x288xbf16> to vector<114x288xbf16>
    %cst_18 = arith.constant dense<0.000000e+00> : vector<36x288xf32>
    %23 = tpu.matmul %20, %22, %cst_18 {dimension_numbers = #tpu.dot_dimension_numbers<[1], [0], [0], [1], [0, 0, 1, 1], [], []>} : vector<36x114xbf16>, vector<114x288xbf16>, vector<36x288xf32> -> vector<36x288xf32>
    %24 = vector.extract_strided_slice %1 {offsets = [1, 0], sizes = [36, 114], strides = [1, 1]} : vector<38x114xf32> to vector<36x114xf32>
    %25 = arith.truncf %24 : vector<36x114xf32> to vector<36x114xbf16>
    %c1_19 = arith.constant 1 : index
    %c1_20 = arith.constant 1 : index
    %c0_21 = arith.constant 0 : index
    %c0_22 = arith.constant 0 : index
    %26 = vector.load %arg3[%c1_19, %c1_20, %c0_21, %c0_22] : memref<2x3x114x288xbf16, #tpu.memory_space<vmem>>, vector<1x1x114x288xbf16>
    %27 = vector.shape_cast %26 : vector<1x1x114x288xbf16> to vector<114x288xbf16>
    %cst_23 = arith.constant dense<0.000000e+00> : vector<36x288xf32>
    %28 = tpu.matmul %25, %27, %cst_23 {dimension_numbers = #tpu.dot_dimension_numbers<[1], [0], [0], [1], [0, 0, 1, 1], [], []>} : vector<36x114xbf16>, vector<114x288xbf16>, vector<36x288xf32> -> vector<36x288xf32>
    %29 = arith.addf %23, %28 : vector<36x288xf32>
    %30 = vector.extract_strided_slice %1 {offsets = [2, 0], sizes = [36, 114], strides = [1, 1]} : vector<38x114xf32> to vector<36x114xf32>
    %31 = arith.truncf %30 : vector<36x114xf32> to vector<36x114xbf16>
    %c1_24 = arith.constant 1 : index
    %c2_25 = arith.constant 2 : index
    %c0_26 = arith.constant 0 : index
    %c0_27 = arith.constant 0 : index
    %32 = vector.load %arg3[%c1_24, %c2_25, %c0_26, %c0_27] : memref<2x3x114x288xbf16, #tpu.memory_space<vmem>>, vector<1x1x114x288xbf16>
    %33 = vector.shape_cast %32 : vector<1x1x114x288xbf16> to vector<114x288xbf16>
    %cst_28 = arith.constant dense<0.000000e+00> : vector<36x288xf32>
    %34 = tpu.matmul %31, %33, %cst_28 {dimension_numbers = #tpu.dot_dimension_numbers<[1], [0], [0], [1], [0, 0, 1, 1], [], []>} : vector<36x114xbf16>, vector<114x288xbf16>, vector<36x288xf32> -> vector<36x288xf32>
    %35 = arith.addf %29, %34 : vector<36x288xf32>
    %36 = arith.maximumf %18, %35 : vector<36x288xf32>
    %37 = vector.shape_cast %36 : vector<36x288xf32> to vector<18x2x288xf32>
    %cst_29 = arith.constant dense<0xFF800000> : vector<18x288xf32>
    %38 = vector.multi_reduction <maximumf>, %37, %cst_29 [1] : vector<18x2x288xf32> to vector<18x288xf32>
    %c0_30 = arith.constant 0 : index
    %c0_31 = arith.constant 0 : index
    %39 = vector.load %arg4[%c0_30, %c0_31] : memref<1x288xf32, #tpu.memory_space<vmem>>, vector<1x288xf32>
    %40 = vector.broadcast %39 : vector<1x288xf32> to vector<18x288xf32>
    %41 = arith.addf %38, %40 : vector<18x288xf32>
    %cst_32 = arith.constant 0.000000e+00 : f32
    %42 = vector.broadcast %cst_32 : f32 to vector<18x288xf32>
    %43 = arith.maximumf %41, %42 : vector<18x288xf32>
    %c0_33 = arith.constant 0 : index
    %c0_34 = arith.constant 0 : index
    %44 = vector.load %arg2[%c0_33, %c0_34] : memref<18x1xf32, #tpu.memory_space<vmem>>, vector<18x1xf32>
    %45 = vector.broadcast %44 : vector<18x1xf32> to vector<18x288xf32>
    %46 = arith.mulf %43, %45 : vector<18x288xf32>
    %47 = vector.extract_strided_slice %46 {offsets = [0, 0], sizes = [16, 288], strides = [1, 1]} : vector<18x288xf32> to vector<16x288xf32>
    %48 = arith.truncf %47 : vector<16x288xf32> to vector<16x288xbf16>
    %c0_35 = arith.constant 0 : index
    %c0_36 = arith.constant 0 : index
    %c0_37 = arith.constant 0 : index
    %c0_38 = arith.constant 0 : index
    %49 = vector.load %arg5[%c0_35, %c0_36, %c0_37, %c0_38] : memref<2x3x288x256xbf16, #tpu.memory_space<vmem>>, vector<1x1x288x256xbf16>
    %50 = vector.shape_cast %49 : vector<1x1x288x256xbf16> to vector<288x256xbf16>
    %cst_39 = arith.constant dense<0.000000e+00> : vector<16x256xf32>
    %51 = tpu.matmul %48, %50, %cst_39 {dimension_numbers = #tpu.dot_dimension_numbers<[1], [0], [0], [1], [0, 0, 1, 1], [], []>} : vector<16x288xbf16>, vector<288x256xbf16>, vector<16x256xf32> -> vector<16x256xf32>
    %52 = vector.extract_strided_slice %46 {offsets = [1, 0], sizes = [16, 288], strides = [1, 1]} : vector<18x288xf32> to vector<16x288xf32>
    %53 = arith.truncf %52 : vector<16x288xf32> to vector<16x288xbf16>
    %c0_40 = arith.constant 0 : index
    %c1_41 = arith.constant 1 : index
    %c0_42 = arith.constant 0 : index
    %c0_43 = arith.constant 0 : index
    %54 = vector.load %arg5[%c0_40, %c1_41, %c0_42, %c0_43] : memref<2x3x288x256xbf16, #tpu.memory_space<vmem>>, vector<1x1x288x256xbf16>
    %55 = vector.shape_cast %54 : vector<1x1x288x256xbf16> to vector<288x256xbf16>
    %cst_44 = arith.constant dense<0.000000e+00> : vector<16x256xf32>
    %56 = tpu.matmul %53, %55, %cst_44 {dimension_numbers = #tpu.dot_dimension_numbers<[1], [0], [0], [1], [0, 0, 1, 1], [], []>} : vector<16x288xbf16>, vector<288x256xbf16>, vector<16x256xf32> -> vector<16x256xf32>
    %57 = arith.addf %51, %56 : vector<16x256xf32>
    %58 = vector.extract_strided_slice %46 {offsets = [2, 0], sizes = [16, 288], strides = [1, 1]} : vector<18x288xf32> to vector<16x288xf32>
    %59 = arith.truncf %58 : vector<16x288xf32> to vector<16x288xbf16>
    %c0_45 = arith.constant 0 : index
    %c2_46 = arith.constant 2 : index
    %c0_47 = arith.constant 0 : index
    %c0_48 = arith.constant 0 : index
    %60 = vector.load %arg5[%c0_45, %c2_46, %c0_47, %c0_48] : memref<2x3x288x256xbf16, #tpu.memory_space<vmem>>, vector<1x1x288x256xbf16>
    %61 = vector.shape_cast %60 : vector<1x1x288x256xbf16> to vector<288x256xbf16>
    %cst_49 = arith.constant dense<0.000000e+00> : vector<16x256xf32>
    %62 = tpu.matmul %59, %61, %cst_49 {dimension_numbers = #tpu.dot_dimension_numbers<[1], [0], [0], [1], [0, 0, 1, 1], [], []>} : vector<16x288xbf16>, vector<288x256xbf16>, vector<16x256xf32> -> vector<16x256xf32>
    %63 = arith.addf %57, %62 : vector<16x256xf32>
    %64 = vector.extract_strided_slice %46 {offsets = [0, 0], sizes = [16, 288], strides = [1, 1]} : vector<18x288xf32> to vector<16x288xf32>
    %65 = arith.truncf %64 : vector<16x288xf32> to vector<16x288xbf16>
    %c1_50 = arith.constant 1 : index
    %c0_51 = arith.constant 0 : index
    %c0_52 = arith.constant 0 : index
    %c0_53 = arith.constant 0 : index
    %66 = vector.load %arg5[%c1_50, %c0_51, %c0_52, %c0_53] : memref<2x3x288x256xbf16, #tpu.memory_space<vmem>>, vector<1x1x288x256xbf16>
    %67 = vector.shape_cast %66 : vector<1x1x288x256xbf16> to vector<288x256xbf16>
    %cst_54 = arith.constant dense<0.000000e+00> : vector<16x256xf32>
    %68 = tpu.matmul %65, %67, %cst_54 {dimension_numbers = #tpu.dot_dimension_numbers<[1], [0], [0], [1], [0, 0, 1, 1], [], []>} : vector<16x288xbf16>, vector<288x256xbf16>, vector<16x256xf32> -> vector<16x256xf32>
    %69 = vector.extract_strided_slice %46 {offsets = [1, 0], sizes = [16, 288], strides = [1, 1]} : vector<18x288xf32> to vector<16x288xf32>
    %70 = arith.truncf %69 : vector<16x288xf32> to vector<16x288xbf16>
    %c1_55 = arith.constant 1 : index
    %c1_56 = arith.constant 1 : index
    %c0_57 = arith.constant 0 : index
    %c0_58 = arith.constant 0 : index
    %71 = vector.load %arg5[%c1_55, %c1_56, %c0_57, %c0_58] : memref<2x3x288x256xbf16, #tpu.memory_space<vmem>>, vector<1x1x288x256xbf16>
    %72 = vector.shape_cast %71 : vector<1x1x288x256xbf16> to vector<288x256xbf16>
    %cst_59 = arith.constant dense<0.000000e+00> : vector<16x256xf32>
    %73 = tpu.matmul %70, %72, %cst_59 {dimension_numbers = #tpu.dot_dimension_numbers<[1], [0], [0], [1], [0, 0, 1, 1], [], []>} : vector<16x288xbf16>, vector<288x256xbf16>, vector<16x256xf32> -> vector<16x256xf32>
    %74 = arith.addf %68, %73 : vector<16x256xf32>
    %75 = vector.extract_strided_slice %46 {offsets = [2, 0], sizes = [16, 288], strides = [1, 1]} : vector<18x288xf32> to vector<16x288xf32>
    %76 = arith.truncf %75 : vector<16x288xf32> to vector<16x288xbf16>
    %c1_60 = arith.constant 1 : index
    %c2_61 = arith.constant 2 : index
    %c0_62 = arith.constant 0 : index
    %c0_63 = arith.constant 0 : index
    %77 = vector.load %arg5[%c1_60, %c2_61, %c0_62, %c0_63] : memref<2x3x288x256xbf16, #tpu.memory_space<vmem>>, vector<1x1x288x256xbf16>
    %78 = vector.shape_cast %77 : vector<1x1x288x256xbf16> to vector<288x256xbf16>
    %cst_64 = arith.constant dense<0.000000e+00> : vector<16x256xf32>
    %79 = tpu.matmul %76, %78, %cst_64 {dimension_numbers = #tpu.dot_dimension_numbers<[1], [0], [0], [1], [0, 0, 1, 1], [], []>} : vector<16x288xbf16>, vector<288x256xbf16>, vector<16x256xf32> -> vector<16x256xf32>
    %80 = arith.addf %74, %79 : vector<16x256xf32>
    %81 = arith.maximumf %63, %80 : vector<16x256xf32>
    %82 = vector.shape_cast %81 : vector<16x256xf32> to vector<8x2x256xf32>
    %cst_65 = arith.constant dense<0xFF800000> : vector<8x256xf32>
    %83 = vector.multi_reduction <maximumf>, %82, %cst_65 [1] : vector<8x2x256xf32> to vector<8x256xf32>
    %c0_66 = arith.constant 0 : index
    %c0_67 = arith.constant 0 : index
    %84 = vector.load %arg6[%c0_66, %c0_67] : memref<1x256xf32, #tpu.memory_space<vmem>>, vector<1x256xf32>
    %85 = vector.broadcast %84 : vector<1x256xf32> to vector<8x256xf32>
    %86 = arith.addf %83, %85 : vector<8x256xf32>
    %cst_68 = arith.constant 0.000000e+00 : f32
    %87 = vector.broadcast %cst_68 : f32 to vector<8x256xf32>
    %88 = arith.maximumf %86, %87 : vector<8x256xf32>
    %89 = vector.extract_strided_slice %88 {offsets = [0, 0], sizes = [1, 256], strides = [1, 1]} : vector<8x256xf32> to vector<1x256xf32>
    %90 = vector.extract_strided_slice %88 {offsets = [1, 0], sizes = [1, 256], strides = [1, 1]} : vector<8x256xf32> to vector<1x256xf32>
    %91 = vector.extract_strided_slice %88 {offsets = [2, 0], sizes = [1, 256], strides = [1, 1]} : vector<8x256xf32> to vector<1x256xf32>
    %92 = vector.extract_strided_slice %88 {offsets = [3, 0], sizes = [1, 256], strides = [1, 1]} : vector<8x256xf32> to vector<1x256xf32>
    %93 = vector.extract_strided_slice %88 {offsets = [4, 0], sizes = [1, 256], strides = [1, 1]} : vector<8x256xf32> to vector<1x256xf32>
    %94 = vector.extract_strided_slice %88 {offsets = [5, 0], sizes = [1, 256], strides = [1, 1]} : vector<8x256xf32> to vector<1x256xf32>
    %95 = vector.extract_strided_slice %88 {offsets = [6, 0], sizes = [1, 256], strides = [1, 1]} : vector<8x256xf32> to vector<1x256xf32>
    %96 = vector.extract_strided_slice %88 {offsets = [7, 0], sizes = [1, 256], strides = [1, 1]} : vector<8x256xf32> to vector<1x256xf32>
    %97 = tpu.concatenate %89, %90, %91, %92, %93, %94, %95, %96 in 1 : vector<1x256xf32>, vector<1x256xf32>, vector<1x256xf32>, vector<1x256xf32>, vector<1x256xf32>, vector<1x256xf32>, vector<1x256xf32>, vector<1x256xf32> -> vector<1x2048xf32>
    %98 = arith.truncf %97 : vector<1x2048xf32> to vector<1x2048xbf16>
    %c0_69 = arith.constant 0 : index
    %c0_70 = arith.constant 0 : index
    %99 = vector.load %arg7[%c0_69, %c0_70] : memref<2048x512xbf16, #tpu.memory_space<vmem>>, vector<2048x512xbf16>
    %cst_71 = arith.constant dense<0.000000e+00> : vector<1x512xf32>
    %100 = tpu.matmul %98, %99, %cst_71 {dimension_numbers = #tpu.dot_dimension_numbers<[1], [0], [0], [1], [0, 0, 1, 1], [], []>} : vector<1x2048xbf16>, vector<2048x512xbf16>, vector<1x512xf32> -> vector<1x512xf32>
    %c0_72 = arith.constant 0 : index
    %c0_73 = arith.constant 0 : index
    %101 = vector.load %arg8[%c0_72, %c0_73] : memref<1x512xf32, #tpu.memory_space<vmem>>, vector<1x512xf32>
    %102 = arith.addf %100, %101 : vector<1x512xf32>
    %cst_74 = arith.constant 0.000000e+00 : f32
    %103 = vector.broadcast %cst_74 : f32 to vector<1x512xf32>
    %104 = arith.maximumf %102, %103 : vector<1x512xf32>
    %c0_75 = arith.constant 0 : index
    %c0_76 = arith.constant 0 : index
    %c0_77 = arith.constant 0 : index
    %105 = vector.load %arg9[%c0_75, %c0_76, %c0_77] : memref<1x1x512xf32, #tpu.memory_space<vmem>>, vector<1x1x512xf32>
    %106 = vector.shape_cast %105 : vector<1x1x512xf32> to vector<1x512xf32>
    %107 = vector.shape_cast %104 : vector<1x512xf32> to vector<1x1x512xf32>
    tpu.vector_store %arg9[%c0_75, %c0_76, %c0_77], %107 {strides = array<i32>} : memref<1x1x512xf32, #tpu.memory_space<vmem>>, vector<1x1x512xf32>,
    return
  }
  func.func @transform_0(%arg0: i32) -> (i32, i32, i32) {
    %c0_i32 = arith.constant 0 : i32
    %c0_i32_0 = arith.constant 0 : i32
    %c0_i32_1 = arith.constant 0 : i32
    return %arg0, %c0_i32, %c0_i32_0 : i32, i32, i32
  }
  func.func @transform_1(%arg0: i32) -> (i32, i32) {
    %c0_i32 = arith.constant 0 : i32
    %c0_i32_0 = arith.constant 0 : i32
    %c0_i32_1 = arith.constant 0 : i32
    return %c0_i32, %c0_i32_0 : i32, i32
  }
  func.func @transform_2(%arg0: i32) -> (i32, i32, i32, i32) {
    %c0_i32 = arith.constant 0 : i32
    %c0_i32_0 = arith.constant 0 : i32
    %c0_i32_1 = arith.constant 0 : i32
    %c0_i32_2 = arith.constant 0 : i32
    %c0_i32_3 = arith.constant 0 : i32
    return %c0_i32, %c0_i32_0, %c0_i32_1, %c0_i32_2 : i32, i32, i32, i32
  }
  func.func @transform_3(%arg0: i32) -> (i32, i32) {
    %c0_i32 = arith.constant 0 : i32
    %c0_i32_0 = arith.constant 0 : i32
    %c0_i32_1 = arith.constant 0 : i32
    return %c0_i32, %c0_i32_0 : i32, i32
  }
  func.func @transform_4(%arg0: i32) -> (i32, i32, i32, i32) {
    %c0_i32 = arith.constant 0 : i32
    %c0_i32_0 = arith.constant 0 : i32
    %c0_i32_1 = arith.constant 0 : i32
    %c0_i32_2 = arith.constant 0 : i32
    %c0_i32_3 = arith.constant 0 : i32
    return %c0_i32, %c0_i32_0, %c0_i32_1, %c0_i32_2 : i32, i32, i32, i32
  }
  func.func @transform_5(%arg0: i32) -> (i32, i32) {
    %c0_i32 = arith.constant 0 : i32
    %c0_i32_0 = arith.constant 0 : i32
    %c0_i32_1 = arith.constant 0 : i32
    return %c0_i32, %c0_i32_0 : i32, i32
  }
  func.func @transform_6(%arg0: i32) -> (i32, i32) {
    %c0_i32 = arith.constant 0 : i32
    %c0_i32_0 = arith.constant 0 : i32
    %c0_i32_1 = arith.constant 0 : i32
    return %c0_i32, %c0_i32_0 : i32, i32
  }
  func.func @transform_7(%arg0: i32) -> (i32, i32) {
    %c0_i32 = arith.constant 0 : i32
    %c0_i32_0 = arith.constant 0 : i32
    %c0_i32_1 = arith.constant 0 : i32
    return %c0_i32, %c0_i32_0 : i32, i32
  }
  func.func @transform_8(%arg0: i32) -> (i32, i32, i32) {
    %c0_i32 = arith.constant 0 : i32
    %c0_i32_0 = arith.constant 0 : i32
    %c0_i32_1 = arith.constant 0 : i32
    return %arg0, %c0_i32, %c0_i32_0 : i32, i32, i32
  }
}

</mosaic_0001>

<bundles_post_ra>
// kernel: adjustable_cnn_forward.1
= control target key start
LH: loop header
LB: loop body
LE: loop exit
PB: predicated region body
PF: predicated region fallthrough
CT: control target
= control target key end

     0   :  { %13 = vsyncpa [#allocation3], 0  ;;  %s16683_s0 = inlined_call_operand.vmem [shape: f32[2,38,114], index: 0, kind: input, shape index: {}]   ;;  %s16684_s1 = inlined_call_operand.vmem [shape: f32[18,1], index: 1, kind: input, shape index: {}]   ;;  %s16685_s2 = inlined_call_operand.vmem [shape: bf16[2,3,114,288], index: 2, kind: input, shape index: {}]   ;;  %s16686_s3 = inlined_call_operand.hbm [shape: f32[1,288], index: 3, kind: input, shape index: {}]   ;;  %s16687_s4 = inlined_call_operand.hbm [shape: bf16[2,3,288,256], index: 4, kind: input, shape index: {}]   ;;  %s16688_s5 = inlined_call_operand.hbm [shape: f32[1,256], index: 5, kind: input, shape index: {}]   ;;  %s16689_s6 = inlined_call_operand.hbm [shape: bf16[2048,512], index: 6, kind: input, shape index: {}]   ;;  %s16690_s7 = inlined_call_operand.hbm [shape: f32[1,512], index: 7, kind: input, shape index: {}]   ;;  %s16691_s8 = inlined_call_operand.vmem [shape: f32[2,1,512], index: 8, kind: output, shape index: {}]  }
   0x1   :  { %14 = vsyncpa [#allocation5], 0 }
   0x2   :  { %15 = vsyncpa [#allocation8], 0  ;;  %s13996_s27 = smov 0  }
   0x3 LB: > { %s254_s30 = sshll.u32 %s16687_s4, 4  ;;  %s14005_s9 = sadd.s32 4294967295, %s13939_s27   ;;  %s13939_s27 = sphi %s13996_s27, %s21_s27   ;;  %s255_s30 = int_to_ptr.hbm [resolvable:$true] %s254_s30 }
   0x4   : > { %p9200_p0 = scmp.ge.s32.totalorder %s13939_s27, 1  ;;  %p225_p1 = scmp.lt.s32.totalorder %s13939_s27, 3 }
   0x5   : > { %p13740_p2 = scmp.eq.s32.totalorder %s14005_s9, 0  ;;  %s13941_s11 = smov [#allocation4]  }
   0x6   : > { %p14010_p3 = pnand %p9200_p0, %p225_p1  ;;  %s256_s12 = sshll.u32 %s13941_s11, 4  ;;  %s257_s12 = int_to_ptr.vmem [resolvable:$true] %s256_s12 }
   0x7   : > { %s280_s15 = sshll.u32 %s16689_s6, 4  ;;  %s13942_s17 = smov [#allocation7]   ;;  %s281_s15 = int_to_ptr.hbm [resolvable:$true] %s280_s15 }
   0x8   : > { %p13724_p4 = pneg %p14010_p3  ;;  %s282_s18 = sshll.u32 %s13942_s17, 4  ;;  %s283_s18 = int_to_ptr.vmem [resolvable:$true] %s282_s18 }
   0x9   : > { %s13943_s19 = smov 128   ;;  %s13944_s20 = smov 8  }
   0xa   : > { %p14021_p5 = pnand %p13740_p2, %p13724_p4  ;;  %s243_s23 = sshll.u32 %s16686_s3, 4  ;;  %s244_s23 = int_to_ptr.hbm [resolvable:$true] %s243_s23 }
   0xb   : > { %s13945_s24 = smov 256   ;;  %s13946_s25 = smov 16  }
   0xc   : > { %13730 = dma.hbm_to_vmem [thread:$0]  (!%p14021_p5), %s255_s30, 27648, %s257_s12, [#allocation5], %s13943_s19, %s13943_s19, %s13944_s20  }
   0xd   : > { %13736 = dma.hbm_to_vmem [thread:$0]  (!%p14021_p5), %s281_s15, 65536, %s283_s18, [#allocation8], %s13945_s24, %s13945_s24, %s13946_s25  }
   0xe   : > { %s13947_s26 = smov [#allocation2]   ;;  %s269_s13 = sshll.u32 %s16688_s5, 4  ;;  %s270_s13 = int_to_ptr.hbm [resolvable:$true] %s269_s13 }
   0xf   : > { %s245_s28 = sshll.u32 %s13947_s26, 4  ;;  %s295_s14 = sshll.u32 %s16690_s7, 4  ;;  %s246_s28 = int_to_ptr.vmem [resolvable:$true] %s245_s28  ;;  %s296_s14 = int_to_ptr.hbm [resolvable:$true] %s295_s14 }
  0x10   : > { %13727 = dma.hbm_to_vmem [thread:$0]  (!%p14021_p5), %s244_s23, 48, %s246_s28, [#allocation3]  }
  0x11   : > { %s13948_s17 = smov [#allocation6]   ;;  %s13949_s15 = smov [#allocation9]  }
  0x12   : > { %s271_s19 = sshll.u32 %s13948_s17, 4  ;;  %s297_s18 = sshll.u32 %s13949_s15, 4  ;;  %s272_s19 = int_to_ptr.vmem [resolvable:$true] %s271_s19  ;;  %s298_s18 = int_to_ptr.vmem [resolvable:$true] %s297_s18 }
  0x13   : > { %13733 = dma.hbm_to_vmem [thread:$0]  (!%p14021_p5), %s270_s13, 32, %s272_s19, [#allocation5]  }
  0x14   : > { %13739 = dma.hbm_to_vmem [thread:$0]  (!%p14021_p5), %s296_s14, 64, %s298_s18, [#allocation8]  }
  0x15   : > { %318 = sbr.rel (%p14010_p3) target bundleno = 1622 (0x656), region = 52 }
  0x1a   : > { %13926 = dma.done.wait (%p13740_p2), [#allocation3], 48  }
  0x1b   : > { %13928 = vsyncadd (%p13740_p2), [#allocation3], 4294967248 }
  0x1c   : > { %13930 = dma.done.wait (%p13740_p2), [#allocation5], 27680  }
  0x1d   : > { %13932 = vsyncadd (%p13740_p2), [#allocation5], 4294939616 }
  0x1e   : > { %13934 = dma.done.wait (%p13740_p2), [#allocation8], 65600  }
  0x1f   : > { %13936 = vsyncadd (%p13740_p2), [#allocation8], 4294901696  ;;  %v9243_v0 = vld [vmem:[%s16685_s2 + $0x15c] sm:$0x11]  ;;  %v9244_v1 = vld [vmem:[%s16685_s2 + $0x164] sm:$0x1] }
  0x20   : > { %v14067_v2 = vld [vmem:[%s16685_s2 + $0xa8] sm:$0x11]  ;;  %v547_v3 = vunpack.c.l.b16 %v9243_v0  ;;  %v548_v4 = vunpack.c.h.b16 %v9243_v0  ;;  %v549_v5 = vunpack.c.l.b16 %v9244_v1  ;;  %vm605_vm0 = vcmask 1040384   ;;  %v9319_v7 = vld [vmem:[%s16685_s2 + $0x144] sm:$0xf]  ;;  %p372_p6 = scmp.lt.s32.totalorder %s14005_s9, 1 }
  0x21   : > { %v756_v6 = vunpack.c.l.b16 %v14067_v2  ;;  %v12889_v8 = vld [vmem:[%s16685_s2 + $0x14c] sm:$0xf0]  ;;  %v12888_v13 = vld [vmem:[%s16685_s2 + $0x148] sm:$0xf]  ;;  %v9321_v14 = vld [vmem:[%s16685_s2 + $0x150] sm:$0xf0] }
  0x22   : > { %v571_v9 = vpack.c.b16 %v547_v3, %v547_v3  ;;  %v572_v10 = vpack.c.b16 %v548_v4, %v548_v4  ;;  %v573_v11 = vpack.c.b16 %v549_v5, %v549_v5  ;;  %v9327_v15 = vld [vmem:[%s16685_s2 + $0x14c] sm:$0xf]  ;;  %v12890_v16 = vld [vmem:[%s16685_s2 + $0x154] sm:$0xf0]  ;;  %v9412_v17 = vld [vmem:[%s16685_s2 + $0x90] sm:$0xf]  ;;  %v9320_v23 = vor.u32 %v12889_v8, %v9319_v7 }
  0x23   : > { %v780_v12 = vpack.c.b16 %v756_v6, %v756_v6  ;;  %v12868_v18 = vld [vmem:[%s16685_s2 + $0x98] sm:$0xf0]  ;;  %v9324_v24 = vor.u32 %v12888_v13, %v9321_v14  ;;  %v9307_v25 = vld [vmem:[%s16685_s2 + $0x12c] sm:$0xf]  ;;  %v12886_v26 = vld [vmem:[%s16685_s2 + $0x134] sm:$0xf0]  ;;  %v9328_v27 = vor.u32 %v12890_v16, %v9327_v15 }
  0x24   : > { %v607_v19 = vsel %vm605_vm0, %v571_v9, 0  ;;  %v610_v20 = vsel %vm605_vm0, %v572_v10, 0  ;;  %v613_v21 = vsel %vm605_vm0, %v573_v11, 0  ;;  %v9413_v28 = vor.u32 %v12868_v18, %v9412_v17  ;;  %v12885_v29 = vld [vmem:[%s16685_s2 + $0x130] sm:$0xf]  ;;  %s16937_s9 = smov (!%p372_p6, %s14005_s9), 1 }
  0x25   : > { %v811_v22 = vsel %vm605_vm0, %v780_v12, 0  ;;  %615 = vmatpush.bf16.msra.mxu0 %v607_v19  ;;  %638 = vmatpush.bf16.msra.mxu1 %v610_v20  ;;  %v9309_v30 = vld [vmem:[%s16685_s2 + $0x138] sm:$0xf0]  ;;  %v9315_v31 = vld [vmem:[%s16685_s2 + $0x134] sm:$0xf]  ;;  %v9308_v35 = vor.u32 %v12886_v26, %v9307_v25  ;;  %s13703_s12 = smul.u32 40, %s16937_s9 }
  0x26   : > { %661 = vmatpush.bf16.msra.mxu2 %v613_v21  ;;  %819 = vmatpush.bf16.msra.mxu3 %v811_v22  ;;  %v12887_v32 = vld [vmem:[%s16685_s2 + $0x13c] sm:$0xf0]  ;;  %v9400_v33 = vld [vmem:[%s16685_s2 + $0x78] sm:$0xf]  ;;  %v12865_v34 = vld [vmem:[%s16685_s2 + $0x80] sm:$0xf0]  ;;  %v9312_v36 = vor.u32 %v12885_v29, %v9309_v30  ;;  %v757_v30 = vunpack.c.h.b16 %v14067_v2 }
  0x27   : > { %v9295_v37 = vld [vmem:[%s16685_s2 + $0x114] sm:$0xf]  ;;  %v12883_v38 = vld [vmem:[%s16685_s2 + $0x11c] sm:$0xf0]  ;;  %v9316_v39 = vor.u32 %v12887_v32, %v9315_v31  ;;  %v9401_v40 = vor.u32 %v12865_v34, %v9400_v33  ;;  %v12882_v41 = vld [vmem:[%s16685_s2 + $0x118] sm:$0xf]  ;;  %s14183_s17 = scalar_lea.vmem %s16683_s0, %s13703_s12 }
  0x28   : > { %v9297_v42 = vld [vmem:[%s16685_s2 + $0x120] sm:$0xf0]  ;;  %v9303_v43 = vld [vmem:[%s16685_s2 + $0x11c] sm:$0xf]  ;;  %v12884_v44 = vld [vmem:[%s16685_s2 + $0x124] sm:$0xf0]  ;;  %v9296_v47 = vor.u32 %v12883_v38, %v9295_v37 }
  0x29   : > { %616 = vmatpush.bf16.msra.mxu0 %v9320_v23  ;;  %639 = vmatpush.bf16.msra.mxu1 %v9324_v24  ;;  %v9388_v45 = vld [vmem:[%s16685_s2 + $0x60] sm:$0xf]  ;;  %v12862_v46 = vld [vmem:[%s16685_s2 + $0x68] sm:$0xf0]  ;;  %v9300_v48 = vor.u32 %v12882_v41, %v9297_v42  ;;  %v9283_v49 = vld [vmem:[%s16685_s2 + $0xfc] sm:$0xf]  ;;  %v9304_v51 = vor.u32 %v12884_v44, %v9303_v43 }
  0x2a   : > { %662 = vmatpush.bf16.msra.mxu2 %v9328_v27  ;;  %820 = vmatpush.bf16.msra.mxu3 %v9413_v28  ;;  %v12880_v50 = vld [vmem:[%s16685_s2 + $0x104] sm:$0xf0]  ;;  %v9389_v52 = vor.u32 %v12862_v46, %v9388_v45  ;;  %v12879_v53 = vld [vmem:[%s16685_s2 + $0x100] sm:$0xf]  ;;  %v9285_v54 = vld [vmem:[%s16685_s2 + $0x108] sm:$0xf0] }
  0x2b   : > { %v9291_v55 = vld [vmem:[%s16685_s2 + $0x104] sm:$0xf]  ;;  %v12881_v56 = vld [vmem:[%s16685_s2 + $0x10c] sm:$0xf0]  ;;  %v9376_v57 = vld [vmem:[%s16685_s2 + $0x48] sm:$0xf]  ;;  %v9284_v60 = vor.u32 %v12880_v50, %v9283_v49  ;;  %v9288_v61 = vor.u32 %v12879_v53, %v9285_v54 }
  0x2c   : > { %v12859_v58 = vld [vmem:[%s16685_s2 + $0x50] sm:$0xf0]  ;;  %v9271_v59 = vld [vmem:[%s16685_s2 + $0xe4] sm:$0xf]  ;;  %v12877_v62 = vld [vmem:[%s16685_s2 + $0xec] sm:$0xf0]  ;;  %v9292_v1 = vor.u32 %v12881_v56, %v9291_v55 }
  0x2d   : > { %617 = vmatpush.bf16.msra.mxu0 %v9308_v35  ;;  %640 = vmatpush.bf16.msra.mxu1 %v9312_v36  ;;  %v12876_v63 = vld [vmem:[%s16685_s2 + $0xe8] sm:$0xf]  ;;  %v9273_v0 = vld [vmem:[%s16685_s2 + $0xf0] sm:$0xf0]  ;;  %v9377_v3 = vor.u32 %v12859_v58, %v9376_v57  ;;  %v9279_v4 = vld [vmem:[%s16685_s2 + $0xec] sm:$0xf]  ;;  %v9272_v14 = vor.u32 %v12877_v62, %v9271_v59 }
  0x2e   : > { %663 = vmatpush.bf16.msra.mxu2 %v9316_v39  ;;  %821 = vmatpush.bf16.msra.mxu3 %v9401_v40  ;;  %v12878_v5 = vld [vmem:[%s16685_s2 + $0xf4] sm:$0xf0]  ;;  %v9364_v6 = vld [vmem:[%s16685_s2 + $0x30] sm:$0xf]  ;;  %v12856_v7 = vld [vmem:[%s16685_s2 + $0x38] sm:$0xf0]  ;;  %v9276_v15 = vor.u32 %v12876_v63, %v9273_v0 }
  0x2f   : > { %v382_v8 = vld [vmem:[%s14183_s17] sm:$0xff]  ;;  %v383_v9 = vld [vmem:[%s14183_s17 + $0x8] sm:$0xff]  ;;  %v384_v11 = vld [vmem:[%s14183_s17 + $0x10] sm:$0xff]  ;;  %v9280_v20 = vor.u32 %v12878_v5, %v9279_v4  ;;  %v9365_v21 = vor.u32 %v12856_v7, %v9364_v6  ;;  %vm451_vm1 = vsmask.f32 7424  ;;  %vm595_vm2 = vcmask 932864  }
  0x30   : > { %v9259_v10 = vld [vmem:[%s16685_s2 + $0xcc] sm:$0xf]  ;;  %v385_v12 = vld [vmem:[%s14183_s17 + $0x18] sm:$0xff]  ;;  %v14213_v13 = vpack.c.bf16 %v383_v9, %v382_v8  ;;  %v12873_v17 = vld [vmem:[%s16685_s2 + $0xd0] sm:$0xf]  ;;  %vm922_vm3 = vcmask 1046528  }
  0x31   : > { %618 = vmatpush.bf16.msra.mxu0 %v9296_v47  ;;  %641 = vmatpush.bf16.msra.mxu1 %v9300_v48  ;;  %v12874_v16 = vld [vmem:[%s16685_s2 + $0xd4] sm:$0xf0]  ;;  %v14221_v18 = vpack.c.bf16 %v385_v12, %v384_v11  ;;  %v419_v19 = vld [vmem:[%s16685_s2 + $0xb0] sm:$0x1]  ;;  %v9261_v22 = vld [vmem:[%s16685_s2 + $0xd8] sm:$0xf0]  ;;  %v781_v47 = vpack.c.b16 %v757_v30, %v757_v30 }
  0x32   : > { %664 = vmatpush.bf16.msra.mxu2 %v9304_v51  ;;  %822 = vmatpush.bf16.msra.mxu3 %v9389_v52  ;;  %v9267_v23 = vld [vmem:[%s16685_s2 + $0xd4] sm:$0xf]  ;;  %v455_v24 = vshll.u32 %v14213_v13, 16  ;;  %v12875_v25 = vld [vmem:[%s16685_s2 + $0xdc] sm:$0xf0]  ;;  %v9260_v28 = vor.u32 %v12874_v16, %v9259_v10  ;;  %v758_v31 = vunpack.c.l.b16 %v419_v19  ;;  %v9264_v33 = vor.u32 %v12873_v17, %v9261_v22  ;;  %s9214_s20 = sshll.u32 %s16937_s9, 2 }
  0x33   : > { %v9352_v26 = vld [vmem:[%s16685_s2 + $0x18] sm:$0xf]  ;;  %v12853_v27 = vld [vmem:[%s16685_s2 + $0x20] sm:$0xf0]  ;;  %v9247_v29 = vld [vmem:[%s16685_s2 + $0xb4] sm:$0xf]  ;;  %v9268_v2 = vor.u32 %v12875_v25, %v9267_v23  ;;  %s380_s21 = scalar_lea.vmem %s16691_s8, %s9214_s20 }
  0x34   : > { %v9459_v32 = vld [vmem:[%s16685_s2 + $0x210] sm:$0x11]  ;;  %v12871_v34 = vld [vmem:[%s16685_s2 + $0xbc] sm:$0xf0]  ;;  %v453_v35 = vshrl.u32 %v14213_v13, 16  ;;  %v457_v36 = vrot.slane %v455_v24, 1  ;;  %v9353_v38 = vor.u32 %v12853_v27, %v9352_v26  ;;  %v782_v48 = vpack.c.b16 %v758_v31, %v758_v31 }
  0x35   : > { %619 = vmatpush.bf16.msra.mxu0 %v9284_v60  ;;  %642 = vmatpush.bf16.msra.mxu1 %v9288_v61  ;;  %v460_v37 = vshll.u32 %v14221_v18, 16  ;;  %v12870_v39 = vld [vmem:[%s16685_s2 + $0xb8] sm:$0xf]  ;;  %v9249_v40 = vld [vmem:[%s16685_s2 + $0xc0] sm:$0xf0]  ;;  %v1000_v45 = vunpack.c.l.b16 %v9459_v32  ;;  %v1001_v46 = vunpack.c.h.b16 %v9459_v32  ;;  %v9248_v49 = vor.u32 %v12871_v34, %v9247_v29 }
  0x36   : > { %665 = vmatpush.bf16.msra.mxu2 %v9292_v1  ;;  %823 = vmatpush.bf16.msra.mxu3 %v9377_v3  ;;  %v9255_v41 = vld [vmem:[%s16685_s2 + $0xbc] sm:$0xf]  ;;  %v12872_v42 = vld [vmem:[%s16685_s2 + $0xc4] sm:$0xf0]  ;;  %v9340_v43 = vld [vmem:[%s16685_s2] sm:$0xf]  ;;  %v9252_v50 = vor.u32 %v12870_v39, %v9249_v40  ;;  %v458_v51 = vor.u32 %v457_v36, %v453_v35 }
  0x37   : > { %v12850_v44 = vld [vmem:[%s16685_s2 + $0x8] sm:$0xf0]  ;;  %v14272_v52 = vrot.slane %v460_v37, 1  ;;  %v9256_v53 = vor.u32 %v12872_v42, %v9255_v41  ;;  %v1024_v55 = vpack.c.b16 %v1000_v45, %v1000_v45  ;;  %v1025_v56 = vpack.c.b16 %v1001_v46, %v1001_v46  ;;  %v12867_v57 = vld [vmem:[%s16685_s2 + $0x94] sm:$0xf] }
  0x38   : > { %v9341_v54 = vor.u32 %v12850_v44, %v9340_v43  ;;  %v9414_v58 = vld [vmem:[%s16685_s2 + $0x9c] sm:$0xf0]  ;;  %v814_v59 = vsel %vm605_vm0, %v781_v47, 0  ;;  %v817_v60 = vsel %vm605_vm0, %v782_v48, 0  ;;  %v9420_v61 = vld [vmem:[%s16685_s2 + $0x98] sm:$0xf] }
  0x39   : > { %620 = vmatpush.bf16.msra.mxu0 %v9272_v14  ;;  %643 = vmatpush.bf16.msra.mxu1 %v9276_v15  ;;  %v12869_v62 = vld [vmem:[%s16685_s2 + $0xa0] sm:$0xf0]  ;;  %v14290_v63 = vsel %vm451_vm1, %v458_v51, %v14272_v52  ;;  %v9535_v1 = vld [vmem:[%s16685_s2 + $0x1f8] sm:$0xf]  ;;  %v12909_v4 = vld [vmem:[%s16685_s2 + $0x1fc] sm:$0xf]  ;;  %v9417_v7 = vor.u32 %v12867_v57, %v9414_v58 }
  0x3a   : > { %666 = vmatpush.bf16.msra.mxu2 %v9280_v20  ;;  %824 = vmatpush.bf16.msra.mxu3 %v9365_v21  ;;  %v386_v0 = vld [vmem:[%s14183_s17 + $0x20] sm:$0x3f]  ;;  %v1058_v5 = vsel %vm605_vm0, %v1024_v55, 0  ;;  %v1061_v6 = vsel %vm605_vm0, %v1025_v56, 0  ;;  %v9421_v8 = vor.u32 %v12869_v62, %v9420_v61  ;;  %v9537_v9 = vld [vmem:[%s16685_s2 + $0x204] sm:$0xf0] }
  0x3b   : > { %v12910_v3 = vld [vmem:[%s16685_s2 + $0x200] sm:$0xf0]  ;;  %v12864_v10 = vld [vmem:[%s16685_s2 + $0x7c] sm:$0xf]  ;;  %v9402_v11 = vld [vmem:[%s16685_s2 + $0x84] sm:$0xf0]  ;;  %v14327_v15 = vpack.c.bf16 %v386_v0, %v386_v0  ;;  %v9540_v17 = vor.u32 %v12909_v4, %v9537_v9 }
  0x3c   : > { %v9408_v12 = vld [vmem:[%s16685_s2 + $0x80] sm:$0xf]  ;;  %v12866_v14 = vld [vmem:[%s16685_s2 + $0x88] sm:$0xf0]  ;;  %v9536_v16 = vor.u32 %v12910_v3, %v9535_v1  ;;  %v9405_v21 = vor.u32 %v12864_v10, %v9402_v11  ;;  %v12906_v23 = vld [vmem:[%s16685_s2 + $0x1e4] sm:$0xf] }
  0x3d   : > { %621 = vmatpush.bf16.msra.mxu0 %v9260_v28  ;;  %644 = vmatpush.bf16.msra.mxu1 %v9264_v33  ;;  %v9523_v19 = vld [vmem:[%s16685_s2 + $0x1e0] sm:$0xf]  ;;  %v12907_v20 = vld [vmem:[%s16685_s2 + $0x1e8] sm:$0xf0]  ;;  %v9409_v22 = vor.u32 %v12866_v14, %v9408_v12  ;;  %v9525_v24 = vld [vmem:[%s16685_s2 + $0x1ec] sm:$0xf0] }
  0x3e   : > { %667 = vmatpush.bf16.msra.mxu2 %v9268_v2  ;;  %825 = vmatpush.bf16.msra.mxu3 %v9353_v38  ;;  %v12861_v25 = vld [vmem:[%s16685_s2 + $0x64] sm:$0xf]  ;;  %v9390_v26 = vld [vmem:[%s16685_s2 + $0x6c] sm:$0xf0]  ;;  %v9396_v27 = vld [vmem:[%s16685_s2 + $0x68] sm:$0xf]  ;;  %v9524_v31 = vor.u32 %v12907_v20, %v9523_v19  ;;  %v9528_v32 = vor.u32 %v12906_v23, %v9525_v24 }
  0x3f   : > { %v12863_v28 = vld [vmem:[%s16685_s2 + $0x70] sm:$0xf0]  ;;  %v464_v29 = vshrl.u32 %v14221_v18, 16  ;;  %v468_v30 = vshll.u32 %v14327_v15, 16  ;;  %v9511_v33 = vld [vmem:[%s16685_s2 + $0x1c8] sm:$0xf]  ;;  %v9393_v35 = vor.u32 %v12861_v25, %v9390_v26 }
  0x40   : > { %v12904_v34 = vld [vmem:[%s16685_s2 + $0x1d0] sm:$0xf0]  ;;  %v9397_v36 = vor.u32 %v12863_v28, %v9396_v27  ;;  %v12903_v37 = vld [vmem:[%s16685_s2 + $0x1cc] sm:$0xf]  ;;  %v9513_v2 = vld [vmem:[%s16685_s2 + $0x1d4] sm:$0xf0] }
  0x41   : > { %622 = vmatpush.bf16.msra.mxu0 %v9248_v49  ;;  %645 = vmatpush.bf16.msra.mxu1 %v9252_v50  ;;  %v12858_v38 = vld [vmem:[%s16685_s2 + $0x4c] sm:$0xf]  ;;  %v9378_v39 = vld [vmem:[%s16685_s2 + $0x54] sm:$0xf0]  ;;  %v9384_v40 = vld [vmem:[%s16685_s2 + $0x50] sm:$0xf]  ;;  %v466_v42 = vor.u32 %v464_v29, %v14272_v52  ;;  %v9512_v44 = vor.u32 %v12904_v34, %v9511_v33  ;;  %v9516_v45 = vor.u32 %v12903_v37, %v9513_v2 }
  0x42   : > { %668 = vmatpush.bf16.msra.mxu2 %v9256_v53  ;;  %826 = vmatpush.bf16.msra.mxu3 %v9341_v54  ;;  %v12860_v41 = vld [vmem:[%s16685_s2 + $0x58] sm:$0xf0]  ;;  %v14380_v43 = vrot.slane %v468_v30, 1  ;;  %v9499_v46 = vld [vmem:[%s16685_s2 + $0x1b0] sm:$0xf]  ;;  %v9381_v48 = vor.u32 %v12858_v38, %v9378_v39  ;;  %v472_v30 = vshrl.u32 %v14327_v15, 16 }
  0x43   : > { %v12901_v47 = vld [vmem:[%s16685_s2 + $0x1b8] sm:$0xf0]  ;;  %v9385_v49 = vor.u32 %v12860_v41, %v9384_v40  ;;  %v12900_v50 = vld [vmem:[%s16685_s2 + $0x1b4] sm:$0xf]  ;;  %v9501_v51 = vld [vmem:[%s16685_s2 + $0x1bc] sm:$0xf0] }
  0x44   : > { %9329 = vmatmul.msk.bf16.vlgmr.msra.gmra.mxu0 %vm595_vm2, %v14290_v63  ;;  %9332 = vmatmul.msk.bf16.vlgmr.msra.gmra.mxu1 %vm595_vm2, %v14290_v63  ;;  %v12855_v52 = vld [vmem:[%s16685_s2 + $0x34] sm:$0xf]  ;;  %v9366_v53 = vld [vmem:[%s16685_s2 + $0x3c] sm:$0xf0]  ;;  %v9372_v54 = vld [vmem:[%s16685_s2 + $0x38] sm:$0xf]  ;;  %v14408_v56 = vsel %vm451_vm1, %v466_v42, %v14380_v43  ;;  %v9500_v57 = vor.u32 %v12901_v47, %v9499_v46  ;;  %v9504_v58 = vor.u32 %v12900_v50, %v9501_v51 }
  0x45   : > { %842 = vmatpush.bf16.msrb.mxu0 %v814_v59  ;;  %865 = vmatpush.bf16.msrb.mxu1 %v817_v60  ;;  %v12857_v55 = vld [vmem:[%s16685_s2 + $0x40] sm:$0xf0]  ;;  %v9487_v59 = vld [vmem:[%s16685_s2 + $0x198] sm:$0xf]  ;;  %v9369_v61 = vor.u32 %v12855_v52, %v9366_v53  ;;  %v12897_v0 = vld [vmem:[%s16685_s2 + $0x19c] sm:$0xf]  ;;  %v14480_v33 = vor.u32 %v472_v30, %v14380_v43 }
  0x46   : > { %9335 = vmatmul.msk.bf16.vlgmr.msra.gmra.mxu2 %vm595_vm2, %v14290_v63  ;;  %9422 = vmatmul.msk.bf16.vlgmr.msra.gmra.mxu3 %vm595_vm2, %v14213_v13  ;;  %v12898_v60 = vld [vmem:[%s16685_s2 + $0x1a0] sm:$0xf0]  ;;  %v9373_v62 = vor.u32 %v12857_v55, %v9372_v54  ;;  %v9489_v1 = vld [vmem:[%s16685_s2 + $0x1a4] sm:$0xf0]  ;;  %v12852_v3 = vld [vmem:[%s16685_s2 + $0x1c] sm:$0xf] }
  0x47   : > { %1066 = vmatpush.bf16.msrb.mxu2 %v1058_v5  ;;  %1089 = vmatpush.bf16.msrb.mxu3 %v1061_v6  ;;  %v9354_v4 = vld [vmem:[%s16685_s2 + $0x24] sm:$0xf0]  ;;  %v9360_v5 = vld [vmem:[%s16685_s2 + $0x20] sm:$0xf]  ;;  %v12854_v6 = vld [vmem:[%s16685_s2 + $0x28] sm:$0xf0] }
  0x48   : > { %v9475_v9 = vld [vmem:[%s16685_s2 + $0x180] sm:$0xf]  ;;  %v12895_v10 = vld [vmem:[%s16685_s2 + $0x188] sm:$0xf0]  ;;  %v9357_v11 = vor.u32 %v12852_v3, %v9354_v4  ;;  %v9361_v12 = vor.u32 %v12854_v6, %v9360_v5  ;;  %v12894_v14 = vld [vmem:[%s16685_s2 + $0x184] sm:$0xf] }
  0x49   : > { %843 = vmatpush.bf16.msrb.mxu0 %v9417_v7  ;;  %866 = vmatpush.bf16.msrb.mxu1 %v9421_v8  ;;  %v9488_v7 = vor.u32 %v12898_v60, %v9487_v59  ;;  %v9492_v8 = vor.u32 %v12897_v0, %v9489_v1  ;;  %v9342_v19 = vld [vmem:[%s16685_s2 + $0xc] sm:$0xf0]  ;;  %v9348_v20 = vld [vmem:[%s16685_s2 + $0x8] sm:$0xf]  ;;  %v12892_v27 = vld [vmem:[%s16685_s2 + $0x170] sm:$0xf0] }
  0x4a   : > { %v9463_v24 = vld [vmem:[%s16685_s2 + $0x168] sm:$0xf]  ;;  %v12891_v28 = vld [vmem:[%s16685_s2 + $0x16c] sm:$0xf]  ;;  %v9465_v29 = vld [vmem:[%s16685_s2 + $0x174] sm:$0xf0] }
  0x4b   : > { %1067 = vmatpush.bf16.msrb.mxu2 %v9536_v16  ;;  %1090 = vmatpush.bf16.msrb.mxu3 %v9540_v17  ;;  %v9477_v16 = vld [vmem:[%s16685_s2 + $0x18c] sm:$0xf0]  ;;  %v12849_v17 = vld [vmem:[%s16685_s2 + $0x4] sm:$0xf]  ;;  %v9460_v34 = vld [vmem:[%s16685_s2 + $0x218] sm:$0x1] }
  0x4c   : > { %v9480_v23 = vor.u32 %v12894_v14, %v9477_v16  ;;  %v9345_v25 = vor.u32 %v12849_v17, %v9342_v19  ;;  %v1002_v37 = vunpack.c.l.b16 %v9460_v34  ;;  %v9688_v50 = vld [vmem:[%s16685_s2 + $0x360] sm:$0xf]  ;;  %v12952_v51 = vld [vmem:[%s16685_s2 + $0x368] sm:$0xf0]  ;;  %v12951_v54 = vld [vmem:[%s16685_s2 + $0x364] sm:$0xf] }
  0x4d   : > { %844 = vmatpush.bf16.msrb.mxu0 %v9405_v21  ;;  %867 = vmatpush.bf16.msrb.mxu1 %v9409_v22  ;;  %v12851_v21 = vld [vmem:[%s16685_s2 + $0x10] sm:$0xf0]  ;;  %v9476_v22 = vor.u32 %v12895_v10, %v9475_v9  ;;  %v9689_v53 = vor.u32 %v12952_v51, %v9688_v50  ;;  %v9690_v55 = vld [vmem:[%s16685_s2 + $0x36c] sm:$0xf0]  ;;  %v9531_v60 = vld [vmem:[%s16685_s2 + $0x1e8] sm:$0xf] }
  0x4e   : > { %v9349_v26 = vor.u32 %v12851_v21, %v9348_v20  ;;  %v1026_v40 = vpack.c.b16 %v1002_v37, %v1002_v37  ;;  %v12953_v59 = vld [vmem:[%s16685_s2 + $0x370] sm:$0xf0]  ;;  %v9676_v0 = vld [vmem:[%s16685_s2 + $0x348] sm:$0xf]  ;;  %v12948_v3 = vld [vmem:[%s16685_s2 + $0x34c] sm:$0xf] }
  0x4f   : > { %1068 = vmatpush.bf16.msrb.mxu2 %v9524_v31  ;;  %1091 = vmatpush.bf16.msrb.mxu3 %v9528_v32  ;;  %v9464_v31 = vor.u32 %v12892_v27, %v9463_v24  ;;  %v9468_v32 = vor.u32 %v12891_v28, %v9465_v29  ;;  %v12949_v1 = vld [vmem:[%s16685_s2 + $0x350] sm:$0xf0]  ;;  %v9678_v6 = vld [vmem:[%s16685_s2 + $0x354] sm:$0xf0]  ;;  %v9664_v14 = vld [vmem:[%s16685_s2 + $0x330] sm:$0xf] }
  0x50   : > { %v9677_v5 = vor.u32 %v12949_v1, %v9676_v0  ;;  %v9681_v9 = vor.u32 %v12948_v3, %v9678_v6  ;;  %v12946_v16 = vld [vmem:[%s16685_s2 + $0x338] sm:$0xf0]  ;;  %v12945_v17 = vld [vmem:[%s16685_s2 + $0x334] sm:$0xf]  ;;  %v9666_v19 = vld [vmem:[%s16685_s2 + $0x33c] sm:$0xf0] }
  0x51   : > { %845 = vmatpush.bf16.msrb.mxu0 %v9393_v35  ;;  %868 = vmatpush.bf16.msrb.mxu1 %v9397_v36  ;;  %v9612_v35 = vld [vmem:[%s16685_s2 + $0x378] sm:$0x11]  ;;  %v9613_v36 = vld [vmem:[%s16685_s2 + $0x380] sm:$0x1]  ;;  %v12947_v21 = vld [vmem:[%s16685_s2 + $0x340] sm:$0xf0] }
  0x52   : > { %v1284_v2 = vunpack.c.l.b16 %v9612_v35  ;;  %v1285_v38 = vunpack.c.h.b16 %v9612_v35  ;;  %v1286_v39 = vunpack.c.l.b16 %v9613_v36  ;;  %v9672_v20 = vld [vmem:[%s16685_s2 + $0x338] sm:$0xf]  ;;  %v12902_v30 = vld [vmem:[%s16685_s2 + $0x1c0] sm:$0xf0]  ;;  %v12942_v35 = vld [vmem:[%s16685_s2 + $0x31c] sm:$0xf] }
  0x53   : > { %1069 = vmatpush.bf16.msrb.mxu2 %v9512_v44  ;;  %1092 = vmatpush.bf16.msrb.mxu3 %v9516_v45  ;;  %v1064_v44 = vsel %vm605_vm0, %v1026_v40, 0  ;;  %v9673_v27 = vor.u32 %v12947_v21, %v9672_v20  ;;  %v9507_v29 = vld [vmem:[%s16685_s2 + $0x1b8] sm:$0xf]  ;;  %v12943_v34 = vld [vmem:[%s16685_s2 + $0x320] sm:$0xf0]  ;;  %vm1892_vm4 = vcmask 1041408  }
  0x54   : > { %9330 = vmatmul.msk.bf16.gmra.mxu0 %vm595_vm2, %v14408_v56  ;;  %9333 = vmatmul.msk.bf16.gmra.mxu1 %vm595_vm2, %v14408_v56  ;;  %v1308_v41 = vpack.c.b16 %v1284_v2, %v1284_v2  ;;  %v1309_v42 = vpack.c.b16 %v1285_v38, %v1285_v38  ;;  %v1310_v43 = vpack.c.b16 %v1286_v39, %v1286_v39  ;;  %v9654_v36 = vld [vmem:[%s16685_s2 + $0x324] sm:$0xf0]  ;;  %v9660_v38 = vld [vmem:[%s16685_s2 + $0x320] sm:$0xf]  ;;  %v12944_v39 = vld [vmem:[%s16685_s2 + $0x328] sm:$0xf0] }
  0x55   : > { %846 = vmatpush.bf16.msrb.mxu0 %v9381_v48  ;;  %869 = vmatpush.bf16.msrb.mxu1 %v9385_v49  ;;  %v9543_v48 = vld [vmem:[%s16685_s2 + $0x200] sm:$0xf]  ;;  %v12911_v49 = vld [vmem:[%s16685_s2 + $0x208] sm:$0xf0]  ;;  %v9657_v2 = vor.u32 %v12942_v35, %v9654_v36  ;;  %v12941_v51 = vld [vmem:[%s16685_s2 + $0x310] sm:$0xf0] }
  0x56   : > { %9336 = vmatmul.msk.bf16.gmra.mxu2 %vm595_vm2, %v14408_v56  ;;  %9423 = vmatmul.msk.bf16.gmra.mxu3 %vm595_vm2, %v14221_v18  ;;  %v1333_v45 = vsel %vm605_vm0, %v1308_v41, 0  ;;  %v1336_v46 = vsel %vm605_vm0, %v1309_v42, 0  ;;  %v1339_v47 = vsel %vm605_vm0, %v1310_v43, 0  ;;  %v9544_v52 = vor.u32 %v12911_v49, %v9543_v48  ;;  %v9495_v40 = vld [vmem:[%s16685_s2 + $0x1a0] sm:$0xf] }
  0x57   : > { %1070 = vmatpush.bf16.msrb.mxu2 %v9500_v57  ;;  %1093 = vmatpush.bf16.msrb.mxu3 %v9504_v58  ;;  %v9696_v57 = vld [vmem:[%s16685_s2 + $0x368] sm:$0xf]  ;;  %v9693_v58 = vor.u32 %v12951_v54, %v9690_v55  ;;  %v9661_v41 = vor.u32 %v12944_v39, %v9660_v38  ;;  %v12899_v42 = vld [vmem:[%s16685_s2 + $0x1a8] sm:$0xf0]  ;;  %v9640_v43 = vld [vmem:[%s16685_s2 + $0x300] sm:$0xf] }
  0x58   : > { %v9642_v48 = vld [vmem:[%s16685_s2 + $0x30c] sm:$0xf0]  ;;  %v9648_v49 = vld [vmem:[%s16685_s2 + $0x308] sm:$0xf]  ;;  %v12931_v38 = vld [vmem:[%s16685_s2 + $0x2b4] sm:$0xf0] }
  0x59   : > { %847 = vmatpush.bf16.msrb.mxu0 %v9369_v61  ;;  %870 = vmatpush.bf16.msrb.mxu1 %v9373_v62  ;;  %v12908_v61 = vld [vmem:[%s16685_s2 + $0x1f0] sm:$0xf0]  ;;  %v9697_v62 = vor.u32 %v12953_v59, %v9696_v57  ;;  %v9649_v54 = vor.u32 %v12941_v51, %v9648_v49  ;;  %v9628_v55 = vld [vmem:[%s16685_s2 + $0x2e8] sm:$0xf]  ;;  %v9471_v3 = vld [vmem:[%s16685_s2 + $0x170] sm:$0xf] }
  0x5a   : > { %v9532_v4 = vor.u32 %v12908_v61, %v9531_v60  ;;  %v12937_v57 = vld [vmem:[%s16685_s2 + $0x2f0] sm:$0xf0]  ;;  %v9630_v60 = vld [vmem:[%s16685_s2 + $0x2f4] sm:$0xf0]  ;;  %v9636_v61 = vld [vmem:[%s16685_s2 + $0x2f0] sm:$0xf] }
  0x5b   : > { %1071 = vmatpush.bf16.msrb.mxu2 %v9488_v7  ;;  %1094 = vmatpush.bf16.msrb.mxu3 %v9492_v8  ;;  %v9684_v7 = vld [vmem:[%s16685_s2 + $0x350] sm:$0xf]  ;;  %v12950_v8 = vld [vmem:[%s16685_s2 + $0x358] sm:$0xf0]  ;;  %v9629_v0 = vor.u32 %v12937_v57, %v9628_v55  ;;  %v9582_v21 = vld [vmem:[%s16685_s2 + $0x2c4] sm:$0x11] }
  0x5c   : > { %v9685_v10 = vor.u32 %v12950_v8, %v9684_v7  ;;  %v12934_v7 = vld [vmem:[%s16685_s2 + $0x2d8] sm:$0xf0]  ;;  %v12933_v8 = vld [vmem:[%s16685_s2 + $0x2d4] sm:$0xf]  ;;  %v12930_v39 = vld [vmem:[%s16685_s2 + $0x2b0] sm:$0xf] }
  0x5d   : > { %848 = vmatpush.bf16.msrb.mxu0 %v9357_v11  ;;  %871 = vmatpush.bf16.msrb.mxu1 %v9361_v12  ;;  %v9519_v11 = vld [vmem:[%s16685_s2 + $0x1d0] sm:$0xf]  ;;  %v12905_v12 = vld [vmem:[%s16685_s2 + $0x1d8] sm:$0xf0]  ;;  %v12928_v49 = vld [vmem:[%s16685_s2 + $0x29c] sm:$0xf0] }
  0x5e   : > { %v9520_v24 = vor.u32 %v12905_v12, %v9519_v11  ;;  %v12927_v51 = vld [vmem:[%s16685_s2 + $0x298] sm:$0xf]  ;;  %v12929_v57 = vld [vmem:[%s16685_s2 + $0x2a4] sm:$0xf0]  ;;  %vm1896_vm5 = vcmask 1043458   ;;  %vm1901_vm6 = vcmask 1045508  }
  0x5f   : > { %1072 = vmatpush.bf16.msrb.mxu2 %v9476_v22  ;;  %1095 = vmatpush.bf16.msrb.mxu3 %v9480_v23  ;;  %v923_v22 = vrot.slane %v14213_v13, 1  ;;  %v924_v23 = vrot.slane %v14221_v18, 1  ;;  %vm1905_vm7 = vcmask 1045504   ;;  %vm1894_vm8 = vcmask 1043456  }
  0x60   : > { %vm1898_vm9 = vcmask 1045506   ;;  %vm2088_vm10 = vcmask 254976   ;;  %vm2892_vm11 = vcmask 1041409   ;;  %vm2895_vm12 = vcmask 1042434  }
  0x61   : > { %849 = vmatpush.bf16.msrb.mxu0 %v9345_v25  ;;  %872 = vmatpush.bf16.msrb.mxu1 %v9349_v26  ;;  %v9665_v25 = vor.u32 %v12946_v16, %v9664_v14  ;;  %v9669_v26 = vor.u32 %v12945_v17, %v9666_v19  ;;  %v14580_v28 = vsel %vm922_vm3, %v923_v22, %v924_v23  ;;  %v9624_v16 = vld [vmem:[%s16685_s2 + $0x2d8] sm:$0xf]  ;;  %v12935_v17 = vld [vmem:[%s16685_s2 + $0x2e0] sm:$0xf0]  ;;  %v9583_v22 = vld [vmem:[%s16685_s2 + $0x2cc] sm:$0x1] }
  0x62   : > { %v9625_v20 = vor.u32 %v12935_v17, %v9624_v16  ;;  %v12922_v16 = vld [vmem:[%s16685_s2 + $0x26c] sm:$0xf0]  ;;  %v12921_v17 = vld [vmem:[%s16685_s2 + $0x268] sm:$0xf]  ;;  %vm2898_vm13 = vcmask 1043459   ;;  %vm2901_vm14 = vcmask 1044484  }
  0x63   : > { %1073 = vmatpush.bf16.msrb.mxu2 %v9464_v31  ;;  %1096 = vmatpush.bf16.msrb.mxu3 %v9468_v32  ;;  %v9652_v31 = vld [vmem:[%s16685_s2 + $0x318] sm:$0xf]  ;;  %v9508_v32 = vor.u32 %v12902_v30, %v9507_v29  ;;  %vm2904_vm15 = vcmask 1045509   ;;  %vm2907_vm1 = vcmask 1046534  }
  0x64   : > { %9331 = vmatmul.msk.bf16.gmra.mxu0 %vm595_vm2, %v14480_v33  ;;  %9334 = vmatmul.msk.bf16.gmra.mxu1 %vm595_vm2, %v14480_v33  ;;  %v9653_v37 = vor.u32 %v12943_v34, %v9652_v31 }
  0x65   : > { %1112 = vmatpush.bf16.msra.mxu0 %v1064_v44  ;;  %1341 = vmatpush.bf16.msra.mxu1 %v1333_v45  ;;  %v12940_v44 = vld [vmem:[%s16685_s2 + $0x308] sm:$0xf0]  ;;  %v9496_v45 = vor.u32 %v12899_v42, %v9495_v40  ;;  %v9783_v40 = vld [vmem:[%s16685_s2 + $0x2b8] sm:$0xf0] }
  0x66   : > { %9337 = vmatmul.msk.bf16.gmra.mxu2 %vm595_vm2, %v14480_v33  ;;  %9424 = vmatmul.msk.bf16.gmra.mxu3 %vm595_vm2, %v14327_v15  ;;  %v9786_v42 = vor.u32 %v12930_v39, %v9783_v40  ;;  %v9856_v39 = vld [vmem:[%s16685_s2 + $0x3b4] sm:$0xf]  ;;  %v12961_v40 = vld [vmem:[%s16685_s2 + $0x3bc] sm:$0xf0] }
  0x67   : > { %1364 = vmatpush.bf16.msra.mxu2 %v1336_v46  ;;  %1387 = vmatpush.bf16.msra.mxu3 %v1339_v47  ;;  %v9641_v46 = vor.u32 %v12940_v44, %v9640_v43  ;;  %v12939_v47 = vld [vmem:[%s16685_s2 + $0x304] sm:$0xf]  ;;  %v9789_v43 = vld [vmem:[%s16685_s2 + $0x2b4] sm:$0xf]  ;;  %v12932_v44 = vld [vmem:[%s16685_s2 + $0x2bc] sm:$0xf0] }
  0x68   : > { %v9645_v50 = vor.u32 %v12939_v47, %v9642_v48  ;;  %v12973_v47 = vld [vmem:[%s16685_s2 + $0x41c] sm:$0xf0]  ;;  %v9769_v48 = vld [vmem:[%s16685_s2 + $0x294] sm:$0xf] }
  0x69   : > { %1113 = vmatpush.bf16.msra.mxu0 %v9544_v52  ;;  %1342 = vmatpush.bf16.msra.mxu1 %v9689_v53  ;;  %v9483_v52 = vld [vmem:[%s16685_s2 + $0x188] sm:$0xf]  ;;  %v12896_v53 = vld [vmem:[%s16685_s2 + $0x190] sm:$0xf0] }
  0x6a   : > { %v9484_v59 = vor.u32 %v12896_v53, %v9483_v52  ;;  %v9771_v52 = vld [vmem:[%s16685_s2 + $0x2a0] sm:$0xf0]  ;;  %v9777_v53 = vld [vmem:[%s16685_s2 + $0x29c] sm:$0xf] }
  0x6b   : > { %1365 = vmatpush.bf16.msra.mxu2 %v9693_v58  ;;  %1388 = vmatpush.bf16.msra.mxu3 %v9697_v62  ;;  %v12936_v58 = vld [vmem:[%s16685_s2 + $0x2ec] sm:$0xf]  ;;  %v12938_v62 = vld [vmem:[%s16685_s2 + $0x2f8] sm:$0xf0]  ;;  %v9774_v55 = vor.u32 %v12927_v51, %v9771_v52  ;;  %v12958_v52 = vld [vmem:[%s16685_s2 + $0x3a4] sm:$0xf0] }
  0x6c   : > { %v9633_v1 = vor.u32 %v12936_v58, %v9630_v60  ;;  %v9637_v6 = vor.u32 %v12938_v62, %v9636_v61  ;;  %v9892_v58 = vld [vmem:[%s16685_s2 + $0x3fc] sm:$0xf]  ;;  %v9778_v60 = vor.u32 %v12929_v57, %v9777_v53  ;;  %v12912_v57 = vld [vmem:[%s16685_s2 + $0x220] sm:$0xf] }
  0x6d   : > { %1114 = vmatpush.bf16.msra.mxu0 %v9532_v4  ;;  %1343 = vmatpush.bf16.msra.mxu1 %v9677_v5  ;;  %v12893_v4 = vld [vmem:[%s16685_s2 + $0x178] sm:$0xf0]  ;;  %v9616_v5 = vld [vmem:[%s16685_s2 + $0x2d0] sm:$0xf] }
  0x6e   : > { %v9472_v11 = vor.u32 %v12893_v4, %v9471_v3  ;;  %v9617_v12 = vor.u32 %v12934_v7, %v9616_v5  ;;  %v9757_v62 = vld [vmem:[%s16685_s2 + $0x27c] sm:$0xf]  ;;  %v9759_v4 = vld [vmem:[%s16685_s2 + $0x288] sm:$0xf0]  ;;  %v9765_v5 = vld [vmem:[%s16685_s2 + $0x284] sm:$0xf] }
  0x6f   : > { %1366 = vmatpush.bf16.msra.mxu2 %v9681_v9  ;;  %1389 = vmatpush.bf16.msra.mxu3 %v9685_v10  ;;  %v9618_v9 = vld [vmem:[%s16685_s2 + $0x2dc] sm:$0xf0]  ;;  %v14681_v10 = vrot.slane %v14327_v15, 1 }
  0x70   : > { %v9621_v14 = vor.u32 %v12933_v8, %v9618_v9  ;;  %v9880_v9 = vld [vmem:[%s16685_s2 + $0x3e4] sm:$0xf] }
  0x71   : > { %1115 = vmatpush.bf16.msra.mxu0 %v9520_v24  ;;  %1344 = vmatpush.bf16.msra.mxu1 %v9665_v25  ;;  %v14693_v19 = vsel %vm922_vm3, %v924_v23, %v14681_v10  ;;  %v14712_v23 = vld [vmem:[%s16685_s2 + $0x42c] sm:$0x11]  ;;  %v1482_v24 = vunpack.c.l.b16 %v9582_v21  ;;  %v1483_v25 = vunpack.c.h.b16 %v9582_v21  ;;  %v9747_v21 = vld [vmem:[%s16685_s2 + $0x270] sm:$0xf0]  ;;  %vm3167_vm3 = vcmask 261120  }
  0x73   : > { %1367 = vmatpush.bf16.msra.mxu2 %v9669_v26  ;;  %1390 = vmatpush.bf16.msra.mxu3 %v9673_v27  ;;  %v1484_v26 = vunpack.c.l.b16 %v9583_v22  ;;  %v1711_v27 = vunpack.c.l.b16 %v14712_v23  ;;  %v1506_v29 = vpack.c.b16 %v1482_v24, %v1482_v24  ;;  %v1507_v30 = vpack.c.b16 %v1483_v25, %v1483_v25  ;;  %v9753_v22 = vld [vmem:[%s16685_s2 + $0x26c] sm:$0xf]  ;;  %v12923_v24 = vld [vmem:[%s16685_s2 + $0x274] sm:$0xf0] }
  0x74   : > { %9425 = vmatmul.msk.bf16.vlgmr.msrb.gmra.mxu0 %vm595_vm2, %v14213_v13  ;;  %9428 = vmatmul.msk.bf16.vlgmr.msrb.gmra.mxu1 %vm595_vm2, %v14213_v13  ;;  %v9750_v25 = vor.u32 %v12921_v17, %v9747_v21  ;;  %v9912_v17 = vld [vmem:[%s16685_s2 + $0x41c] sm:$0xf] }
  0x75   : > { %1116 = vmatpush.bf16.msra.mxu0 %v9508_v32  ;;  %1345 = vmatpush.bf16.msra.mxu1 %v9653_v37  ;;  %v1508_v31 = vpack.c.b16 %v1484_v26, %v1484_v26  ;;  %v1735_v32 = vpack.c.b16 %v1711_v27, %v1711_v27  ;;  %v1531_v34 = vsel %vm605_vm0, %v1506_v29, 0  ;;  %v1534_v35 = vsel %vm605_vm0, %v1507_v30, 0  ;;  %v9868_v27 = vld [vmem:[%s16685_s2 + $0x3cc] sm:$0xf]  ;;  %v12964_v29 = vld [vmem:[%s16685_s2 + $0x3d4] sm:$0xf0] }
  0x76   : > { %9545 = vmatmul.msk.bf16.vlgmr.msrb.gmra.mxu2 %vm595_vm2, %v14580_v28  ;;  %9548 = vmatmul.msk.bf16.vlgmr.msrb.gmra.mxu3 %vm595_vm2, %v14580_v28  ;;  %v9754_v26 = vor.u32 %v12923_v24, %v9753_v22  ;;  %v9869_v30 = vor.u32 %v12964_v29, %v9868_v27  ;;  %v12974_v22 = vld [vmem:[%s16685_s2 + $0x424] sm:$0xf0]  ;;  %v12969_v29 = vld [vmem:[%s16685_s2 + $0x400] sm:$0xf] }
  0x77   : > { %1368 = vmatpush.bf16.msra.mxu2 %v9657_v2  ;;  %1391 = vmatpush.bf16.msra.mxu3 %v9661_v41  ;;  %v1537_v36 = vsel %vm605_vm0, %v1508_v31, 0  ;;  %v1760_v37 = vsel %vm605_vm0, %v1735_v32, 0  ;;  %v9781_v2 = vld [vmem:[%s16685_s2 + $0x2ac] sm:$0xf]  ;;  %v12918_v32 = vld [vmem:[%s16685_s2 + $0x250] sm:$0xf]  ;;  %v9913_v27 = vor.u32 %v12974_v22, %v9912_v17 }
  0x78   : > { %v9782_v41 = vor.u32 %v12931_v38, %v9781_v2  ;;  %v9733_v31 = vld [vmem:[%s16685_s2 + $0x24c] sm:$0xf] }
  0x79   : > { %1117 = vmatpush.bf16.msra.mxu0 %v9496_v45  ;;  %1346 = vmatpush.bf16.msra.mxu1 %v9641_v46  ;;  %v9904_v45 = vld [vmem:[%s16685_s2 + $0x414] sm:$0xf]  ;;  %v9790_v46 = vor.u32 %v12932_v44, %v9789_v43  ;;  %v12916_v43 = vld [vmem:[%s16685_s2 + $0x23c] sm:$0xf0]  ;;  %v12915_v44 = vld [vmem:[%s16685_s2 + $0x238] sm:$0xf] }
  0x7b   : > { %1369 = vmatpush.bf16.msra.mxu2 %v9645_v50  ;;  %1392 = vmatpush.bf16.msra.mxu3 %v9649_v54  ;;  %v9905_v50 = vor.u32 %v12973_v47, %v9904_v45  ;;  %v9770_v54 = vor.u32 %v12928_v49, %v9769_v48  ;;  %v9723_v45 = vld [vmem:[%s16685_s2 + $0x240] sm:$0xf0]  ;;  %v9729_v48 = vld [vmem:[%s16685_s2 + $0x23c] sm:$0xf]  ;;  %v12917_v49 = vld [vmem:[%s16685_s2 + $0x244] sm:$0xf0] }
  0x7c   : > { %v9726_v47 = vor.u32 %v12915_v44, %v9723_v45  ;;  %v9730_v51 = vor.u32 %v12917_v49, %v9729_v48  ;;  %v12963_v44 = vld [vmem:[%s16685_s2 + $0x3d0] sm:$0xf]  ;;  %v9870_v45 = vld [vmem:[%s16685_s2 + $0x3d8] sm:$0xf0]  ;;  %v12965_v48 = vld [vmem:[%s16685_s2 + $0x3dc] sm:$0xf0] }
  0x7d   : > { %1118 = vmatpush.bf16.msra.mxu0 %v9484_v59  ;;  %1347 = vmatpush.bf16.msra.mxu1 %v9629_v0  ;;  %v12970_v59 = vld [vmem:[%s16685_s2 + $0x404] sm:$0xf0] }
  0x7e   : > { %v9893_v61 = vor.u32 %v12970_v59, %v9892_v58  ;;  %v12925_v0 = vld [vmem:[%s16685_s2 + $0x284] sm:$0xf0]  ;;  %v9711_v59 = vld [vmem:[%s16685_s2 + $0x228] sm:$0xf0] }
  0x7f   : > { %1370 = vmatpush.bf16.msra.mxu2 %v9633_v1  ;;  %1393 = vmatpush.bf16.msra.mxu3 %v9637_v6  ;;  %v12924_v1 = vld [vmem:[%s16685_s2 + $0x280] sm:$0xf]  ;;  %v9758_v3 = vor.u32 %v12925_v0, %v9757_v62  ;;  %v12926_v6 = vld [vmem:[%s16685_s2 + $0x28c] sm:$0xf0]  ;;  %v9714_v62 = vor.u32 %v12912_v57, %v9711_v59 }
  0x80   : > { %v9762_v7 = vor.u32 %v12924_v1, %v9759_v4  ;;  %v9766_v8 = vor.u32 %v12926_v6, %v9765_v5  ;;  %v9832_v1 = vld [vmem:[%s16685_s2 + $0x384] sm:$0xf]  ;;  %v9829_v5 = vld [vmem:[%s16685_s2 + $0x434] sm:$0x1] }
  0x81   : > { %1119 = vmatpush.bf16.msra.mxu0 %v9472_v11  ;;  %1348 = vmatpush.bf16.msra.mxu1 %v9617_v12  ;;  %v12967_v11 = vld [vmem:[%s16685_s2 + $0x3ec] sm:$0xf0] }
  0x82   : > { %v9881_v12 = vor.u32 %v12967_v11, %v9880_v9  ;;  %v1713_v9 = vunpack.c.l.b16 %v9829_v5  ;;  %v12954_v5 = vld [vmem:[%s16685_s2 + $0x388] sm:$0xf] }
  0x83   : > { %1371 = vmatpush.bf16.msra.mxu2 %v9621_v14  ;;  %1394 = vmatpush.bf16.msra.mxu3 %v9625_v20  ;;  %v9745_v14 = vld [vmem:[%s16685_s2 + $0x264] sm:$0xf] }
  0x84   : > { %9426 = vmatmul.msk.bf16.gmra.mxu0 %vm595_vm2, %v14221_v18  ;;  %9429 = vmatmul.msk.bf16.gmra.mxu1 %vm595_vm2, %v14221_v18  ;;  %v9746_v20 = vor.u32 %v12922_v16, %v9745_v14  ;;  %v9906_v16 = vld [vmem:[%s16685_s2 + $0x420] sm:$0xf0] }
  0x85   : > { %1539 = vmatpush.bf16.msrb.mxu0 %v1531_v34  ;;  %1562 = vmatpush.bf16.msrb.mxu1 %v1534_v35  ;;  %v9735_v35 = vld [vmem:[%s16685_s2 + $0x258] sm:$0xf0] }
  0x86   : > { %9546 = vmatmul.msk.bf16.gmra.mxu2 %vm595_vm2, %v14693_v19  ;;  %9549 = vmatmul.msk.bf16.gmra.mxu3 %vm595_vm2, %v14693_v19  ;;  %v9738_v2 = vor.u32 %v12918_v32, %v9735_v35  ;;  %v12971_v32 = vld [vmem:[%s16685_s2 + $0x40c] sm:$0xf0]  ;;  %v12966_v35 = vld [vmem:[%s16685_s2 + $0x3e8] sm:$0xf] }
  0x87   : > { %1585 = vmatpush.bf16.msrb.mxu2 %v1537_v36  ;;  %1768 = vmatpush.bf16.msrb.mxu3 %v1760_v37  ;;  %v9741_v36 = vld [vmem:[%s16685_s2 + $0x254] sm:$0xf]  ;;  %v12920_v37 = vld [vmem:[%s16685_s2 + $0x25c] sm:$0xf0] }
  0x88   : > { %v9742_v38 = vor.u32 %v12920_v37, %v9741_v36  ;;  %v9882_v36 = vld [vmem:[%s16685_s2 + $0x3f0] sm:$0xf0]  ;;  %v9888_v37 = vld [vmem:[%s16685_s2 + $0x3ec] sm:$0xf] }
  0x89   : > { %1540 = vmatpush.bf16.msrb.mxu0 %v9782_v41  ;;  %1563 = vmatpush.bf16.msrb.mxu1 %v9786_v42  ;;  %v9721_v41 = vld [vmem:[%s16685_s2 + $0x234] sm:$0xf]  ;;  %v9857_v42 = vor.u32 %v12961_v40, %v9856_v39  ;;  %v9885_v39 = vor.u32 %v12966_v35, %v9882_v36  ;;  %v12968_v40 = vld [vmem:[%s16685_s2 + $0x3f4] sm:$0xf0] }
  0x8b   : > { %1586 = vmatpush.bf16.msrb.mxu2 %v9790_v46  ;;  %1769 = vmatpush.bf16.msrb.mxu3 %v9905_v50  ;;  %v9722_v46 = vor.u32 %v12916_v43, %v9721_v41  ;;  %v9844_v50 = vld [vmem:[%s16685_s2 + $0x39c] sm:$0xf]  ;;  %v9889_v43 = vor.u32 %v12968_v40, %v9888_v37 }
  0x8c   : > { %v9845_v53 = vor.u32 %v12958_v52, %v9844_v50  ;;  %v12960_v50 = vld [vmem:[%s16685_s2 + $0x3b8] sm:$0xf]  ;;  %v9864_v52 = vld [vmem:[%s16685_s2 + $0x3bc] sm:$0xf] }
  0x8d   : > { %1541 = vmatpush.bf16.msrb.mxu0 %v9770_v54  ;;  %1564 = vmatpush.bf16.msrb.mxu1 %v9774_v55  ;;  %v9709_v54 = vld [vmem:[%s16685_s2 + $0x21c] sm:$0xf]  ;;  %v12913_v55 = vld [vmem:[%s16685_s2 + $0x224] sm:$0xf0] }
  0x8e   : > { %v9710_v58 = vor.u32 %v12913_v55, %v9709_v54  ;;  %v12962_v55 = vld [vmem:[%s16685_s2 + $0x3c4] sm:$0xf0] }
  0x8f   : > { %1587 = vmatpush.bf16.msrb.mxu2 %v9778_v60  ;;  %1770 = vmatpush.bf16.msrb.mxu3 %v9893_v61  ;;  %v9717_v60 = vld [vmem:[%s16685_s2 + $0x224] sm:$0xf]  ;;  %v12914_v61 = vld [vmem:[%s16685_s2 + $0x22c] sm:$0xf0] }
  0x90   : > { %v9718_v0 = vor.u32 %v12914_v61, %v9717_v60  ;;  %v9865_v60 = vor.u32 %v12962_v55, %v9864_v52  ;;  %v12957_v61 = vld [vmem:[%s16685_s2 + $0x3a0] sm:$0xf] }
  0x91   : > { %1542 = vmatpush.bf16.msrb.mxu0 %v9758_v3  ;;  %1565 = vmatpush.bf16.msrb.mxu1 %v9762_v7  ;;  %v12955_v3 = vld [vmem:[%s16685_s2 + $0x38c] sm:$0xf0] }
  0x92   : > { %v9833_v4 = vor.u32 %v12955_v3, %v9832_v1  ;;  %v12959_v3 = vld [vmem:[%s16685_s2 + $0x3ac] sm:$0xf0] }
  0x93   : > { %1588 = vmatpush.bf16.msrb.mxu2 %v9766_v8  ;;  %1771 = vmatpush.bf16.msrb.mxu3 %v9881_v12  ;;  %v1712_v8 = vunpack.c.h.b16 %v14712_v23  ;;  %v1737_v12 = vpack.c.b16 %v1713_v9, %v1713_v9  ;;  %v12972_v23 = vld [vmem:[%s16685_s2 + $0x418] sm:$0xf] }
  0x94   : > { %9427 = vmatmul.msk.bf16.gmra.mxu0 %vm595_vm2, %v14327_v15  ;;  %9430 = vmatmul.msk.bf16.gmra.mxu1 %vm595_vm2, %v14327_v15  ;;  %v9909_v21 = vor.u32 %v12972_v23, %v9906_v16 }
  0x95   : > { %1543 = vmatpush.bf16.msrb.mxu0 %v9746_v20  ;;  %1566 = vmatpush.bf16.msrb.mxu1 %v9750_v25  ;;  %v1736_v11 = vpack.c.b16 %v1712_v8, %v1712_v8  ;;  %v1766_v14 = vsel %vm605_vm0, %v1737_v12, 0  ;;  %v9840_v8 = vld [vmem:[%s16685_s2 + $0x38c] sm:$0xf] }
  0x96   : > { %9547 = vmatmul.msk.bf16.gmra.mxu2 %vm595_vm2, %v14681_v10  ;;  %9550 = vmatmul.msk.bf16.gmra.mxu3 %vm595_vm2, %v14681_v10 }
  0x97   : > { %1589 = vmatpush.bf16.msrb.mxu2 %v9754_v26  ;;  %1772 = vmatpush.bf16.msrb.mxu3 %v9869_v30  ;;  %v9894_v30 = vld [vmem:[%s16685_s2 + $0x408] sm:$0xf0] }
  0x99   : > { %1567 = vmatpush.bf16.msrb.mxu1 %v9738_v2 }
  0x9b   : > { %1590 = vmatpush.bf16.msrb.mxu2 %v9742_v38  ;;  %1773 = vmatpush.bf16.msrb.mxu3 %v9857_v42 }
  0x9d   : > { %1568 = vmatpush.bf16.msrb.mxu1 %v9726_v47  ;;  %v9873_v47 = vor.u32 %v12963_v44, %v9870_v45 }
  0x9f   : > { %1591 = vmatpush.bf16.msrb.mxu2 %v9730_v51  ;;  %1774 = vmatpush.bf16.msrb.mxu3 %v9845_v53  ;;  %v9858_v51 = vld [vmem:[%s16685_s2 + $0x3c0] sm:$0xf0] }
  0xa0   : > { %v9861_v54 = vor.u32 %v12960_v50, %v9858_v51  ;;  %v13950_v50 = vmov 0  }
  0xa1   : > { %1569 = vmatpush.bf16.msrb.mxu1 %v9714_v62  ;;  %v9846_v62 = vld [vmem:[%s16685_s2 + $0x3a8] sm:$0xf0]  ;;  %13768 = vset.pattern.permute.xlu0 %v13950_v50 }
  0xa2   : > { %v9849_v1 = vor.u32 %v12957_v61, %v9846_v62  ;;  %13769 = vset.pattern.permute.xlu1 %v13950_v50 }
  0xa3   : > { %1592 = vmatpush.bf16.msrb.mxu2 %v9718_v0  ;;  %1775 = vmatpush.bf16.msrb.mxu3 %v9833_v4  ;;  %v9852_v0 = vld [vmem:[%s16685_s2 + $0x3a4] sm:$0xf] }
  0xa4   : > { %9551 = vmatmul.msk.bf16.vlgmr.msra.gmra.mxu0 %vm595_vm2, %v14580_v28  ;;  %9698 = vmatmul.msk.bf16.vlgmr.msra.gmra.mxu1 %vm595_vm2, %v14290_v63  ;;  %v9853_v4 = vor.u32 %v12959_v3, %v9852_v0 }
  0xa5   : > { %1814 = vmatpush.bf16.msra.mxu1 %v1766_v14 }
  0xa6   : > { %9701 = vmatmul.msk.bf16.vlgmr.msra.gmra.mxu2 %vm595_vm2, %v14290_v63  ;;  %9704 = vmatmul.msk.bf16.vlgmr.msra.gmra.mxu3 %vm595_vm2, %v14290_v63  ;;  %v12919_v63 = vld [vmem:[%s16685_s2 + $0x254] sm:$0xf0] }
  0xa7   : > { %v9734_v34 = vor.u32 %v12919_v63, %v9733_v31  ;;  %v9900_v31 = vld [vmem:[%s16685_s2 + $0x404] sm:$0xf]  ;;  %v9897_v63 = vor.u32 %v12969_v29, %v9894_v30 }
  0xa9   : > { %1544 = vmatpush.bf16.msrb.mxu0 %v9734_v34  ;;  %1815 = vmatpush.bf16.msra.mxu1 %v9913_v27  ;;  %v9901_v34 = vor.u32 %v12971_v32, %v9900_v31 }
  0xad   : > { %1545 = vmatpush.bf16.msrb.mxu0 %v9722_v46  ;;  %1816 = vmatpush.bf16.msra.mxu1 %v9901_v34  ;;  %v9876_v46 = vld [vmem:[%s16685_s2 + $0x3d4] sm:$0xf] }
  0xae   : > { %v9877_v49 = vor.u32 %v12965_v48, %v9876_v46 }
  0xb1   : > { %1546 = vmatpush.bf16.msrb.mxu0 %v9710_v58  ;;  %1817 = vmatpush.bf16.msra.mxu1 %v9889_v43 }
  0xb4   : > { %9552 = vmatmul.msk.bf16.gmra.mxu0 %vm595_vm2, %v14693_v19  ;;  %9699 = vmatmul.msk.bf16.gmra.mxu1 %vm595_vm2, %v14408_v56 }
  0xb5   : > { %1818 = vmatpush.bf16.msra.mxu1 %v9877_v49 }
  0xb6   : > { %9702 = vmatmul.msk.bf16.gmra.mxu2 %vm595_vm2, %v14408_v56  ;;  %9705 = vmatmul.msk.bf16.gmra.mxu3 %vm595_vm2, %v14408_v56  ;;  %v1763_v56 = vsel %vm605_vm0, %v1736_v11, 0 }
  0xb7   : > { %1791 = vmatpush.bf16.msra.mxu0 %v1763_v56  ;;  %v12956_v56 = vld [vmem:[%s16685_s2 + $0x394] sm:$0xf0] }
  0xb8   : > { %v9841_v16 = vor.u32 %v12956_v56, %v9840_v8 }
  0xb9   : > { %1819 = vmatpush.bf16.msra.mxu1 %v9865_v60 }
  0xbb   : > { %1792 = vmatpush.bf16.msra.mxu0 %v9909_v21 }
  0xbd   : > { %1820 = vmatpush.bf16.msra.mxu1 %v9853_v4 }
  0xbf   : > { %1793 = vmatpush.bf16.msra.mxu0 %v9897_v63 }
  0xc1   : > { %v624_v6 = vpop.f32.mrf.mxu0  ;;  %v14914_v7 = vpop.f32.mrf.mxu1  ;;  %1821 = vmatpush.bf16.msra.mxu1 %v9841_v16  ;;  %v2570_v16 = vld [vmem:[%s16684_s1 + $0x8] sm:$0xff] }
  0xc3   : > { %1794 = vmatpush.bf16.msra.mxu0 %v9885_v39 }
  0xc4   : > { %9553 = vmatmul.msk.bf16.gmra.mxu0 %vm595_vm2, %v14681_v10  ;;  %9700 = vmatmul.msk.bf16.gmra.mxu1 %vm595_vm2, %v14480_v33 }
  0xc6   : > { %9703 = vmatmul.msk.bf16.gmra.mxu2 %vm595_vm2, %v14480_v33  ;;  %9706 = vmatmul.msk.bf16.gmra.mxu3 %vm595_vm2, %v14480_v33 }
  0xc7   : > { %1795 = vmatpush.bf16.msra.mxu0 %v9873_v47 }
  0xc9   : > { %v14936_v20 = vpop.f32.mrf.mxu2  ;;  %v828_v33 = vpop.f32.mrf.mxu3 }
  0xca   : > { %v14941_v24 = vadd.f32 %v828_v33, %v624_v6  ;;  %v14943_v25 = vpop.f32.mrf.mxu0  ;;  %v14945_v26 = vpop.f32.mrf.mxu1  ;;  %v9834_v6 = vld [vmem:[%s16685_s2 + $0x390] sm:$0xf0] }
  0xcb   : > { %1796 = vmatpush.bf16.msra.mxu0 %v9861_v54  ;;  %v9837_v12 = vor.u32 %v12954_v5, %v9834_v6 }
  0xcf   : > { %1797 = vmatpush.bf16.msra.mxu0 %v9849_v1 }
  0xd1   : > { %v14968_v2 = vpop.f32.mrf.mxu2  ;;  %v14970_v38 = vpop.f32.mrf.mxu3 }
  0xd2   : > { %v629_v41 = vpop.f32.mrf.mxu0  ;;  %v14975_v42 = vpop.f32.mrf.mxu1 }
  0xd3   : > { %1798 = vmatpush.bf16.msra.mxu0 %v9837_v12 }
  0xd4   : > { %9791 = vmatmul.msk.bf16.vlgmr.msrb.gmra.mxu0 %vm595_vm2, %v14213_v13  ;;  %9794 = vmatmul.msk.bf16.vlgmr.msrb.gmra.mxu1 %vm595_vm2, %v14213_v13 }
  0xd6   : > { %9797 = vmatmul.msk.bf16.vlgmr.msrb.gmra.mxu2 %vm595_vm2, %v14213_v13  ;;  %9914 = vmatmul.msk.bf16.vlgmr.msrb.gmra.mxu3 %vm595_vm2, %v14580_v28 }
  0xd9   : > { %v675_v53 = vpop.f32.mrf.mxu2  ;;  %v833_v13 = vpop.f32.mrf.mxu3 }
  0xda   : > { %v834_v57 = vadd.f32 %v833_v13, %v629_v41  ;;  %v15009_v58 = vpop.f32.mrf.mxu0  ;;  %v15011_v59 = vpop.f32.mrf.mxu1 }
  0xe1   : > { %v15034_v9 = vpop.f32.mrf.mxu2  ;;  %v15036_v11 = vpop.f32.mrf.mxu3 }
  0xe2   : > { %v634_v14 = vpop.f32.mrf.mxu0  ;;  %v657_v23 = vpop.f32.mrf.mxu1 }
  0xe4   : > { %9792 = vmatmul.msk.bf16.gmra.mxu0 %vm595_vm2, %v14221_v18  ;;  %9795 = vmatmul.msk.bf16.gmra.mxu1 %vm595_vm2, %v14221_v18 }
  0xe6   : > { %9798 = vmatmul.msk.bf16.gmra.mxu2 %vm595_vm2, %v14221_v18  ;;  %9915 = vmatmul.msk.bf16.gmra.mxu3 %vm595_vm2, %v14693_v19 }
  0xe9   : > { %v680_v17 = vpop.f32.mrf.mxu2  ;;  %v838_v33 = vpop.f32.mrf.mxu3 }
  0xea   : > { %v839_v21 = vadd.f32 %v838_v33, %v634_v14  ;;  %v636_v22 = vpop.f32.mrf.mxu0  ;;  %v659_v27 = vpop.f32.mrf.mxu1 }
  0xf1   : > { %v682_v29 = vpop.f32.mrf.mxu2  ;;  %v840_v30 = vpop.f32.mrf.mxu3 }
  0xf2   : > { %v851_v31 = vpop.f32.mrf.mxu0  ;;  %v874_v63 = vpop.f32.mrf.mxu1 }
  0xf3   : > { %v852_v32 = vadd.f32 %v851_v31, %v14914_v7  ;;  %v875_v34 = vadd.f32 %v874_v63, %v14936_v20 }
  0xf4   : > { %9793 = vmatmul.msk.bf16.gmra.mxu0 %vm595_vm2, %v14327_v15  ;;  %9796 = vmatmul.msk.bf16.gmra.mxu1 %vm595_vm2, %v14327_v15 }
  0xf6   : > { %9799 = vmatmul.msk.bf16.gmra.mxu2 %vm595_vm2, %v14327_v15  ;;  %9916 = vmatmul.msk.bf16.gmra.mxu3 %vm595_vm2, %v14681_v10 }
  0xf9   : > { %v1075_v18 = vpop.f32.mrf.mxu2  ;;  %v1098_v35 = vpop.f32.mrf.mxu3 }
  0xfa   : > { %v15060_v36 = vadd.f32 %v1075_v18, %v14941_v24  ;;  %v15062_v7 = vadd.f32 %v1098_v35, %v852_v32  ;;  %v15064_v20 = vpop.f32.mrf.mxu0  ;;  %v15066_v37 = vpop.f32.mrf.mxu1 }
 0x101   : > { %v15068_v39 = vpop.f32.mrf.mxu2  ;;  %v15070_v40 = vpop.f32.mrf.mxu3 }
 0x102   : > { %v856_v41 = vpop.f32.mrf.mxu0  ;;  %v879_v15 = vpop.f32.mrf.mxu1 }
 0x103   : > { %v857_v43 = vadd.f32 %v856_v41, %v14975_v42  ;;  %v880_v44 = vadd.f32 %v879_v15, %v675_v53 }
 0x104   : > { %9917 = vmatmul.msk.bf16.vlgmr.msra.gmra.mxu0 %vm595_vm2, %v14580_v28  ;;  %9920 = vmatmul.msk.bf16.vlgmr.msra.gmra.mxu1 %vm595_vm2, %v14580_v28  ;;  %v2569_v28 = vld [vmem:[%s16684_s1] sm:$0xff] }
 0x105   : > { %2574 = vperm.xlu0 %13768, %v2569_v28  }
 0x109   : > { %v1080_v24 = vpop.f32.mrf.mxu2  ;;  %v1103_v45 = vpop.f32.mrf.mxu3 }
 0x10a   : > { %v15077_v46 = vadd.f32 %v1080_v24, %v834_v57  ;;  %v15079_v47 = vadd.f32 %v1103_v45, %v857_v43  ;;  %v15081_v48 = vpop.f32.mrf.mxu0  ;;  %v15083_v49 = vpop.f32.mrf.mxu1  ;;  %v2571_v24 = vld [vmem:[%s16684_s1 + $0x10] sm:$0x3] }
 0x10b   : > { %2582 = vperm.xlu1 %13769, %v2571_v24  }
 0x10d   : > { %2578 = vperm.xlu0 %13768, %v2570_v16  }
 0x111   : > { %v15085_v42 = vpop.f32.mrf.mxu2  ;;  %v15087_v51 = vpop.f32.mrf.mxu3 }
 0x112   : > { %16752 = vst [vmem:[#allocation13_spill] sm:$0xff] %v15085_v42  ;;  %v861_v52 = vpop.f32.mrf.mxu0  ;;  %v884_v53 = vpop.f32.mrf.mxu1 }
 0x113   : > { %v862_v13 = vadd.f32 %v861_v52, %v657_v23  ;;  %v885_v54 = vadd.f32 %v884_v53, %v680_v17 }
 0x114   : > { %9918 = vmatmul.msk.bf16.gmra.mxu0 %vm595_vm2, %v14693_v19  ;;  %9921 = vmatmul.msk.bf16.gmra.mxu1 %vm595_vm2, %v14693_v19 }
 0x119   : > { %v1085_v55 = vpop.f32.mrf.mxu2  ;;  %v1108_v57 = vpop.f32.mrf.mxu3 }
 0x11a   : > { %v15096_v60 = vadd.f32 %v1085_v55, %v839_v21  ;;  %v15098_v61 = vadd.f32 %v1108_v57, %v862_v13  ;;  %v863_v62 = vpop.f32.mrf.mxu0  ;;  %v886_v0 = vpop.f32.mrf.mxu1 }
 0x11c   : > { %16753 = vst [vmem:[#allocation14_spill] sm:$0xff] %v15098_v61 }
 0x121   : > { %v1087_v1 = vpop.f32.mrf.mxu2  ;;  %v1110_v3 = vpop.f32.mrf.mxu3 }
 0x122   : > { %v1121_v4 = vpop.f32.mrf.mxu0  ;;  %v1350_v5 = vpop.f32.mrf.mxu1 }
 0x123   : > { %v15100_v6 = vadd.f32 %v1121_v4, %v875_v34 }
 0x124   : > { %9919 = vmatmul.msk.bf16.gmra.mxu0 %vm595_vm2, %v14681_v10  ;;  %9922 = vmatmul.msk.bf16.gmra.mxu1 %vm595_vm2, %v14681_v10  ;;  %vm2910_vm2 = vcmask 1047559  }
 0x129   : > { %v1373_v19 = vpop.f32.mrf.mxu2  ;;  %v1396_v8 = vpop.f32.mrf.mxu3 }
 0x12a   : > { %v15106_v12 = vpop.f32.mrf.mxu0  ;;  %v15108_v56 = vpop.f32.mrf.mxu1 }
 0x131   : > { %v15110_v14 = vpop.f32.mrf.mxu2  ;;  %v15112_v23 = vpop.f32.mrf.mxu3 }
 0x132   : > { %v1126_v17 = vpop.f32.mrf.mxu0  ;;  %v1355_v33 = vpop.f32.mrf.mxu1 }
 0x133   : > { %v15117_v21 = vadd.f32 %v1126_v17, %v880_v44 }
 0x139   : > { %v1378_v10 = vpop.f32.mrf.mxu2  ;;  %v15119_v22 = vpop.f32.mrf.mxu3 }
 0x13a   : > { %v15121_v27 = vpop.f32.mrf.mxu0  ;;  %v15123_v29 = vpop.f32.mrf.mxu1 }
 0x13b   : > { %16754 = vst [vmem:[#allocation15_spill] sm:$0xff] %v15121_v27 }
 0x141   : > { %v15125_v30 = vpop.f32.mrf.mxu2  ;;  %v15127_v31 = vpop.f32.mrf.mxu3 }
 0x142   : > { %v1131_v63 = vpop.f32.mrf.mxu0  ;;  %v1360_v32 = vpop.f32.mrf.mxu1 }
 0x143   : > { %v15129_v34 = vadd.f32 %v1131_v63, %v885_v54 }
 0x145   : > { %16755 = vst [vmem:[#allocation16_spill] sm:$0xff] %v15129_v34 }
 0x149   : > { %v1383_v18 = vpop.f32.mrf.mxu2  ;;  %v1406_v35 = vpop.f32.mrf.mxu3 }
 0x14a   : > { %v1133_v41 = vpop.f32.mrf.mxu0  ;;  %v1362_v15 = vpop.f32.mrf.mxu1 }
 0x151   : > { %v1385_v43 = vpop.f32.mrf.mxu2  ;;  %v1408_v44 = vpop.f32.mrf.mxu3 }
 0x152   : > { %v1548_v45 = vpop.f32.mrf.mxu0  ;;  %v1571_v50 = vpop.f32.mrf.mxu1 }
 0x153   : > { %v1549_v28 = vadd.f32 %v1548_v45, %v1350_v5 }
 0x159   : > { %v1594_v52 = vpop.f32.mrf.mxu2  ;;  %v1777_v53 = vpop.f32.mrf.mxu3 }
 0x15a   : > { %v1837_v13 = vadd.f32 %v1777_v53, %v1549_v28  ;;  %v1550_v55 = vpop.f32.mrf.mxu0  ;;  %v1573_v54 = vpop.f32.mrf.mxu1 }
 0x15c   : > { %v1852_v57 = vmax.f32 %v15060_v36, %v1837_v13 }
 0x161   : > { %v1596_v62 = vpop.f32.mrf.mxu2  ;;  %v1779_v0 = vpop.f32.mrf.mxu3 }
 0x162   : > { %v1553_v1 = vpop.f32.mrf.mxu0  ;;  %v1576_v3 = vpop.f32.mrf.mxu1 }
 0x163   : > { %v1554_v4 = vadd.f32 %v1553_v1, %v1355_v33  ;;  %v15135_v16 = vadd.f32 %v1576_v3, %v1378_v10 }
 0x169   : > { %v15137_v17 = vpop.f32.mrf.mxu2  ;;  %v1782_v63 = vpop.f32.mrf.mxu3 }
 0x16a   : > { %v1843_v41 = vadd.f32 %v1782_v63, %v1554_v4  ;;  %v15139_v15 = vpop.f32.mrf.mxu0  ;;  %v15141_v5 = vpop.f32.mrf.mxu1 }
 0x16c   : > { %v15144_v43 = vmax.f32 %v15077_v46, %v1843_v41  ;;  %v1572_v46 = vadd.f32 %v1571_v50, %v1373_v19  ;;  %v1595_v41 = vadd.f32 %v1594_v52, %v1396_v8 }
 0x171   : > { %v15146_v44 = vpop.f32.mrf.mxu2  ;;  %v15148_v36 = vpop.f32.mrf.mxu3 }
 0x172   : > { %16756 = vst [vmem:[#allocation17_spill] sm:$0xff] %v15148_v36  ;;  %v1558_v24 = vpop.f32.mrf.mxu0  ;;  %v1581_v45 = vpop.f32.mrf.mxu1 }
 0x173   : > { %v1559_v33 = vadd.f32 %v1558_v24, %v1360_v32  ;;  %v15150_v10 = vadd.f32 %v1581_v45, %v1383_v18  ;;  %v831_v18 = vadd.f32 %v14970_v38, %v14943_v25  ;;  %v1551_v25 = vadd.f32 %v1550_v55, %v15108_v56 }
 0x174   : > { %v1574_v38 = vadd.f32 %v1573_v54, %v15110_v14 }
 0x175   : > { %v1138_v54 = vadd.f32 %v15068_v39, %v831_v18  ;;  %v1600_v39 = vadd.f32 %v15137_v17, %v15119_v22  ;;  %v836_v17 = vadd.f32 %v15036_v11, %v15009_v58 }
 0x179   : > { %v1604_v28 = vpop.f32.mrf.mxu2  ;;  %v1787_v53 = vpop.f32.mrf.mxu3 }
 0x17a   : > { %v15152_v13 = vadd.f32 %v1604_v28, %v1406_v35  ;;  %v1849_v1 = vadd.f32 %v1787_v53, %v1559_v33  ;;  %v1560_v3 = vpop.f32.mrf.mxu0  ;;  %v1583_v4 = vpop.f32.mrf.mxu1  ;;  %v854_v35 = vadd.f32 %v15064_v20, %v14945_v26  ;;  %v1597_v26 = vadd.f32 %v1596_v62, %v15112_v23 }
 0x17c   : > { %v15155_v63 = vmax.f32 %v15096_v60, %v1849_v1  ;;  %v1139_v23 = vadd.f32 %v15070_v40, %v854_v35 }
 0x181   : > { %v1606_v34 = vpop.f32.mrf.mxu2  ;;  %v1789_v61 = vpop.f32.mrf.mxu3 }
 0x182   : > { %v1800_v42 = vpop.f32.mrf.mxu0  ;;  %v1823_v27 = vpop.f32.mrf.mxu1  ;;  %v1840_v34 = vadd.f32 %v1779_v0, %v1551_v25 }
 0x183   : > { %v1838_v36 = vadd.f32 %v1800_v42, %v1572_v46  ;;  %v1839_v32 = vadd.f32 %v1823_v27, %v1595_v41  ;;  %v877_v42 = vadd.f32 %v15066_v37, %v14968_v2 }
 0x185   : > { %v1853_v24 = vmax.f32 %v15062_v7, %v1838_v36  ;;  %v1854_v45 = vmax.f32 %v15100_v6, %v1839_v32  ;;  %v1855_v36 = vmax.f32 %v1138_v54, %v1840_v34  ;;  %v16762_v54 = vld [vmem:[#allocation13_spill] sm:$0xff] }
 0x187   : > { %v1882_v60 = vrot.slane %v1853_v24, 6  ;;  %v1883_v61 = vrot.slane %v1854_v45, 4 }
 0x189   : > { %v1893_v7 = vsel %vm1892_vm4, %v1852_v57, %v1882_v60  ;;  %v1897_v20 = vsel %vm1896_vm5, %v1852_v57, %v1882_v60  ;;  %v1902_v6 = vsel %vm1901_vm6, %v1852_v57, %v1882_v60  ;;  %v1906_v19 = vsel %vm1905_vm7, %v1882_v60, %v1852_v57 }
 0x18a   : > { %v1895_v8 = vsel %vm1894_vm8, %v1893_v7, %v1883_v61  ;;  %v1899_v27 = vsel %vm1898_vm9, %v1897_v20, %v1883_v61  ;;  %v1903_v2 = vsel %vm1894_vm8, %v1883_v61, %v1902_v6  ;;  %v1907_v37 = vsel %vm1898_vm9, %v1883_v61, %v1906_v19  ;;  %v1802_v56 = vpop.f32.mrf.mxu0  ;;  %v1825_v14 = vpop.f32.mrf.mxu1  ;;  %v12990_v6 = vld [vmem:[#allocation4 + $0x74] sm:$0xf0] }
 0x18b   : > { %v1900_v50 = vrot.slane %v1899_v27, 2  ;;  %1947 = vst [vmem:[#allocation1] ss:$4 sm:$0xff] %v1895_v8  ;;  %v1841_v52 = vadd.f32 %v1802_v56, %v1574_v38  ;;  %v1842_v55 = vadd.f32 %v1825_v14, %v1597_v26  ;;  %v1140_v57 = vadd.f32 %v15106_v12, %v877_v42  ;;  %v16759_v8 = vld [vmem:[#allocation17_spill] sm:$0xff]  ;;  %v16760_v14 = vld [vmem:[#allocation15_spill] sm:$0xff] }
 0x18c   : > { %v1904_v41 = vrot.slane %v1903_v2, 4  ;;  %v1908_v32 = vrot.slane %v1907_v37, 6  ;;  %v859_v38 = vadd.f32 %v15081_v48, %v15011_v59  ;;  %v1556_v26 = vadd.f32 %v15139_v15, %v15123_v29  ;;  %v10119_v37 = vld [vmem:[#allocation4 + $0x60] sm:$0xf]  ;;  %v12988_v56 = vld [vmem:[#allocation4 + $0x64] sm:$0xf0] }
 0x18d   : > { %1952 = vst [vmem:[#allocation1 + $0x20] ss:$4 sm:$0xff] %v1900_v50  ;;  %v1856_v62 = vmax.f32 %v1139_v23, %v1841_v52  ;;  %v1857_v28 = vmax.f32 %v1140_v57, %v1842_v55  ;;  %v1579_v20 = vadd.f32 %v15141_v5, %v15125_v30  ;;  %v1144_v57 = vadd.f32 %v16762_v54, %v836_v17  ;;  %v2453_v54 = vld [vmem:[#allocation2] sm:$0x7] }
 0x18e   : > { %v1145_v19 = vadd.f32 %v15087_v51, %v859_v38 }
 0x18f   : > { %v1884_v33 = vrot.slane %v1856_v62, 6  ;;  %v1885_v35 = vrot.slane %v1857_v28, 4 }
 0x191   : > { %v1909_v53 = vsel %vm1892_vm4, %v1855_v36, %v1884_v33  ;;  %v1911_v1 = vsel %vm1896_vm5, %v1855_v36, %v1884_v33  ;;  %v15182_v40 = vsel %vm1901_vm6, %v1855_v36, %v1884_v33  ;;  %v15185_v0 = vsel %vm1905_vm7, %v1884_v33, %v1855_v36 }
 0x192   : > { %v15189_v3 = vld.sshfl [vmem:[#allocation1] sm:$0xff pattern:$0x73625140]  ;;  %v15191_v12 = vld.sshfl [vmem:[#allocation1 + $0x8] sm:$0xff pattern:$0x73625140]  ;;  %v1805_v4 = vpop.f32.mrf.mxu0  ;;  %v1828_v46 = vpop.f32.mrf.mxu1  ;;  %v1912_v58 = vsel %vm1898_vm9, %v1911_v1, %v1885_v35  ;;  %v1910_v1 = vsel %vm1894_vm8, %v1909_v53, %v1885_v35 }
 0x193   : > { %v15193_v18 = vld.sshfl [vmem:[#allocation1 + $0x10] sm:$0xff pattern:$0x73625140]  ;;  %v1844_v24 = vadd.f32 %v1805_v4, %v15135_v16  ;;  %v1845_v61 = vadd.f32 %v1828_v46, %v1600_v39  ;;  %v882_v16 = vadd.f32 %v15083_v49, %v15034_v9  ;;  %v1913_v27 = vrot.slane %v1912_v58, 2 }
 0x194   : > { %v15196_v45 = vld.sshfl [vmem:[#allocation1 + $0x20] sm:$0xff pattern:$0x73625140]  ;;  %v15198_v60 = vld.sshfl [vmem:[#allocation1 + $0x28] sm:$0xff pattern:$0x73625140]  ;;  %v10120_v4 = vor.u32 %v12988_v56, %v10119_v37 }
 0x195   : > { %16757 = vst [vmem:[#allocation18_spill] sm:$0xff] %v15196_v45  ;;  %v15200_v42 = vld.sshfl [vmem:[#allocation1 + $0x30] sm:$0xff pattern:$0x73625140]  ;;  %v1859_v22 = vmax.f32 %v15079_v47, %v1844_v24  ;;  %v1860_v25 = vmax.f32 %v15117_v21, %v1845_v61  ;;  %v1602_v47 = vadd.f32 %v15146_v44, %v15127_v31  ;;  %v10127_v44 = vld [vmem:[#allocation4 + $0x70] sm:$0xf]  ;;  %v1146_v23 = vadd.f32 %v16760_v14, %v882_v16 }
 0x196   : > { %16758 = vst [vmem:[#allocation19_spill] sm:$0xff] %v15198_v60  ;;  %v10128_v55 = vor.u32 %v12990_v6, %v10127_v44  ;;  %v1918_v24 = vsel %vm1898_vm9, %v1885_v35, %v15185_v0  ;;  %v10103_v44 = vld [vmem:[#allocation4 + $0x40] sm:$0xf]  ;;  %v13030_v45 = vld [vmem:[#allocation4 + $0x1b4] sm:$0xf0] }
 0x197   : > { %1956 = vst [vmem:[#allocation1] ss:$4 sm:$0xff] %v1904_v41  ;;  %v1886_v7 = vrot.slane %v1859_v22, 6  ;;  %v1887_v11 = vrot.slane %v1860_v25, 4 }
 0x198   : > { %1960 = vst [vmem:[#allocation1 + $0x20] ss:$4 sm:$0xff] %v1908_v32  ;;  %3533 = vmatpush.bf16.msrb.mxu1 %v10128_v55  ;;  %v1915_v32 = vsel %vm1894_vm8, %v1885_v35, %v15182_v40 }
 0x199   : > { %v1920_v21 = vsel %vm1892_vm4, %v15144_v43, %v1886_v7  ;;  %v1922_v59 = vsel %vm1896_vm5, %v15144_v43, %v1886_v7  ;;  %v1925_v9 = vsel %vm1901_vm6, %v15144_v43, %v1886_v7  ;;  %v1928_v48 = vsel %vm1905_vm7, %v1886_v7, %v15144_v43  ;;  %v10111_v7 = vld [vmem:[#allocation4 + $0x50] sm:$0xf] }
 0x19a   : > { %v15226_v49 = vsel %vm1894_vm8, %v1920_v21, %v1887_v11  ;;  %v15229_v29 = vsel %vm1898_vm9, %v1922_v59, %v1887_v11  ;;  %v15232_v30 = vsel %vm1894_vm8, %v1887_v11, %v1925_v9  ;;  %v15235_v31 = vsel %vm1898_vm9, %v1887_v11, %v1928_v48  ;;  %v1807_v15 = vpop.f32.mrf.mxu0  ;;  %v1830_v5 = vpop.f32.mrf.mxu1  ;;  %v13041_v21 = vld [vmem:[#allocation4 + $0x214] sm:$0xf]  ;;  %v10047_v59 = vld [vmem:[#allocation4 + $0x218] sm:$0xf0] }
 0x19b   : > { %v1846_v43 = vadd.f32 %v16759_v8, %v1556_v26  ;;  %v1847_v2 = vadd.f32 %v1807_v15, %v1579_v20  ;;  %v1848_v52 = vadd.f32 %v1830_v5, %v1602_v47  ;;  %v1916_v16 = vrot.slane %v1915_v32, 4  ;;  %v12986_v20 = vld [vmem:[#allocation4 + $0x54] sm:$0xf0]  ;;  %v16765_v9 = vld [vmem:[#allocation14_spill] sm:$0xff] }
 0x19c   : > { %3534 = vmatpush.bf16.msrb.mxu1 %v10120_v4  ;;  %v1919_v47 = vrot.slane %v1918_v24, 6  ;;  %v2074_v11 = vsel %vm1892_vm4, %v15189_v3, -inf  ;;  %v2081_v15 = vsel %vm1892_vm4, %v15191_v12, -inf  ;;  %v2089_v5 = vsel %vm2088_vm10, %v15193_v18, -inf  ;;  %v15302_v4 = vpop.permute.xlu0 %2574 }
 0x19d   : > { %v1862_v51 = vmax.f32 %v1145_v19, %v1847_v2  ;;  %v1863_v39 = vmax.f32 %v1146_v23, %v1848_v52  ;;  %v1861_v46 = vmax.f32 %v1144_v57, %v1846_v43  ;;  %v10112_v43 = vor.u32 %v12986_v20, %v10111_v7  ;;  %v10095_v2 = vld [vmem:[#allocation4 + $0x30] sm:$0xf]  ;;  %v12982_v52 = vld [vmem:[#allocation4 + $0x34] sm:$0xf0]  ;;  %16771 = vst [vmem:[#allocation22_spill] sm:$0xff] %v15302_v4 }
 0x19e   : > { %v15240_v34 = vld.sshfl [vmem:[#allocation1] sm:$0xff pattern:$0x73625140]  ;;  %v15242_v50 = vld.sshfl [vmem:[#allocation1 + $0x8] sm:$0xff pattern:$0x73625140]  ;;  %v10050_v37 = vor.u32 %v13041_v21, %v10047_v59 }
 0x19f   : > { %16761 = vst [vmem:[#allocation17_spill] sm:$0xff] %v15240_v34  ;;  %v15245_v62 = vld.sshfl [vmem:[#allocation1 + $0x10] sm:$0xff pattern:$0x73625140]  ;;  %v1888_v41 = vrot.slane %v1862_v51, 6  ;;  %v15258_v61 = vrot.slane %v1863_v39, 4 }
 0x1a0   : > { %v15247_v36 = vld.sshfl [vmem:[#allocation1 + $0x20] sm:$0xff pattern:$0x73625140]  ;;  %v15249_v33 = vld.sshfl [vmem:[#allocation1 + $0x28] sm:$0xff pattern:$0x73625140]  ;;  %3535 = vmatpush.bf16.msrb.mxu1 %v10112_v43  ;;  %3227 = vmatpush.bf16.msrb.mxu0 %v10050_v37 }
 0x1a1   : > { %16763 = vst [vmem:[#allocation15_spill] sm:$0xff] %v15247_v36  ;;  %v15251_v28 = vld.sshfl [vmem:[#allocation1 + $0x30] sm:$0xff pattern:$0x73625140]  ;;  %v15261_v22 = vsel %vm1892_vm4, %v1861_v46, %v1888_v41  ;;  %v15264_v53 = vsel %vm1896_vm5, %v1861_v46, %v1888_v41  ;;  %v1936_v17 = vsel %vm1901_vm6, %v1861_v46, %v1888_v41  ;;  %v1939_v25 = vsel %vm1905_vm7, %v1888_v41, %v1861_v46 }
 0x1a2   : > { %16764 = vst [vmem:[#allocation13_spill] sm:$0xff] %v15249_v33  ;;  %v15270_v38 = vsel %vm1894_vm8, %v15258_v61, %v1936_v17  ;;  %v15274_v40 = vsel %vm1898_vm9, %v15258_v61, %v1939_v25  ;;  %v1810_v0 = vpop.f32.mrf.mxu0  ;;  %v1833_v35 = vpop.f32.mrf.mxu1  ;;  %v2075_v55 = vrot.slane %v2074_v11, 4  ;;  %v2082_v46 = vrot.slane %v2081_v15, 4 }
 0x1a3   : > { %1964 = vst [vmem:[#allocation1] ss:$4 sm:$0xff] %v1910_v1  ;;  %v1850_v26 = vadd.f32 %v1810_v0, %v15150_v10  ;;  %v1851_v58 = vadd.f32 %v1833_v35, %v15152_v13  ;;  %v12984_v10 = vld [vmem:[#allocation4 + $0x44] sm:$0xf0]  ;;  %v16768_v13 = vld [vmem:[#allocation16_spill] sm:$0xff]  ;;  %v2090_v41 = vrot.slane %v2089_v5, 4  ;;  %v10096_v25 = vor.u32 %v12982_v52, %v10095_v2 }
 0x1a4   : > { %1968 = vst [vmem:[#allocation1 + $0x20] ss:$4 sm:$0xff] %v1913_v27  ;;  %v10104_v18 = vor.u32 %v12984_v10, %v10103_v44  ;;  %v2124_v17 = vsel %vm1892_vm4, %v15242_v50, -inf  ;;  %v15312_v0 = vperm.slane %v2453_v54, 0  ;;  %v2076_v35 = vmax.f32 %v2074_v11, %v2075_v55  ;;  %v10045_v10 = vld [vmem:[#allocation4 + $0x210] sm:$0xf] }
 0x1a5   : > { %v1865_v48 = vmax.f32 %v16765_v9, %v1850_v26  ;;  %v1866_v8 = vmax.f32 %v16768_v13, %v1851_v58  ;;  %v15319_v26 = vrot.slane %v15302_v4, 1  ;;  %v1924_v7 = vrot.slane %v15229_v29, 2  ;;  %v10039_v52 = vld [vmem:[#allocation4 + $0x208] sm:$0xf0]  ;;  %v10037_v55 = vld [vmem:[#allocation4 + $0x200] sm:$0xf] }
 0x1a6   : > { %3536 = vmatpush.bf16.msrb.mxu1 %v10104_v18  ;;  %v1927_v20 = vrot.slane %v15232_v30, 4  ;;  %v15325_v50 = vsel %vm2088_vm10, %v15200_v42, -inf  ;;  %v2083_v11 = vmax.f32 %v2081_v15, %v2082_v46  ;;  %v2091_v59 = vmax.f32 %v2089_v5, %v2090_v41  ;;  %v13042_v15 = vld [vmem:[#allocation4 + $0x214] sm:$0xf0] }
 0x1a7   : > { %v1890_v14 = vrot.slane %v1865_v48, 6  ;;  %v1891_v23 = vrot.slane %v1866_v8, 4  ;;  %16772 = vst [vmem:[#allocation23_spill] sm:$0xff] %v15319_v26  ;;  %v1930_v30 = vrot.slane %v15235_v31, 6  ;;  %v2077_v42 = vrot.slane %v2076_v35, 2 }
 0x1a8   : > { %v2084_v13 = vrot.slane %v2083_v11, 2  ;;  %v2092_v8 = vrot.slane %v2091_v59, 2  ;;  %v15344_v5 = vsel %vm1898_vm9, %v15264_v53, %v15258_v61  ;;  %v15347_v2 = vrot.slane %v15302_v4, 2  ;;  %v10087_v31 = vld [vmem:[#allocation4 + $0x20] sm:$0xf] }
 0x1a9   : > { %v1942_v1 = vsel %vm1892_vm4, %v15155_v63, %v1890_v14  ;;  %v1944_v39 = vsel %vm1896_vm5, %v15155_v63, %v1890_v14  ;;  %v15316_v63 = vperm.slane %v2453_v54, 2  ;;  %v15350_v37 = vrot.slane %v15302_v4, 3 }
 0x1aa   : > { %v15285_v6 = vld.sshfl [vmem:[#allocation1] sm:$0xff pattern:$0x73625140]  ;;  %v15287_v19 = vld.sshfl [vmem:[#allocation1 + $0x8] sm:$0xff pattern:$0x73625140]  ;;  %v1812_v57 = vpop.f32.mrf.mxu0  ;;  %v1835_v51 = vpop.f32.mrf.mxu1  ;;  %v15305_v32 = vsel %vm1894_vm8, %v1942_v1, %v1891_v23  ;;  %v15308_v24 = vsel %vm1898_vm9, %v1944_v39, %v1891_v23  ;;  %3537 = vmatpush.bf16.msrb.mxu1 %v10096_v25  ;;  %v10046_v18 = vor.u32 %v13042_v15, %v10045_v10  ;;  %v2085_v53 = vmax.f32 %v2083_v11, %v2084_v13 }
 0x1ab   : > { %16766 = vst [vmem:[#allocation14_spill] sm:$0xff] %v15285_v6  ;;  %v15290_v3 = vld.sshfl [vmem:[#allocation1 + $0x10] sm:$0xff pattern:$0x73625140]  ;;  %v10079_v51 = vld [vmem:[#allocation4 + $0x10] sm:$0xf]  ;;  %v15405_v6 = vpop.permute.xlu0 %2578 }
 0x1ac   : > { %16767 = vst [vmem:[#allocation20_spill] sm:$0xff] %v15287_v19  ;;  %v15292_v27 = vld.sshfl [vmem:[#allocation1 + $0x20] sm:$0xff pattern:$0x73625140]  ;;  %v13039_v23 = vld [vmem:[#allocation4 + $0x204] sm:$0xf]  ;;  %3185 = vmatpush.bf16.msra.mxu3 %v10046_v18 }
 0x1ad   : > { %16769 = vst [vmem:[#allocation16_spill] sm:$0xff] %v15292_v27  ;;  %v15294_v56 = vld.sshfl [vmem:[#allocation1 + $0x28] sm:$0xff pattern:$0x73625140]  ;;  %v13040_v57 = vld [vmem:[#allocation4 + $0x204] sm:$0xf0] }
 0x1ae   : > { %16770 = vst [vmem:[#allocation21_spill] sm:$0xff] %v15294_v56  ;;  %v15296_v12 = vld.sshfl [vmem:[#allocation1 + $0x30] sm:$0xff pattern:$0x73625140]  ;;  %v12978_v1 = vld [vmem:[#allocation4 + $0x14] sm:$0xf0]  ;;  %v10038_v46 = vor.u32 %v13040_v57, %v10037_v55 }
 0x1af   : > { %1972 = vst [vmem:[#allocation1] ss:$4 sm:$0xff] %v1916_v16  ;;  %v15314_v16 = vperm.slane %v2453_v54, 1  ;;  %v10042_v54 = vor.u32 %v13039_v23, %v10039_v52  ;;  %v10080_v41 = vor.u32 %v12978_v1, %v10079_v51  ;;  %v10031_v25 = vld [vmem:[#allocation4 + $0x1f8] sm:$0xf0]  ;;  %v2078_v23 = vmax.f32 %v2076_v35, %v2077_v42 }
 0x1b0   : > { %1976 = vst [vmem:[#allocation1 + $0x20] ss:$4 sm:$0xff] %v1919_v47  ;;  %v2125_v47 = vrot.slane %v2124_v17, 4  ;;  %v10029_v15 = vld [vmem:[#allocation4 + $0x1f0] sm:$0xf]  ;;  %3186 = vmatpush.bf16.msra.mxu3 %v10038_v46  ;;  %v2093_v1 = vmax.f32 %v2091_v59, %v2092_v8  ;;  %v15365_v13 = vrot.slane %v15302_v4, 4 }
 0x1b1   : > { %16777 = vst [vmem:[#allocation28_spill] sm:$0xff] %v15347_v2  ;;  %3228 = vmatpush.bf16.msrb.mxu0 %v10042_v54  ;;  %v2079_v11 = vrot.slane %v2078_v23, 1  ;;  %v2086_v46 = vrot.slane %v2085_v53, 1  ;;  %v12976_v8 = vld [vmem:[#allocation4 + $0x4] sm:$0xf0] }
 0x1b2   : > { %v2126_v43 = vmax.f32 %v2124_v17, %v2125_v47  ;;  %16778 = vst [vmem:[#allocation29_spill] sm:$0xff] %v15350_v37  ;;  %v13037_v17 = vld [vmem:[#allocation4 + $0x1f4] sm:$0xf]  ;;  %v13026_v19 = vld [vmem:[#allocation4 + $0x194] sm:$0xf0] }
 0x1b3   : > { %v10034_v10 = vor.u32 %v13037_v17, %v10031_v25  ;;  %16780 = vst [vmem:[#allocation31_spill] sm:$0xff] %v15365_v13  ;;  %v15368_v25 = vrot.slane %v15302_v4, 5  ;;  %v9991_v37 = vld [vmem:[#allocation4 + $0x1a8] sm:$0xf0] }
 0x1b4   : > { %v2127_v47 = vrot.slane %v2126_v43, 2  ;;  %16787 = vst [vmem:[#allocation37_spill] sm:$0xff] %v15405_v6 }
 0x1b5   : > { %3229 = vmatpush.bf16.msrb.mxu0 %v10034_v10  ;;  %16781 = vst [vmem:[#allocation32_spill] sm:$0xff] %v15368_v25 }
 0x1b6   : > { %v15327_v58 = vld.sshfl [vmem:[#allocation1] sm:$0xff pattern:$0x73625140]  ;;  %v15329_v21 = vld.sshfl [vmem:[#allocation1 + $0x8] sm:$0xff pattern:$0x73625140]  ;;  %v2128_v42 = vmax.f32 %v2126_v43, %v2127_v47 }
 0x1b7   : > { %16773 = vst [vmem:[#allocation24_spill] sm:$0xff] %v15327_v58  ;;  %v15331_v9 = vld.sshfl [vmem:[#allocation1 + $0x10] sm:$0xff pattern:$0x73625140]  ;;  %v10021_v43 = vld [vmem:[#allocation4 + $0x1e0] sm:$0xf] }
 0x1b8   : > { %16774 = vst [vmem:[#allocation25_spill] sm:$0xff] %v15329_v21  ;;  %v15333_v48 = vld.sshfl [vmem:[#allocation1 + $0x20] sm:$0xff pattern:$0x73625140]  ;;  %v13036_v47 = vld [vmem:[#allocation4 + $0x1e4] sm:$0xf0] }
 0x1b9   : > { %16775 = vst [vmem:[#allocation26_spill] sm:$0xff] %v15333_v48  ;;  %v15335_v44 = vld.sshfl [vmem:[#allocation1 + $0x28] sm:$0xff pattern:$0x73625140]  ;;  %v2129_v39 = vrot.slane %v2128_v42, 1  ;;  %v10022_v56 = vor.u32 %v13036_v47, %v10021_v43  ;;  %v2087_v48 = vmax.f32 %v2085_v53, %v2086_v46 }
 0x1ba   : > { %16776 = vst [vmem:[#allocation27_spill] sm:$0xff] %v15335_v44  ;;  %v15337_v29 = vld.sshfl [vmem:[#allocation1 + $0x30] sm:$0xff pattern:$0x73625140]  ;;  %v9981_v21 = vld [vmem:[#allocation4 + $0x190] sm:$0xf] }
 0x1bb   : > { %1980 = vst [vmem:[#allocation1] ss:$4 sm:$0xff] %v15226_v49  ;;  %v12980_v49 = vld [vmem:[#allocation4 + $0x24] sm:$0xf0]  ;;  %v9982_v60 = vor.u32 %v13026_v19, %v9981_v21  ;;  %v2130_v47 = vmax.f32 %v2128_v42, %v2129_v39  ;;  %v2111_v21 = vrot.slane %v15325_v50, 4 }
 0x1bc   : > { %1984 = vst [vmem:[#allocation1 + $0x20] ss:$4 sm:$0xff] %v1924_v7  ;;  %v10088_v14 = vor.u32 %v12980_v49, %v10087_v31  ;;  %v13038_v31 = vld [vmem:[#allocation4 + $0x1f4] sm:$0xf0]  ;;  %v2094_v7 = vrot.slane %v2093_v1, 1 }
 0x1bd   : > { %v10030_v51 = vor.u32 %v13038_v31, %v10029_v15  ;;  %v13035_v31 = vld [vmem:[#allocation4 + $0x1e4] sm:$0xf]  ;;  %3171 = vmatpush.bf16.msra.mxu2 %v9982_v60  ;;  %v15390_v60 = vadd.f32 %v15314_v16, %v2087_v48  ;;  %v15399_v48 = vadd.f32 %v15314_v16, %v2130_v47 }
 0x1be   : > { %3538 = vmatpush.bf16.msrb.mxu1 %v10088_v14  ;;  %v10071_v14 = vld [vmem:[#allocation4] sm:$0xf]  ;;  %v2095_v43 = vmax.f32 %v2093_v1, %v2094_v7  ;;  %v10185_v7 = vld [vmem:[#allocation4 + $0xe8] sm:$0xf0] }
 0x1bf   : > { %3187 = vmatpush.bf16.msra.mxu3 %v10030_v51  ;;  %v10072_v15 = vor.u32 %v12976_v8, %v10071_v14  ;;  %v13033_v51 = vld [vmem:[#allocation4 + $0x1d4] sm:$0xf]  ;;  %v10015_v14 = vld [vmem:[#allocation4 + $0x1d8] sm:$0xf0]  ;;  %v2080_v8 = vmax.f32 %v2078_v23, %v2079_v11 }
 0x1c2   : > { %v15355_v49 = vld.sshfl [vmem:[#allocation1 + $0x8] sm:$0xff pattern:$0x73625140]  ;;  %v1981_v52 = vld.sshfl [vmem:[#allocation1] sm:$0xff pattern:$0x73625140]  ;;  %3539 = vmatpush.bf16.msrb.mxu1 %v10080_v41 }
 0x1c3   : > { %16779 = vst [vmem:[#allocation30_spill] sm:$0xff] %v15355_v49  ;;  %v15357_v44 = vld.sshfl [vmem:[#allocation1 + $0x10] sm:$0xff pattern:$0x73625140]  ;;  %v2243_v54 = vsel %vm1892_vm4, %v1981_v52, -inf  ;;  %v15371_v49 = vrot.slane %v15302_v4, 6  ;;  %3188 = vmatpush.bf16.msra.mxu3 %v10022_v56 }
 0x1c4   : > { %v1985_v18 = vld.sshfl [vmem:[#allocation1 + $0x20] sm:$0xff pattern:$0x73625140]  ;;  %v1986_v55 = vld.sshfl [vmem:[#allocation1 + $0x28] sm:$0xff pattern:$0x73625140] }
 0x1c5   : > { %v15359_v57 = vld.sshfl [vmem:[#allocation1 + $0x30] sm:$0xff pattern:$0x73625140]  ;;  %1988 = vst [vmem:[#allocation1] ss:$4 sm:$0xff] %v1927_v20  ;;  %v2264_v17 = vsel %vm1892_vm4, %v1985_v18, -inf }
 0x1c6   : > { %v2271_v35 = vsel %vm1892_vm4, %v1986_v55, -inf  ;;  %1992 = vst [vmem:[#allocation1 + $0x20] ss:$4 sm:$0xff] %v1930_v30  ;;  %v2244_v41 = vrot.slane %v2243_v54, 4  ;;  %v2265_v59 = vrot.slane %v2264_v17, 4  ;;  %3540 = vmatpush.bf16.msrb.mxu1 %v10072_v15 }
 0x1c7   : > { %v2272_v20 = vrot.slane %v2271_v35, 4  ;;  %v10023_v52 = vld [vmem:[#allocation4 + $0x1e8] sm:$0xf0]  ;;  %v13005_v18 = vld [vmem:[#allocation4 + $0xf4] sm:$0xf]  ;;  %16782 = vst [vmem:[#allocation33_spill] sm:$0xff] %v15371_v49 }
 0x1c8   : > { %v10026_v10 = vor.u32 %v13035_v31, %v10023_v52  ;;  %v10193_v55 = vld [vmem:[#allocation4 + $0xf8] sm:$0xf0]  ;;  %v2245_v52 = vmax.f32 %v2243_v54, %v2244_v41  ;;  %v2266_v15 = vmax.f32 %v2264_v17, %v2265_v59  ;;  %v10013_v59 = vld [vmem:[#allocation4 + $0x1d0] sm:$0xf]  ;;  %v13020_v49 = vld [vmem:[#allocation4 + $0x164] sm:$0xf0] }
 0x1c9   : > { %v10196_v30 = vor.u32 %v13005_v18, %v10193_v55  ;;  %v2273_v18 = vmax.f32 %v2271_v35, %v2272_v20  ;;  %v1932_v55 = vsel %vm1894_vm8, %v15261_v22, %v15258_v61  ;;  %v16786_v35 = vrot.slane %v15344_v5, 2  ;;  %v13034_v20 = vld [vmem:[#allocation4 + $0x1d4] sm:$0xf0]  ;;  %v9973_v5 = vld [vmem:[#allocation4 + $0x180] sm:$0xf] }
 0x1ca   : > { %3230 = vmatpush.bf16.msrb.mxu0 %v10026_v10  ;;  %v10018_v10 = vor.u32 %v13033_v51, %v10015_v14  ;;  %v2246_v53 = vrot.slane %v2245_v52, 2  ;;  %v2461_v61 = vadd.f32 %v15312_v0, %v2080_v8  ;;  %v2267_v22 = vrot.slane %v2266_v15, 2  ;;  %v13024_v51 = vld [vmem:[#allocation4 + $0x184] sm:$0xf0]  ;;  %v13031_v14 = vld [vmem:[#allocation4 + $0x1c4] sm:$0xf] }
 0x1cb   : > { %3589 = vmatpush.bf16.msra.mxu1 %v10196_v30  ;;  %v2274_v39 = vrot.slane %v2273_v18, 2  ;;  %v15393_v30 = vadd.f32 %v15316_v63, %v2095_v43  ;;  %v15396_v8 = vmax.f32 %v15325_v50, %v2111_v21  ;;  %v2516_v43 = vmax.f32 %v15390_v60, 0.0 }
 0x1cc   : > { %v15373_v33 = vld.sshfl [vmem:[#allocation1] sm:$0xff pattern:$0x73625140]  ;;  %v15375_v31 = vld.sshfl [vmem:[#allocation1 + $0x8] sm:$0xff pattern:$0x73625140] }
 0x1cd   : > { %16783 = vst [vmem:[#allocation34_spill] sm:$0xff] %v15373_v33  ;;  %v15377_v58 = vld.sshfl [vmem:[#allocation1 + $0x10] sm:$0xff pattern:$0x73625140] }
 0x1ce   : > { %16784 = vst [vmem:[#allocation35_spill] sm:$0xff] %v15375_v31  ;;  %v1993_v27 = vld.sshfl [vmem:[#allocation1 + $0x20] sm:$0xff pattern:$0x73625140]  ;;  %3231 = vmatpush.bf16.msrb.mxu0 %v10018_v10 }
 0x1cf   : > { %16785 = vst [vmem:[#allocation36_spill] sm:$0xff] %v15377_v58  ;;  %v1994_v23 = vld.sshfl [vmem:[#allocation1 + $0x28] sm:$0xff pattern:$0x73625140]  ;;  %v2306_v19 = vsel %vm1892_vm4, %v1993_v27, -inf }
 0x1d0   : > { %v1995_v11 = vld.sshfl [vmem:[#allocation1 + $0x30] sm:$0xff pattern:$0x73625140]  ;;  %1996 = vst [vmem:[#allocation1] ss:$4 sm:$0xff] %v1932_v55  ;;  %v2307_v54 = vrot.slane %v2306_v19, 4  ;;  %v10014_v55 = vor.u32 %v13034_v20, %v10013_v59  ;;  %v15407_v20 = vmax.f32 %v2266_v15, %v2267_v22 }
 0x1d1   : > { %v2313_v56 = vsel %vm1892_vm4, %v1994_v23, -inf  ;;  %v2320_v17 = vsel %vm2088_vm10, %v1995_v11, -inf  ;;  %2000 = vst [vmem:[#allocation1 + $0x20] ss:$4 sm:$0xff] %v16786_v35  ;;  %v13003_v27 = vld [vmem:[#allocation4 + $0xe4] sm:$0xf]  ;;  %v9974_v23 = vor.u32 %v13024_v51, %v9973_v5  ;;  %v15409_v5 = vmax.f32 %v2273_v18, %v2274_v39 }
 0x1d2   : > { %v2308_v1 = vmax.f32 %v2306_v19, %v2307_v54  ;;  %v2314_v42 = vrot.slane %v2313_v56, 4  ;;  %v2321_v46 = vrot.slane %v2320_v17, 4  ;;  %v10188_v41 = vor.u32 %v13003_v27, %v10185_v7  ;;  %v10007_v11 = vld [vmem:[#allocation4 + $0x1c8] sm:$0xf0]  ;;  %v13001_v19 = vld [vmem:[#allocation4 + $0xd4] sm:$0xf]  ;;  %3189 = vmatpush.bf16.msra.mxu3 %v10014_v55 }
 0x1d3   : > { %v2515_v35 = vmax.f32 %v2461_v61, 0.0  ;;  %v15403_v27 = vmax.f32 %v2245_v52, %v2246_v53  ;;  %v10177_v7 = vld [vmem:[#allocation4 + $0xd8] sm:$0xf0]  ;;  %3172 = vmatpush.bf16.msra.mxu2 %v9974_v23  ;;  %v10010_v47 = vor.u32 %v13031_v14, %v10007_v11  ;;  %v2517_v52 = vmax.f32 %v15393_v30, 0.0  ;;  %v9965_v11 = vld [vmem:[#allocation4 + $0x170] sm:$0xf] }
 0x1d4   : > { %v2309_v10 = vrot.slane %v2308_v1, 2  ;;  %3590 = vmatpush.bf16.msra.mxu1 %v10188_v41  ;;  %v10180_v41 = vor.u32 %v13001_v19, %v10177_v7  ;;  %v2315_v51 = vmax.f32 %v2313_v56, %v2314_v42  ;;  %v15411_v61 = vmax.f32 %v2320_v17, %v2321_v46  ;;  %v13032_v42 = vld [vmem:[#allocation4 + $0x1c4] sm:$0xf0]  ;;  %v13022_v19 = vld [vmem:[#allocation4 + $0x174] sm:$0xf0] }
 0x1d5   : > { %v2522_v53 = vmax.f32 %v15399_v48, 0.0  ;;  %v16788_v54 = vrot.slane %v15270_v38, 4  ;;  %3232 = vmatpush.bf16.msrb.mxu0 %v10010_v47  ;;  %v2113_v14 = vrot.slane %v15396_v8, 2  ;;  %v2248_v15 = vrot.slane %v15403_v27, 1  ;;  %v9997_v30 = vld [vmem:[#allocation4 + $0x1b0] sm:$0xf] }
 0x1d6   : > { %v15415_v60 = vmax.f32 %v2308_v1, %v2309_v10  ;;  %v15425_v56 = vrot.slane %v15405_v6, 1  ;;  %v15428_v17 = vrot.slane %v15405_v6, 2  ;;  %v2617_v22 = vmul.f32 %v15302_v4, %v2515_v35  ;;  %v10005_v1 = vld [vmem:[#allocation4 + $0x1c0] sm:$0xf]  ;;  %v10161_v58 = vld [vmem:[#allocation4 + $0xb8] sm:$0xf0] }
 0x1d7   : > { %v1997_v50 = vld.sshfl [vmem:[#allocation1] sm:$0xff pattern:$0x73625140]  ;;  %v1998_v21 = vld.sshfl [vmem:[#allocation1 + $0x8] sm:$0xff pattern:$0x73625140]  ;;  %v10006_v7 = vor.u32 %v13032_v42, %v10005_v1  ;;  %v15445_v47 = vmul.f32 %v15302_v4, %v2516_v43  ;;  %v9966_v34 = vor.u32 %v13022_v19, %v9965_v11  ;;  %v15448_v25 = vmul.f32 %v15302_v4, %v2517_v52 }
 0x1d8   : > { %v1999_v59 = vld.sshfl [vmem:[#allocation1 + $0x10] sm:$0xff pattern:$0x73625140]  ;;  %3591 = vmatpush.bf16.msra.mxu1 %v10180_v41  ;;  %v15422_v18 = vsel %vm1892_vm4, %v1997_v50, -inf  ;;  %16789 = vst [vmem:[#allocation38_spill] sm:$0xff] %v15425_v56  ;;  %v15432_v38 = vsel %vm1892_vm4, %v1998_v21, -inf  ;;  %v2671_v36 = vpack.c.bf16 %v2617_v22, %v2617_v22  ;;  %v15451_v13 = vmul.f32 %v15347_v2, %v2522_v53 }
 0x1d9   : > { %2004 = vst [vmem:[#allocation1] ss:$4 sm:$0xff] %v16788_v54  ;;  %v15435_v39 = vsel %vm2088_vm10, %v1999_v59, -inf  ;;  %v2269_v46 = vrot.slane %v15407_v20, 1  ;;  %v2316_v48 = vrot.slane %v2315_v51, 2  ;;  %v2323_v10 = vrot.slane %v15411_v61, 2  ;;  %3190 = vmatpush.bf16.msra.mxu3 %v10006_v7  ;;  %3173 = vmatpush.bf16.msra.mxu2 %v9966_v34 }
 0x1da   : > { %16790 = vst [vmem:[#allocation39_spill] sm:$0xff] %v15428_v17  ;;  %v2311_v55 = vrot.slane %v15415_v60, 1  ;;  %v2328_v23 = vrot.slane %v15422_v18, 4  ;;  %v2335_v54 = vrot.slane %v15432_v38, 4  ;;  %v2342_v35 = vrot.slane %v15435_v39, 4 }
 0x1db   : > { %v13029_v50 = vld [vmem:[#allocation4 + $0x1b4] sm:$0xf]  ;;  %v9999_v21 = vld [vmem:[#allocation4 + $0x1b8] sm:$0xf0]  ;;  %v12999_v41 = vld [vmem:[#allocation4 + $0xc4] sm:$0xf]  ;;  %v2672_v11 = vpack.c.bf16 %v15445_v47, %v15445_v47  ;;  %v9998_v19 = vor.u32 %v13030_v45, %v9997_v30  ;;  %v15455_v33 = vunpack.c.l.b16 %v2671_v36  ;;  %v2317_v53 = vmax.f32 %v2315_v51, %v2316_v48 }
 0x1dc   : > { %v10169_v59 = vld [vmem:[#allocation4 + $0xc8] sm:$0xf0]  ;;  %v9957_v17 = vld [vmem:[#allocation4 + $0x160] sm:$0xf]  ;;  %v10002_v1 = vor.u32 %v13029_v50, %v9999_v21  ;;  %v13027_v42 = vld [vmem:[#allocation4 + $0x1a4] sm:$0xf]  ;;  %v2678_v45 = vpack.c.bf16 %v15451_v13, %v15451_v13  ;;  %v2249_v30 = vmax.f32 %v15403_v27, %v2248_v15  ;;  %v2312_v13 = vmax.f32 %v15415_v60, %v2311_v55 }
 0x1dd   : > { %v12997_v43 = vld [vmem:[#allocation4 + $0xb4] sm:$0xf]  ;;  %v10172_v26 = vor.u32 %v12999_v41, %v10169_v59  ;;  %v10129_v22 = vld [vmem:[#allocation4 + $0x78] sm:$0xf0]  ;;  %v9989_v7 = vld [vmem:[#allocation4 + $0x1a0] sm:$0xf]  ;;  %v9958_v50 = vor.u32 %v13020_v49, %v9957_v17  ;;  %v15458_v41 = vmax.f32 %v15396_v8, %v2113_v14  ;;  %v2673_v59 = vpack.c.bf16 %v15448_v25, %v15448_v25  ;;  %3191 = vmatpush.bf16.msra.mxu3 %v9998_v19 }
 0x1de   : > { %v12989_v31 = vld [vmem:[#allocation4 + $0x74] sm:$0xf]  ;;  %3233 = vmatpush.bf16.msrb.mxu0 %v10002_v1  ;;  %v13028_v52 = vld [vmem:[#allocation4 + $0x1a4] sm:$0xf0]  ;;  %v9949_v4 = vld [vmem:[#allocation4 + $0x150] sm:$0xf]  ;;  %v9994_v36 = vor.u32 %v13027_v42, %v9991_v37  ;;  %v2270_v49 = vmax.f32 %v15407_v20, %v2269_v46  ;;  %v2324_v17 = vmax.f32 %v15411_v61, %v2323_v10  ;;  %v2329_v8 = vmax.f32 %v15422_v18, %v2328_v23 }
 0x1df   : > { %16791 = vst [vmem:[#allocation40_spill] sm:$0xff] %v15455_v33  ;;  %3592 = vmatpush.bf16.msra.mxu1 %v10172_v26  ;;  %v13018_v21 = vld [vmem:[#allocation4 + $0x154] sm:$0xf0]  ;;  %v13025_v2 = vld [vmem:[#allocation4 + $0x194] sm:$0xf]  ;;  %3174 = vmatpush.bf16.msra.mxu2 %v9958_v50  ;;  %v10164_v14 = vor.u32 %v12997_v43, %v10161_v58  ;;  %v2336_v27 = vmax.f32 %v15432_v38, %v2335_v54  ;;  %v2318_v20 = vrot.slane %v2317_v53, 1  ;;  %v15481_v60 = vunpack.c.l.b16 %v2672_v11 }
 0x1e0   : > { %v9983_v34 = vld [vmem:[#allocation4 + $0x198] sm:$0xf0]  ;;  %v12995_v47 = vld [vmem:[#allocation4 + $0xa4] sm:$0xf]  ;;  %v10153_v51 = vld [vmem:[#allocation4 + $0xa8] sm:$0xf0]  ;;  %v10132_v37 = vor.u32 %v12989_v31, %v10129_v22  ;;  %v9990_v15 = vor.u32 %v13028_v52, %v9989_v7  ;;  %v2343_v61 = vmax.f32 %v15435_v39, %v2342_v35  ;;  %v9950_v18 = vor.u32 %v13018_v21, %v9949_v4 }
 0x1e1   : > { %v12987_v26 = vld [vmem:[#allocation4 + $0x64] sm:$0xf]  ;;  %v15468_v48 = vld.sshfl [vmem:[#allocation1 + $0x20] sm:$0xff pattern:$0x73625140]  ;;  %v9986_v58 = vor.u32 %v13025_v2, %v9983_v34  ;;  %v16792_v10 = vrot.slane %v15274_v40, 6  ;;  %v15487_v55 = vadd.f32 %v15312_v0, %v2249_v30  ;;  %v10156_v39 = vor.u32 %v12995_v47, %v10153_v51 }
 0x1e2   : > { %v15470_v25 = vld.sshfl [vmem:[#allocation1 + $0x28] sm:$0xff pattern:$0x73625140]  ;;  %3234 = vmatpush.bf16.msrb.mxu0 %v9994_v36  ;;  %v10121_v1 = vld [vmem:[#allocation4 + $0x68] sm:$0xf0]  ;;  %16793 = vst [vmem:[#allocation41_spill] sm:$0xff] %v15481_v60  ;;  %3192 = vmatpush.bf16.msra.mxu3 %v9990_v15  ;;  %v2488_v40 = vadd.f32 %v15312_v0, %v2270_v49  ;;  %v2319_v19 = vmax.f32 %v2317_v53, %v2318_v20  ;;  %v15518_v49 = vunpack.c.l.b16 %v2673_v59 }
 0x1e3   : > { %v15474_v42 = vld.sshfl [vmem:[#allocation1 + $0x30] sm:$0xff pattern:$0x73625140]  ;;  %3593 = vmatpush.bf16.msra.mxu1 %v10164_v14  ;;  %v15477_v46 = vld.sshfl [vmem:[#allocation1] sm:$0xff pattern:$0x73625140]  ;;  %3175 = vmatpush.bf16.msra.mxu2 %v9950_v18  ;;  %v10124_v35 = vor.u32 %v12987_v26, %v10121_v1  ;;  %v2494_v52 = vadd.f32 %v15312_v0, %v2312_v13  ;;  %v15516_v26 = vunpack.c.l.b16 %v2678_v45 }
 0x1e4   : > { %2008 = vst [vmem:[#allocation1 + $0x20] ss:$4 sm:$0xff] %v16792_v10  ;;  %v16794_v38 = vrot.slane %v15409_v5, 1  ;;  %v15489_v23 = vld.sshfl [vmem:[#allocation1 + $0x8] sm:$0xff pattern:$0x73625140] }
 0x1e5   : > { %v15491_v4 = vld.sshfl [vmem:[#allocation1 + $0x10] sm:$0xff pattern:$0x73625140]  ;;  %v2325_v2 = vrot.slane %v2324_v17, 1  ;;  %v2330_v54 = vrot.slane %v2329_v8, 2  ;;  %v15496_v43 = vrot.slane %v15405_v6, 3 }
 0x1e6   : > { %v2277_v31 = vmax.f32 %v15409_v5, %v16794_v38  ;;  %3575 = vmatpush.bf16.msra.mxu0 %v10132_v37  ;;  %3213 = vmatpush.bf16.msrb.mxu3 %v9986_v58  ;;  %2012 = vst [vmem:[#allocation1] ss:$4 sm:$0xff] %v15305_v32  ;;  %v2337_v5 = vrot.slane %v2336_v27, 2  ;;  %v15499_v22 = vrot.slane %v15405_v6, 4  ;;  %v2115_v11 = vrot.slane %v15458_v41, 1 }
 0x1e7   : > { %v2344_v7 = vrot.slane %v2343_v61, 2  ;;  %v15504_v50 = vrot.slane %v15405_v6, 5  ;;  %3594 = vmatpush.bf16.msra.mxu1 %v10156_v39  ;;  %v2539_v32 = vmax.f32 %v15487_v55, 0.0  ;;  %v15509_v34 = vrot.slane %v15405_v6, 6  ;;  %16798 = vst [vmem:[#allocation45_spill] sm:$0xff] %v15516_v26 }
 0x1e8   : > { %v2489_v21 = vadd.f32 %v15314_v16, %v2277_v31  ;;  %v15512_v30 = vrot.slane %v15405_v6, 7  ;;  %v2326_v36 = vmax.f32 %v2324_v17, %v2325_v2  ;;  %v2331_v53 = vmax.f32 %v2329_v8, %v2330_v54  ;;  %16799 = vst [vmem:[#allocation46_spill] sm:$0xff] %v15518_v49 }
 0x1e9   : > { %16795 = vst [vmem:[#allocation42_spill] sm:$0xff] %v15504_v50  ;;  %v2542_v47 = vmax.f32 %v2488_v40, 0.0  ;;  %v2131_v51 = vsel %vm2088_vm10, %v15245_v62, -inf  ;;  %v2338_v14 = vmax.f32 %v2336_v27, %v2337_v5  ;;  %v15525_v15 = vmax.f32 %v15458_v41, %v2115_v11 }
 0x1ea   : > { %16796 = vst [vmem:[#allocation43_spill] sm:$0xff] %v15509_v34  ;;  %3576 = vmatpush.bf16.msra.mxu0 %v10124_v35  ;;  %v2345_v1 = vmax.f32 %v2343_v61, %v2344_v7  ;;  %v2495_v17 = vadd.f32 %v15314_v16, %v2319_v19  ;;  %v2548_v8 = vmax.f32 %v2494_v52, 0.0  ;;  %v2152_v62 = vsel %vm2088_vm10, %v15251_v28, -inf }
 0x1eb   : > { %16797 = vst [vmem:[#allocation44_spill] sm:$0xff] %v15512_v30  ;;  %v15520_v13 = vld.sshfl [vmem:[#allocation1 + $0x20] sm:$0xff pattern:$0x73625140]  ;;  %v2132_v45 = vrot.slane %v2131_v51, 4  ;;  %v2173_v59 = vsel %vm2088_vm10, %v15290_v3, -inf  ;;  %v2496_v61 = vadd.f32 %v15316_v63, %v2326_v36  ;;  %v15552_v52 = vmul.f32 %v15425_v56, %v2542_v47 }
 0x1ec   : > { %v15522_v37 = vld.sshfl [vmem:[#allocation1 + $0x28] sm:$0xff pattern:$0x73625140]  ;;  %v15528_v20 = vld.sshfl [vmem:[#allocation1 + $0x30] sm:$0xff pattern:$0x73625140]  ;;  %v2650_v40 = vmul.f32 %v15496_v43, %v2548_v8 }
 0x1ed   : > { %v2194_v27 = vsel %vm2088_vm10, %v15296_v12, -inf  ;;  %v2215_v41 = vsel %vm2088_vm10, %v15331_v9, -inf  ;;  %v2332_v18 = vrot.slane %v2331_v53, 1  ;;  %v2543_v58 = vmax.f32 %v2489_v21, 0.0  ;;  %16802 = vst [vmem:[#allocation48_spill] sm:$0xff] %v15552_v52 }
 0x1ee   : > { %v16800_v10 = vrot.slane %v15308_v24, 2  ;;  %v2236_v28 = vsel %vm2088_vm10, %v15337_v29, -inf  ;;  %v2339_v38 = vrot.slane %v2338_v14, 1  ;;  %v2153_v31 = vrot.slane %v2152_v62, 4 }
 0x1ef   : > { %v2257_v3 = vsel %vm2088_vm10, %v15357_v44, -inf  ;;  %v2278_v12 = vsel %vm2088_vm10, %v15359_v57, -inf  ;;  %v2549_v55 = vmax.f32 %v2495_v17, 0.0  ;;  %v2174_v9 = vrot.slane %v2173_v59, 4 }
 0x1f0   : > { %2016 = vst [vmem:[#allocation1 + $0x20] ss:$4 sm:$0xff] %v16800_v10  ;;  %v2195_v39 = vrot.slane %v2194_v27, 4  ;;  %v2216_v2 = vrot.slane %v2215_v41, 4  ;;  %v2346_v54 = vrot.slane %v2345_v1, 1  ;;  %v2133_v24 = vmax.f32 %v2131_v51, %v2132_v45 }
 0x1f1   : > { %v2237_v35 = vrot.slane %v2236_v28, 4  ;;  %v2550_v5 = vmax.f32 %v2496_v61, 0.0  ;;  %v15549_v29 = vmul.f32 %v15405_v6, %v2539_v32  ;;  %v2258_v11 = vrot.slane %v2257_v3, 4 }
 0x1f2   : > { %v2279_v19 = vrot.slane %v2278_v12, 4  ;;  %v2333_v7 = vmax.f32 %v2331_v53, %v2332_v18  ;;  %v2340_v44 = vmax.f32 %v2338_v14, %v2339_v38  ;;  %v2154_v57 = vmax.f32 %v2152_v62, %v2153_v31 }
 0x1f3   : > { %16801 = vst [vmem:[#allocation47_spill] sm:$0xff] %v15549_v29  ;;  %v2651_v21 = vmul.f32 %v15496_v43, %v2549_v55  ;;  %v2175_v36 = vmax.f32 %v2173_v59, %v2174_v9  ;;  %v2196_v17 = vmax.f32 %v2194_v27, %v2195_v39  ;;  %v2217_v10 = vmax.f32 %v2215_v41, %v2216_v2  ;;  %v16805_v9 = vld [vmem:[#allocation34_spill] sm:$0xff] }
 0x1f4   : > { %v2347_v8 = vmax.f32 %v2345_v1, %v2346_v54  ;;  %v2704_v51 = vpack.c.bf16 %v2650_v40, %v2650_v40  ;;  %v2134_v45 = vrot.slane %v2133_v24, 2  ;;  %v2238_v61 = vmax.f32 %v2236_v28, %v2237_v35  ;;  %v16806_v35 = vld [vmem:[#allocation35_spill] sm:$0xff] }
 0x1f5   : > { %v15556_v32 = vmul.f32 %v15425_v56, %v2543_v58  ;;  %v2652_v49 = vmul.f32 %v15496_v43, %v2550_v5  ;;  %v2259_v53 = vmax.f32 %v2257_v3, %v2258_v11  ;;  %v2280_v14 = vmax.f32 %v2278_v12, %v2279_v19 }
 0x1f6   : > { %v2497_v47 = vadd.f32 %v15312_v0, %v2333_v7  ;;  %v2498_v62 = vadd.f32 %v15314_v16, %v2340_v44  ;;  %v2155_v27 = vrot.slane %v2154_v57, 2  ;;  %v2705_v41 = vpack.c.bf16 %v2651_v21, %v2651_v21  ;;  %v16807_v44 = vld [vmem:[#allocation36_spill] sm:$0xff] }
 0x1f7   : > { %16803 = vst [vmem:[#allocation49_spill] sm:$0xff] %v15556_v32  ;;  %v2176_v1 = vrot.slane %v2175_v36, 2  ;;  %v2197_v18 = vrot.slane %v2196_v17, 2  ;;  %v2218_v38 = vrot.slane %v2217_v10, 2  ;;  %v2499_v28 = vadd.f32 %v15316_v63, %v2347_v8 }
 0x1f8   : > { %v15564_v58 = vunpack.c.l.b16 %v2704_v51  ;;  %v2135_v31 = vmax.f32 %v2133_v24, %v2134_v45  ;;  %v2239_v43 = vrot.slane %v2238_v61, 2  ;;  %v2706_v3 = vpack.c.bf16 %v2652_v49, %v2652_v49 }
 0x1f9   : > { %v2260_v12 = vrot.slane %v2259_v53, 2  ;;  %v2281_v55 = vrot.slane %v2280_v14, 2  ;;  %v2285_v39 = vsel %vm1892_vm4, %v16805_v9, -inf  ;;  %v2551_v2 = vmax.f32 %v2497_v47, 0.0 }
 0x1fa   : > { %16804 = vst [vmem:[#allocation50_spill] sm:$0xff] %v15564_v58  ;;  %v2552_v54 = vmax.f32 %v2498_v62, 0.0  ;;  %v2156_v40 = vmax.f32 %v2154_v57, %v2155_v27  ;;  %v2292_v5 = vsel %vm1892_vm4, %v16806_v35, -inf  ;;  %v2177_v11 = vmax.f32 %v2175_v36, %v2176_v1 }
 0x1fb   : > { %v2198_v19 = vmax.f32 %v2196_v17, %v2197_v18  ;;  %v2219_v7 = vmax.f32 %v2217_v10, %v2218_v38  ;;  %v2299_v21 = vsel %vm2088_vm10, %v16807_v44, -inf  ;;  %v15572_v24 = vunpack.c.l.b16 %v2705_v41 }
 0x1fc   : > { %v2136_v49 = vrot.slane %v2135_v31, 1  ;;  %v2240_v8 = vmax.f32 %v2238_v61, %v2239_v43  ;;  %v2286_v51 = vrot.slane %v2285_v39, 4  ;;  %v2553_v45 = vmax.f32 %v2499_v28, 0.0 }
 0x1fd   : > { %16808 = vst [vmem:[#allocation34_spill] sm:$0xff] %v15572_v24  ;;  %v2261_v59 = vmax.f32 %v2259_v53, %v2260_v12  ;;  %v2282_v9 = vmax.f32 %v2280_v14, %v2281_v55  ;;  %v2293_v47 = vrot.slane %v2292_v5, 4  ;;  %v15575_v57 = vmul.f32 %v15499_v22, %v2551_v2 }
 0x1fe   : > { %v15577_v62 = vunpack.c.l.b16 %v2706_v3  ;;  %v2157_v36 = vrot.slane %v2156_v40, 1  ;;  %v2300_v17 = vrot.slane %v2299_v21, 4  ;;  %v15580_v10 = vmul.f32 %v15499_v22, %v2552_v54 }
 0x1ff   : > { %16809 = vst [vmem:[#allocation35_spill] sm:$0xff] %v15575_v57  ;;  %v2178_v27 = vrot.slane %v2177_v11, 1  ;;  %v2199_v41 = vrot.slane %v2198_v19, 1  ;;  %v2220_v1 = vrot.slane %v2219_v7, 1  ;;  %v2137_v18 = vmax.f32 %v2135_v31, %v2136_v49 }
 0x200   : > { %16810 = vst [vmem:[#allocation36_spill] sm:$0xff] %v15577_v62  ;;  %v2241_v61 = vrot.slane %v2240_v8, 1  ;;  %v2287_v38 = vmax.f32 %v2285_v39, %v2286_v51  ;;  %v2348_v53 = vsel %vm1892_vm4, %v15468_v48, -inf  ;;  %v2262_v14 = vrot.slane %v2261_v59, 1 }
 0x201   : > { %16811 = vst [vmem:[#allocation51_spill] sm:$0xff] %v15580_v10  ;;  %v2283_v28 = vrot.slane %v2282_v9, 1  ;;  %v2294_v43 = vmax.f32 %v2292_v5, %v2293_v47  ;;  %v2355_v3 = vsel %vm1892_vm4, %v15470_v25, -inf  ;;  %v15587_v12 = vmul.f32 %v15499_v22, %v2553_v45  ;;  %v2013_v5 = vld.sshfl [vmem:[#allocation1] sm:$0xff pattern:$0x73625140] }
 0x202   : > { %v15589_v55 = vmax.f32 %v2156_v40, %v2157_v36  ;;  %v2301_v2 = vmax.f32 %v2299_v21, %v2300_v17  ;;  %v15593_v31 = vadd.f32 %v15316_v63, %v15525_v15  ;;  %v15595_v39 = vmax.f32 %v2177_v11, %v2178_v27  ;;  %v2014_v21 = vld.sshfl [vmem:[#allocation1 + $0x8] sm:$0xff pattern:$0x73625140]  ;;  %v2015_v47 = vld.sshfl [vmem:[#allocation1 + $0x10] sm:$0xff pattern:$0x73625140] }
 0x203   : > { %16812 = vst [vmem:[#allocation52_spill] sm:$0xff] %v15587_v12  ;;  %v15597_v54 = vmax.f32 %v2198_v19, %v2199_v41  ;;  %v15599_v48 = vmax.f32 %v2219_v7, %v2220_v1  ;;  %v2349_v35 = vrot.slane %v2348_v53, 4  ;;  %v15601_v44 = vmax.f32 %v2240_v8, %v2241_v61  ;;  %v2017_v17 = vld.sshfl [vmem:[#allocation1 + $0x20] sm:$0xff pattern:$0x73625140] }
 0x204   : > { %v2288_v25 = vrot.slane %v2287_v38, 2  ;;  %v2356_v22 = vrot.slane %v2355_v3, 4  ;;  %v15604_v40 = vadd.f32 %v15316_v63, %v2137_v18  ;;  %v15606_v49 = vmax.f32 %v2261_v59, %v2262_v14 }
 0x205   : > { %v15608_v15 = vmax.f32 %v2282_v9, %v2283_v28  ;;  %v2295_v11 = vrot.slane %v2294_v43, 2  ;;  %v2362_v19 = vsel %vm2088_vm10, %v15474_v42, -inf  ;;  %v2302_v7 = vrot.slane %v2301_v2, 2 }
 0x206   : > { %16813 = vst [vmem:[#allocation53_spill] sm:$0xff] %v15604_v40  ;;  %v2369_v51 = vsel %vm1892_vm4, %v15477_v46, -inf  ;;  %v2376_v8 = vsel %vm1892_vm4, %v15489_v23, -inf  ;;  %v2383_v45 = vsel %vm2088_vm10, %v15491_v4, -inf  ;;  %v2350_v36 = vmax.f32 %v2348_v53, %v2349_v35 }
 0x207   : > { %v2390_v59 = vsel %vm1892_vm4, %v15520_v13, -inf  ;;  %v2397_v9 = vsel %vm1892_vm4, %v15522_v37, -inf  ;;  %v2404_v42 = vsel %vm2088_vm10, %v15528_v20, -inf  ;;  %v2289_v27 = vmax.f32 %v2287_v38, %v2288_v25  ;;  %v2018_v37 = vld.sshfl [vmem:[#allocation1 + $0x28] sm:$0xff pattern:$0x73625140] }
 0x208   : > { %v2357_v46 = vmax.f32 %v2355_v3, %v2356_v22  ;;  %v2363_v41 = vrot.slane %v2362_v19, 4  ;;  %v2411_v23 = vsel %vm1892_vm4, %v2013_v5, -inf  ;;  %v2370_v1 = vrot.slane %v2369_v51, 4  ;;  %v2019_v3 = vld.sshfl [vmem:[#allocation1 + $0x30] sm:$0xff pattern:$0x73625140] }
 0x209   : > { %v2377_v18 = vrot.slane %v2376_v8, 4  ;;  %v2384_v4 = vrot.slane %v2383_v45, 4  ;;  %v2418_v61 = vsel %vm1892_vm4, %v2014_v21, -inf  ;;  %v2391_v53 = vrot.slane %v2390_v59, 4 }
 0x20a   : > { %v2398_v14 = vrot.slane %v2397_v9, 4  ;;  %v2405_v13 = vrot.slane %v2404_v42, 4  ;;  %v2425_v28 = vsel %vm2088_vm10, %v2015_v47, -inf  ;;  %v2296_v35 = vmax.f32 %v2294_v43, %v2295_v11 }
 0x20b   : > { %v15627_v60 = vmax.f32 %v2301_v2, %v2302_v7  ;;  %v2351_v20 = vrot.slane %v2350_v36, 2  ;;  %v2412_v38 = vrot.slane %v2411_v23, 4  ;;  %v2358_v25 = vrot.slane %v2357_v46, 2 }
 0x20c   : > { %v2364_v22 = vmax.f32 %v2362_v19, %v2363_v41  ;;  %v2419_v5 = vrot.slane %v2418_v61, 4  ;;  %v2432_v26 = vsel %vm1892_vm4, %v2017_v17, -inf  ;;  %v2290_v33 = vrot.slane %v2289_v27, 1 }
 0x20d   : > { %v2371_v29 = vmax.f32 %v2369_v51, %v2370_v1  ;;  %v2378_v21 = vmax.f32 %v2376_v8, %v2377_v18  ;;  %v2426_v24 = vrot.slane %v2425_v28, 4  ;;  %v2385_v62 = vmax.f32 %v2383_v45, %v2384_v4 }
 0x20e   : > { %v2392_v58 = vmax.f32 %v2390_v59, %v2391_v53  ;;  %v2399_v12 = vmax.f32 %v2397_v9, %v2398_v14  ;;  %v2406_v47 = vmax.f32 %v2404_v42, %v2405_v13  ;;  %v2413_v10 = vmax.f32 %v2411_v23, %v2412_v38 }
 0x20f   : > { %v2433_v43 = vrot.slane %v2432_v26, 4  ;;  %v2439_v2 = vsel %vm1892_vm4, %v2018_v37, -inf  ;;  %v2446_v11 = vsel %vm2088_vm10, %v2019_v3, -inf  ;;  %v2297_v7 = vrot.slane %v2296_v35, 1 }
 0x210   : > { %v2304_v19 = vrot.slane %v15627_v60, 1  ;;  %v2420_v41 = vmax.f32 %v2418_v61, %v2419_v5  ;;  %v2440_v57 = vrot.slane %v2439_v2, 4  ;;  %v2365_v17 = vrot.slane %v2364_v22, 2 }
 0x211   : > { %v2372_v32 = vrot.slane %v2371_v29, 2  ;;  %v2427_v51 = vmax.f32 %v2425_v28, %v2426_v24  ;;  %v2447_v8 = vrot.slane %v2446_v11, 4  ;;  %v2379_v1 = vrot.slane %v2378_v21, 2 }
 0x212   : > { %v2386_v45 = vrot.slane %v2385_v62, 2  ;;  %v2393_v59 = vrot.slane %v2392_v58, 2  ;;  %v2400_v9 = vrot.slane %v2399_v12, 2  ;;  %v2352_v42 = vmax.f32 %v2350_v36, %v2351_v20 }
 0x213   : > { %v2407_v23 = vrot.slane %v2406_v47, 2  ;;  %v2414_v18 = vrot.slane %v2413_v10, 2  ;;  %v2434_v4 = vmax.f32 %v2432_v26, %v2433_v43  ;;  %v2291_v53 = vmax.f32 %v2289_v27, %v2290_v33 }
 0x214   : > { %v2359_v14 = vmax.f32 %v2357_v46, %v2358_v25  ;;  %v2421_v13 = vrot.slane %v2420_v41, 2  ;;  %v2441_v37 = vmax.f32 %v2439_v2, %v2440_v57  ;;  %v2366_v38 = vmax.f32 %v2364_v22, %v2365_v17 }
 0x215   : > { %v2373_v3 = vmax.f32 %v2371_v29, %v2372_v32  ;;  %v2428_v61 = vrot.slane %v2427_v51, 2  ;;  %v2448_v5 = vmax.f32 %v2446_v11, %v2447_v8  ;;  %v2380_v52 = vmax.f32 %v2378_v21, %v2379_v1 }
 0x216   : > { %v2387_v30 = vmax.f32 %v2385_v62, %v2386_v45  ;;  %v2394_v24 = vmax.f32 %v2392_v58, %v2393_v59  ;;  %v2401_v28 = vmax.f32 %v2399_v12, %v2400_v9  ;;  %v2298_v34 = vmax.f32 %v2296_v35, %v2297_v7 }
 0x217   : > { %v2408_v50 = vmax.f32 %v2406_v47, %v2407_v23  ;;  %v2415_v56 = vmax.f32 %v2413_v10, %v2414_v18  ;;  %v2435_v6 = vrot.slane %v2434_v4, 2  ;;  %v2353_v36 = vrot.slane %v2352_v42, 1 }
 0x218   : > { %v2360_v20 = vrot.slane %v2359_v14, 1  ;;  %v2422_v40 = vmax.f32 %v2420_v41, %v2421_v13  ;;  %v2442_v26 = vrot.slane %v2441_v37, 2  ;;  %v2367_v33 = vrot.slane %v2366_v38, 1 }
 0x219   : > { %v2374_v27 = vrot.slane %v2373_v3, 1  ;;  %v2429_v46 = vmax.f32 %v2427_v51, %v2428_v61  ;;  %v2449_v57 = vrot.slane %v2448_v5, 2  ;;  %v2381_v25 = vrot.slane %v2380_v52, 1 }
 0x21a   : > { %v2388_v29 = vrot.slane %v2387_v30, 1  ;;  %v2395_v32 = vrot.slane %v2394_v24, 1  ;;  %v2402_v22 = vrot.slane %v2401_v28, 1  ;;  %v2305_v62 = vmax.f32 %v15627_v60, %v2304_v19 }
 0x21b   : > { %v2409_v58 = vrot.slane %v2408_v50, 1  ;;  %v2416_v12 = vrot.slane %v2415_v56, 1  ;;  %v2436_v35 = vmax.f32 %v2434_v4, %v2435_v6  ;;  %v2354_v21 = vmax.f32 %v2352_v42, %v2353_v36 }
 0x21c   : > { %v2361_v10 = vmax.f32 %v2359_v14, %v2360_v20  ;;  %v2423_v47 = vrot.slane %v2422_v40, 1  ;;  %v2443_v43 = vmax.f32 %v2441_v37, %v2442_v26  ;;  %v2368_v2 = vmax.f32 %v2366_v38, %v2367_v33  ;;  %v16814_v20 = vld [vmem:[#allocation53_spill] sm:$0xff] }
 0x21d   : > { %v2375_v11 = vmax.f32 %v2373_v3, %v2374_v27  ;;  %v2430_v7 = vrot.slane %v2429_v46, 1  ;;  %v2450_v41 = vmax.f32 %v2448_v5, %v2449_v57  ;;  %v2382_v17 = vmax.f32 %v2380_v52, %v2381_v25 }
 0x21e   : > { %v2389_v51 = vmax.f32 %v2387_v30, %v2388_v29  ;;  %v2396_v8 = vmax.f32 %v2394_v24, %v2395_v32  ;;  %v2403_v1 = vmax.f32 %v2401_v28, %v2402_v22  ;;  %v2410_v45 = vmax.f32 %v2408_v50, %v2409_v58 }
 0x21f   : > { %v2417_v59 = vmax.f32 %v2415_v56, %v2416_v12  ;;  %v2437_v9 = vrot.slane %v2436_v35, 1  ;;  %v15636_v60 = vadd.f32 %v15316_v63, %v15589_v55  ;;  %v2424_v6 = vmax.f32 %v2422_v40, %v2423_v47 }
 0x220   : > { %v2444_v19 = vrot.slane %v2443_v43, 1  ;;  %v15640_v42 = vadd.f32 %v15316_v63, %v15595_v39  ;;  %v15644_v23 = vadd.f32 %v15316_v63, %v15597_v54  ;;  %v2431_v30 = vmax.f32 %v2429_v46, %v2430_v7 }
 0x221   : > { %v2451_v52 = vrot.slane %v2450_v41, 1  ;;  %v2481_v56 = vadd.f32 %v15316_v63, %v15599_v48  ;;  %v2484_v50 = vadd.f32 %v15316_v63, %v15601_v44  ;;  %v2487_v55 = vadd.f32 %v15316_v63, %v15606_v49 }
 0x222   : > { %v2490_v40 = vadd.f32 %v15316_v63, %v15608_v15  ;;  %v2491_v39 = vadd.f32 %v15312_v0, %v2291_v53  ;;  %v2492_v18 = vadd.f32 %v15314_v16, %v2298_v34  ;;  %v2438_v54 = vmax.f32 %v2436_v35, %v2437_v9 }
 0x223   : > { %v2493_v4 = vadd.f32 %v15316_v63, %v2305_v62  ;;  %v2500_v14 = vadd.f32 %v15312_v0, %v2354_v21  ;;  %v2501_v48 = vadd.f32 %v15314_v16, %v2361_v10  ;;  %v2445_v13 = vmax.f32 %v2443_v43, %v2444_v19  ;;  %v2583_v21 = vpop.permute.xlu1 %2582  ;;  %v16818_v19 = vld [vmem:[#allocation23_spill] sm:$0xff] }
 0x224   : > { %v2502_v44 = vadd.f32 %v15316_v63, %v2368_v2  ;;  %v2503_v37 = vadd.f32 %v15312_v0, %v2375_v11  ;;  %v2504_v49 = vadd.f32 %v15314_v16, %v2382_v17  ;;  %v2452_v38 = vmax.f32 %v2450_v41, %v2451_v52  ;;  %v16816_v17 = vld [vmem:[#allocation22_spill] sm:$0xff]  ;;  %v16820_v52 = vld [vmem:[#allocation29_spill] sm:$0xff] }
 0x225   : > { %v2505_v15 = vadd.f32 %v15316_v63, %v2389_v51  ;;  %v2506_v53 = vadd.f32 %v15312_v0, %v2396_v8  ;;  %v2507_v34 = vadd.f32 %v15314_v16, %v2403_v1  ;;  %v2508_v3 = vadd.f32 %v15316_v63, %v2410_v45 }
 0x226   : > { %v2509_v61 = vadd.f32 %v15312_v0, %v2417_v59  ;;  %v2510_v5 = vadd.f32 %v15314_v16, %v2424_v6  ;;  %v2511_v24 = vadd.f32 %v15316_v63, %v2431_v30  ;;  %v15670_v28 = vadd.f32 %v15312_v0, %v2438_v54 }
 0x227   : > { %v2520_v36 = vmax.f32 %v15593_v31, 0.0  ;;  %v2523_v26 = vmax.f32 %v16814_v20, 0.0  ;;  %v2526_v33 = vmax.f32 %v15636_v60, 0.0  ;;  %v15676_v27 = vadd.f32 %v15314_v16, %v2445_v13  ;;  %v16825_v13 = vld [vmem:[#allocation38_spill] sm:$0xff] }
 0x228   : > { %v2529_v46 = vmax.f32 %v15640_v42, 0.0  ;;  %v2532_v57 = vmax.f32 %v15644_v23, 0.0  ;;  %v2535_v25 = vmax.f32 %v2481_v56, 0.0  ;;  %v15681_v29 = vadd.f32 %v15316_v63, %v2452_v38  ;;  %v16819_v23 = vld [vmem:[#allocation28_spill] sm:$0xff] }
 0x229   : > { %16815 = vst [vmem:[#allocation53_spill] sm:$0xff] %v15676_v27  ;;  %v2538_v32 = vmax.f32 %v2484_v50, 0.0  ;;  %v2541_v22 = vmax.f32 %v2487_v55, 0.0  ;;  %v2544_v62 = vmax.f32 %v2490_v40, 0.0  ;;  %v2545_v58 = vmax.f32 %v2491_v39, 0.0  ;;  %v16821_v50 = vld [vmem:[#allocation31_spill] sm:$0xff] }
 0x22a   : > { %v2546_v31 = vmax.f32 %v2492_v18, 0.0  ;;  %v2547_v12 = vmax.f32 %v2493_v4, 0.0  ;;  %v2554_v35 = vmax.f32 %v2500_v14, 0.0  ;;  %v2555_v10 = vmax.f32 %v2501_v48, 0.0  ;;  %v16822_v40 = vld [vmem:[#allocation32_spill] sm:$0xff]  ;;  %v16823_v18 = vld [vmem:[#allocation33_spill] sm:$0xff] }
 0x22b   : > { %v2556_v47 = vmax.f32 %v2502_v44, 0.0  ;;  %v2557_v43 = vmax.f32 %v2503_v37, 0.0  ;;  %v2558_v2 = vmax.f32 %v2504_v49, 0.0  ;;  %v2559_v11 = vmax.f32 %v2505_v15, 0.0  ;;  %v16824_v14 = vld [vmem:[#allocation37_spill] sm:$0xff]  ;;  %v16826_v37 = vld [vmem:[#allocation39_spill] sm:$0xff] }
 0x22c   : > { %v2560_v7 = vmax.f32 %v2506_v53, 0.0  ;;  %v2561_v41 = vmax.f32 %v2507_v34, 0.0  ;;  %v15684_v51 = vrot.slane %v16816_v17, 7  ;;  %v2562_v63 = vmax.f32 %v2508_v3, 0.0  ;;  %v16827_v53 = vld [vmem:[#allocation42_spill] sm:$0xff] }
 0x22d   : > { %v2563_v8 = vmax.f32 %v2509_v61, 0.0  ;;  %v2564_v1 = vmax.f32 %v2510_v5, 0.0  ;;  %v2565_v45 = vmax.f32 %v2511_v24, 0.0  ;;  %v15689_v6 = vrot.slane %v2583_v21, 1  ;;  %v16828_v5 = vld [vmem:[#allocation43_spill] sm:$0xff] }
 0x22e   : > { %v2622_v42 = vmul.f32 %v16818_v19, %v2520_v36  ;;  %v2625_v30 = vmul.f32 %v16819_v23, %v2523_v26  ;;  %v2628_v56 = vmul.f32 %v16820_v52, %v2526_v33  ;;  %v2631_v55 = vmul.f32 %v16821_v50, %v2529_v46  ;;  %v16829_v26 = vld [vmem:[#allocation44_spill] sm:$0xff] }
 0x22f   : > { %16817 = vst [vmem:[#allocation22_spill] sm:$0xff] %v15689_v6  ;;  %v2634_v39 = vmul.f32 %v16822_v40, %v2532_v57  ;;  %v2637_v54 = vmul.f32 %v16823_v18, %v2535_v25  ;;  %v2640_v4 = vmul.f32 %v15684_v51, %v2538_v32  ;;  %v2643_v48 = vmul.f32 %v16824_v14, %v2541_v22 }
 0x230   : > { %v2646_v44 = vmul.f32 %v16825_v13, %v2544_v62  ;;  %v2647_v49 = vmul.f32 %v16826_v37, %v2545_v58  ;;  %v2648_v38 = vmul.f32 %v16826_v37, %v2546_v31  ;;  %v2649_v15 = vmul.f32 %v16826_v37, %v2547_v12 }
 0x231   : > { %v2656_v34 = vmul.f32 %v16827_v53, %v2554_v35  ;;  %v2657_v3 = vmul.f32 %v16827_v53, %v2555_v10  ;;  %v2658_v61 = vmul.f32 %v16827_v53, %v2556_v47  ;;  %v2659_v24 = vmul.f32 %v16828_v5, %v2557_v43 }
 0x232   : > { %v15708_v36 = vmul.f32 %v16828_v5, %v2558_v2  ;;  %v15711_v20 = vmul.f32 %v16828_v5, %v2559_v11  ;;  %v15714_v33 = vmul.f32 %v16829_v26, %v2560_v7  ;;  %v15717_v46 = vmul.f32 %v16829_v26, %v2561_v41  ;;  %v16830_v2 = vld [vmem:[#allocation48_spill] sm:$0xff]  ;;  %v16831_v7 = vld [vmem:[#allocation49_spill] sm:$0xff] }
 0x233   : > { %v15720_v57 = vmul.f32 %v16829_v26, %v2562_v63  ;;  %v15722_v25 = vmul.f32 %v2583_v21, %v2563_v8  ;;  %v15724_v32 = vmul.f32 %v2583_v21, %v2564_v1  ;;  %v15726_v22 = vmul.f32 %v2583_v21, %v2565_v45  ;;  %v16832_v21 = vld [vmem:[#allocation35_spill] sm:$0xff] }
 0x234   : > { %v2676_v62 = vpack.c.bf16 %v2622_v42, %v2622_v42  ;;  %v2679_v58 = vpack.c.bf16 %v2625_v30, %v2625_v30  ;;  %v2682_v31 = vpack.c.bf16 %v2628_v56, %v2628_v56  ;;  %v2685_v12 = vpack.c.bf16 %v2631_v55, %v2631_v55  ;;  %v16833_v42 = vld [vmem:[#allocation51_spill] sm:$0xff]  ;;  %v16834_v56 = vld [vmem:[#allocation52_spill] sm:$0xff] }
 0x235   : > { %v2688_v35 = vpack.c.bf16 %v2634_v39, %v2634_v39  ;;  %v2691_v10 = vpack.c.bf16 %v2637_v54, %v2637_v54  ;;  %v2694_v47 = vpack.c.bf16 %v2640_v4, %v2640_v4  ;;  %v2697_v43 = vpack.c.bf16 %v2643_v48, %v2643_v48 }
 0x236   : > { %v2698_v11 = vpack.c.bf16 %v16830_v2, %v16830_v2  ;;  %v2699_v41 = vpack.c.bf16 %v16831_v7, %v16831_v7  ;;  %v2700_v17 = vpack.c.bf16 %v2646_v44, %v2646_v44  ;;  %v2701_v63 = vpack.c.bf16 %v2647_v49, %v2647_v49 }
 0x237   : > { %v2702_v8 = vpack.c.bf16 %v2648_v38, %v2648_v38  ;;  %v2703_v1 = vpack.c.bf16 %v2649_v15, %v2649_v15  ;;  %v2707_v45 = vpack.c.bf16 %v16832_v21, %v16832_v21  ;;  %v2708_v30 = vpack.c.bf16 %v16833_v42, %v16833_v42 }
 0x238   : > { %v2709_v55 = vpack.c.bf16 %v16834_v56, %v16834_v56  ;;  %v2710_v39 = vpack.c.bf16 %v2656_v34, %v2656_v34  ;;  %v2711_v54 = vpack.c.bf16 %v2657_v3, %v2657_v3  ;;  %v2712_v4 = vpack.c.bf16 %v2658_v61, %v2658_v61 }
 0x239   : > { %v2713_v48 = vpack.c.bf16 %v2659_v24, %v2659_v24  ;;  %v2714_v13 = vpack.c.bf16 %v15708_v36, %v15708_v36  ;;  %v2715_v44 = vpack.c.bf16 %v15711_v20, %v15711_v20  ;;  %v2716_v37 = vpack.c.bf16 %v15714_v33, %v15714_v33 }
 0x23a   : > { %v2717_v49 = vpack.c.bf16 %v15717_v46, %v15717_v46  ;;  %v2718_v38 = vpack.c.bf16 %v15720_v57, %v15720_v57  ;;  %v2755_v15 = vpack.c.bf16 %v15722_v25, %v15722_v25  ;;  %v2756_v53 = vpack.c.bf16 %v15724_v32, %v15724_v32 }
 0x23b   : > { %v2757_v34 = vpack.c.bf16 %v15726_v22, %v15726_v22  ;;  %v15754_v3 = vunpack.c.l.b16 %v2676_v62  ;;  %v15756_v61 = vunpack.c.l.b16 %v2679_v58  ;;  %v15758_v5 = vunpack.c.l.b16 %v2682_v31 }
 0x23c   : > { %v15760_v24 = vunpack.c.l.b16 %v2685_v12  ;;  %v15762_v36 = vunpack.c.l.b16 %v2688_v35  ;;  %v15764_v20 = vunpack.c.l.b16 %v2691_v10  ;;  %v15766_v26 = vunpack.c.l.b16 %v2701_v63 }
 0x23d   : > { %16835 = vst [vmem:[#allocation23_spill] sm:$0xff] %v15754_v3  ;;  %v15768_v33 = vunpack.c.l.b16 %v2694_v47  ;;  %v15770_v46 = vunpack.c.l.b16 %v2697_v43  ;;  %v15772_v57 = vunpack.c.l.b16 %v2698_v11  ;;  %v15774_v25 = vunpack.c.l.b16 %v2703_v1 }
 0x23e   : > { %16836 = vst [vmem:[#allocation28_spill] sm:$0xff] %v15756_v61  ;;  %v15776_v32 = vunpack.c.l.b16 %v2699_v41  ;;  %v15778_v22 = vunpack.c.l.b16 %v2700_v17  ;;  %v15780_v62 = vunpack.c.l.b16 %v2702_v8  ;;  %v15782_v58 = vunpack.c.l.b16 %v2707_v45 }
 0x23f   : > { %16837 = vst [vmem:[#allocation29_spill] sm:$0xff] %v15758_v5  ;;  %v15784_v31 = vunpack.c.l.b16 %v2708_v30  ;;  %v15786_v12 = vunpack.c.l.b16 %v2709_v55  ;;  %v15788_v35 = vunpack.c.l.b16 %v2710_v39  ;;  %v2926_v10 = vrot.slane %v15756_v61, 7  ;;  %v16852_v55 = vld [vmem:[#allocation50_spill] sm:$0xff] }
 0x240   : > { %16838 = vst [vmem:[#allocation31_spill] sm:$0xff] %v15760_v24  ;;  %v15791_v47 = vunpack.c.l.b16 %v2711_v54  ;;  %v15793_v43 = vunpack.c.l.b16 %v2712_v4  ;;  %v15795_v2 = vunpack.c.l.b16 %v2713_v48  ;;  %v2940_v11 = vrot.slane %v15766_v26, 7 }
 0x241   : > { %16839 = vst [vmem:[#allocation32_spill] sm:$0xff] %v15762_v36  ;;  %v15798_v7 = vunpack.c.l.b16 %v2714_v13  ;;  %v15800_v41 = vunpack.c.l.b16 %v2715_v44  ;;  %v15802_v17 = vunpack.c.l.b16 %v2716_v37  ;;  %v2968_v63 = vrot.slane %v15774_v25, 7  ;;  %v16854_v13 = vld [vmem:[#allocation36_spill] sm:$0xff] }
 0x242   : > { %16840 = vst [vmem:[#allocation33_spill] sm:$0xff] %v15772_v57  ;;  %v15805_v8 = vunpack.c.l.b16 %v2717_v49  ;;  %v15807_v1 = vunpack.c.l.b16 %v2718_v38  ;;  %v2928_v21 = vrot.slane %v15758_v5, 6  ;;  %v2954_v45 = vrot.slane %v15780_v62, 7  ;;  %v16856_v49 = vld [vmem:[#allocation34_spill] sm:$0xff] }
 0x243   : > { %16841 = vst [vmem:[#allocation37_spill] sm:$0xff] %v15774_v25  ;;  %v15811_v42 = vunpack.c.l.b16 %v2755_v15  ;;  %v2927_v30 = vsel %vm2892_vm11, %v2926_v10, %v15754_v3  ;;  %v2930_v56 = vrot.slane %v15760_v24, 5  ;;  %v2942_v39 = vrot.slane %v16852_v55, 6  ;;  %v16865_v3 = vld [vmem:[#allocation18_spill] sm:$0xff] }
 0x244   : > { %16842 = vst [vmem:[#allocation38_spill] sm:$0xff] %v15776_v32  ;;  %v15817_v54 = vunpack.c.l.b16 %v2756_v53  ;;  %v2941_v4 = vsel %vm2892_vm11, %v2940_v11, %v15772_v57  ;;  %v2944_v48 = vrot.slane %v15782_v58, 5  ;;  %v2970_v44 = vrot.slane %v16854_v13, 6 }
 0x245   : > { %16843 = vst [vmem:[#allocation39_spill] sm:$0xff] %v15784_v31  ;;  %v15823_v37 = vunpack.c.l.b16 %v2757_v34  ;;  %v2956_v38 = vrot.slane %v16856_v49, 6  ;;  %v2969_v15 = vsel %vm2892_vm11, %v2968_v63, %v15778_v22  ;;  %v2972_v10 = vrot.slane %v15786_v12, 5 }
 0x246   : > { %16844 = vst [vmem:[#allocation42_spill] sm:$0xff] %v15786_v12  ;;  %v2929_v53 = vsel %vm2895_vm12, %v2928_v21, %v2927_v30  ;;  %v2932_v9 = vrot.slane %v15762_v36, 4  ;;  %v2955_v11 = vsel %vm2892_vm11, %v2954_v45, %v15776_v32  ;;  %v2958_v60 = vrot.slane %v15784_v31, 5 }
 0x247   : > { %16845 = vst [vmem:[#allocation43_spill] sm:$0xff] %v15788_v35  ;;  %v2931_v34 = vsel %vm2898_vm13, %v2930_v56, %v2929_v53  ;;  %v2934_v59 = vrot.slane %v15764_v20, 3  ;;  %v2943_v27 = vsel %vm2895_vm12, %v2942_v39, %v2941_v4  ;;  %v2946_v63 = vrot.slane %v15788_v35, 4 }
 0x248   : > { %16846 = vst [vmem:[#allocation44_spill] sm:$0xff] %v15793_v43  ;;  %v2945_v12 = vsel %vm2898_vm13, %v2944_v48, %v2943_v27  ;;  %v2948_v21 = vrot.slane %v15795_v2, 3  ;;  %v2971_v30 = vsel %vm2895_vm12, %v2970_v44, %v2969_v15  ;;  %v2974_v13 = vrot.slane %v15793_v43, 4 }
 0x249   : > { %16847 = vst [vmem:[#allocation48_spill] sm:$0xff] %v15795_v2  ;;  %v2957_v45 = vsel %vm2895_vm12, %v2956_v38, %v2955_v11  ;;  %v2960_v31 = vrot.slane %v15791_v47, 4  ;;  %v2973_v56 = vsel %vm2898_vm13, %v2972_v10, %v2971_v30  ;;  %v2976_v53 = vrot.slane %v15800_v41, 3 }
 0x24a   : > { %16848 = vst [vmem:[#allocation49_spill] sm:$0xff] %v15800_v41  ;;  %v2936_v39 = vrot.slane %v15768_v33, 2  ;;  %v2938_v4 = vrot.slane %v15770_v46, 1  ;;  %v2959_v27 = vsel %vm2898_vm13, %v2958_v60, %v2957_v45  ;;  %v2962_v48 = vrot.slane %v15798_v7, 3 }
 0x24b   : > { %16849 = vst [vmem:[#allocation35_spill] sm:$0xff] %v15802_v17  ;;  %v2933_v44 = vsel %vm2901_vm14, %v2932_v9, %v2931_v34  ;;  %v2947_v15 = vsel %vm2901_vm14, %v2946_v63, %v2945_v12  ;;  %v2950_v38 = vrot.slane %v15802_v17, 2  ;;  %v2952_v11 = vrot.slane %v15811_v42, 1 }
 0x24c   : > { %16850 = vst [vmem:[#allocation51_spill] sm:$0xff] %v15807_v1  ;;  %v2935_v10 = vsel %vm2904_vm15, %v2934_v59, %v2933_v44  ;;  %v2949_v30 = vsel %vm2904_vm15, %v2948_v21, %v2947_v15  ;;  %v2975_v41 = vsel %vm2901_vm14, %v2974_v13, %v2973_v56  ;;  %v2978_v43 = vrot.slane %v15807_v1, 2  ;;  %v13016_v44 = vld [vmem:[#allocation4 + $0x144] sm:$0xf0]  ;;  %v13023_v15 = vld [vmem:[#allocation4 + $0x184] sm:$0xf] }
 0x24d   : > { %16851 = vst [vmem:[#allocation52_spill] sm:$0xff] %v15811_v42  ;;  %v2961_v60 = vsel %vm2901_vm14, %v2960_v31, %v2959_v27  ;;  %v2964_v45 = vrot.slane %v15805_v8, 2  ;;  %v2977_v9 = vsel %vm2904_vm15, %v2976_v53, %v2975_v41  ;;  %v2980_v12 = vrot.slane %v15823_v37, 1  ;;  %v9941_v27 = vld [vmem:[#allocation4 + $0x140] sm:$0xf] }
 0x24e   : > { %16853 = vst [vmem:[#allocation50_spill] sm:$0xff] %v15817_v54  ;;  %v16857_v34 = vmax.f32 %v15670_v28, 0.0  ;;  %v2963_v59 = vsel %vm2904_vm15, %v2962_v48, %v2961_v60  ;;  %v2966_v21 = vrot.slane %v15817_v54, 1  ;;  %v3331_v13 = vrot.slane %v15778_v22, 7  ;;  %v10267_v42 = vld [vmem:[#allocation4 + $0x2a8] sm:$0xf0] }
 0x24f   : > { %16855 = vst [vmem:[#allocation54_spill] sm:$0xff] %v15823_v37  ;;  %v16858_v56 = vmax.f32 %v15681_v29, 0.0  ;;  %v2937_v41 = vsel %vm2907_vm1, %v2936_v39, %v2935_v10  ;;  %v3333_v53 = vrot.slane %v15774_v25, 6  ;;  %v3691_v28 = vrot.slane %v15758_v5, 7  ;;  %v12993_v39 = vld [vmem:[#allocation4 + $0x94] sm:$0xf] }
 0x250   : > { %v15865_v63 = vmul.f32 %v15689_v6, %v16857_v34  ;;  %v16860_v34 = vld [vmem:[#allocation47_spill] sm:$0xff]  ;;  %v2939_v54 = vsel %vm2910_vm2, %v2938_v4, %v2937_v41  ;;  %v2951_v29 = vsel %vm2907_vm1, %v2950_v38, %v2949_v30  ;;  %v2965_v5 = vsel %vm2907_vm1, %v2964_v45, %v2963_v59  ;;  %v9933_v30 = vld [vmem:[#allocation4 + $0x130] sm:$0xf] }
 0x251   : > { %v15873_v31 = vmul.f32 %v15689_v6, %v16858_v56  ;;  %v16861_v48 = vpack.c.bf16 %v16860_v34, %v16860_v34  ;;  %v2979_v56 = vsel %vm2907_vm1, %v2978_v43, %v2977_v9  ;;  %v9975_v6 = vld [vmem:[#allocation4 + $0x188] sm:$0xf0]  ;;  %v10145_v10 = vld [vmem:[#allocation4 + $0x98] sm:$0xf0]  ;;  %v15887_v37 = vsel %vm2910_vm2, %v2952_v11, %v2951_v29  ;;  %v13014_v9 = vld [vmem:[#allocation4 + $0x134] sm:$0xf0] }
 0x252   : > { %v2981_v1 = vsel %vm2910_vm2, %v2980_v12, %v2979_v56  ;;  %v3693_v34 = vrot.slane %v15760_v24, 6  ;;  %v10113_v25 = vld [vmem:[#allocation4 + $0x58] sm:$0xf0]  ;;  %v15893_v4 = vsel %vm2910_vm2, %v2966_v21, %v2965_v5  ;;  %v3332_v43 = vsel %vm2892_vm11, %v3331_v13, %v15770_v46  ;;  %v13021_v21 = vld [vmem:[#allocation4 + $0x174] sm:$0xf] }
 0x253   : > { %16859 = vst [vmem:[#allocation34_spill] sm:$0xff] %v15873_v31  ;;  %v15881_v60 = vunpack.c.l.b16 %v16861_v48  ;;  %v12985_v48 = vld [vmem:[#allocation4 + $0x54] sm:$0xf]  ;;  %v15901_v45 = vsel %vm2895_vm12, %v3333_v53, %v3332_v43  ;;  %v3692_v5 = vsel %vm2892_vm11, %v3691_v28, %v15756_v61  ;;  %v9967_v41 = vld [vmem:[#allocation4 + $0x178] sm:$0xf0]  ;;  %v15908_v29 = vpack.c.b16 %v2981_v1, %v2939_v54  ;;  %v16866_v54 = vld [vmem:[#allocation17_spill] sm:$0xff] }
 0x254   : > { %16863 = vst [vmem:[#allocation55_spill] sm:$0xff] %v15901_v45  ;;  %v9942_v13 = vor.u32 %v13016_v44, %v9941_v27  ;;  %v9978_v56 = vor.u32 %v13023_v15, %v9975_v6  ;;  %v10148_v38 = vor.u32 %v12993_v39, %v10145_v10  ;;  %v12991_v11 = vld [vmem:[#allocation4 + $0x84] sm:$0xf]  ;;  %v10137_v24 = vld [vmem:[#allocation4 + $0x88] sm:$0xf0]  ;;  %v15911_v53 = vsel %vm2895_vm12, %v3693_v34, %v3692_v5  ;;  %v16867_v39 = vld [vmem:[#allocation15_spill] sm:$0xff] }
 0x255   : > { %16862 = vst [vmem:[#allocation47_spill] sm:$0xff] %v15881_v60  ;;  %v10116_v45 = vor.u32 %v12985_v48, %v10113_v25  ;;  %v9934_v28 = vor.u32 %v13014_v9, %v9933_v30  ;;  %v9970_v59 = vor.u32 %v13021_v21, %v9967_v41  ;;  %v2096_v1 = vsel %vm1892_vm4, %v16865_v3, -inf  ;;  %v16868_v48 = vld [vmem:[#allocation14_spill] sm:$0xff]  ;;  %v16869_v9 = vld [vmem:[#allocation16_spill] sm:$0xff] }
 0x256   : > { %16864 = vst [vmem:[#allocation56_spill] sm:$0xff] %v15911_v53  ;;  %3176 = vmatpush.bf16.msra.mxu2 %v9942_v13  ;;  %3214 = vmatpush.bf16.msrb.mxu3 %v9978_v56  ;;  %v2117_v6 = vsel %vm1892_vm4, %v16866_v54, -inf  ;;  %v10140_v27 = vor.u32 %v12991_v11, %v10137_v24  ;;  %v2097_v44 = vrot.slane %v2096_v1, 4  ;;  %v2138_v10 = vsel %vm1892_vm4, %v16867_v39, -inf  ;;  %v16870_v41 = vld [vmem:[#allocation24_spill] sm:$0xff]  ;;  %v16871_v56 = vld [vmem:[#allocation26_spill] sm:$0xff] }
 0x257   : > { %3595 = vmatpush.bf16.msra.mxu1 %v10148_v38  ;;  %3577 = vmatpush.bf16.msra.mxu0 %v10116_v45  ;;  %v2118_v15 = vrot.slane %v2117_v6, 4  ;;  %v2139_v34 = vrot.slane %v2138_v10, 4  ;;  %v2159_v30 = vsel %vm1892_vm4, %v16868_v48, -inf  ;;  %v2180_v3 = vsel %vm1892_vm4, %v16869_v9, -inf }
 0x258   : > { %v2098_v21 = vmax.f32 %v2096_v1, %v2097_v44  ;;  %v2160_v45 = vrot.slane %v2159_v30, 4  ;;  %v2181_v11 = vrot.slane %v2180_v3, 4  ;;  %v2201_v13 = vsel %vm1892_vm4, %v16870_v41, -inf }
 0x259   : > { %v2119_v38 = vmax.f32 %v2117_v6, %v2118_v15  ;;  %v2140_v24 = vmax.f32 %v2138_v10, %v2139_v34  ;;  %v2222_v54 = vsel %vm1892_vm4, %v16871_v56, -inf  ;;  %v2202_v9 = vrot.slane %v2201_v13, 4 }
 0x25a   : > { %3177 = vmatpush.bf16.msra.mxu2 %v9934_v28  ;;  %3215 = vmatpush.bf16.msrb.mxu3 %v9970_v59  ;;  %v2099_v39 = vrot.slane %v2098_v21, 2  ;;  %v2161_v25 = vmax.f32 %v2159_v30, %v2160_v45  ;;  %v2182_v5 = vmax.f32 %v2180_v3, %v2181_v11  ;;  %v2223_v1 = vrot.slane %v2222_v54, 4 }
 0x25b   : > { %3596 = vmatpush.bf16.msra.mxu1 %v10140_v27  ;;  %v2120_v48 = vrot.slane %v2119_v38, 2  ;;  %v2141_v12 = vrot.slane %v2140_v24, 2  ;;  %v3303_v6 = vrot.slane %v15772_v57, 7  ;;  %v2203_v15 = vmax.f32 %v2201_v13, %v2202_v9 }
 0x25c   : > { %v2100_v28 = vmax.f32 %v2098_v21, %v2099_v39  ;;  %v2162_v44 = vrot.slane %v2161_v25, 2  ;;  %v2183_v34 = vrot.slane %v2182_v5, 2  ;;  %v2224_v41 = vmax.f32 %v2222_v54, %v2223_v1 }
 0x25d   : > { %v2121_v59 = vmax.f32 %v2119_v38, %v2120_v48  ;;  %v2142_v10 = vmax.f32 %v2140_v24, %v2141_v12  ;;  %v3304_v56 = vsel %vm2892_vm11, %v3303_v6, %v15881_v60  ;;  %v2204_v30 = vrot.slane %v2203_v15, 2 }
 0x25e   : > { %v2101_v27 = vrot.slane %v2100_v28, 1  ;;  %v2163_v61 = vmax.f32 %v2161_v25, %v2162_v44  ;;  %v2184_v31 = vmax.f32 %v2182_v5, %v2183_v34  ;;  %v2225_v3 = vrot.slane %v2224_v41, 2 }
 0x25f   : > { %v2122_v43 = vrot.slane %v2121_v59, 1  ;;  %v2143_v45 = vrot.slane %v2142_v10, 1  ;;  %v3305_v11 = vrot.slane %v15766_v26, 6  ;;  %v2205_v39 = vmax.f32 %v2203_v15, %v2204_v30 }
 0x260   : > { %v2102_v57 = vmax.f32 %v2100_v28, %v2101_v27  ;;  %v2164_v38 = vrot.slane %v2163_v61, 1  ;;  %v2185_v12 = vrot.slane %v2184_v31, 1  ;;  %v2226_v24 = vmax.f32 %v2224_v41, %v2225_v3 }
 0x261   : > { %v2123_v21 = vmax.f32 %v2121_v59, %v2122_v43  ;;  %v2144_v13 = vmax.f32 %v2142_v10, %v2143_v45  ;;  %v3306_v54 = vsel %vm2895_vm12, %v3305_v11, %v3304_v56  ;;  %v2206_v9 = vrot.slane %v2205_v39, 1 }
 0x262   : > { %v2165_v48 = vmax.f32 %v2163_v61, %v2164_v38  ;;  %v2464_v1 = vadd.f32 %v15312_v0, %v2102_v57  ;;  %v2186_v6 = vmax.f32 %v2184_v31, %v2185_v12  ;;  %v2227_v5 = vrot.slane %v2226_v24, 1 }
 0x263   : > { %v2467_v25 = vadd.f32 %v15312_v0, %v2123_v21  ;;  %v2470_v44 = vadd.f32 %v15312_v0, %v2144_v13  ;;  %v3307_v28 = vrot.slane %v16852_v55, 5  ;;  %v2207_v43 = vmax.f32 %v2205_v39, %v2206_v9 }
 0x264   : > { %v2473_v59 = vadd.f32 %v15312_v0, %v2165_v48  ;;  %v2518_v15 = vmax.f32 %v2464_v1, 0.0  ;;  %v2228_v34 = vmax.f32 %v2226_v24, %v2227_v5  ;;  %v2476_v41 = vadd.f32 %v15312_v0, %v2186_v6 }
 0x265   : > { %v2521_v10 = vmax.f32 %v2467_v25, 0.0  ;;  %v2524_v61 = vmax.f32 %v2470_v44, 0.0  ;;  %v3308_v56 = vsel %vm2898_vm13, %v3307_v28, %v3306_v54  ;;  %v2479_v57 = vadd.f32 %v15312_v0, %v2207_v43  ;;  %v12983_v43 = vld [vmem:[#allocation4 + $0x44] sm:$0xf] }
 0x266   : > { %v2527_v27 = vmax.f32 %v2473_v59, 0.0  ;;  %v2620_v31 = vmul.f32 %v16818_v19, %v2518_v15  ;;  %v2482_v45 = vadd.f32 %v15312_v0, %v2228_v34  ;;  %v2530_v3 = vmax.f32 %v2476_v41, 0.0  ;;  %v10105_v59 = vld [vmem:[#allocation4 + $0x48] sm:$0xf0] }
 0x267   : > { %v2623_v30 = vmul.f32 %v16819_v23, %v2521_v10  ;;  %v2626_v11 = vmul.f32 %v16820_v52, %v2524_v61  ;;  %v3309_v21 = vrot.slane %v15782_v58, 4  ;;  %v2533_v38 = vmax.f32 %v2479_v57, 0.0  ;;  %v13061_v61 = vld [vmem:[#allocation4 + $0x2b4] sm:$0xf] }
 0x268   : > { %v2629_v39 = vmul.f32 %v16821_v50, %v2527_v27  ;;  %v2674_v13 = vpack.c.bf16 %v2620_v31, %v2620_v31  ;;  %v2536_v24 = vmax.f32 %v2482_v45, 0.0  ;;  %v2632_v54 = vmul.f32 %v16822_v40, %v2530_v3  ;;  %v9925_v45 = vld [vmem:[#allocation4 + $0x120] sm:$0xf]  ;;  %v13012_v3 = vld [vmem:[#allocation4 + $0x124] sm:$0xf0] }
 0x269   : > { %v2677_v12 = vpack.c.bf16 %v2623_v30, %v2623_v30  ;;  %v2680_v48 = vpack.c.bf16 %v2626_v11, %v2626_v11  ;;  %v3310_v9 = vsel %vm2901_vm14, %v3309_v21, %v3308_v56  ;;  %v2635_v23 = vmul.f32 %v16823_v18, %v2533_v38  ;;  %v10275_v56 = vld [vmem:[#allocation4 + $0x2b8] sm:$0xf0] }
 0x26a   : > { %v2683_v1 = vpack.c.bf16 %v2629_v39, %v2629_v39  ;;  %v2843_v0 = vunpack.c.l.b16 %v2674_v13  ;;  %v2638_v6 = vmul.f32 %v15684_v51, %v2536_v24  ;;  %v2686_v5 = vpack.c.bf16 %v2632_v54, %v2632_v54  ;;  %v16872_v21 = vld [vmem:[#allocation40_spill] sm:$0xff]  ;;  %v9959_v24 = vld [vmem:[#allocation4 + $0x168] sm:$0xf0] }
 0x26b   : > { %v15953_v25 = vunpack.c.l.b16 %v2677_v12  ;;  %v15956_v44 = vunpack.c.l.b16 %v2680_v48  ;;  %v3311_v28 = vrot.slane %v15788_v35, 3  ;;  %v2689_v15 = vpack.c.bf16 %v2635_v23, %v2635_v23  ;;  %v13019_v12 = vld [vmem:[#allocation4 + $0x164] sm:$0xf] }
 0x26c   : > { %v15959_v10 = vunpack.c.l.b16 %v2683_v1  ;;  %v3261_v34 = vrot.slane %v2843_v0, 7  ;;  %v2692_v57 = vpack.c.bf16 %v2638_v6, %v2638_v6  ;;  %v15962_v27 = vunpack.c.l.b16 %v2686_v5  ;;  %v12981_v1 = vld [vmem:[#allocation4 + $0x34] sm:$0xf]  ;;  %v10097_v6 = vld [vmem:[#allocation4 + $0x38] sm:$0xf0] }
 0x26d   : > { %v3263_v41 = vrot.slane %v15953_v25, 6  ;;  %v3265_v31 = vrot.slane %v15956_v44, 5  ;;  %v3312_v30 = vsel %vm2904_vm15, %v3311_v28, %v3310_v9  ;;  %v15966_v11 = vunpack.c.l.b16 %v2689_v15 }
 0x26e   : > { %v3262_v38 = vsel %vm2892_vm11, %v3261_v34, %v16872_v21  ;;  %v3267_v39 = vrot.slane %v15959_v10, 4  ;;  %v3313_v13 = vrot.slane %v15795_v2, 2  ;;  %v15972_v54 = vunpack.c.l.b16 %v2692_v57  ;;  %v13059_v21 = vld [vmem:[#allocation4 + $0x2a4] sm:$0xf] }
 0x26f   : > { %v3264_v48 = vsel %vm2895_vm12, %v3263_v41, %v3262_v38  ;;  %v3269_v23 = vrot.slane %v15962_v27, 3  ;;  %v3315_v9 = vrot.slane %v15802_v17, 1  ;;  %v3271_v28 = vrot.slane %v15966_v11, 2 }
 0x270   : > { %16873 = vst [vmem:[#allocation18_spill] sm:$0xff] %v15972_v54  ;;  %v3266_v5 = vsel %vm2898_vm13, %v3265_v31, %v3264_v48  ;;  %v3314_v15 = vsel %vm2907_vm1, %v3313_v13, %v3312_v30  ;;  %v10108_v34 = vor.u32 %v12983_v43, %v10105_v59  ;;  %v3273_v2 = vrot.slane %v15972_v54, 1 }
 0x271   : > { %v3268_v57 = vsel %vm2901_vm14, %v3267_v39, %v3266_v5  ;;  %v3316_v41 = vsel %vm2910_vm2, %v3315_v9, %v3314_v15  ;;  %v10278_v38 = vor.u32 %v13061_v61, %v10275_v56  ;;  %v9926_v35 = vor.u32 %v13012_v3, %v9925_v45 }
 0x272   : > { %v3270_v17 = vsel %vm2904_vm15, %v3269_v23, %v3268_v57  ;;  %3578 = vmatpush.bf16.msra.mxu0 %v10108_v34  ;;  %v9962_v36 = vor.u32 %v13019_v12, %v9959_v24  ;;  %v10100_v31 = vor.u32 %v12981_v1, %v10097_v6  ;;  %v10270_v53 = vor.u32 %v13059_v21, %v10267_v42  ;;  %v16877_v24 = vld [vmem:[#allocation20_spill] sm:$0xff]  ;;  %v16879_v34 = vld [vmem:[#allocation25_spill] sm:$0xff]  ;;  %v16880_v57 = vld [vmem:[#allocation27_spill] sm:$0xff] }
 0x273   : > { %v3272_v48 = vsel %vm2907_vm1, %v3271_v28, %v3270_v17  ;;  %v2891_v43 = vrot.slane %v15953_v25, 7  ;;  %v2894_v59 = vrot.slane %v15956_v44, 6  ;;  %3178 = vmatpush.bf16.msra.mxu2 %v9926_v35  ;;  %v2897_v39 = vrot.slane %v15959_v10, 5  ;;  %v16876_v35 = vld [vmem:[#allocation13_spill] sm:$0xff] }
 0x274   : > { %v3274_v30 = vsel %vm2910_vm2, %v3273_v2, %v3272_v48  ;;  %3216 = vmatpush.bf16.msrb.mxu3 %v9962_v36  ;;  %v2900_v61 = vrot.slane %v15962_v27, 4  ;;  %v2903_v56 = vrot.slane %v15966_v11, 3  ;;  %v2906_v17 = vrot.slane %v15972_v54, 2  ;;  %v16875_v2 = vld [vmem:[#allocation19_spill] sm:$0xff]  ;;  %v16878_v28 = vld [vmem:[#allocation21_spill] sm:$0xff] }
 0x275   : > { %v15991_v45 = vpack.c.b16 %v3316_v41, %v3274_v30  ;;  %v2893_v3 = vsel %vm2892_vm11, %v2891_v43, %v2843_v0  ;;  %v2909_v42 = vrot.slane %v15881_v60, 1  ;;  %v2103_v36 = vsel %vm1892_vm4, %v16875_v2, -inf  ;;  %v10259_v60 = vld [vmem:[#allocation4 + $0x298] sm:$0xf0] }
 0x276   : > { %3579 = vmatpush.bf16.msra.mxu0 %v10100_v31  ;;  %v2896_v13 = vsel %vm2895_vm12, %v2894_v59, %v2893_v3  ;;  %v2145_v12 = vsel %vm1892_vm4, %v16876_v35, -inf  ;;  %v2166_v23 = vsel %vm1892_vm4, %v16877_v24, -inf  ;;  %v2104_v9 = vrot.slane %v2103_v36, 4 }
 0x277   : > { %16874 = vst [vmem:[#allocation17_spill] sm:$0xff] %v15991_v45  ;;  %3541 = vmatmul.bf16.vlgmr.msrb.gmra.mxu1 %v15991_v45  ;;  %v2899_v0 = vsel %vm2898_vm13, %v2897_v39, %v2896_v13  ;;  %v2146_v1 = vrot.slane %v2145_v12, 4  ;;  %v2167_v6 = vrot.slane %v2166_v23, 4  ;;  %v2187_v15 = vsel %vm1892_vm4, %v16878_v28, -inf }
 0x278   : > { %3977 = vmatpush.bf16.msrb.mxu1 %v10278_v38  ;;  %v2902_v5 = vsel %vm2901_vm14, %v2900_v61, %v2899_v0  ;;  %v2208_v21 = vsel %vm1892_vm4, %v16879_v34, -inf  ;;  %v2229_v41 = vsel %vm1892_vm4, %v16880_v57, -inf  ;;  %v2105_v48 = vmax.f32 %v2103_v36, %v2104_v9  ;;  %v16882_v9 = vld [vmem:[#allocation30_spill] sm:$0xff] }
 0x279   : > { %v2905_v31 = vsel %vm2904_vm15, %v2903_v56, %v2902_v5  ;;  %v2147_v43 = vmax.f32 %v2145_v12, %v2146_v1  ;;  %v2168_v59 = vmax.f32 %v2166_v23, %v2167_v6  ;;  %v2188_v39 = vrot.slane %v2187_v15, 4  ;;  %v13017_v1 = vld [vmem:[#allocation4 + $0x154] sm:$0xf] }
 0x27a   : > { %v2908_v30 = vsel %vm2907_vm1, %v2906_v17, %v2905_v31  ;;  %v2209_v38 = vrot.slane %v2208_v21, 4  ;;  %v2230_v3 = vrot.slane %v2229_v41, 4  ;;  %v2106_v13 = vrot.slane %v2105_v48, 2 }
 0x27b   : > { %v2911_v61 = vsel %vm2910_vm2, %v2909_v42, %v2908_v30  ;;  %v2148_v2 = vrot.slane %v2147_v43, 2  ;;  %v2169_v35 = vrot.slane %v2168_v59, 2  ;;  %v2189_v0 = vmax.f32 %v2187_v15, %v2188_v39  ;;  %v16883_v15 = vld [vmem:[#allocation45_spill] sm:$0xff] }
 0x27c   : > { %3978 = vmatpush.bf16.msrb.mxu1 %v10270_v53  ;;  %v16016_v24 = vpack.c.b16 %v15887_v37, %v2911_v61  ;;  %v2210_v28 = vmax.f32 %v2208_v21, %v2209_v38  ;;  %v2231_v56 = vmax.f32 %v2229_v41, %v2230_v3  ;;  %v2107_v36 = vmax.f32 %v2105_v48, %v2106_v13  ;;  %v9951_v53 = vld [vmem:[#allocation4 + $0x158] sm:$0xf0]  ;;  %v12979_v30 = vld [vmem:[#allocation4 + $0x24] sm:$0xf]  ;;  %v10089_v39 = vld [vmem:[#allocation4 + $0x28] sm:$0xf0] }
 0x27d   : > { %v2149_v12 = vmax.f32 %v2147_v43, %v2148_v2  ;;  %v2170_v23 = vmax.f32 %v2168_v59, %v2169_v35  ;;  %v2250_v17 = vsel %vm1892_vm4, %v16882_v9, -inf  ;;  %v2190_v42 = vrot.slane %v2189_v0, 2  ;;  %v13057_v2 = vld [vmem:[#allocation4 + $0x294] sm:$0xf] }
 0x27e   : > { %16881 = vst [vmem:[#allocation15_spill] sm:$0xff] %v16016_v24  ;;  %3179 = vmatmul.bf16.vlgmr.msra.gmra.mxu2 %v16016_v24  ;;  %v2211_v6 = vrot.slane %v2210_v28, 2  ;;  %v2232_v5 = vrot.slane %v2231_v56, 2  ;;  %v2251_v34 = vrot.slane %v2250_v17, 4  ;;  %v2108_v57 = vrot.slane %v2107_v36, 1 }
 0x27f   : > { %v2150_v37 = vrot.slane %v2149_v12, 1  ;;  %v2171_v31 = vrot.slane %v2170_v23, 1  ;;  %v2191_v41 = vmax.f32 %v2189_v0, %v2190_v42  ;;  %v9954_v13 = vor.u32 %v13017_v1, %v9951_v53  ;;  %v9943_v1 = vld [vmem:[#allocation4 + $0x148] sm:$0xf0] }
 0x280   : > { %v2212_v48 = vmax.f32 %v2210_v28, %v2211_v6  ;;  %v2233_v43 = vmax.f32 %v2231_v56, %v2232_v5  ;;  %v2252_v59 = vmax.f32 %v2250_v17, %v2251_v34  ;;  %v2109_v38 = vmax.f32 %v2107_v36, %v2108_v57 }
 0x281   : > { %v2151_v3 = vmax.f32 %v2149_v12, %v2150_v37  ;;  %v2172_v61 = vmax.f32 %v2170_v23, %v2171_v31  ;;  %v2192_v35 = vrot.slane %v2191_v41, 1  ;;  %3217 = vmatpush.bf16.msrb.mxu3 %v9954_v13  ;;  %v10092_v28 = vor.u32 %v12979_v30, %v10089_v39  ;;  %v13015_v23 = vld [vmem:[#allocation4 + $0x144] sm:$0xf]  ;;  %v13046_v30 = vld [vmem:[#allocation4 + $0x234] sm:$0xf0] }
 0x282   : > { %v2213_v9 = vrot.slane %v2212_v48, 1  ;;  %v2234_v45 = vrot.slane %v2233_v43, 1  ;;  %v2253_v24 = vrot.slane %v2252_v59, 2  ;;  %v2465_v54 = vadd.f32 %v15314_v16, %v2109_v38  ;;  %v10061_v38 = vld [vmem:[#allocation4 + $0x230] sm:$0xf] }
 0x283   : > { %v2471_v21 = vadd.f32 %v15314_v16, %v2151_v3  ;;  %v2474_v0 = vadd.f32 %v15314_v16, %v2172_v61  ;;  %v2193_v56 = vmax.f32 %v2191_v41, %v2192_v35  ;;  %3580 = vmatpush.bf16.msra.mxu0 %v10092_v28  ;;  %v10262_v34 = vor.u32 %v13057_v2, %v10259_v60  ;;  %v10081_v39 = vld [vmem:[#allocation4 + $0x18] sm:$0xf0]  ;;  %v13013_v28 = vld [vmem:[#allocation4 + $0x134] sm:$0xf] }
 0x284   : > { %v2214_v17 = vmax.f32 %v2212_v48, %v2213_v9  ;;  %v2235_v36 = vmax.f32 %v2233_v43, %v2234_v45  ;;  %v2254_v12 = vmax.f32 %v2252_v59, %v2253_v24  ;;  %v2519_v42 = vmax.f32 %v2465_v54, 0.0  ;;  %v13055_v9 = vld [vmem:[#allocation4 + $0x284] sm:$0xf] }
 0x285   : > { %v2525_v6 = vmax.f32 %v2471_v21, 0.0  ;;  %v2528_v5 = vmax.f32 %v2474_v0, 0.0  ;;  %v2477_v57 = vadd.f32 %v15314_v16, %v2193_v56  ;;  %3979 = vmatpush.bf16.msrb.mxu1 %v10262_v34  ;;  %v9946_v54 = vor.u32 %v13015_v23, %v9943_v1  ;;  %v12977_v21 = vld [vmem:[#allocation4 + $0x14] sm:$0xf]  ;;  %v10251_v0 = vld [vmem:[#allocation4 + $0x288] sm:$0xf0] }
 0x286   : > { %v2255_v53 = vrot.slane %v2254_v12, 1  ;;  %v2480_v37 = vadd.f32 %v15314_v16, %v2214_v17  ;;  %v2483_v31 = vadd.f32 %v15314_v16, %v2235_v36  ;;  %v2621_v41 = vmul.f32 %v16818_v19, %v2519_v42  ;;  %v9935_v23 = vld [vmem:[#allocation4 + $0x138] sm:$0xf0]  ;;  %v10053_v1 = vld [vmem:[#allocation4 + $0x220] sm:$0xf] }
 0x287   : > { %v2627_v45 = vmul.f32 %v16820_v52, %v2525_v6  ;;  %v2630_v24 = vmul.f32 %v16821_v50, %v2528_v5  ;;  %v2531_v60 = vmax.f32 %v2477_v57, 0.0  ;;  %3218 = vmatpush.bf16.msrb.mxu3 %v9946_v54  ;;  %v10062_v2 = vor.u32 %v13046_v30, %v10061_v38  ;;  %v13044_v42 = vld [vmem:[#allocation4 + $0x224] sm:$0xf0]  ;;  %v10073_v34 = vld [vmem:[#allocation4 + $0x8] sm:$0xf0] }
 0x288   : > { %v2256_v48 = vmax.f32 %v2254_v12, %v2255_v53  ;;  %v2534_v43 = vmax.f32 %v2480_v37, 0.0  ;;  %v2537_v59 = vmax.f32 %v2483_v31, 0.0  ;;  %v2675_v3 = vpack.c.bf16 %v2621_v41, %v2621_v41 }
 0x289   : > { %v2681_v61 = vpack.c.bf16 %v2627_v45, %v2627_v45  ;;  %v2684_v13 = vpack.c.bf16 %v2630_v24, %v2630_v24  ;;  %v2633_v19 = vmul.f32 %v16822_v40, %v2531_v60  ;;  %3205 = vmatpush.bf16.msrb.mxu2 %v10062_v2  ;;  %v10084_v12 = vor.u32 %v12977_v21, %v10081_v39 }
 0x28a   : > { %v2486_v35 = vadd.f32 %v15314_v16, %v2256_v48  ;;  %v2636_v52 = vmul.f32 %v16823_v18, %v2534_v43  ;;  %v2639_v50 = vmul.f32 %v15684_v51, %v2537_v59  ;;  %v2844_v56 = vunpack.c.l.b16 %v2675_v3  ;;  %v12975_v18 = vld [vmem:[#allocation4 + $0x4] sm:$0xf] }
 0x28b   : > { %v16035_v17 = vunpack.c.l.b16 %v2681_v61  ;;  %v16037_v36 = vunpack.c.l.b16 %v2684_v13  ;;  %v2687_v6 = vpack.c.bf16 %v2633_v19, %v2633_v19  ;;  %v16884_v51 = vrot.slane %v16883_v15, 7  ;;  %3581 = vmatpush.bf16.msra.mxu0 %v10084_v12  ;;  %v13053_v12 = vld [vmem:[#allocation4 + $0x274] sm:$0xf] }
 0x28c   : > { %v2540_v16 = vmax.f32 %v2486_v35, 0.0  ;;  %v2690_v40 = vpack.c.bf16 %v2636_v52, %v2636_v52  ;;  %v2693_v5 = vpack.c.bf16 %v2639_v50, %v2639_v50  ;;  %v10254_v31 = vor.u32 %v13055_v9, %v10251_v0  ;;  %v16885_v9 = vld [vmem:[#allocation41_spill] sm:$0xff] }
 0x28d   : > { %v2913_v53 = vsel %vm2892_vm11, %v16884_v51, %v2844_v56  ;;  %v2914_v57 = vrot.slane %v16035_v17, 6  ;;  %v2916_v37 = vrot.slane %v16037_v36, 5  ;;  %v16045_v30 = vunpack.c.l.b16 %v2687_v6 }
 0x28e   : > { %v2642_v38 = vmul.f32 %v16824_v14, %v2540_v16  ;;  %v16047_v41 = vunpack.c.l.b16 %v2690_v40  ;;  %v16049_v45 = vunpack.c.l.b16 %v2693_v5  ;;  %3980 = vmatpush.bf16.msrb.mxu1 %v10254_v31  ;;  %v9938_v54 = vor.u32 %v13013_v28, %v9935_v23  ;;  %v10243_v23 = vld [vmem:[#allocation4 + $0x278] sm:$0xf0]  ;;  %v13045_v40 = vld [vmem:[#allocation4 + $0x234] sm:$0xf]  ;;  %v13082_v31 = vld [vmem:[#allocation4 + $0x354] sm:$0xf0] }
 0x28f   : > { %v2915_v24 = vsel %vm2895_vm12, %v2914_v57, %v2913_v53  ;;  %v10054_v21 = vor.u32 %v13044_v42, %v10053_v1  ;;  %v10076_v48 = vor.u32 %v12975_v18, %v10073_v34  ;;  %v2918_v59 = vrot.slane %v16045_v30, 4  ;;  %v10063_v5 = vld [vmem:[#allocation4 + $0x238] sm:$0xf0] }
 0x290   : > { %v2696_v60 = vpack.c.bf16 %v2642_v38, %v2642_v38  ;;  %v2917_v43 = vsel %vm2898_vm13, %v2916_v37, %v2915_v24  ;;  %v2920_v39 = vrot.slane %v16047_v41, 3  ;;  %v2922_v14 = vrot.slane %v16049_v45, 2  ;;  %3219 = vmatpush.bf16.msrb.mxu3 %v9938_v54  ;;  %v16886_v53 = vld [vmem:[#allocation39_spill] sm:$0xff]  ;;  %v10353_v37 = vld [vmem:[#allocation4 + $0x350] sm:$0xf] }
 0x291   : > { %3206 = vmatpush.bf16.msrb.mxu2 %v10054_v21  ;;  %v3275_v3 = vrot.slane %v2844_v56, 7  ;;  %v3277_v61 = vrot.slane %v16883_v15, 6  ;;  %v3279_v13 = vrot.slane %v16035_v17, 5  ;;  %v2919_v35 = vsel %vm2901_vm14, %v2918_v59, %v2917_v43  ;;  %3582 = vmatpush.bf16.msra.mxu0 %v10076_v48  ;;  %v13011_v38 = vld [vmem:[#allocation4 + $0x124] sm:$0xf] }
 0x292   : > { %v16058_v2 = vunpack.c.l.b16 %v2696_v60  ;;  %v3281_v19 = vrot.slane %v16037_v36, 4  ;;  %v3283_v52 = vrot.slane %v16045_v30, 3  ;;  %v2921_v50 = vsel %vm2904_vm15, %v2920_v39, %v2919_v35  ;;  %v9927_v24 = vld [vmem:[#allocation4 + $0x128] sm:$0xf0]  ;;  %v13051_v43 = vld [vmem:[#allocation4 + $0x264] sm:$0xf] }
 0x293   : > { %v3276_v0 = vsel %vm2892_vm11, %v3275_v3, %v16885_v9  ;;  %v3285_v28 = vrot.slane %v16047_v41, 2  ;;  %v3287_v56 = vrot.slane %v16049_v45, 1  ;;  %v2923_v1 = vsel %vm2907_vm1, %v2922_v14, %v2921_v50  ;;  %v10235_v59 = vld [vmem:[#allocation4 + $0x268] sm:$0xf0] }
 0x294   : > { %v2924_v42 = vrot.slane %v16058_v2, 1  ;;  %v3278_v16 = vsel %vm2895_vm12, %v3277_v61, %v3276_v0  ;;  %v3317_v6 = vrot.slane %v15776_v32, 7  ;;  %v3319_v34 = vrot.slane %v15780_v62, 6  ;;  %v10055_v35 = vld [vmem:[#allocation4 + $0x228] sm:$0xf0]  ;;  %10067 = vmatmul.msk.bf16.vlgmr.msrb.gmra.mxu2 %vm3167_vm3, %v15908_v29 }
 0x295   : > { %v3280_v18 = vsel %vm2898_vm13, %v3279_v13, %v3278_v16  ;;  %v3321_v51 = vrot.slane %v16856_v49, 5  ;;  %v3323_v57 = vrot.slane %v16886_v53, 4  ;;  %v3325_v60 = vrot.slane %v15791_v47, 3  ;;  %v13043_v13 = vld [vmem:[#allocation4 + $0x224] sm:$0xf] }
 0x296   : > { %v2925_v54 = vsel %vm2910_vm2, %v2924_v42, %v2923_v1  ;;  %v3282_v21 = vsel %vm2901_vm14, %v3281_v19, %v3280_v18  ;;  %v3318_v48 = vsel %vm2892_vm11, %v3317_v6, %v16058_v2  ;;  %v3327_v61 = vrot.slane %v15798_v7, 2  ;;  %v10345_v1 = vld [vmem:[#allocation4 + $0x340] sm:$0xf]  ;;  %v13080_v42 = vld [vmem:[#allocation4 + $0x344] sm:$0xf0] }
 0x297   : > { %v16082_v39 = vpack.c.b16 %v15893_v4, %v2925_v54  ;;  %v3284_v14 = vsel %vm2904_vm15, %v3283_v52, %v3282_v21  ;;  %v3320_v3 = vsel %vm2895_vm12, %v3319_v34, %v3318_v48  ;;  %v3329_v9 = vrot.slane %v15805_v8, 1  ;;  %v13006_v18 = vld [vmem:[#allocation4 + $0xf4] sm:$0xf0]  ;;  %v10207_v54 = vld [vmem:[#allocation4 + $0x110] sm:$0xf] }
 0x298   : > { %v3286_v19 = vsel %vm2907_vm1, %v3285_v28, %v3284_v14  ;;  %v3322_v50 = vsel %vm2898_vm13, %v3321_v51, %v3320_v3  ;;  %v10246_v0 = vor.u32 %v13053_v12, %v10243_v23  ;;  %v16888_v4 = vrot.slane %v16852_v55, 7  ;;  %v10191_v28 = vld [vmem:[#allocation4 + $0xf0] sm:$0xf]  ;;  %v13010_v55 = vld [vmem:[#allocation4 + $0x114] sm:$0xf0] }
 0x299   : > { %16887 = vst [vmem:[#allocation14_spill] sm:$0xff] %v16082_v39  ;;  %3193 = vmatmul.bf16.vlgmr.msra.gmra.mxu3 %v16082_v39  ;;  %3235 = vmatmul.bf16.vlgmr.msrb.gmra.mxu0 %v16082_v39  ;;  %v3324_v16 = vsel %vm2901_vm14, %v3323_v57, %v3322_v50  ;;  %v10066_v6 = vor.u32 %v13045_v40, %v10063_v5  ;;  %v13049_v5 = vld [vmem:[#allocation4 + $0x254] sm:$0xf]  ;;  %v10227_v14 = vld [vmem:[#allocation4 + $0x258] sm:$0xf0] }
 0x29a   : > { %v3706_v52 = vsel %vm2892_vm11, %v16888_v4, %v15766_v26  ;;  %v3326_v34 = vsel %vm2904_vm15, %v3325_v60, %v3324_v16  ;;  %3981 = vmatpush.bf16.msrb.mxu1 %v10246_v0  ;;  %v10354_v12 = vor.u32 %v13082_v31, %v10353_v37  ;;  %v9930_v23 = vor.u32 %v13011_v38, %v9927_v24  ;;  %v10199_v50 = vld [vmem:[#allocation4 + $0x100] sm:$0xf]  ;;  %v13146_v32 = vld [vmem:[#allocation4 + $0x554] sm:$0xf0] }
 0x29b   : > { %v10238_v51 = vor.u32 %v13051_v43, %v10235_v59  ;;  %v16889_v26 = vrot.slane %v15782_v58, 6  ;;  %v3288_v48 = vsel %vm2910_vm2, %v3287_v56, %v3286_v19  ;;  %v3328_v57 = vsel %vm2907_vm1, %v3327_v61, %v3326_v34  ;;  %3247 = vmatpush.bf16.msra.mxu2 %v10066_v6  ;;  %v10183_v56 = vld [vmem:[#allocation4 + $0xe0] sm:$0xf]  ;;  %v13004_v59 = vld [vmem:[#allocation4 + $0xe4] sm:$0xf0] }
 0x29c   : > { %v10058_v40 = vor.u32 %v13043_v13, %v10055_v35  ;;  %v3330_v60 = vsel %vm2910_vm2, %v3329_v9, %v3328_v57  ;;  %3969 = vmatpush.bf16.msrb.mxu0 %v10354_v12  ;;  %3220 = vmatpush.bf16.msrb.mxu3 %v9930_v23  ;;  %v10346_v37 = vor.u32 %v13080_v42, %v10345_v1  ;;  %v3663_v38 = vrot.slane %v15956_v44, 7  ;;  %v13008_v9 = vld [vmem:[#allocation4 + $0x104] sm:$0xf0]  ;;  %v16891_v0 = vld [vmem:[#allocation56_spill] sm:$0xff]  ;;  %v10219_v34 = vld [vmem:[#allocation4 + $0x248] sm:$0xf0] }
 0x29d   : > { %v3708_v21 = vsel %vm2895_vm12, %v16889_v26, %v3706_v52  ;;  %v10192_v31 = vor.u32 %v13006_v18, %v10191_v28  ;;  %v3697_v58 = vrot.slane %v15764_v20, 4  ;;  %v16107_v43 = vpack.c.b16 %v3330_v60, %v3288_v48  ;;  %v16892_v1 = vld [vmem:[#allocation32_spill] sm:$0xff]  ;;  %v16894_v52 = vld [vmem:[#allocation43_spill] sm:$0xff]  ;;  %v10483_v26 = vld [vmem:[#allocation4 + $0x570] sm:$0xf] }
 0x29e   : > { %v10208_v3 = vor.u32 %v13010_v55, %v10207_v54  ;;  %v16890_v61 = vpack.c.bf16 %v15865_v63, %v15865_v63  ;;  %3982 = vmatpush.bf16.msrb.mxu1 %v10238_v51  ;;  %v10230_v19 = vor.u32 %v13049_v5, %v10227_v14  ;;  %v16893_v42 = vrot.slane %v16892_v1, 5  ;;  %v16896_v63 = vld [vmem:[#allocation35_spill] sm:$0xff]  ;;  %v13047_v18 = vld [vmem:[#allocation4 + $0x244] sm:$0xf]  ;;  %v10175_v14 = vld [vmem:[#allocation4 + $0xd0] sm:$0xf] }
 0x29f   : > { %v16895_v16 = vrot.slane %v16894_v52, 5  ;;  %v3713_v28 = vrot.slane %v16896_v63, 3  ;;  %3597 = vmatmul.bf16.vlgmr.msra.gmra.mxu1 %v16107_v43  ;;  %3248 = vmatpush.bf16.msra.mxu2 %v10058_v40  ;;  %v3665_v12 = vrot.slane %v15959_v10, 6  ;;  %v16897_v23 = vld [vmem:[#allocation48_spill] sm:$0xff]  ;;  %v10184_v55 = vor.u32 %v13004_v59, %v10183_v56  ;;  %v13150_v48 = vld [vmem:[#allocation4 + $0x574] sm:$0xf0] }
 0x2a0   : > { %v16114_v13 = vunpack.c.l.b16 %v16890_v61  ;;  %v3696_v4 = vsel %vm2898_vm13, %v16893_v42, %v16891_v0  ;;  %v16898_v51 = vrot.slane %v16897_v23, 4  ;;  %3970 = vmatpush.bf16.msrb.mxu0 %v10346_v37  ;;  %v3667_v57 = vrot.slane %v15962_v27, 5  ;;  %v16899_v5 = vld [vmem:[#allocation36_spill] sm:$0xff]  ;;  %3567 = vmatpush.bf16.msra.mxu3 %v10208_v3  ;;  %v13002_v60 = vld [vmem:[#allocation4 + $0xd4] sm:$0xf0]  ;;  %v16901_v59 = vld [vmem:[#allocation42_spill] sm:$0xff] }
 0x2a1   : > { %v3710_v6 = vsel %vm2898_vm13, %v16895_v16, %v3708_v21  ;;  %v3664_v21 = vsel %vm2892_vm11, %v3663_v38, %v15953_v25  ;;  %v3733_v40 = vrot.slane %v16899_v5, 7  ;;  %v10200_v10 = vor.u32 %v13008_v9, %v10199_v50  ;;  %v16900_v37 = vld [vmem:[#allocation52_spill] sm:$0xff]  ;;  %v13077_v52 = vld [vmem:[#allocation4 + $0x334] sm:$0xf] }
 0x2a2   : > { %v3712_v54 = vsel %vm2901_vm14, %v16898_v51, %v3710_v6  ;;  %v3666_v61 = vsel %vm2895_vm12, %v3665_v12, %v3664_v21  ;;  %v3669_v0 = vrot.slane %v15966_v11, 4  ;;  %v3717_v56 = vrot.slane %v16114_v13, 1  ;;  %3983 = vmatpush.bf16.msrb.mxu1 %v10230_v19  ;;  %v16902_v27 = vld [vmem:[#allocation34_spill] sm:$0xff]  ;;  %v10339_v11 = vld [vmem:[#allocation4 + $0x338] sm:$0xf0] }
 0x2a3   : > { %3547 = vmatpush.bf16.msrb.mxu2 %v10192_v31  ;;  %v3715_v31 = vrot.slane %v16900_v37, 2  ;;  %v3735_v42 = vrot.slane %v16901_v59, 6  ;;  %v10222_v25 = vor.u32 %v13047_v18, %v10219_v34  ;;  %v16903_v38 = vpack.c.bf16 %v16902_v27, %v16902_v27  ;;  %v13009_v6 = vld [vmem:[#allocation4 + $0x114] sm:$0xf]  ;;  %v10209_v63 = vld [vmem:[#allocation4 + $0x118] sm:$0xf0] }
 0x2a4   : > { %v16146_v50 = vsel %vm2901_vm14, %v3697_v58, %v3696_v4  ;;  %v3714_v9 = vsel %vm2904_vm15, %v3713_v28, %v3712_v54  ;;  %v10484_v16 = vor.u32 %v13150_v48, %v10483_v26  ;;  %v16904_v13 = vld [vmem:[#allocation44_spill] sm:$0xff]  ;;  %v10176_v23 = vor.u32 %v13002_v60, %v10175_v14  ;;  %v16905_v18 = vld [vmem:[#allocation18_spill] sm:$0xff]  ;;  %v13148_v21 = vld [vmem:[#allocation4 + $0x564] sm:$0xf0]  ;;  %3568 = vmatpush.bf16.msra.mxu3 %v10200_v10 }
 0x2a5   : > { %v16143_v3 = vunpack.c.l.b16 %v16903_v38  ;;  %v3737_v12 = vrot.slane %v16904_v13, 5  ;;  %v3668_v19 = vsel %vm2898_vm13, %v3667_v57, %v3666_v61  ;;  %v3671_v34 = vrot.slane %v16905_v18, 3  ;;  %v10475_v51 = vld [vmem:[#allocation4 + $0x560] sm:$0xf]  ;;  %v16906_v37 = vld [vmem:[#allocation37_spill] sm:$0xff]  ;;  %v16908_v54 = vld [vmem:[#allocation47_spill] sm:$0xff]  ;;  %10068 = vmatmul.msk.bf16.vlgmr.msra.gmra.mxu2 %vm3167_vm3, %v15908_v29 }
 0x2a6   : > { %v3734_v58 = vsel %vm2892_vm11, %v3733_v40, %v16906_v37  ;;  %v16907_v4 = vld [vmem:[#allocation49_spill] sm:$0xff]  ;;  %v3670_v28 = vsel %vm2901_vm14, %v3669_v0, %v3668_v19  ;;  %v3673_v26 = vrot.slane %v16908_v54, 2  ;;  %v10167_v48 = vld [vmem:[#allocation4 + $0xc0] sm:$0xf]  ;;  %v16909_v14 = vld [vmem:[#allocation51_spill] sm:$0xff]  ;;  %v10342_v60 = vor.u32 %v13077_v52, %v10339_v11  ;;  %3984 = vmatpush.bf16.msrb.mxu1 %v10222_v25 }
 0x2a7   : > { %3548 = vmatpush.bf16.msrb.mxu2 %v10184_v55  ;;  %v3739_v27 = vrot.slane %v16907_v4, 4  ;;  %v13000_v38 = vld [vmem:[#allocation4 + $0xc4] sm:$0xf0]  ;;  %v3736_v55 = vsel %vm2895_vm12, %v3735_v42, %v3734_v58  ;;  %v3741_v57 = vrot.slane %v16909_v14, 3  ;;  %v13075_v61 = vld [vmem:[#allocation4 + $0x324] sm:$0xf]  ;;  %v10212_v44 = vor.u32 %v13009_v6, %v10209_v63 }
 0x2a8   : > { %v10331_v18 = vld [vmem:[#allocation4 + $0x328] sm:$0xf0]  ;;  %v3716_v40 = vsel %vm2907_vm1, %v3715_v31, %v3714_v9  ;;  %v10476_v10 = vor.u32 %v13148_v21, %v10475_v51  ;;  %v13007_v0 = vld [vmem:[#allocation4 + $0x104] sm:$0xf]  ;;  %v3672_v42 = vsel %vm2904_vm15, %v3671_v34, %v3670_v28  ;;  %v10168_v52 = vor.u32 %v13000_v38, %v10167_v48  ;;  %v10467_v11 = vld [vmem:[#allocation4 + $0x550] sm:$0xf] }
 0x2a9   : > { %v16910_v37 = vld [vmem:[#allocation54_spill] sm:$0xff]  ;;  %v16911_v54 = vld [vmem:[#allocation28_spill] sm:$0xff]  ;;  %v16912_v58 = vld [vmem:[#allocation33_spill] sm:$0xff]  ;;  %v3335_v25 = vrot.slane %v16899_v5, 5  ;;  %v3738_v31 = vsel %vm2898_vm13, %v3737_v12, %v3736_v55  ;;  %v10334_v6 = vor.u32 %v13075_v61, %v10331_v18  ;;  %v3674_v63 = vsel %vm2907_vm1, %v3673_v26, %v3672_v42 }
 0x2aa   : > { %v3743_v35 = vrot.slane %v16910_v37, 2  ;;  %4291 = vmatpush.bf16.msra.mxu1 %v10484_v16  ;;  %v10201_v19 = vld [vmem:[#allocation4 + $0x108] sm:$0xf0]  ;;  %v3291_v24 = vrot.slane %v16911_v54, 6  ;;  %v3675_v39 = vrot.slane %v16912_v58, 1  ;;  %v16913_v9 = vld [vmem:[#allocation15_spill] sm:$0xff]  ;;  %v3718_v21 = vsel %vm2910_vm2, %v3717_v56, %v3716_v40 }
 0x2ab   : > { %3549 = vmatpush.bf16.msrb.mxu2 %v10176_v23  ;;  %3221 = vmatmul.bf16.vlgmr.msrb.gmra.mxu3 %v16913_v9  ;;  %v16914_v16 = vld [vmem:[#allocation17_spill] sm:$0xff]  ;;  %v10159_v51 = vld [vmem:[#allocation4 + $0xb0] sm:$0xf]  ;;  %v12998_v23 = vld [vmem:[#allocation4 + $0xb4] sm:$0xf0]  ;;  %v3337_v34 = vrot.slane %v16901_v59, 4  ;;  %v10204_v28 = vor.u32 %v13007_v0, %v10201_v19  ;;  %v3740_v61 = vsel %vm2901_vm14, %v3739_v27, %v3738_v31  ;;  %v10468_v54 = vor.u32 %v13146_v32, %v10467_v11 }
 0x2ac   : > { %3583 = vmatmul.bf16.vlgmr.msra.gmra.mxu0 %v16914_v16  ;;  %3609 = vmatpush.bf16.msrb.mxu3 %v10212_v44  ;;  %v16915_v48 = vld [vmem:[#allocation46_spill] sm:$0xff]  ;;  %v16916_v5 = vld [vmem:[#allocation23_spill] sm:$0xff]  ;;  %v16918_v55 = vld [vmem:[#allocation29_spill] sm:$0xff]  ;;  %v3676_v44 = vsel %vm2910_vm2, %v3675_v39, %v3674_v63  ;;  %v10160_v56 = vor.u32 %v12998_v23, %v10159_v51  ;;  %v3339_v19 = vrot.slane %v16904_v13, 3  ;;  %v3719_v27 = vrot.slane %v16856_v49, 7 }
 0x2ad   : > { %3991 = vmatpush.bf16.msra.mxu0 %v10342_v60  ;;  %v16917_v38 = vrot.slane %v16916_v5, 7  ;;  %v3293_v37 = vrot.slane %v16918_v55, 5  ;;  %v13073_v18 = vld [vmem:[#allocation4 + $0x314] sm:$0xf]  ;;  %v10323_v26 = vld [vmem:[#allocation4 + $0x318] sm:$0xf0]  ;;  %v16184_v31 = vpack.c.b16 %v3718_v21, %v3676_v44 }
 0x2ae   : > { %4292 = vmatpush.bf16.msra.mxu1 %v10476_v10  ;;  %v16919_v60 = vld [vmem:[#allocation31_spill] sm:$0xff]  ;;  %v10459_v58 = vld [vmem:[#allocation4 + $0x540] sm:$0xf]  ;;  %v3341_v39 = vrot.slane %v16907_v4, 2  ;;  %v12996_v10 = vld [vmem:[#allocation4 + $0xa4] sm:$0xf0]  ;;  %v10326_v11 = vor.u32 %v13073_v18, %v10323_v26 }
 0x2af   : > { %v3290_v12 = vsel %vm2892_vm11, %v16917_v38, %v16915_v48  ;;  %v3295_v42 = vrot.slane %v16919_v60, 4  ;;  %3550 = vmatpush.bf16.msrb.mxu2 %v10168_v52  ;;  %v16920_v40 = vld [vmem:[#allocation55_spill] sm:$0xff]  ;;  %v13144_v48 = vld [vmem:[#allocation4 + $0x544] sm:$0xf0]  ;;  %v3742_v52 = vsel %vm2904_vm15, %v3741_v57, %v3740_v61  ;;  %v3745_v51 = vrot.slane %v16143_v3, 1  ;;  %3985 = vmatmul.bf16.vlgmr.msrb.gmra.mxu1 %v16184_v31  ;;  %v16923_v3 = vld [vmem:[#allocation22_spill] sm:$0xff] }
 0x2b0   : > { %v3292_v59 = vsel %vm2895_vm12, %v3291_v24, %v3290_v12  ;;  %v3336_v0 = vsel %vm2898_vm13, %v3335_v25, %v16920_v40  ;;  %v10151_v24 = vld [vmem:[#allocation4 + $0xa0] sm:$0xf]  ;;  %3610 = vmatpush.bf16.msrb.mxu3 %v10204_v28  ;;  %v3297_v25 = vrot.slane %v16892_v1, 3  ;;  %v3744_v63 = vsel %vm2907_vm1, %v3743_v35, %v3742_v52  ;;  %v13071_v23 = vld [vmem:[#allocation4 + $0x304] sm:$0xf] }
 0x2b1   : > { %v3338_v32 = vsel %vm2901_vm14, %v3337_v34, %v3336_v0  ;;  %3992 = vmatpush.bf16.msra.mxu0 %v10334_v6  ;;  %v3294_v13 = vsel %vm2898_vm13, %v3293_v37, %v3292_v59  ;;  %v10315_v34 = vld [vmem:[#allocation4 + $0x308] sm:$0xf0]  ;;  %v3299_v21 = vrot.slane %v15764_v20, 2  ;;  %v3343_v6 = vrot.slane %v16909_v14, 1  ;;  %v10451_v5 = vld [vmem:[#allocation4 + $0x530] sm:$0xf] }
 0x2b2   : > { %v3296_v4 = vsel %vm2901_vm14, %v3295_v42, %v3294_v13  ;;  %4293 = vmatpush.bf16.msra.mxu1 %v10468_v54  ;;  %v3340_v57 = vsel %vm2904_vm15, %v3339_v19, %v3338_v32  ;;  %v10460_v28 = vor.u32 %v13144_v48, %v10459_v58  ;;  %v10152_v1 = vor.u32 %v12996_v10, %v10151_v24  ;;  %v16921_v35 = vld [vmem:[#allocation53_spill] sm:$0xff]  ;;  %v13142_v61 = vld [vmem:[#allocation4 + $0x534] sm:$0xf0]  ;;  %v10143_v18 = vld [vmem:[#allocation4 + $0x90] sm:$0xf] }
 0x2b3   : > { %3551 = vmatpush.bf16.msrb.mxu2 %v10160_v56  ;;  %v16922_v38 = vmax.f32 %v16921_v35, 0.0  ;;  %v16924_v55 = vrot.slane %v15768_v33, 3  ;;  %v3342_v20 = vsel %vm2907_vm1, %v3341_v39, %v3340_v57  ;;  %v12994_v26 = vld [vmem:[#allocation4 + $0x94] sm:$0xf0]  ;;  %v16925_v14 = vrot.slane %v15770_v46, 2 }
 0x2b4   : > { %v10318_v59 = vor.u32 %v13071_v23, %v10315_v34  ;;  %v3298_v60 = vsel %vm2904_vm15, %v3297_v25, %v3296_v4  ;;  %v3301_v42 = vrot.slane %v15768_v33, 1  ;;  %v10337_v44 = vld [vmem:[#allocation4 + $0x330] sm:$0xf]  ;;  %v3746_v56 = vsel %vm2910_vm2, %v3745_v51, %v3744_v63  ;;  %v13078_v40 = vld [vmem:[#allocation4 + $0x334] sm:$0xf0] }
 0x2b5   : > { %v16203_v12 = vmul.f32 %v16923_v3, %v16922_v38  ;;  %v3700_v37 = vsel %vm2904_vm15, %v16924_v55, %v16146_v50  ;;  %3993 = vmatpush.bf16.msra.mxu0 %v10326_v11  ;;  %v3300_v50 = vsel %vm2907_vm1, %v3299_v21, %v3298_v60  ;;  %v13069_v0 = vld [vmem:[#allocation4 + $0x2f4] sm:$0xf]  ;;  %v10307_v19 = vld [vmem:[#allocation4 + $0x2f8] sm:$0xf0]  ;;  %v3721_v58 = vrot.slane %v16886_v53, 6 }
 0x2b6   : > { %v3702_v54 = vsel %vm2907_vm1, %v16925_v14, %v3700_v37  ;;  %v3344_v46 = vsel %vm2910_vm2, %v3343_v6, %v3342_v20  ;;  %4294 = vmatpush.bf16.msra.mxu1 %v10460_v28  ;;  %v10452_v48 = vor.u32 %v13142_v61, %v10451_v5  ;;  %v10144_v32 = vor.u32 %v12994_v26, %v10143_v18  ;;  %v10443_v39 = vld [vmem:[#allocation4 + $0x520] sm:$0xf]  ;;  %v13076_v11 = vld [vmem:[#allocation4 + $0x324] sm:$0xf0]  ;;  %v10273_v34 = vld [vmem:[#allocation4 + $0x2b0] sm:$0xf] }
 0x2b7   : > { %3552 = vmatpush.bf16.msrb.mxu2 %v10152_v1  ;;  %v3618_v33 = vpack.c.bf16 %v16203_v12, %v16203_v12  ;;  %v16926_v24 = vrot.slane %v15778_v22, 1  ;;  %v10329_v52 = vld [vmem:[#allocation4 + $0x320] sm:$0xf]  ;;  %v13140_v13 = vld [vmem:[#allocation4 + $0x524] sm:$0xf0]  ;;  %v3302_v53 = vsel %vm2910_vm2, %v3301_v42, %v3300_v50  ;;  %v10338_v51 = vor.u32 %v13078_v40, %v10337_v44 }
 0x2b8   : > { %v10135_v25 = vld [vmem:[#allocation4 + $0x80] sm:$0xf]  ;;  %v12992_v63 = vld [vmem:[#allocation4 + $0x84] sm:$0xf0]  ;;  %v10310_v23 = vor.u32 %v13069_v0, %v10307_v19  ;;  %v13062_v4 = vld [vmem:[#allocation4 + $0x2b4] sm:$0xf0]  ;;  %v16229_v22 = vpack.c.b16 %v3344_v46, %v3302_v53  ;;  %v3720_v35 = vsel %vm2892_vm11, %v3719_v27, %v15780_v62  ;;  %v10330_v62 = vor.u32 %v13076_v11, %v10329_v52 }
 0x2b9   : > { %v3704_v10 = vsel %vm2910_vm2, %v16926_v24, %v3702_v54  ;;  %3994 = vmatpush.bf16.msra.mxu0 %v10318_v59  ;;  %v3677_v21 = vrot.slane %v16035_v17, 7  ;;  %v3723_v57 = vrot.slane %v15791_v47, 5  ;;  %v13067_v28 = vld [vmem:[#allocation4 + $0x2e4] sm:$0xf]  ;;  %v10299_v1 = vld [vmem:[#allocation4 + $0x2e8] sm:$0xf0]  ;;  %v10444_v17 = vor.u32 %v13140_v13, %v10443_v39 }
 0x2ba   : > { %v16227_v6 = vpack.c.b16 %v3746_v56, %v3704_v10  ;;  %v3679_v5 = vrot.slane %v16037_v36, 6  ;;  %v3725_v38 = vrot.slane %v15798_v7, 4  ;;  %4295 = vmatpush.bf16.msra.mxu1 %v10452_v48  ;;  %v10136_v3 = vor.u32 %v12992_v63, %v10135_v25  ;;  %v10321_v36 = vld [vmem:[#allocation4 + $0x310] sm:$0xf]  ;;  %v13074_v12 = vld [vmem:[#allocation4 + $0x314] sm:$0xf0] }
 0x2bb   : > { %3553 = vmatpush.bf16.msrb.mxu2 %v10144_v32  ;;  %v3722_v47 = vsel %vm2895_vm12, %v3721_v58, %v3720_v35  ;;  %10213 = vmatmul.msk.bf16.vlgmr.msra.gmra.mxu3 %vm3167_vm3, %v16229_v22  ;;  %v10274_v55 = vor.u32 %v13062_v4, %v10273_v34  ;;  %v10435_v49 = vld [vmem:[#allocation4 + $0x510] sm:$0xf]  ;;  %v13138_v37 = vld [vmem:[#allocation4 + $0x514] sm:$0xf0]  ;;  %v10302_v7 = vor.u32 %v13067_v28, %v10299_v1  ;;  %v3681_v20 = vrot.slane %v16045_v30, 5 }
 0x2bc   : > { %10359 = vmatmul.msk.bf16.vlgmr.msrb.gmra.mxu0 %vm3167_vm3, %v16227_v6  ;;  %3949 = vmatpush.bf16.msra.mxu3 %v10338_v51  ;;  %v3678_v27 = vsel %vm2892_vm11, %v3677_v21, %v16883_v15  ;;  %v10265_v61 = vld [vmem:[#allocation4 + $0x2a0] sm:$0xf]  ;;  %v13060_v18 = vld [vmem:[#allocation4 + $0x2a4] sm:$0xf0]  ;;  %v3661_v26 = vunpack.c.l.b16 %v3618_v33  ;;  %v13065_v14 = vld [vmem:[#allocation4 + $0x2d4] sm:$0xf]  ;;  %v3724_v42 = vsel %vm2898_vm13, %v3723_v57, %v3722_v47  ;;  %v10436_v15 = vor.u32 %v13138_v37, %v10435_v49 }
 0x2bd   : > { %3995 = vmatpush.bf16.msra.mxu0 %v10310_v23  ;;  %v10291_v54 = vld [vmem:[#allocation4 + $0x2d8] sm:$0xf0]  ;;  %v3680_v59 = vsel %vm2895_vm12, %v3679_v5, %v3678_v27  ;;  %v3683_v60 = vrot.slane %v16047_v41, 4  ;;  %v3727_v44 = vrot.slane %v15805_v8, 3  ;;  %v16927_v56 = vld [vmem:[#allocation50_spill] sm:$0xff]  ;;  %v3726_v30 = vsel %vm2901_vm14, %v3725_v38, %v3724_v42 }
 0x2be   : > { %v3729_v50 = vrot.slane %v16927_v56, 2  ;;  %4296 = vmatpush.bf16.msra.mxu1 %v10444_v17  ;;  %v10427_v40 = vld [vmem:[#allocation4 + $0x500] sm:$0xf]  ;;  %v13072_v19 = vld [vmem:[#allocation4 + $0x304] sm:$0xf0]  ;;  %v10266_v58 = vor.u32 %v13060_v18, %v10265_v61  ;;  %v10322_v41 = vor.u32 %v13074_v12, %v10321_v36  ;;  %v10294_v39 = vor.u32 %v13065_v14, %v10291_v54  ;;  %v16928_v35 = vld [vmem:[#allocation38_spill] sm:$0xff] }
 0x2bf   : > { %3554 = vmatpush.bf16.msrb.mxu2 %v10136_v3  ;;  %v10313_v0 = vld [vmem:[#allocation4 + $0x300] sm:$0xf]  ;;  %v13136_v46 = vld [vmem:[#allocation4 + $0x504] sm:$0xf0]  ;;  %v10565_v48 = vld [vmem:[#allocation4 + $0x3d0] sm:$0xf]  ;;  %v3682_v8 = vsel %vm2898_vm13, %v3681_v20, %v3680_v59  ;;  %v3728_v63 = vsel %vm2904_vm15, %v3727_v44, %v3726_v30 }
 0x2c0   : > { %v13098_v32 = vld [vmem:[#allocation4 + $0x3d4] sm:$0xf0]  ;;  %3950 = vmatpush.bf16.msra.mxu3 %v10330_v62  ;;  %v3685_v33 = vrot.slane %v16049_v45, 3  ;;  %v10257_v24 = vld [vmem:[#allocation4 + $0x290] sm:$0xf]  ;;  %v3684_v13 = vsel %vm2901_vm14, %v3683_v60, %v3682_v8  ;;  %v3687_v25 = vrot.slane %v16058_v2, 2  ;;  %v10428_v34 = vor.u32 %v13136_v46, %v10427_v40 }
 0x2c1   : > { %3996 = vmatpush.bf16.msra.mxu0 %v10302_v7  ;;  %v13058_v10 = vld [vmem:[#allocation4 + $0x294] sm:$0xf0]  ;;  %v13063_v52 = vld [vmem:[#allocation4 + $0x2c4] sm:$0xf]  ;;  %v10283_v11 = vld [vmem:[#allocation4 + $0x2c8] sm:$0xf0]  ;;  %v3730_v4 = vsel %vm2907_vm1, %v3729_v50, %v3728_v63  ;;  %v10566_v45 = vor.u32 %v13098_v32, %v10565_v48  ;;  %v10314_v57 = vor.u32 %v13072_v19, %v10313_v0 }
 0x2c2   : > { %3555 = vmatmul.bf16.vlgmr.msrb.gmra.mxu2 %v16107_v43  ;;  %v3731_v53 = vrot.slane %v3661_v26, 1  ;;  %v13133_v51 = vld [vmem:[#allocation4 + $0x4f4] sm:$0xf]  ;;  %v10421_v23 = vld [vmem:[#allocation4 + $0x4f8] sm:$0xf0]  ;;  %4297 = vmatpush.bf16.msra.mxu1 %v10436_v15  ;;  %v10258_v21 = vor.u32 %v13058_v10, %v10257_v24  ;;  %v10286_v28 = vor.u32 %v13063_v52, %v10283_v11  ;;  %v3686_v2 = vsel %vm2904_vm15, %v3685_v33, %v3684_v13 }
 0x2c3   : > { %3935 = vmatpush.bf16.msra.mxu2 %v10274_v55  ;;  %v10305_v1 = vld [vmem:[#allocation4 + $0x2f0] sm:$0xf]  ;;  %v13070_v5 = vld [vmem:[#allocation4 + $0x2f4] sm:$0xf0]  ;;  %v3689_v38 = vrot.slane %v16928_v35, 1  ;;  %v10424_v17 = vor.u32 %v13133_v51, %v10421_v23  ;;  %v3688_v3 = vsel %vm2907_vm1, %v3687_v25, %v3686_v2 }
 0x2c4   : > { %3951 = vmatpush.bf16.msra.mxu3 %v10322_v41  ;;  %v13131_v47 = vld [vmem:[#allocation4 + $0x4e4] sm:$0xf]  ;;  %v10557_v36 = vld [vmem:[#allocation4 + $0x3c0] sm:$0xf]  ;;  %v13096_v12 = vld [vmem:[#allocation4 + $0x3c4] sm:$0xf0]  ;;  %v3732_v55 = vsel %vm2910_vm2, %v3731_v53, %v3730_v4  ;;  %v10306_v7 = vor.u32 %v13070_v5, %v10305_v1 }
 0x2c5   : > { %3997 = vmatpush.bf16.msra.mxu0 %v10294_v39  ;;  %v10413_v49 = vld [vmem:[#allocation4 + $0x4e8] sm:$0xf0]  ;;  %v10249_v37 = vld [vmem:[#allocation4 + $0x280] sm:$0xf]  ;;  %v13056_v62 = vld [vmem:[#allocation4 + $0x284] sm:$0xf0]  ;;  %v3690_v27 = vsel %vm2910_vm2, %v3689_v38, %v3688_v3  ;;  %v10558_v18 = vor.u32 %v13096_v12, %v10557_v36 }
 0x2c6   : > { %4298 = vmatpush.bf16.msra.mxu1 %v10428_v34  ;;  %v10297_v20 = vld [vmem:[#allocation4 + $0x2e0] sm:$0xf]  ;;  %v13068_v61 = vld [vmem:[#allocation4 + $0x2e4] sm:$0xf0]  ;;  %v16263_v26 = vpack.c.b16 %v3732_v55, %v3690_v27  ;;  %v10416_v14 = vor.u32 %v13131_v47, %v10413_v49  ;;  %v13129_v54 = vld [vmem:[#allocation4 + $0x4d4] sm:$0xf]  ;;  %v10250_v60 = vor.u32 %v13056_v62, %v10249_v37 }
 0x2c7   : > { %3936 = vmatpush.bf16.msra.mxu2 %v10266_v58  ;;  %v16929_v59 = vld [vmem:[#allocation14_spill] sm:$0xff]  ;;  %v13094_v44 = vld [vmem:[#allocation4 + $0x3b4] sm:$0xf0]  ;;  %v10405_v56 = vld [vmem:[#allocation4 + $0x4d8] sm:$0xf0]  ;;  %v10298_v40 = vor.u32 %v13068_v61, %v10297_v20 }
 0x2c8   : > { %3952 = vmatpush.bf16.msra.mxu3 %v10314_v57  ;;  %v10549_v42 = vld [vmem:[#allocation4 + $0x3b0] sm:$0xf]  ;;  %v13054_v15 = vld [vmem:[#allocation4 + $0x274] sm:$0xf0]  ;;  %v10408_v58 = vor.u32 %v13129_v54, %v10405_v56  ;;  %v13127_v46 = vld [vmem:[#allocation4 + $0x4c4] sm:$0xf] }
 0x2c9   : > { %3998 = vmatpush.bf16.msra.mxu0 %v10286_v28  ;;  %4299 = vmatmul.bf16.vlgmr.msra.gmra.mxu1 %v16929_v59  ;;  %v10241_v50 = vld [vmem:[#allocation4 + $0x270] sm:$0xf]  ;;  %v13066_v0 = vld [vmem:[#allocation4 + $0x2d4] sm:$0xf0]  ;;  %v10550_v19 = vor.u32 %v13094_v44, %v10549_v42  ;;  %v10541_v32 = vld [vmem:[#allocation4 + $0x3a0] sm:$0xf] }
 0x2ca   : > { %4541 = vmatpush.bf16.msrb.mxu1 %v10566_v45  ;;  %v10289_v30 = vld [vmem:[#allocation4 + $0x2d0] sm:$0xf]  ;;  %v10242_v48 = vor.u32 %v13054_v15, %v10241_v50  ;;  %v13092_v41 = vld [vmem:[#allocation4 + $0x3a4] sm:$0xf0]  ;;  %v10397_v39 = vld [vmem:[#allocation4 + $0x4c8] sm:$0xf0] }
 0x2cb   : > { %3937 = vmatpush.bf16.msra.mxu2 %v10258_v21  ;;  %10214 = vmatmul.msk.bf16.vlgmr.msrb.gmra.mxu3 %vm3167_vm3, %v16229_v22  ;;  %v10233_v8 = vld [vmem:[#allocation4 + $0x260] sm:$0xf]  ;;  %v13052_v33 = vld [vmem:[#allocation4 + $0x264] sm:$0xf0]  ;;  %v10290_v24 = vor.u32 %v13066_v0, %v10289_v30  ;;  %v10542_v11 = vor.u32 %v13092_v41, %v10541_v32  ;;  %v10400_v13 = vor.u32 %v13127_v46, %v10397_v39  ;;  %v10419_v25 = vld [vmem:[#allocation4 + $0x4f0] sm:$0xf] }
 0x2cc   : > { %3999 = vmatmul.bf16.vlgmr.msra.gmra.mxu0 %v16263_v26  ;;  %3953 = vmatpush.bf16.msra.mxu3 %v10306_v7  ;;  %v10281_v10 = vld [vmem:[#allocation4 + $0x2c0] sm:$0xf]  ;;  %v13064_v52 = vld [vmem:[#allocation4 + $0x2c4] sm:$0xf0]  ;;  %v10234_v63 = vor.u32 %v13052_v33, %v10233_v8  ;;  %v10533_v53 = vld [vmem:[#allocation4 + $0x390] sm:$0xf] }
 0x2cd   : > { %4319 = vmatpush.bf16.msrb.mxu0 %v10424_v17  ;;  %v13090_v51 = vld [vmem:[#allocation4 + $0x394] sm:$0xf0]  ;;  %v13125_v34 = vld [vmem:[#allocation4 + $0x4b4] sm:$0xf]  ;;  %v10389_v4 = vld [vmem:[#allocation4 + $0x4b8] sm:$0xf0]  ;;  %v10282_v57 = vor.u32 %v13064_v52, %v10281_v10 }
 0x2ce   : > { %4542 = vmatpush.bf16.msrb.mxu1 %v10558_v18  ;;  %v13134_v23 = vld [vmem:[#allocation4 + $0x4f4] sm:$0xf0]  ;;  %v10225_v45 = vld [vmem:[#allocation4 + $0x250] sm:$0xf]  ;;  %v10534_v28 = vor.u32 %v13090_v51, %v10533_v53  ;;  %v10392_v5 = vor.u32 %v13125_v34, %v10389_v4  ;;  %v10411_v2 = vld [vmem:[#allocation4 + $0x4e0] sm:$0xf] }
 0x2cf   : > { %3938 = vmatpush.bf16.msra.mxu2 %v10250_v60  ;;  %v13050_v21 = vld [vmem:[#allocation4 + $0x254] sm:$0xf0]  ;;  %v10420_v1 = vor.u32 %v13134_v23, %v10419_v25  ;;  %v10525_v35 = vld [vmem:[#allocation4 + $0x380] sm:$0xf]  ;;  %v13088_v38 = vld [vmem:[#allocation4 + $0x384] sm:$0xf0] }
 0x2d0   : > { %3954 = vmatpush.bf16.msra.mxu3 %v10298_v40  ;;  %v13132_v17 = vld [vmem:[#allocation4 + $0x4e4] sm:$0xf0]  ;;  %v13123_v3 = vld [vmem:[#allocation4 + $0x4a4] sm:$0xf]  ;;  %v10381_v47 = vld [vmem:[#allocation4 + $0x4a8] sm:$0xf0]  ;;  %v10226_v36 = vor.u32 %v13050_v21, %v10225_v45  ;;  %v10526_v49 = vor.u32 %v13088_v38, %v10525_v35 }
 0x2d1   : > { %4320 = vmatpush.bf16.msrb.mxu0 %v10416_v14  ;;  %v10217_v12 = vld [vmem:[#allocation4 + $0x240] sm:$0xf]  ;;  %v13048_v55 = vld [vmem:[#allocation4 + $0x244] sm:$0xf0]  ;;  %v13081_v37 = vld [vmem:[#allocation4 + $0x354] sm:$0xf]  ;;  %v10412_v7 = vor.u32 %v13132_v17, %v10411_v2  ;;  %v10384_v27 = vor.u32 %v13123_v3, %v10381_v47 }
 0x2d2   : > { %4543 = vmatpush.bf16.msrb.mxu1 %v10550_v19  ;;  %v10355_v62 = vld [vmem:[#allocation4 + $0x358] sm:$0xf0]  ;;  %v10403_v20 = vld [vmem:[#allocation4 + $0x4d0] sm:$0xf]  ;;  %v13086_v18 = vld [vmem:[#allocation4 + $0x374] sm:$0xf0]  ;;  %v10218_v42 = vor.u32 %v13048_v55, %v10217_v12 }
 0x2d3   : > { %3939 = vmatpush.bf16.msra.mxu2 %v10242_v48  ;;  %v10517_v61 = vld [vmem:[#allocation4 + $0x370] sm:$0xf]  ;;  %v13130_v14 = vld [vmem:[#allocation4 + $0x4d4] sm:$0xf0]  ;;  %v13121_v54 = vld [vmem:[#allocation4 + $0x494] sm:$0xf]  ;;  %v10358_v44 = vor.u32 %v13081_v37, %v10355_v62 }
 0x2d4   : > { %3955 = vmatpush.bf16.msra.mxu3 %v10290_v24  ;;  %v10373_v60 = vld [vmem:[#allocation4 + $0x498] sm:$0xf0]  ;;  %v10395_v56 = vld [vmem:[#allocation4 + $0x4c0] sm:$0xf]  ;;  %v13128_v50 = vld [vmem:[#allocation4 + $0x4c4] sm:$0xf0]  ;;  %v10518_v15 = vor.u32 %v13086_v18, %v10517_v61  ;;  %v10404_v19 = vor.u32 %v13130_v14, %v10403_v20 }
 0x2d5   : > { %4321 = vmatpush.bf16.msrb.mxu0 %v10408_v58  ;;  %v10509_v40 = vld [vmem:[#allocation4 + $0x360] sm:$0xf]  ;;  %v13079_v30 = vld [vmem:[#allocation4 + $0x344] sm:$0xf]  ;;  %v10347_v0 = vld [vmem:[#allocation4 + $0x348] sm:$0xf0]  ;;  %v10376_v58 = vor.u32 %v13121_v54, %v10373_v60  ;;  %v10396_v25 = vor.u32 %v13128_v50, %v10395_v56 }
 0x2d6   : > { %4544 = vmatpush.bf16.msrb.mxu1 %v10542_v11  ;;  %v13084_v46 = vld [vmem:[#allocation4 + $0x364] sm:$0xf0]  ;;  %v10499_v48 = vld [vmem:[#allocation4 + $0x590] sm:$0xf]  ;;  %v13154_v32 = vld [vmem:[#allocation4 + $0x594] sm:$0xf0]  ;;  %v10350_v52 = vor.u32 %v13079_v30, %v10347_v0 }
 0x2d7   : > { %3940 = vmatpush.bf16.msra.mxu2 %v10234_v63  ;;  %v13119_v41 = vld [vmem:[#allocation4 + $0x484] sm:$0xf]  ;;  %v10365_v39 = vld [vmem:[#allocation4 + $0x488] sm:$0xf0]  ;;  %v10645_v8 = vld [vmem:[#allocation4 + $0x470] sm:$0xf]  ;;  %v10510_v11 = vor.u32 %v13084_v46, %v10509_v40 }
 0x2d8   : > { %3956 = vmatpush.bf16.msra.mxu3 %v10282_v57  ;;  %v13118_v33 = vld [vmem:[#allocation4 + $0x474] sm:$0xf0]  ;;  %v13117_v24 = vld [vmem:[#allocation4 + $0x474] sm:$0xf]  ;;  %v10647_v10 = vld [vmem:[#allocation4 + $0x478] sm:$0xf0]  ;;  %v10368_v63 = vor.u32 %v13119_v41, %v10365_v39 }
 0x2d9   : > { %4322 = vmatpush.bf16.msrb.mxu0 %v10400_v13  ;;  %v10500_v13 = vor.u32 %v13154_v32, %v10499_v48  ;;  %v10387_v53 = vld [vmem:[#allocation4 + $0x4b0] sm:$0xf]  ;;  %v10491_v51 = vld [vmem:[#allocation4 + $0x580] sm:$0xf]  ;;  %v13152_v23 = vld [vmem:[#allocation4 + $0x584] sm:$0xf0]  ;;  %v10646_v34 = vor.u32 %v13118_v33, %v10645_v8  ;;  %v10650_v57 = vor.u32 %v13117_v24, %v10647_v10 }
 0x2da   : > { %4545 = vmatpush.bf16.msrb.mxu1 %v10534_v28  ;;  %v13126_v4 = vld [vmem:[#allocation4 + $0x4b4] sm:$0xf0]  ;;  %v10637_v45 = vld [vmem:[#allocation4 + $0x460] sm:$0xf]  ;;  %v13116_v21 = vld [vmem:[#allocation4 + $0x464] sm:$0xf0]  ;;  %v10492_v17 = vor.u32 %v13152_v23, %v10491_v51 }
 0x2db   : > { %3941 = vmatpush.bf16.msra.mxu2 %v10226_v36  ;;  %3957 = vmatmul.bf16.vlgmr.msra.gmra.mxu3 %v16263_v26  ;;  %v13113_v28 = vld [vmem:[#allocation4 + $0x454] sm:$0xf]  ;;  %v10631_v2 = vld [vmem:[#allocation4 + $0x458] sm:$0xf0]  ;;  %v10775_v35 = vld [vmem:[#allocation4 + $0x690] sm:$0xf]  ;;  %v10388_v3 = vor.u32 %v13126_v4, %v10387_v53  ;;  %v10638_v47 = vor.u32 %v13116_v21, %v10637_v45 }
 0x2dc   : > { %4277 = vmatpush.bf16.msrb.mxu3 %v10420_v1  ;;  %v13115_v1 = vld [vmem:[#allocation4 + $0x464] sm:$0xf]  ;;  %v13186_v38 = vld [vmem:[#allocation4 + $0x694] sm:$0xf0]  ;;  %v10379_v36 = vld [vmem:[#allocation4 + $0x4a0] sm:$0xf] }
 0x2dd   : > { %4323 = vmatpush.bf16.msrb.mxu0 %v10392_v5  ;;  %v10639_v5 = vld [vmem:[#allocation4 + $0x468] sm:$0xf0]  ;;  %v13124_v12 = vld [vmem:[#allocation4 + $0x4a4] sm:$0xf0]  ;;  %v13111_v37 = vld [vmem:[#allocation4 + $0x444] sm:$0xf]  ;;  %v10776_v62 = vor.u32 %v13186_v38, %v10775_v35 }
 0x2de   : > { %4546 = vmatpush.bf16.msrb.mxu1 %v10526_v49  ;;  %v10642_v55 = vor.u32 %v13115_v1, %v10639_v5  ;;  %v10634_v49 = vor.u32 %v13113_v28, %v10631_v2  ;;  %v13184_v20 = vld [vmem:[#allocation4 + $0x684] sm:$0xf0]  ;;  %v10380_v61 = vor.u32 %v13124_v12, %v10379_v36  ;;  %v10371_v18 = vld [vmem:[#allocation4 + $0x490] sm:$0xf]  ;;  %v13122_v14 = vld [vmem:[#allocation4 + $0x494] sm:$0xf0] }
 0x2df   : > { %3942 = vmatpush.bf16.msra.mxu2 %v10218_v42  ;;  %v13109_v60 = vld [vmem:[#allocation4 + $0x434] sm:$0xf]  ;;  %v10485_v50 = vld [vmem:[#allocation4 + $0x578] sm:$0xf0]  ;;  %v10759_v40 = vld [vmem:[#allocation4 + $0x670] sm:$0xf] }
 0x2e0   : > { %4278 = vmatpush.bf16.msrb.mxu3 %v10412_v7  ;;  %v10623_v7 = vld [vmem:[#allocation4 + $0x448] sm:$0xf0]  ;;  %v13149_v56 = vld [vmem:[#allocation4 + $0x574] sm:$0xf]  ;;  %v13182_v30 = vld [vmem:[#allocation4 + $0x674] sm:$0xf0] }
 0x2e1   : > { %4324 = vmatpush.bf16.msrb.mxu0 %v10384_v27  ;;  %v10767_v27 = vld [vmem:[#allocation4 + $0x680] sm:$0xf]  ;;  %v10626_v54 = vor.u32 %v13111_v37, %v10623_v7  ;;  %v13153_v46 = vld [vmem:[#allocation4 + $0x594] sm:$0xf]  ;;  %v10501_v48 = vld [vmem:[#allocation4 + $0x598] sm:$0xf0]  ;;  %v10488_v41 = vor.u32 %v13149_v56, %v10485_v50  ;;  %v10760_v8 = vor.u32 %v13182_v30, %v10759_v40 }
 0x2e2   : > { %4547 = vmatpush.bf16.msrb.mxu1 %v10518_v15  ;;  %3943 = vmatmul.bf16.vlgmr.msra.gmra.mxu2 %v16184_v31  ;;  %v10768_v42 = vor.u32 %v13184_v20, %v10767_v27  ;;  %v10372_v15 = vor.u32 %v13122_v14, %v10371_v18  ;;  %v10363_v0 = vld [vmem:[#allocation4 + $0x480] sm:$0xf]  ;;  %v13107_v32 = vld [vmem:[#allocation4 + $0x424] sm:$0xf]  ;;  %v10607_v39 = vld [vmem:[#allocation4 + $0x428] sm:$0xf0] }
 0x2e3   : > { %4011 = vmatpush.bf16.msrb.mxu2 %v10358_v44  ;;  %v10615_v44 = vld [vmem:[#allocation4 + $0x438] sm:$0xf0]  ;;  %v13147_v33 = vld [vmem:[#allocation4 + $0x564] sm:$0xf]  ;;  %v10477_v24 = vld [vmem:[#allocation4 + $0x568] sm:$0xf0] }
 0x2e4   : > { %4279 = vmatpush.bf16.msrb.mxu3 %v10404_v19  ;;  %v13120_v19 = vld [vmem:[#allocation4 + $0x484] sm:$0xf0]  ;;  %v10493_v53 = vld [vmem:[#allocation4 + $0x588] sm:$0xf0]  ;;  %v10629_v51 = vld [vmem:[#allocation4 + $0x450] sm:$0xf]  ;;  %v10480_v23 = vor.u32 %v13147_v33, %v10477_v24 }
 0x2e5   : > { %4325 = vmatpush.bf16.msrb.mxu0 %v10376_v58  ;;  %v10618_v58 = vor.u32 %v13109_v60, %v10615_v44  ;;  %v10364_v10 = vor.u32 %v13120_v19, %v10363_v0  ;;  %v13105_v4 = vld [vmem:[#allocation4 + $0x414] sm:$0xf]  ;;  %v10599_v45 = vld [vmem:[#allocation4 + $0x418] sm:$0xf0]  ;;  %v10743_v5 = vld [vmem:[#allocation4 + $0x650] sm:$0xf] }
 0x2e6   : > { %4548 = vmatpush.bf16.msrb.mxu1 %v10510_v11  ;;  %v10751_v11 = vld [vmem:[#allocation4 + $0x660] sm:$0xf]  ;;  %v10469_v28 = vld [vmem:[#allocation4 + $0x558] sm:$0xf0]  ;;  %v13178_v2 = vld [vmem:[#allocation4 + $0x654] sm:$0xf0]  ;;  %v10602_v38 = vor.u32 %v13105_v4, %v10599_v45 }
 0x2e7   : > { %4012 = vmatpush.bf16.msrb.mxu2 %v10350_v52  ;;  %v10504_v52 = vor.u32 %v13153_v46, %v10501_v48  ;;  %v10591_v36 = vld [vmem:[#allocation4 + $0x408] sm:$0xf0]  ;;  %v13176_v7 = vld [vmem:[#allocation4 + $0x644] sm:$0xf0]  ;;  %v10613_v20 = vld [vmem:[#allocation4 + $0x430] sm:$0xf] }
 0x2e8   : > { %4280 = vmatpush.bf16.msrb.mxu3 %v10396_v25  ;;  %v10610_v25 = vor.u32 %v13107_v32, %v10607_v39  ;;  %v10461_v37 = vld [vmem:[#allocation4 + $0x548] sm:$0xf0]  ;;  %v13101_v18 = vld [vmem:[#allocation4 + $0x3f4] sm:$0xf]  ;;  %v10583_v14 = vld [vmem:[#allocation4 + $0x3f8] sm:$0xf0] }
 0x2e9   : > { %4326 = vmatpush.bf16.msrb.mxu0 %v10368_v63  ;;  %4549 = vmatmul.bf16.vlgmr.msrb.gmra.mxu1 %v16914_v16  ;;  %v13151_v63 = vld [vmem:[#allocation4 + $0x584] sm:$0xf]  ;;  %v10453_v44 = vld [vmem:[#allocation4 + $0x538] sm:$0xf0]  ;;  %v10727_v56 = vld [vmem:[#allocation4 + $0x630] sm:$0xf] }
 0x2ea   : > { %4617 = vmatpush.bf16.msra.mxu1 %v10650_v57  ;;  %v13145_v57 = vld [vmem:[#allocation4 + $0x554] sm:$0xf]  ;;  %v10496_v1 = vor.u32 %v13151_v63, %v10493_v53  ;;  %v13174_v50 = vld [vmem:[#allocation4 + $0x634] sm:$0xf0]  ;;  %v10605_v40 = vld [vmem:[#allocation4 + $0x420] sm:$0xf] }
 0x2eb   : > { %4311 = vmatpush.bf16.msra.mxu2 %v10500_v13  ;;  %v13180_v13 = vld [vmem:[#allocation4 + $0x664] sm:$0xf0]  ;;  %v10472_v12 = vor.u32 %v13145_v57, %v10469_v28  ;;  %v13099_v0 = vld [vmem:[#allocation4 + $0x3e4] sm:$0xf]  ;;  %v10575_v19 = vld [vmem:[#allocation4 + $0x3e8] sm:$0xf0]  ;;  %v10728_v32 = vor.u32 %v13174_v50, %v10727_v56 }
 0x2ec   : > { %4327 = vmatmul.bf16.vlgmr.msrb.gmra.mxu0 %v16913_v9  ;;  %4281 = vmatpush.bf16.msrb.mxu3 %v10388_v3  ;;  %v10752_v21 = vor.u32 %v13180_v13, %v10751_v11  ;;  %v13112_v3 = vld [vmem:[#allocation4 + $0x444] sm:$0xf0]  ;;  %v13169_v46 = vld [vmem:[#allocation4 + $0x614] sm:$0xf]  ;;  %v10713_v48 = vld [vmem:[#allocation4 + $0x618] sm:$0xf0] }
 0x2ed   : > { %4575 = vmatpush.bf16.msra.mxu0 %v10646_v34  ;;  %v13114_v34 = vld [vmem:[#allocation4 + $0x454] sm:$0xf0]  ;;  %v13108_v30 = vld [vmem:[#allocation4 + $0x424] sm:$0xf0]  ;;  %v10445_v39 = vld [vmem:[#allocation4 + $0x528] sm:$0xf0] }
 0x2ee   : > { %4618 = vmatpush.bf16.msra.mxu1 %v10642_v55  ;;  %v10630_v35 = vor.u32 %v13114_v34, %v10629_v51  ;;  %v10744_v55 = vor.u32 %v13178_v2, %v10743_v5  ;;  %v13172_v33 = vld [vmem:[#allocation4 + $0x624] sm:$0xf0]  ;;  %v10606_v24 = vor.u32 %v13108_v30, %v10605_v40  ;;  %v10597_v11 = vld [vmem:[#allocation4 + $0x410] sm:$0xf]  ;;  %v13106_v13 = vld [vmem:[#allocation4 + $0x414] sm:$0xf0] }
 0x2ef   : > { %4312 = vmatpush.bf16.msra.mxu2 %v10492_v17  ;;  %v10621_v17 = vld [vmem:[#allocation4 + $0x440] sm:$0xf]  ;;  %v13167_v63 = vld [vmem:[#allocation4 + $0x604] sm:$0xf]  ;;  %v10705_v53 = vld [vmem:[#allocation4 + $0x608] sm:$0xf0]  ;;  %v10598_v4 = vor.u32 %v13106_v13, %v10597_v11 }
 0x2f0   : > { %4282 = vmatpush.bf16.msrb.mxu3 %v10380_v61  ;;  %v13110_v61 = vld [vmem:[#allocation4 + $0x434] sm:$0xf0]  ;;  %v10437_v34 = vld [vmem:[#allocation4 + $0x518] sm:$0xf0]  ;;  %v10708_v45 = vor.u32 %v13167_v63, %v10705_v53  ;;  %v13104_v57 = vld [vmem:[#allocation4 + $0x404] sm:$0xf0] }
 0x2f1   : > { %4576 = vmatpush.bf16.msra.mxu0 %v10638_v47  ;;  %v13103_v47 = vld [vmem:[#allocation4 + $0x404] sm:$0xf]  ;;  %v10697_v5 = vld [vmem:[#allocation4 + $0x5f8] sm:$0xf0]  ;;  %v13093_v50 = vld [vmem:[#allocation4 + $0x3b4] sm:$0xf] }
 0x2f2   : > { %4856 = vmatpush.bf16.msrb.mxu1 %v10776_v62  ;;  %10360 = vmatmul.msk.bf16.vlgmr.msrb.gmra.mxu2 %vm3167_vm3, %v16227_v6  ;;  %v10735_v62 = vld [vmem:[#allocation4 + $0x640] sm:$0xf]  ;;  %v10594_v27 = vor.u32 %v13103_v47, %v10591_v36  ;;  %v13135_v2 = vld [vmem:[#allocation4 + $0x504] sm:$0xf]  ;;  %v13102_v36 = vld [vmem:[#allocation4 + $0x3f4] sm:$0xf0] }
 0x2f3   : > { %4333 = vmatpush.bf16.msrb.mxu2 %v10488_v41  ;;  %v10736_v60 = vor.u32 %v13176_v7, %v10735_v62  ;;  %v13139_v41 = vld [vmem:[#allocation4 + $0x524] sm:$0xf]  ;;  %v10703_v30 = vld [vmem:[#allocation4 + $0x600] sm:$0xf]  ;;  %v13089_v11 = vld [vmem:[#allocation4 + $0x394] sm:$0xf] }
 0x2f4   : > { %4283 = vmatpush.bf16.msrb.mxu3 %v10372_v15  ;;  %v10586_v15 = vor.u32 %v13101_v18, %v10583_v14  ;;  %v13100_v18 = vld [vmem:[#allocation4 + $0x3e4] sm:$0xf0]  ;;  %v10711_v14 = vld [vmem:[#allocation4 + $0x610] sm:$0xf]  ;;  %v10535_v13 = vld [vmem:[#allocation4 + $0x398] sm:$0xf0] }
 0x2f5   : > { %4597 = vmatpush.bf16.msrb.mxu0 %v10634_v49  ;;  %v13143_v49 = vld [vmem:[#allocation4 + $0x544] sm:$0xf]  ;;  %v10687_v53 = vld [vmem:[#allocation4 + $0x5e0] sm:$0xf] }
 0x2f6   : > { %4857 = vmatpush.bf16.msrb.mxu1 %v10768_v42  ;;  %v13141_v42 = vld [vmem:[#allocation4 + $0x534] sm:$0xf] }
 0x2f7   : > { %4334 = vmatpush.bf16.msrb.mxu2 %v10480_v23  ;;  %v13137_v23 = vld [vmem:[#allocation4 + $0x514] sm:$0xf] }
 0x2f8   : > { %4284 = vmatpush.bf16.msrb.mxu3 %v10364_v10  ;;  %v10578_v10 = vor.u32 %v13099_v0, %v10575_v19  ;;  %v10440_v28 = vor.u32 %v13137_v23, %v10437_v34  ;;  %v13168_v0 = vld [vmem:[#allocation4 + $0x604] sm:$0xf0]  ;;  %v13159_v19 = vld [vmem:[#allocation4 + $0x5c4] sm:$0xf]  ;;  %v10657_v34 = vld [vmem:[#allocation4 + $0x5a8] sm:$0xf0] }
 0x2f9   : > { %4598 = vmatpush.bf16.msrb.mxu0 %v10626_v54  ;;  %10652 = vmatmul.msk.bf16.vlgmr.msra.gmra.mxu1 %vm3167_vm3, %v16229_v22  ;;  %v10464_v54 = vor.u32 %v13143_v49, %v10461_v37  ;;  %v10689_v49 = vld [vmem:[#allocation4 + $0x5e8] sm:$0xf0]  ;;  %v13155_v23 = vld [vmem:[#allocation4 + $0x5a4] sm:$0xf] }
 0x2fa   : > { %4858 = vmatpush.bf16.msrb.mxu1 %v10760_v8  ;;  %v10719_v8 = vld [vmem:[#allocation4 + $0x620] sm:$0xf] }
 0x2fb   : > { %4285 = vmatmul.bf16.vlgmr.msrb.gmra.mxu3 %v16913_v9  ;;  %v10622_v9 = vor.u32 %v13112_v3, %v10621_v17  ;;  %4335 = vmatpush.bf16.msrb.mxu2 %v10472_v12  ;;  %v10720_v51 = vor.u32 %v13172_v33, %v10719_v8  ;;  %v13097_v17 = vld [vmem:[#allocation4 + $0x3d4] sm:$0xf]  ;;  %v10567_v3 = vld [vmem:[#allocation4 + $0x3d8] sm:$0xf0]  ;;  %v10695_v8 = vld [vmem:[#allocation4 + $0x5f0] sm:$0xf] }
 0x2fc   : > { %4353 = vmatpush.bf16.msra.mxu3 %v10504_v52  ;;  %10651 = vmatmul.msk.bf16.vlgmr.msra.gmra.mxu0 %vm3167_vm3, %v16229_v22  ;;  %v10614_v22 = vor.u32 %v13110_v61, %v10613_v20  ;;  %v10716_v52 = vor.u32 %v13169_v46, %v10713_v48  ;;  %v10570_v37 = vor.u32 %v13097_v17, %v10567_v3  ;;  %v10573_v61 = vld [vmem:[#allocation4 + $0x3e0] sm:$0xf]  ;;  %v13091_v48 = vld [vmem:[#allocation4 + $0x3a4] sm:$0xf] }
 0x2fd   : > { %4599 = vmatpush.bf16.msrb.mxu0 %v10618_v58  ;;  %v10456_v58 = vor.u32 %v13141_v42, %v10453_v44  ;;  %v10681_v42 = vld [vmem:[#allocation4 + $0x5d8] sm:$0xf0]  ;;  %v10574_v56 = vor.u32 %v13100_v18, %v10573_v61  ;;  %v13190_v61 = vld [vmem:[#allocation4 + $0x6b4] sm:$0xf0]  ;;  %v10663_v18 = vld [vmem:[#allocation4 + $0x5b0] sm:$0xf] }
 0x2fe   : > { %4859 = vmatpush.bf16.msrb.mxu1 %v10752_v21  ;;  %v10589_v21 = vld [vmem:[#allocation4 + $0x400] sm:$0xf] }
 0x2ff   : > { %4336 = vmatpush.bf16.msrb.mxu2 %v10464_v54  ;;  %v13170_v54 = vld [vmem:[#allocation4 + $0x614] sm:$0xf0] }
 0x300   : > { %4354 = vmatpush.bf16.msra.mxu3 %v10496_v1  ;;  %v13165_v1 = vld [vmem:[#allocation4 + $0x5f4] sm:$0xf] }
 0x301   : > { %4600 = vmatpush.bf16.msrb.mxu0 %v10610_v25  ;;  %v10448_v25 = vor.u32 %v13139_v41, %v10445_v39  ;;  %v10700_v47 = vor.u32 %v13165_v1, %v10697_v5  ;;  %v3180_v62 = vpop.f32.mrf.mxu2  ;;  %v10704_v41 = vor.u32 %v13168_v0, %v10703_v30  ;;  %v10660_v5 = vor.u32 %v13155_v23, %v10657_v34  ;;  %v13188_v30 = vld [vmem:[#allocation4 + $0x6a4] sm:$0xf0]  ;;  %v13181_v34 = vld [vmem:[#allocation4 + $0x674] sm:$0xf] }
 0x302   : > { %4860 = vmatpush.bf16.msrb.mxu1 %v10744_v55  ;;  %10505 = vmatmul.msk.bf16.vlgmr.msra.gmra.mxu2 %vm3167_vm3, %v15908_v29  ;;  %v13163_v55 = vld [vmem:[#allocation4 + $0x5e4] sm:$0xf]  ;;  %v13156_v0 = vld [vmem:[#allocation4 + $0x5a4] sm:$0xf0] }
 0x303   : > { %4337 = vmatpush.bf16.msrb.mxu2 %v10456_v58  ;;  %v10692_v20 = vor.u32 %v13163_v55, %v10689_v49  ;;  %v10673_v58 = vld [vmem:[#allocation4 + $0x5c8] sm:$0xf0]  ;;  %v10671_v55 = vld [vmem:[#allocation4 + $0x5c0] sm:$0xf]  ;;  %v13160_v49 = vld [vmem:[#allocation4 + $0x5c4] sm:$0xf0] }
 0x304   : > { %4555 = vmatpush.bf16.msrb.mxu3 %v10630_v35  ;;  %v10429_v35 = vld [vmem:[#allocation4 + $0x508] sm:$0xf0]  ;;  %v10676_v39 = vor.u32 %v13159_v19, %v10673_v58  ;;  %v13185_v19 = vld [vmem:[#allocation4 + $0x694] sm:$0xf]  ;;  %v10777_v58 = vld [vmem:[#allocation4 + $0x698] sm:$0xf0] }
 0x305   : > { %4601 = vmatpush.bf16.msrb.mxu0 %v10602_v38  ;;  %v10590_v38 = vor.u32 %v13104_v57, %v10589_v21  ;;  %v10432_v12 = vor.u32 %v13135_v2, %v10429_v35  ;;  %v13087_v57 = vld [vmem:[#allocation4 + $0x384] sm:$0xf]  ;;  %v10679_v2 = vld [vmem:[#allocation4 + $0x5d0] sm:$0xf]  ;;  %v13162_v35 = vld [vmem:[#allocation4 + $0x5d4] sm:$0xf0] }
 0x306   : > { %4861 = vmatpush.bf16.msrb.mxu1 %v10736_v60  ;;  %v13161_v60 = vld [vmem:[#allocation4 + $0x5d4] sm:$0xf] }
 0x307   : > { %4338 = vmatpush.bf16.msrb.mxu2 %v10448_v25  ;;  %v10684_v40 = vor.u32 %v13161_v60, %v10681_v42 }
 0x308   : > { %4556 = vmatpush.bf16.msrb.mxu3 %v10622_v9  ;;  %v13095_v9 = vld [vmem:[#allocation4 + $0x3c4] sm:$0xf] }
 0x309   : > { %4602 = vmatpush.bf16.msrb.mxu0 %v10594_v27  ;;  %v10559_v27 = vld [vmem:[#allocation4 + $0x3c8] sm:$0xf0]  ;;  %v16287_v33 = vpop.f32.mrf.mxu2 }
 0x30a   : > { %4862 = vmatpush.bf16.msrb.mxu1 %v10728_v32  ;;  %v10562_v44 = vor.u32 %v13095_v9, %v10559_v27  ;;  %v10543_v32 = vld [vmem:[#allocation4 + $0x3a8] sm:$0xf0]  ;;  %v10672_v27 = vor.u32 %v13160_v49, %v10671_v55  ;;  %v13173_v55 = vld [vmem:[#allocation4 + $0x634] sm:$0xf]  ;;  %v10729_v49 = vld [vmem:[#allocation4 + $0x638] sm:$0xf0] }
 0x30b   : > { %10506 = vmatmul.msk.bf16.vlgmr.msra.gmra.mxu3 %vm3167_vm3, %v15908_v29  ;;  %v10581_v29 = vld [vmem:[#allocation4 + $0x3f0] sm:$0xf]  ;;  %4339 = vmatpush.bf16.msrb.mxu2 %v10440_v28  ;;  %v10527_v28 = vld [vmem:[#allocation4 + $0x388] sm:$0xf0] }
 0x30c   : > { %4557 = vmatpush.bf16.msrb.mxu3 %v10614_v22  ;;  %v10582_v7 = vor.u32 %v13102_v36, %v10581_v29  ;;  %v10551_v22 = vld [vmem:[#allocation4 + $0x3b8] sm:$0xf0]  ;;  %v10530_v17 = vor.u32 %v13087_v57, %v10527_v28  ;;  %v10511_v9 = vld [vmem:[#allocation4 + $0x368] sm:$0xf0] }
 0x30d   : > { %4603 = vmatpush.bf16.msrb.mxu0 %v10586_v15  ;;  %v10712_v15 = vor.u32 %v13170_v54, %v10711_v14  ;;  %v10554_v46 = vor.u32 %v13093_v50, %v10551_v22  ;;  %v10519_v29 = vld [vmem:[#allocation4 + $0x378] sm:$0xf0]  ;;  %v13158_v14 = vld [vmem:[#allocation4 + $0x5b4] sm:$0xf0] }
 0x30e   : > { %4863 = vmatpush.bf16.msrb.mxu1 %v10720_v51  ;;  %v13164_v51 = vld [vmem:[#allocation4 + $0x5e4] sm:$0xf0]  ;;  %v10664_v22 = vor.u32 %v13158_v14, %v10663_v18 }
 0x30f   : > { %4340 = vmatpush.bf16.msrb.mxu2 %v10432_v12  ;;  %v10680_v12 = vor.u32 %v13162_v35, %v10679_v2  ;;  %v13177_v35 = vld [vmem:[#allocation4 + $0x654] sm:$0xf] }
 0x310   : > { %4558 = vmatpush.bf16.msrb.mxu3 %v10606_v24  ;;  %v13166_v24 = vld [vmem:[#allocation4 + $0x5f4] sm:$0xf0] }
 0x311   : > { %4604 = vmatpush.bf16.msrb.mxu0 %v10578_v10  ;;  %4864 = vmatmul.bf16.vlgmr.msrb.gmra.mxu1 %v16263_v26  ;;  %v10665_v10 = vld [vmem:[#allocation4 + $0x5b8] sm:$0xf0]  ;;  %v10696_v25 = vor.u32 %v13166_v24, %v10695_v8  ;;  %v10780_v24 = vor.u32 %v13185_v19, %v10777_v58 }
 0x312   : > { %4341 = vmatmul.bf16.vlgmr.msrb.gmra.mxu2 %v16929_v59  ;;  %v13157_v59 = vld [vmem:[#allocation4 + $0x5b4] sm:$0xf] }
 0x313   : > { %4583 = vmatpush.bf16.msra.mxu2 %v10570_v37  ;;  %v10668_v63 = vor.u32 %v13157_v59, %v10665_v10  ;;  %v13183_v59 = vld [vmem:[#allocation4 + $0x684] sm:$0xf]  ;;  %v10769_v10 = vld [vmem:[#allocation4 + $0x688] sm:$0xf0] }
 0x314   : > { %4605 = vmatmul.bf16.vlgmr.msrb.gmra.mxu0 %v16107_v43  ;;  %4559 = vmatpush.bf16.msrb.mxu3 %v10598_v4 }
 0x315   : > { %4884 = vmatpush.bf16.msra.mxu0 %v10716_v52  ;;  %v10546_v52 = vor.u32 %v13091_v48, %v10543_v32  ;;  %v13189_v48 = vld [vmem:[#allocation4 + $0x6b4] sm:$0xf]  ;;  %v10793_v32 = vld [vmem:[#allocation4 + $0x6b8] sm:$0xf0] }
 0x316   : > { %v3236_v1 = vpop.f32.mrf.mxu0 }
 0x317   : > { %4584 = vmatpush.bf16.msra.mxu2 %v10562_v44  ;;  %v3208_v3 = vpop.f32.mrf.mxu2 }
 0x318   : > { %4560 = vmatpush.bf16.msrb.mxu3 %v10590_v38  ;;  %v3542_v38 = vpop.f32.mrf.mxu1 }
 0x319   : > { %4885 = vmatpush.bf16.msra.mxu0 %v10708_v45  ;;  %v10538_v45 = vor.u32 %v13089_v11, %v10535_v13  ;;  %v13187_v13 = vld [vmem:[#allocation4 + $0x6a4] sm:$0xf] }
 0x31b   : > { %4585 = vmatpush.bf16.msra.mxu2 %v10554_v46 }
 0x31c   : > { %4561 = vmatpush.bf16.msrb.mxu3 %v10582_v7  ;;  %v3194_v4 = vpop.f32.mrf.mxu3  ;;  %v13083_v7 = vld [vmem:[#allocation4 + $0x364] sm:$0xf] }
 0x31d   : > { %4886 = vmatpush.bf16.msra.mxu0 %v10700_v47  ;;  %v3195_v21 = vadd.f32 %v3194_v4, %v3180_v62  ;;  %v13085_v47 = vld [vmem:[#allocation4 + $0x374] sm:$0xf]  ;;  %v10514_v42 = vor.u32 %v13083_v7, %v10511_v9  ;;  %v10761_v4 = vld [vmem:[#allocation4 + $0x678] sm:$0xf0]  ;;  %v10732_v9 = vor.u32 %v13173_v55, %v10729_v49  ;;  %v11025_v49 = vld [vmem:[#allocation7 + $0x1c0] sm:$0xf] }
 0x31e   : > { %v10522_v62 = vor.u32 %v13085_v47, %v10519_v29  ;;  %v16295_v60 = vpop.f32.mrf.mxu0  ;;  %v10764_v28 = vor.u32 %v13181_v34, %v10761_v4  ;;  %v13175_v47 = vld [vmem:[#allocation4 + $0x644] sm:$0xf] }
 0x31f   : > { %4586 = vmatpush.bf16.msra.mxu2 %v10546_v52  ;;  %v3209_v36 = vadd.f32 %v3208_v3, %v3195_v21  ;;  %v16297_v44 = vpop.f32.mrf.mxu2  ;;  %v10796_v52 = vor.u32 %v13189_v48, %v10793_v32  ;;  %v10913_v4 = vld [vmem:[#allocation7 + $0xe0] sm:$0xf] }
 0x320   : > { %4562 = vmatpush.bf16.msrb.mxu3 %v10574_v56  ;;  %v16299_v50 = vpop.f32.mrf.mxu1 }
 0x321   : > { %4887 = vmatpush.bf16.msra.mxu0 %v10692_v20  ;;  %v10791_v20 = vld [vmem:[#allocation4 + $0x6b0] sm:$0xf]  ;;  %v16293_v54 = vadd.f32 %v3542_v38, %v3209_v36  ;;  %v10745_v38 = vld [vmem:[#allocation4 + $0x658] sm:$0xf0] }
 0x322   : > { %v10792_v56 = vor.u32 %v13190_v61, %v10791_v20  ;;  %v10748_v3 = vor.u32 %v13177_v35, %v10745_v38  ;;  %v10721_v20 = vld [vmem:[#allocation4 + $0x628] sm:$0xf0]  ;;  %v11169_v35 = vld [vmem:[#allocation7 + $0x2e0] sm:$0xf]  ;;  %v13285_v38 = vld [vmem:[#allocation7 + $0x2ec] sm:$0xf0] }
 0x323   : > { %4563 = vmatmul.bf16.vlgmr.msrb.gmra.mxu3 %v16107_v43  ;;  %v10688_v43 = vor.u32 %v13164_v51, %v10687_v53  ;;  %4587 = vmatpush.bf16.msra.mxu2 %v10538_v45  ;;  %v10772_v51 = vor.u32 %v13183_v59, %v10769_v10 }
 0x324   : > { %4842 = vmatpush.bf16.msra.mxu3 %v10712_v15  ;;  %v16290_v37 = vpop.f32.mrf.mxu3  ;;  %v10655_v15 = vld [vmem:[#allocation4 + $0x5a0] sm:$0xf] }
 0x325   : > { %4888 = vmatpush.bf16.msra.mxu0 %v10684_v40  ;;  %v10783_v40 = vld [vmem:[#allocation4 + $0x6a0] sm:$0xf]  ;;  %v10656_v8 = vor.u32 %v13156_v0, %v10655_v15 }
 0x327   : > { %4588 = vmatpush.bf16.msra.mxu2 %v10530_v17 }
 0x328   : > { %4843 = vmatpush.bf16.msra.mxu3 %v10704_v41  ;;  %v3250_v11 = vpop.f32.mrf.mxu2  ;;  %v3598_v21 = vpop.f32.mrf.mxu1 }
 0x329   : > { %4889 = vmatpush.bf16.msra.mxu0 %v10676_v39  ;;  %v10784_v39 = vor.u32 %v13188_v30, %v10783_v40  ;;  %v3584_v53 = vpop.f32.mrf.mxu0 }
 0x32b   : > { %4589 = vmatpush.bf16.msra.mxu2 %v10522_v62 }
 0x32c   : > { %4844 = vmatpush.bf16.msra.mxu3 %v10696_v25  ;;  %v10785_v25 = vld [vmem:[#allocation4 + $0x6a8] sm:$0xf0] }
 0x32d   : > { %4890 = vmatpush.bf16.msra.mxu0 %v10668_v63  ;;  %v10788_v45 = vor.u32 %v13187_v13, %v10785_v25 }
 0x32e   : > { %v3222_v46 = vpop.f32.mrf.mxu3 }
 0x32f   : > { %4590 = vmatpush.bf16.msra.mxu2 %v10514_v42  ;;  %v3237_v41 = vadd.f32 %v3236_v1, %v3222_v46  ;;  %v13179_v1 = vld [vmem:[#allocation4 + $0x664] sm:$0xf] }
 0x330   : > { %4845 = vmatpush.bf16.msra.mxu3 %v10688_v43  ;;  %v10753_v43 = vld [vmem:[#allocation4 + $0x668] sm:$0xf0]  ;;  %v16323_v19 = vpop.f32.mrf.mxu1 }
 0x331   : > { %4891 = vmatpush.bf16.msra.mxu0 %v10660_v5  ;;  %v3251_v63 = vadd.f32 %v3250_v11, %v3237_v41  ;;  %v16305_v5 = vpop.f32.mrf.mxu2  ;;  %v10756_v2 = vor.u32 %v13179_v1, %v10753_v43  ;;  %v16314_v42 = vpop.f32.mrf.mxu0 }
 0x332   : > { %4591 = vmatmul.bf16.vlgmr.msra.gmra.mxu2 %v16914_v16 }
 0x333   : > { %4876 = vmatpush.bf16.msrb.mxu2 %v10792_v56  ;;  %v3585_v23 = vadd.f32 %v3584_v53, %v3251_v63 }
 0x334   : > { %4892 = vmatmul.bf16.vlgmr.msra.gmra.mxu0 %v16184_v31  ;;  %4846 = vmatpush.bf16.msra.mxu3 %v10680_v12 }
 0x335   : > { %v3599_v16 = vadd.f32 %v3598_v21, %v3585_v23  ;;  %v11041_v21 = vld [vmem:[#allocation7 + $0x1e0] sm:$0xf] }
 0x336   : > { %v16302_v57 = vpop.f32.mrf.mxu3 }
 0x337   : > { %4877 = vmatpush.bf16.msrb.mxu2 %v10784_v39 }
 0x338   : > { %4847 = vmatpush.bf16.msra.mxu3 %v10672_v27  ;;  %v13171_v27 = vld [vmem:[#allocation4 + $0x624] sm:$0xf]  ;;  %v3986_v32 = vpop.f32.mrf.mxu1 }
 0x339   : > { %v10724_v61 = vor.u32 %v13171_v27, %v10721_v20  ;;  %v3972_v56 = vpop.f32.mrf.mxu0 }
 0x33b   : > { %4898 = vmatpush.bf16.msra.mxu2 %v10780_v24 }
 0x33c   : > { %4848 = vmatpush.bf16.msra.mxu3 %v10664_v22 }
 0x33e   : > { %v3570_v17 = vpop.f32.mrf.mxu3 }
 0x33f   : > { %4899 = vmatpush.bf16.msra.mxu2 %v10772_v51 }
 0x340   : > { %4849 = vmatpush.bf16.msra.mxu3 %v10656_v8  ;;  %v16339_v11 = vpop.f32.mrf.mxu1 }
 0x341   : > { %v16321_v30 = vpop.f32.mrf.mxu0 }
 0x342   : > { %10797 = vmatmul.msk.bf16.vlgmr.msrb.gmra.mxu2 %vm3167_vm3, %v16227_v6  ;;  %16931 = vst [vmem:[#allocation24_spill] sm:$0xff] %v16321_v30  ;;  %v13345_v30 = vld [vmem:[#allocation7 + $0x4cc] sm:$0xf0] }
 0x343   : > { %4850 = vmatmul.bf16.vlgmr.msra.gmra.mxu3 %v16184_v31  ;;  %4900 = vmatpush.bf16.msra.mxu2 %v10764_v28  ;;  %v10737_v31 = vld [vmem:[#allocation4 + $0x648] sm:$0xf0]  ;;  %v13253_v28 = vld [vmem:[#allocation7 + $0x1ec] sm:$0xf0] }
 0x344   : > { %4918 = vmatpush.bf16.msrb.mxu3 %v10796_v52  ;;  %v10740_v29 = vor.u32 %v13175_v47, %v10737_v31  ;;  %v11042_v1 = vor.u32 %v13253_v28, %v11041_v21  ;;  %v11170_v47 = vor.u32 %v13285_v38, %v11169_v35  ;;  %v13317_v31 = vld [vmem:[#allocation7 + $0x3ec] sm:$0xf0]  ;;  %v11265_v21 = vld [vmem:[#allocation7 + $0x3a0] sm:$0xf] }
 0x345   : > { %v3556_v36 = vpop.f32.mrf.mxu2  ;;  %v10865_v35 = vld [vmem:[#allocation7 + $0x80] sm:$0xf]  ;;  %v13209_v38 = vld [vmem:[#allocation7 + $0x8c] sm:$0xf0] }
 0x346   : > { %v3557_v12 = vadd.f32 %v3556_v36, %v16293_v54  ;;  %v16310_v62 = vpop.f32.mrf.mxu3  ;;  %v13217_v36 = vld [vmem:[#allocation7 + $0xcc] sm:$0xf0]  ;;  %8269 = vmatpush.bf16.msrb.mxu0 %v11170_v47  ;;  %v10866_v47 = vor.u32 %v13209_v38, %v10865_v35 }
 0x347   : > { %4901 = vmatpush.bf16.msra.mxu2 %v10756_v2  ;;  %16930 = vst [vmem:[#allocation16_spill] sm:$0xff] %v16310_v62  ;;  %v13293_v62 = vld [vmem:[#allocation7 + $0x32c] sm:$0xf0] }
 0x348   : > { %4919 = vmatpush.bf16.msrb.mxu3 %v10788_v45  ;;  %v3571_v7 = vadd.f32 %v3570_v17, %v3557_v12  ;;  %v16347_v53 = vpop.f32.mrf.mxu1  ;;  %v13221_v45 = vld [vmem:[#allocation7 + $0xec] sm:$0xf0]  ;;  %v11297_v17 = vld [vmem:[#allocation7 + $0x3e0] sm:$0xf] }
 0x349   : > { %v4000_v48 = vpop.f32.mrf.mxu0  ;;  %v11298_v12 = vor.u32 %v13317_v31, %v11297_v17  ;;  %v10993_v31 = vld [vmem:[#allocation7 + $0x180] sm:$0xf] }
 0x34b   : > { %4902 = vmatpush.bf16.msra.mxu2 %v10748_v3 }
 0x34c   : > { %8256 = vmatpush.bf16.msra.mxu3 %v11042_v1  ;;  %v13309_v1 = vld [vmem:[#allocation7 + $0x3ac] sm:$0xf0] }
 0x34d   : > { %v16319_v22 = vpop.f32.mrf.mxu2  ;;  %v11266_v17 = vor.u32 %v13309_v1, %v11265_v21 }
 0x34e   : > { %v3612_v18 = vpop.f32.mrf.mxu3 }
 0x34f   : > { %4903 = vmatpush.bf16.msra.mxu2 %v10740_v29  ;;  %v3613_v14 = vadd.f32 %v3612_v18, %v3599_v16  ;;  %v10914_v16 = vor.u32 %v13221_v45, %v10913_v4  ;;  %v10897_v29 = vld [vmem:[#allocation7 + $0xc0] sm:$0xf]  ;;  %v13277_v45 = vld [vmem:[#allocation7 + $0x2ac] sm:$0xf0] }
 0x350   : > { %v16355_v43 = vpop.f32.mrf.mxu1  ;;  %v10898_v55 = vor.u32 %v13217_v36, %v10897_v29  ;;  %v11281_v18 = vld [vmem:[#allocation7 + $0x3c0] sm:$0xf]  ;;  %v13241_v29 = vld [vmem:[#allocation7 + $0x18c] sm:$0xf0] }
 0x351   : > { %v16341_v13 = vpop.f32.mrf.mxu0  ;;  %8243 = vmatpush.bf16.msra.mxu1 %v10914_v16  ;;  %v11137_v4 = vld [vmem:[#allocation7 + $0x2a0] sm:$0xf] }
 0x352   : > { %v11138_v28 = vor.u32 %v13277_v45, %v11137_v4  ;;  %v11121_v36 = vld [vmem:[#allocation7 + $0x280] sm:$0xf] }
 0x353   : > { %10798 = vmatmul.msk.bf16.vlgmr.msrb.gmra.mxu3 %vm3167_vm3, %v16227_v6  ;;  %4904 = vmatpush.bf16.msra.mxu2 %v10732_v9  ;;  %v11153_v9 = vld [vmem:[#allocation7 + $0x2c0] sm:$0xf] }
 0x355   : > { %8244 = vmatpush.bf16.msra.mxu1 %v10898_v55  ;;  %v10994_v55 = vor.u32 %v13241_v29, %v10993_v31  ;;  %v10833_v29 = vld [vmem:[#allocation7 + $0x40] sm:$0xf] }
 0x356   : > { %v16317_v54 = vpop.f32.mrf.mxu3 }
 0x357   : > { %4905 = vmatpush.bf16.msra.mxu2 %v10724_v61  ;;  %v13281_v61 = vld [vmem:[#allocation7 + $0x2cc] sm:$0xf0] }
 0x35a   : > { %4906 = vmatmul.bf16.vlgmr.msra.gmra.mxu2 %v16263_v26  ;;  %v4001_v26 = vadd.f32 %v4000_v48, %v3986_v32 }
 0x35b   : > { %8282 = vmatpush.bf16.msrb.mxu2 %v11298_v12 }
 0x35e   : > { %v3958_v6 = vpop.f32.mrf.mxu3 }
 0x365   : > { %v3944_v15 = vpop.f32.mrf.mxu2 }
 0x366   : > { %v3959_v40 = vadd.f32 %v3958_v6, %v3944_v15  ;;  %v16331_v24 = vpop.f32.mrf.mxu3  ;;  %v10881_v15 = vld [vmem:[#allocation7 + $0xa0] sm:$0xf]  ;;  %v16363_v48 = vpop.f32.mrf.mxu1 }
 0x368   : > { %v3973_v0 = vadd.f32 %v3972_v56, %v3959_v40  ;;  %v11154_v56 = vor.u32 %v13281_v61, %v11153_v9  ;;  %v13213_v40 = vld [vmem:[#allocation7 + $0xac] sm:$0xf0] }
 0x369   : > { %v16349_v51 = vpop.f32.mrf.mxu0  ;;  %v10882_v32 = vor.u32 %v13213_v40, %v10881_v15  ;;  %v13305_v9 = vld [vmem:[#allocation7 + $0x38c] sm:$0xf0]  ;;  %v11105_v40 = vld [vmem:[#allocation7 + $0x260] sm:$0xf] }
 0x36a   : > { %v16325_v58 = vadd.f32 %v3973_v0, %v3571_v7  ;;  %v13249_v7 = vld [vmem:[#allocation7 + $0x1cc] sm:$0xf0]  ;;  %v11009_v0 = vld [vmem:[#allocation7 + $0x1a0] sm:$0xf]  ;;  %8270 = vmatpush.bf16.msrb.mxu0 %v11154_v56 }
 0x36b   : > { %v11026_v20 = vor.u32 %v13249_v7, %v11025_v49  ;;  %8245 = vmatpush.bf16.msra.mxu1 %v10882_v32  ;;  %v13273_v49 = vld [vmem:[#allocation7 + $0x28c] sm:$0xf0]  ;;  %v11249_v7 = vld [vmem:[#allocation7 + $0x380] sm:$0xf] }
 0x36c   : > { %v11250_v61 = vor.u32 %v13305_v9, %v11249_v7  ;;  %v10977_v56 = vld [vmem:[#allocation7 + $0x160] sm:$0xf]  ;;  %v13237_v15 = vld [vmem:[#allocation7 + $0x16c] sm:$0xf0] }
 0x36d   : > { %v16327_v46 = vpop.f32.mrf.mxu2  ;;  %8257 = vmatpush.bf16.msra.mxu3 %v11026_v20  ;;  %v11122_v20 = vor.u32 %v13273_v49, %v11121_v36  ;;  %v10978_v32 = vor.u32 %v13237_v15, %v10977_v56  ;;  %v13201_v36 = vld [vmem:[#allocation7 + $0x4c] sm:$0xf0]  ;;  %v11089_v9 = vld [vmem:[#allocation7 + $0x240] sm:$0xf] }
 0x36e   : > { %8271 = vmatpush.bf16.msrb.mxu0 %v11138_v28  ;;  %v16371_v4 = vpop.f32.mrf.mxu1  ;;  %v10834_v49 = vor.u32 %v13201_v36, %v10833_v29  ;;  %v13233_v7 = vld [vmem:[#allocation7 + $0x14c] sm:$0xf0]  ;;  %v11201_v29 = vld [vmem:[#allocation7 + $0x320] sm:$0xf] }
 0x36f   : > { %8246 = vmatpush.bf16.msra.mxu1 %v10866_v47  ;;  %v13297_v56 = vld [vmem:[#allocation7 + $0x34c] sm:$0xf0] }
 0x371   : > { %v16357_v2 = vpop.f32.mrf.mxu0 }
 0x372   : > { %8272 = vmatpush.bf16.msrb.mxu0 %v11122_v20  ;;  %v13265_v20 = vld [vmem:[#allocation7 + $0x24c] sm:$0xf0] }
 0x375   : > { %v4014_v41 = vpop.f32.mrf.mxu2 }
 0x376   : > { %v4015_v39 = vadd.f32 %v4014_v41, %v4001_v26  ;;  %v13245_v26 = vld [vmem:[#allocation7 + $0x1ac] sm:$0xf0]  ;;  %v16379_v38 = vpop.f32.mrf.mxu1 }
 0x377   : > { %v11010_v41 = vor.u32 %v13245_v26, %v11009_v0  ;;  %v13269_v0 = vld [vmem:[#allocation7 + $0x26c] sm:$0xf0]  ;;  %v11233_v26 = vld [vmem:[#allocation7 + $0x360] sm:$0xf] }
 0x378   : > { %v16329_v8 = vadd.f32 %v4015_v39, %v3613_v14  ;;  %v13313_v14 = vld [vmem:[#allocation7 + $0x3cc] sm:$0xf0]  ;;  %v11106_v45 = vor.u32 %v13269_v0, %v11105_v40  ;;  %v10945_v0 = vld [vmem:[#allocation7 + $0x120] sm:$0xf] }
 0x379   : > { %v11282_v6 = vor.u32 %v13313_v14, %v11281_v18  ;;  %v16365_v39 = vpop.f32.mrf.mxu0  ;;  %8258 = vmatpush.bf16.msra.mxu3 %v11010_v41  ;;  %v10849_v18 = vld [vmem:[#allocation7 + $0x60] sm:$0xf]  ;;  %v13205_v14 = vld [vmem:[#allocation7 + $0x6c] sm:$0xf0] }
 0x37a   : > { %v13301_v41 = vld [vmem:[#allocation7 + $0x36c] sm:$0xf0]  ;;  %8273 = vmatpush.bf16.msrb.mxu0 %v11106_v45  ;;  %v11073_v45 = vld [vmem:[#allocation7 + $0x220] sm:$0xf] }
 0x37b   : > { %8283 = vmatpush.bf16.msrb.mxu2 %v11282_v6  ;;  %v10850_v6 = vor.u32 %v13205_v14, %v10849_v18  ;;  %v11234_v21 = vor.u32 %v13301_v41, %v11233_v26  ;;  %v11090_v18 = vor.u32 %v13265_v20, %v11089_v9  ;;  %v11217_v14 = vld [vmem:[#allocation7 + $0x340] sm:$0xf]  ;;  %v13197_v40 = vld [vmem:[#allocation7 + $0x2c] sm:$0xf0] }
 0x37c   : > { %v11218_v15 = vor.u32 %v13297_v56, %v11217_v14  ;;  %v13193_v9 = vld [vmem:[#allocation7 + $0xc] sm:$0xf0]  ;;  %v10929_v20 = vld [vmem:[#allocation7 + $0x100] sm:$0xf] }
 0x37d   : > { %v16333_v59 = vpop.f32.mrf.mxu2  ;;  %8259 = vmatpush.bf16.msra.mxu3 %v10994_v55  ;;  %8247 = vmatpush.bf16.msra.mxu1 %v10850_v6  ;;  %v10961_v55 = vld [vmem:[#allocation7 + $0x140] sm:$0xf] }
 0x37e   : > { %v16335_v10 = vpop.f32.mrf.mxu3  ;;  %v10817_v6 = vld [vmem:[#allocation7 + $0x20] sm:$0xf]  ;;  %8274 = vmatpush.bf16.msrb.mxu0 %v11090_v18  ;;  %v16389_v14 = vpop.f32.mrf.mxu1  ;;  %v13225_v18 = vld [vmem:[#allocation7 + $0x10c] sm:$0xf0] }
 0x37f   : > { %8284 = vmatpush.bf16.msrb.mxu2 %v11266_v17  ;;  %v10818_v26 = vor.u32 %v13197_v40, %v10817_v6  ;;  %v11425_v56 = vld [vmem:[#allocation7 + $0x4e0] sm:$0xf]  ;;  %v13349_v6 = vld [vmem:[#allocation7 + $0x4ec] sm:$0xf0] }
 0x381   : > { %8260 = vmatpush.bf16.msra.mxu3 %v10978_v32  ;;  %v16373_v28 = vpop.f32.mrf.mxu0  ;;  %8248 = vmatpush.bf16.msra.mxu1 %v10834_v49  ;;  %v13229_v32 = vld [vmem:[#allocation7 + $0x12c] sm:$0xf0]  ;;  %v10801_v49 = vld [vmem:[#allocation7] sm:$0xf] }
 0x382   : > { %16932 = vst [vmem:[#allocation26_spill] sm:$0xff] %v16373_v28  ;;  %v10946_v41 = vor.u32 %v13229_v32, %v10945_v0  ;;  %v13381_v0 = vld [vmem:[#allocation7 + $0x5ec] sm:$0xf0]  ;;  %v11057_v32 = vld [vmem:[#allocation7 + $0x200] sm:$0xf] }
 0x383   : > { %8285 = vmatpush.bf16.msrb.mxu2 %v11250_v61  ;;  %v10962_v61 = vor.u32 %v13233_v7, %v10961_v55  ;;  %v11202_v55 = vor.u32 %v13293_v62, %v11201_v29  ;;  %v10930_v62 = vor.u32 %v13225_v18, %v10929_v20  ;;  %v11185_v29 = vld [vmem:[#allocation7 + $0x300] sm:$0xf]  ;;  %v13413_v20 = vld [vmem:[#allocation7 + $0x6ec] sm:$0xf0] }
 0x384   : > { %v11809_v18 = vld [vmem:[#allocation7 + $0x7e0] sm:$0xf] }
 0x385   : > { %v16337_v52 = vpop.f32.mrf.mxu2  ;;  %8261 = vmatpush.bf16.msra.mxu3 %v10962_v61  ;;  %8249 = vmatpush.bf16.msra.mxu1 %v10818_v26  ;;  %v10802_v61 = vor.u32 %v13193_v9, %v10801_v49  ;;  %v11681_v9 = vld [vmem:[#allocation7 + $0x6e0] sm:$0xf] }
 0x386   : > { %v16343_v25 = vpop.f32.mrf.mxu3  ;;  %v11409_v28 = vld [vmem:[#allocation7 + $0x4c0] sm:$0xf] }
 0x387   : > { %8286 = vmatpush.bf16.msrb.mxu2 %v11234_v21  ;;  %v13261_v21 = vld [vmem:[#allocation7 + $0x22c] sm:$0xf0] }
 0x388   : > { %v11074_v36 = vor.u32 %v13261_v21, %v11073_v45  ;;  %v13257_v21 = vld [vmem:[#allocation7 + $0x20c] sm:$0xf0] }
 0x389   : > { %8262 = vmatpush.bf16.msra.mxu3 %v10946_v41  ;;  %8250 = vmatpush.bf16.msra.mxu1 %v10802_v61 }
 0x38a   : > { %8275 = vmatpush.bf16.msrb.mxu0 %v11074_v36  ;;  %v13289_v36 = vld [vmem:[#allocation7 + $0x30c] sm:$0xf0] }
 0x38b   : > { %8287 = vmatpush.bf16.msrb.mxu2 %v11218_v15  ;;  %v4301_v15 = vadd.f32 %v16347_v53, %v16335_v10  ;;  %v11058_v53 = vor.u32 %v13257_v21, %v11057_v32  ;;  %v13409_v32 = vld [vmem:[#allocation7 + $0x6cc] sm:$0xf0]  ;;  %v11793_v21 = vld [vmem:[#allocation7 + $0x7c0] sm:$0xf] }
 0x38d   : > { %v16345_v63 = vpop.f32.mrf.mxu2  ;;  %v4315_v49 = vadd.f32 %v16337_v52, %v4301_v15  ;;  %8263 = vmatpush.bf16.msra.mxu3 %v10930_v62  ;;  %v11410_v52 = vor.u32 %v13345_v30, %v11409_v28  ;;  %v11537_v15 = vld [vmem:[#allocation7 + $0x5c0] sm:$0xf]  ;;  %v13441_v62 = vld [vmem:[#allocation7 + $0x7cc] sm:$0xf0] }
 0x38e   : > { %v16351_v23 = vpop.f32.mrf.mxu3  ;;  %8276 = vmatpush.bf16.msrb.mxu0 %v11058_v53  ;;  %v13373_v28 = vld [vmem:[#allocation7 + $0x5ac] sm:$0xf0]  ;;  %v11649_v53 = vld [vmem:[#allocation7 + $0x6a0] sm:$0xf] }
 0x38f   : > { %8288 = vmatpush.bf16.msrb.mxu2 %v11202_v55  ;;  %v11186_v55 = vor.u32 %v13289_v36, %v11185_v29  ;;  %v11794_v36 = vor.u32 %v13441_v62, %v11793_v21  ;;  %v13369_v21 = vld [vmem:[#allocation7 + $0x58c] sm:$0xf0] }
 0x391   : > { %v16381_v17 = vpop.f32.mrf.mxu0 }
 0x393   : > { %8289 = vmatpush.bf16.msrb.mxu2 %v11186_v55 }
 0x395   : > { %v16353_v34 = vpop.f32.mrf.mxu2 }
 0x396   : > { %v16359_v3 = vpop.f32.mrf.mxu3  ;;  %v4343_v7 = vadd.f32 %v16353_v34, %v16349_v51  ;;  %v11426_v51 = vor.u32 %v13349_v6, %v11425_v56  ;;  %v11553_v34 = vld [vmem:[#allocation7 + $0x5e0] sm:$0xf]  ;;  %v11682_v56 = vor.u32 %v13413_v20, %v11681_v9  ;;  %v13445_v6 = vld [vmem:[#allocation7 + $0x7ec] sm:$0xf0] }
 0x397   : > { %v11554_v41 = vor.u32 %v13381_v0, %v11553_v34  ;;  %v11810_v0 = vor.u32 %v13445_v6, %v11809_v18  ;;  %v11393_v9 = vld [vmem:[#allocation7 + $0x4a0] sm:$0xf]  ;;  %v13405_v20 = vld [vmem:[#allocation7 + $0x6ac] sm:$0xf0] }
 0x398   : > { %v4357_v10 = vadd.f32 %v16351_v23, %v4343_v7  ;;  %8295 = vmatpush.bf16.msrb.mxu1 %v11426_v51  ;;  %v13377_v23 = vld [vmem:[#allocation7 + $0x5cc] sm:$0xf0]  ;;  %v11665_v7 = vld [vmem:[#allocation7 + $0x6c0] sm:$0xf]  ;;  %8321 = vmatpush.bf16.msra.mxu0 %v11682_v56  ;;  %v4551_v51 = vadd.f32 %v16363_v48, %v4315_v49 }
 0x399   : > { %v16393_v40 = vpop.f32.mrf.mxu0  ;;  %8308 = vmatpush.bf16.msrb.mxu3 %v11554_v41  ;;  %v11538_v61 = vor.u32 %v13377_v23, %v11537_v15  ;;  %8334 = vmatpush.bf16.msra.mxu2 %v11810_v0  ;;  %v11666_v29 = vor.u32 %v13409_v32, %v11665_v7  ;;  %v11521_v41 = vld [vmem:[#allocation7 + $0x5a0] sm:$0xf]  ;;  %v13437_v6 = vld [vmem:[#allocation7 + $0x7ac] sm:$0xf0]  ;;  %v11650_v7 = vor.u32 %v13405_v20, %v11649_v53 }
 0x39a   : > { %v11522_v48 = vor.u32 %v13373_v28, %v11521_v41  ;;  %v11777_v49 = vld [vmem:[#allocation7 + $0x7a0] sm:$0xf]  ;;  %v13333_v20 = vld [vmem:[#allocation7 + $0x46c] sm:$0xf0] }
 0x39b   : > { %v11377_v0 = vld [vmem:[#allocation7 + $0x480] sm:$0xf] }
 0x39c   : > { %8296 = vmatpush.bf16.msrb.mxu1 %v11410_v52  ;;  %8322 = vmatpush.bf16.msra.mxu0 %v11666_v29  ;;  %v13337_v52 = vld [vmem:[#allocation7 + $0x48c] sm:$0xf0]  ;;  %v11505_v32 = vld [vmem:[#allocation7 + $0x580] sm:$0xf] }
 0x39d   : > { %v16361_v27 = vpop.f32.mrf.mxu2  ;;  %8309 = vmatpush.bf16.msrb.mxu3 %v11538_v61  ;;  %8335 = vmatpush.bf16.msra.mxu2 %v11794_v36  ;;  %v11378_v61 = vor.u32 %v13337_v52, %v11377_v0  ;;  %v11506_v28 = vor.u32 %v13369_v21, %v11505_v32  ;;  %v11361_v53 = vld [vmem:[#allocation7 + $0x460] sm:$0xf]  ;;  %v13329_v52 = vld [vmem:[#allocation7 + $0x44c] sm:$0xf0] }
 0x39e   : > { %v11489_v36 = vld [vmem:[#allocation7 + $0x560] sm:$0xf]  ;;  %v13361_v21 = vld [vmem:[#allocation7 + $0x54c] sm:$0xf0] }
 0x39f   : > { %v11617_v0 = vld [vmem:[#allocation7 + $0x660] sm:$0xf] }
 0x3a0   : > { %8323 = vmatpush.bf16.msra.mxu0 %v11650_v7  ;;  %v11473_v32 = vld [vmem:[#allocation7 + $0x540] sm:$0xf] }
 0x3a1   : > { %8310 = vmatpush.bf16.msrb.mxu3 %v11522_v48  ;;  %v11345_v48 = vld [vmem:[#allocation7 + $0x440] sm:$0xf] }
 0x3a5   : > { %8311 = vmatpush.bf16.msrb.mxu3 %v11506_v28  ;;  %v13325_v28 = vld [vmem:[#allocation7 + $0x42c] sm:$0xf0] }
 0x3a6   : > { %v16367_v16 = vpop.f32.mrf.mxu3 }
 0x3a7   : > { %v4565_v55 = vadd.f32 %v16367_v16, %v4551_v51  ;;  %v11778_v16 = vor.u32 %v13437_v6, %v11777_v49  ;;  %v11761_v51 = vld [vmem:[#allocation7 + $0x780] sm:$0xf] }
 0x3a9   : > { %v4579_v41 = vadd.f32 %v16365_v39, %v4565_v55  ;;  %8336 = vmatpush.bf16.msra.mxu2 %v11778_v16  ;;  %v4345_v39 = vadd.f32 %v16361_v27, %v16357_v2  ;;  %v11745_v55 = vld [vmem:[#allocation7 + $0x760] sm:$0xf] }
 0x3ae   : > { %v16375_v1 = vpop.f32.mrf.mxu3 }
 0x3b1   : > { %v4893_v15 = vpop.f32.mrf.mxu0 }
 0x3b5   : > { %v16369_v12 = vpop.f32.mrf.mxu2 }
 0x3b6   : > { %v4593_v34 = vadd.f32 %v16369_v12, %v4357_v10  ;;  %v13341_v12 = vld [vmem:[#allocation7 + $0x4ac] sm:$0xf0]  ;;  %v4865_v10 = vpop.f32.mrf.mxu1 }
 0x3b7   : > { %v11394_v30 = vor.u32 %v13341_v12, %v11393_v9  ;;  %v13433_v12 = vld [vmem:[#allocation7 + $0x78c] sm:$0xf0] }
 0x3b8   : > { %v4607_v18 = vadd.f32 %v16381_v17, %v4593_v34  ;;  %v11633_v17 = vld [vmem:[#allocation7 + $0x680] sm:$0xf]  ;;  %v13401_v34 = vld [vmem:[#allocation7 + $0x68c] sm:$0xf0] }
 0x3b9   : > { %8297 = vmatpush.bf16.msrb.mxu1 %v11394_v30  ;;  %v11762_v30 = vor.u32 %v13433_v12, %v11761_v51  ;;  %v11474_v51 = vor.u32 %v13361_v21, %v11473_v32  ;;  %v11729_v12 = vld [vmem:[#allocation7 + $0x740] sm:$0xf]  ;;  %v4003_v32 = vadd.f32 %v16341_v13, %v16339_v11 }
 0x3ba   : > { %v4621_v29 = vadd.f32 %v16379_v38, %v4607_v18  ;;  %v11362_v38 = vor.u32 %v13333_v20, %v11361_v53  ;;  %v13429_v18 = vld [vmem:[#allocation7 + $0x76c] sm:$0xf0] }
 0x3bb   : > { %8337 = vmatpush.bf16.msra.mxu2 %v11762_v30  ;;  %v11746_v27 = vor.u32 %v13429_v18, %v11745_v55  ;;  %v11713_v55 = vld [vmem:[#allocation7 + $0x720] sm:$0xf]  ;;  %v13421_v18 = vld [vmem:[#allocation7 + $0x72c] sm:$0xf0] }
 0x3bd   : > { %v16377_v35 = vpop.f32.mrf.mxu2  ;;  %8298 = vmatpush.bf16.msrb.mxu1 %v11378_v61  ;;  %v11346_v61 = vor.u32 %v13329_v52, %v11345_v48  ;;  %v11441_v52 = vld [vmem:[#allocation7 + $0x500] sm:$0xf] }
 0x3bf   : > { %8338 = vmatpush.bf16.msra.mxu2 %v11746_v27 }
 0x3c1   : > { %8299 = vmatpush.bf16.msrb.mxu1 %v11362_v38 }
 0x3c5   : > { %v16385_v31 = vpop.f32.mrf.mxu2  ;;  %8300 = vmatpush.bf16.msrb.mxu1 %v11346_v61 }
 0x3c6   : > { %v16383_v47 = vpop.f32.mrf.mxu3 }
 0x3c7   : > { %v4866_v56 = vadd.f32 %v4865_v10, %v16383_v47 }
 0x3c9   : > { %v4880_v62 = vadd.f32 %v16385_v31, %v4866_v56  ;;  %v11634_v31 = vor.u32 %v13401_v34, %v11633_v17  ;;  %v13365_v56 = vld [vmem:[#allocation7 + $0x56c] sm:$0xf0]  ;;  %v11601_v17 = vld [vmem:[#allocation7 + $0x640] sm:$0xf] }
 0x3ca   : > { %v11490_v7 = vor.u32 %v13365_v56, %v11489_v36  ;;  %v13393_v34 = vld [vmem:[#allocation7 + $0x64c] sm:$0xf0]  ;;  %v3197_v56 = vadd.f32 %v16290_v37, %v16287_v33 }
 0x3cb   : > { %v4926_v49 = vadd.f32 %v4880_v62, %v4579_v41  ;;  %v3239_v62 = vadd.f32 %v16295_v60, %v16302_v57  ;;  %8324 = vmatpush.bf16.msra.mxu0 %v11634_v31  ;;  %v13425_v41 = vld [vmem:[#allocation7 + $0x74c] sm:$0xf0]  ;;  %v11602_v31 = vor.u32 %v13393_v34, %v11601_v17 }
 0x3cc   : > { %8312 = vmatpush.bf16.msrb.mxu3 %v11490_v7  ;;  %v13357_v36 = vld [vmem:[#allocation7 + $0x52c] sm:$0xf0]  ;;  %v11730_v30 = vor.u32 %v13425_v41, %v11729_v12  ;;  %v3211_v48 = vadd.f32 %v16297_v44, %v3197_v56  ;;  %v4867_v12 = vpop.f32.mrf.mxu1 }
 0x3cd   : > { %v16397_v45 = vpop.f32.mrf.mxu2  ;;  %v4930_v16 = vmax.f32 %v16325_v58, %v4926_v49  ;;  %v4303_v49 = vadd.f32 %v16355_v43, %v16343_v25  ;;  %v11313_v25 = vld [vmem:[#allocation7 + $0x400] sm:$0xf]  ;;  %v13321_v43 = vld [vmem:[#allocation7 + $0x40c] sm:$0xf0] }
 0x3ce   : > { %v16395_v26 = vpop.f32.mrf.mxu3  ;;  %8339 = vmatpush.bf16.msra.mxu2 %v11730_v30  ;;  %v13385_v44 = vld [vmem:[#allocation7 + $0x60c] sm:$0xf0]  ;;  %v11314_v27 = vor.u32 %v13321_v43, %v11313_v25  ;;  %v3545_v34 = vadd.f32 %v16299_v50, %v3211_v48  ;;  %v16459_v43 = vld [vmem:[#allocation7 + $0x8e0] sm:$0xf] }
 0x3cf   : > { %v4317_v33 = vadd.f32 %v16345_v63, %v4303_v49  ;;  %v13417_v17 = vld [vmem:[#allocation7 + $0x70c] sm:$0xf0] }
 0x3d0   : > { %8313 = vmatpush.bf16.msrb.mxu3 %v11474_v51 }
 0x3d1   : > { %v4553_v11 = vadd.f32 %v16371_v4, %v4317_v33 }
 0x3d3   : > { %v4567_v50 = vadd.f32 %v16375_v1, %v4553_v11 }
 0x3d6   : > { %v4921_v47 = vpop.f32.mrf.mxu3 }
 0x3dd   : > { %v4907_v23 = vpop.f32.mrf.mxu2 }
 0x3de   : > { %v4908_v9 = vadd.f32 %v4907_v23, %v4893_v15  ;;  %v13397_v15 = vld [vmem:[#allocation7 + $0x66c] sm:$0xf0]  ;;  %v4923_v21 = vpop.f32.mrf.mxu3 }
 0x3e0   : > { %v4922_v10 = vadd.f32 %v4921_v47, %v4908_v9  ;;  %v11618_v9 = vor.u32 %v13397_v15, %v11617_v0  ;;  %v3253_v47 = vadd.f32 %v16305_v5, %v3239_v62  ;;  %v11329_v5 = vld [vmem:[#allocation7 + $0x420] sm:$0xf]  ;;  %v13389_v15 = vld [vmem:[#allocation7 + $0x62c] sm:$0xf0]  ;;  %v11714_v62 = vor.u32 %v13421_v18, %v11713_v55 }
 0x3e1   : > { %v11585_v0 = vld [vmem:[#allocation7 + $0x620] sm:$0xf]  ;;  %v11330_v38 = vor.u32 %v13325_v28, %v11329_v5 }
 0x3e2   : > { %v4927_v6 = vadd.f32 %v4922_v10, %v4621_v29  ;;  %8325 = vmatpush.bf16.msra.mxu0 %v11618_v9  ;;  %v11586_v7 = vor.u32 %v13389_v15, %v11585_v0  ;;  %v11569_v9 = vld [vmem:[#allocation7 + $0x600] sm:$0xf]  ;;  %8340 = vmatpush.bf16.msra.mxu2 %v11714_v62  ;;  %v5107_v15 = vld [vmem:[#allocation6] sm:$0x3]  ;;  %v16467_v62 = vld [vmem:[#allocation7 + $0x9ec] sm:$0xf0] }
 0x3e3   : > { %8301 = vmatpush.bf16.msrb.mxu1 %v11330_v38 }
 0x3e4   : > { %v4931_v23 = vmax.f32 %v16329_v8, %v4927_v6  ;;  %v4359_v8 = vadd.f32 %v16359_v3, %v4345_v39  ;;  %v11457_v3 = vld [vmem:[#allocation7 + $0x520] sm:$0xf]  ;;  %v4895_v6 = vpop.f32.mrf.mxu0  ;;  %v3587_v39 = vadd.f32 %v16314_v42, %v3253_v47  ;;  %v13353_v42 = vld [vmem:[#allocation7 + $0x50c] sm:$0xf0]  ;;  %v4017_v47 = vadd.f32 %v16333_v59, %v4003_v32 }
 0x3e5   : > { %v4909_v10 = vpop.f32.mrf.mxu2  ;;  %v11458_v37 = vor.u32 %v13357_v36, %v11457_v3  ;;  %v11442_v13 = vor.u32 %v13353_v42, %v11441_v52  ;;  %v4868_v59 = vadd.f32 %v4867_v12, %v16395_v26 }
 0x3e6   : > { %v4938_v2 = vrot.slane %v4931_v23, 6  ;;  %v4595_v53 = vadd.f32 %v16377_v35, %v4359_v8  ;;  %v4910_v35 = vadd.f32 %v4909_v10, %v4895_v6  ;;  %8326 = vmatpush.bf16.msra.mxu0 %v11602_v31  ;;  %v3601_v63 = vadd.f32 %v16323_v19, %v3587_v39  ;;  %v16933_v31 = vld [vmem:[#allocation24_spill] sm:$0xff] }
 0x3e7   : > { %8314 = vmatpush.bf16.msrb.mxu3 %v11458_v37  ;;  %v3961_v19 = vadd.f32 %v16331_v24, %v16327_v46  ;;  %8302 = vmatpush.bf16.msrb.mxu1 %v11314_v27  ;;  %v4882_v3 = vadd.f32 %v16397_v45, %v4868_v59  ;;  %v16935_v45 = vld [vmem:[#allocation16_spill] sm:$0xff]  ;;  %v16457_v37 = vperm.slane %v5107_v15, 0 }
 0x3e8   : > { %v4940_v60 = vsel %vm1892_vm4, %v4930_v16, %v4938_v2  ;;  %v4941_v57 = vsel %vm1896_vm5, %v4930_v16, %v4938_v2  ;;  %v16420_v58 = vsel %vm1901_vm6, %v4930_v16, %v4938_v2  ;;  %v16423_v29 = vsel %vm1905_vm7, %v4938_v2, %v4930_v16 }
 0x3e9   : > { %v4942_v20 = vrot.slane %v4941_v57, 2  ;;  %4954 = vst [vmem:[#allocation1] ss:$4 sm:$0xff] %v4940_v60  ;;  %v4609_v23 = vadd.f32 %v16393_v40, %v4595_v53  ;;  %v4944_v16 = vrot.slane %v16420_v58, 4  ;;  %v4924_v2 = vadd.f32 %v4923_v21, %v4910_v35  ;;  %v11697_v40 = vld [vmem:[#allocation7 + $0x700] sm:$0xf] }
 0x3ea   : > { %v3615_v51 = vadd.f32 %v16317_v54, %v3601_v63  ;;  %8327 = vmatpush.bf16.msra.mxu0 %v11586_v7  ;;  %v11570_v60 = vor.u32 %v13385_v44, %v11569_v9  ;;  %v11698_v57 = vor.u32 %v13417_v17, %v11697_v40  ;;  %v4946_v58 = vrot.slane %v16423_v29, 6  ;;  %v16465_v21 = vld [vmem:[#allocation7 + $0x9e0] sm:$0xf] }
 0x3eb   : > { %4958 = vst [vmem:[#allocation1 + $0x20] ss:$4 sm:$0xff] %v4942_v20  ;;  %v4623_v41 = vadd.f32 %v16389_v14, %v4609_v23  ;;  %v3559_v14 = vadd.f32 %v16319_v22, %v3545_v34  ;;  %8315 = vmatpush.bf16.msrb.mxu3 %v11442_v13  ;;  %v3975_v36 = vadd.f32 %v16933_v31, %v3961_v19  ;;  %v16934_v22 = vld [vmem:[#allocation26_spill] sm:$0xff]  ;;  %v16469_v63 = vperm.slane %v5107_v15, 1  ;;  %v16477_v13 = vld [vmem:[#allocation7 + $0xae0] sm:$0xf] }
 0x3ec   : > { %v4022_v5 = vadd.f32 %v4017_v47, %v3615_v51  ;;  %8341 = vmatpush.bf16.msra.mxu2 %v11698_v57  ;;  %v4581_v6 = vadd.f32 %v16934_v22, %v4567_v50  ;;  %v16461_v23 = vld [vmem:[#allocation7 + $0x8ec] sm:$0xf0]  ;;  %v12066_v47 = vor.u32 %v16467_v62, %v16465_v21  ;;  %v16499_v22 = vld [vmem:[#allocation7 + $0xbc0] sm:$0xf] }
 0x3ed   : > { %v4929_v54 = vadd.f32 %v4924_v2, %v4623_v41  ;;  %v3573_v55 = vadd.f32 %v16935_v45, %v3559_v14  ;;  %v11938_v34 = vor.u32 %v16461_v23, %v16459_v43  ;;  %v16488_v41 = vld [vmem:[#allocation7 + $0xbe0] sm:$0xf]  ;;  %v13573_v57 = vld [vmem:[#allocation7 + $0xbec] sm:$0xf0] }
 0x3ee   : > { %8328 = vmatpush.bf16.msra.mxu0 %v11570_v60  ;;  %v4928_v18 = vadd.f32 %v4882_v3, %v4581_v6  ;;  %v13473_v14 = vld [vmem:[#allocation7 + $0x8cc] sm:$0xf0]  ;;  %v12033_v62 = vld [vmem:[#allocation7 + $0x9a0] sm:$0xf] }
 0x3ef   : > { %v4933_v30 = vmax.f32 %v4022_v5, %v4929_v54  ;;  %v4021_v52 = vadd.f32 %v3975_v36, %v3573_v55  ;;  %v13569_v6 = vld [vmem:[#allocation7 + $0xbcc] sm:$0xf0] }
 0x3f0   : > { %v4955_v8 = vld.sshfl [vmem:[#allocation1] sm:$0xff pattern:$0x73625140]  ;;  %v4956_v61 = vld.sshfl [vmem:[#allocation1 + $0x8] sm:$0xff pattern:$0x73625140] }
 0x3f1   : > { %v4995_v4 = vsel %vm1892_vm4, %v4955_v8, -inf  ;;  %4961 = vst [vmem:[#allocation1] ss:$4 sm:$0xff] %v4944_v16  ;;  %v5002_v46 = vsel %vm1892_vm4, %v4956_v61, -inf  ;;  %v16463_v42 = vrot.slane %v4933_v30, 6  ;;  %v16471_v2 = vmax.f32 %v4021_v52, %v4928_v18 }
 0x3f2   : > { %v4996_v10 = vrot.slane %v4995_v4, 4  ;;  %v4959_v24 = vld.sshfl [vmem:[#allocation1 + $0x20] sm:$0xff pattern:$0x73625140]  ;;  %v5003_v1 = vrot.slane %v5002_v46, 4 }
 0x3f3   : > { %v5009_v26 = vsel %vm1892_vm4, %v4959_v24, -inf  ;;  %v4960_v28 = vld.sshfl [vmem:[#allocation1 + $0x28] sm:$0xff pattern:$0x73625140]  ;;  %v16479_v8 = vld [vmem:[#allocation7 + $0xaec] sm:$0xf0]  ;;  %v4947_v61 = vsel %vm1892_vm4, %v16471_v2, %v16463_v42  ;;  %v4948_v51 = vsel %vm1896_vm5, %v16471_v2, %v16463_v42 }
 0x3f4   : > { %v4997_v53 = vmax.f32 %v4995_v4, %v4996_v10  ;;  %v5010_v20 = vrot.slane %v5009_v26, 4  ;;  %v5016_v29 = vsel %vm1892_vm4, %v4960_v28, -inf  ;;  %4964 = vst [vmem:[#allocation1 + $0x20] ss:$4 sm:$0xff] %v4946_v58  ;;  %v5004_v56 = vmax.f32 %v5002_v46, %v5003_v1  ;;  %v11921_v24 = vld [vmem:[#allocation7 + $0x8c0] sm:$0xf] }
 0x3f5   : > { %v5017_v49 = vrot.slane %v5016_v29, 4  ;;  %v11922_v23 = vor.u32 %v13473_v14, %v11921_v24  ;;  %v11905_v52 = vld [vmem:[#allocation7 + $0x8a0] sm:$0xf]  ;;  %v16524_v24 = vsel %vm1905_vm7, %v16463_v42, %v16471_v2 }
 0x3f6   : > { %v4998_v0 = vrot.slane %v4997_v53, 2  ;;  %v5011_v39 = vmax.f32 %v5009_v26, %v5010_v20  ;;  %v5005_v35 = vrot.slane %v5004_v56, 2  ;;  %v4949_v26 = vrot.slane %v4948_v51, 2  ;;  %v12049_v20 = vld [vmem:[#allocation7 + $0x9c0] sm:$0xf] }
 0x3f7   : > { %v5018_v38 = vmax.f32 %v5016_v29, %v5017_v49  ;;  %v13505_v29 = vld [vmem:[#allocation7 + $0x9cc] sm:$0xf0] }
 0x3f8   : > { %v4999_v48 = vmax.f32 %v4997_v53, %v4998_v0  ;;  %v5012_v33 = vrot.slane %v5011_v39, 2  ;;  %v5006_v25 = vmax.f32 %v5004_v56, %v5005_v35  ;;  %v4962_v60 = vld.sshfl [vmem:[#allocation1] sm:$0xff pattern:$0x73625140]  ;;  %v12194_v53 = vor.u32 %v16479_v8, %v16477_v13  ;;  %v12177_v56 = vld [vmem:[#allocation7 + $0xac0] sm:$0xf] }
 0x3f9   : > { %v5019_v7 = vrot.slane %v5018_v38, 2  ;;  %v4963_v50 = vld.sshfl [vmem:[#allocation1 + $0x8] sm:$0xff pattern:$0x73625140]  ;;  %v5023_v58 = vsel %vm1892_vm4, %v4962_v60, -inf }
 0x3fa   : > { %v5000_v32 = vrot.slane %v4999_v48, 1  ;;  %v5013_v9 = vmax.f32 %v5011_v39, %v5012_v33  ;;  %v5007_v44 = vrot.slane %v5006_v25, 1  ;;  %v5030_v54 = vsel %vm1892_vm4, %v4963_v50, -inf  ;;  %4967 = vst [vmem:[#allocation1] ss:$4 sm:$0xff] %v4947_v61 }
 0x3fb   : > { %v5020_v16 = vmax.f32 %v5018_v38, %v5019_v7  ;;  %v5024_v5 = vrot.slane %v5023_v58, 4  ;;  %v5031_v1 = vrot.slane %v5030_v54, 4  ;;  %v13537_v49 = vld [vmem:[#allocation7 + $0xacc] sm:$0xf0]  ;;  %v12322_v38 = vor.u32 %v13573_v57, %v16488_v41  ;;  %v12289_v8 = vld [vmem:[#allocation7 + $0xba0] sm:$0xf] }
 0x3fc   : > { %v5001_v27 = vmax.f32 %v4999_v48, %v5000_v32  ;;  %v5014_v40 = vrot.slane %v5013_v9, 1  ;;  %v5008_v17 = vmax.f32 %v5006_v25, %v5007_v44  ;;  %v4965_v15 = vld.sshfl [vmem:[#allocation1 + $0x20] sm:$0xff pattern:$0x73625140]  ;;  %v12050_v7 = vor.u32 %v13505_v29, %v12049_v20 }
 0x3fd   : > { %v5021_v11 = vrot.slane %v5020_v16, 1  ;;  %v5025_v30 = vmax.f32 %v5023_v58, %v5024_v5  ;;  %v5032_v0 = vmax.f32 %v5030_v54, %v5031_v1  ;;  %v5037_v45 = vsel %vm1892_vm4, %v4965_v15, -inf  ;;  %v4966_v55 = vld.sshfl [vmem:[#allocation1 + $0x28] sm:$0xff pattern:$0x73625140] }
 0x3fe   : > { %v5113_v19 = vadd.f32 %v16457_v37, %v5001_v27  ;;  %v5015_v12 = vmax.f32 %v5013_v9, %v5014_v40  ;;  %v5114_v59 = vadd.f32 %v16469_v63, %v5008_v17  ;;  %v5038_v25 = vrot.slane %v5037_v45, 4  ;;  %4970 = vst [vmem:[#allocation1 + $0x20] ss:$4 sm:$0xff] %v4949_v26  ;;  %v13469_v32 = vld [vmem:[#allocation7 + $0x8ac] sm:$0xf0] }
 0x3ff   : > { %v5022_v4 = vmax.f32 %v5020_v16, %v5021_v11  ;;  %v5026_v48 = vrot.slane %v5025_v30, 2  ;;  %v5033_v33 = vrot.slane %v5032_v0, 2  ;;  %v5044_v21 = vsel %vm1892_vm4, %v4966_v55, -inf  ;;  %v13501_v9 = vld [vmem:[#allocation7 + $0x9ac] sm:$0xf0] }
 0x400   : > { %v5129_v10 = vmax.f32 %v5113_v19, 0.0  ;;  %v5115_v46 = vadd.f32 %v16457_v37, %v5015_v12  ;;  %v5130_v28 = vmax.f32 %v5114_v59, 0.0  ;;  %v5039_v27 = vmax.f32 %v5037_v45, %v5038_v25  ;;  %v13533_v13 = vld [vmem:[#allocation7 + $0xaac] sm:$0xf0]  ;;  %v11889_v59 = vld [vmem:[#allocation7 + $0x880] sm:$0xf] }
 0x401   : > { %v5116_v3 = vadd.f32 %v16469_v63, %v5022_v4  ;;  %v5027_v44 = vmax.f32 %v5025_v30, %v5026_v48  ;;  %v5034_v16 = vmax.f32 %v5032_v0, %v5033_v33  ;;  %v5045_v40 = vrot.slane %v5044_v21, 4  ;;  %v13565_v61 = vld [vmem:[#allocation7 + $0xbac] sm:$0xf0]  ;;  %v12017_v1 = vld [vmem:[#allocation7 + $0x980] sm:$0xf] }
 0x402   : > { %v16497_v31 = vpack.c.bf16 %v5129_v10, %v5129_v10  ;;  %v5131_v36 = vmax.f32 %v5115_v46, 0.0  ;;  %v16501_v39 = vpack.c.bf16 %v5130_v28, %v5130_v28  ;;  %v16516_v17 = vsel %vm1901_vm6, %v16471_v2, %v16463_v42  ;;  %v13465_v4 = vld [vmem:[#allocation7 + $0x88c] sm:$0xf0]  ;;  %v12145_v28 = vld [vmem:[#allocation7 + $0xa80] sm:$0xf] }
 0x403   : > { %v5132_v35 = vmax.f32 %v5116_v3, 0.0  ;;  %v12306_v11 = vor.u32 %v13569_v6, %v16499_v22  ;;  %v5028_v51 = vrot.slane %v5027_v44, 1  ;;  %v5035_v19 = vrot.slane %v5034_v16, 1  ;;  %v13497_v26 = vld [vmem:[#allocation7 + $0x98c] sm:$0xf0] }
 0x404   : > { %8251 = vmatmul.bf16.vlgmr.msra.gmra.mxu1 %v16497_v31  ;;  %v16506_v18 = vpack.c.bf16 %v5131_v36, %v5131_v36  ;;  %8264 = vmatmul.bf16.vlgmr.msra.gmra.mxu3 %v16501_v39  ;;  %v5040_v12 = vrot.slane %v5039_v27, 2  ;;  %v5046_v41 = vmax.f32 %v5044_v21, %v5045_v40  ;;  %v11906_v60 = vor.u32 %v13469_v32, %v11905_v52  ;;  %v13529_v3 = vld [vmem:[#allocation7 + $0xa8c] sm:$0xf0]  ;;  %v11873_v42 = vld [vmem:[#allocation7 + $0x860] sm:$0xf] }
 0x405   : > { %8347 = vmatpush.bf16.msra.mxu1 %v11938_v34  ;;  %v16509_v43 = vpack.c.bf16 %v5132_v35, %v5132_v35  ;;  %8360 = vmatpush.bf16.msra.mxu3 %v12066_v47  ;;  %v12178_v34 = vor.u32 %v13537_v49, %v12177_v56  ;;  %v12161_v47 = vld [vmem:[#allocation7 + $0xaa0] sm:$0xf]  ;;  %v12034_v50 = vor.u32 %v13501_v9, %v12033_v62  ;;  %v4951_v46 = vrot.slane %v16516_v17, 4  ;;  %v13561_v22 = vld [vmem:[#allocation7 + $0xb8c] sm:$0xf0] }
 0x406   : > { %8277 = vmatmul.bf16.vlgmr.msrb.gmra.mxu0 %v16506_v18  ;;  %v5029_v57 = vmax.f32 %v5027_v44, %v5028_v51  ;;  %v5036_v58 = vmax.f32 %v5034_v16, %v5035_v19  ;;  %v5041_v54 = vmax.f32 %v5039_v27, %v5040_v12  ;;  %v5047_v10 = vrot.slane %v5046_v41, 2  ;;  %v12273_v49 = vld [vmem:[#allocation7 + $0xb80] sm:$0xf]  ;;  %v13461_v30 = vld [vmem:[#allocation7 + $0x86c] sm:$0xf0] }
 0x407   : > { %8290 = vmatmul.bf16.vlgmr.msrb.gmra.mxu2 %v16509_v43  ;;  %8373 = vmatpush.bf16.msrb.mxu0 %v12194_v53  ;;  %v12162_v14 = vor.u32 %v13533_v13, %v12161_v47  ;;  %v12290_v5 = vor.u32 %v13565_v61, %v12289_v8  ;;  %v11890_v56 = vor.u32 %v13465_v4, %v11889_v59  ;;  %v12001_v0 = vld [vmem:[#allocation7 + $0x960] sm:$0xf]  ;;  %v13493_v48 = vld [vmem:[#allocation7 + $0x96c] sm:$0xf0] }
 0x408   : > { %8386 = vmatpush.bf16.msrb.mxu2 %v12322_v38  ;;  %v5117_v53 = vadd.f32 %v16457_v37, %v5029_v57  ;;  %v5118_v20 = vadd.f32 %v16469_v63, %v5036_v58  ;;  %v5042_v29 = vrot.slane %v5041_v54, 1  ;;  %v5048_v36 = vmax.f32 %v5046_v41, %v5047_v10  ;;  %v12129_v33 = vld [vmem:[#allocation7 + $0xa60] sm:$0xf]  ;;  %v13525_v52 = vld [vmem:[#allocation7 + $0xa6c] sm:$0xf0] }
 0x409   : > { %8348 = vmatpush.bf16.msra.mxu1 %v11922_v23  ;;  %8361 = vmatpush.bf16.msra.mxu3 %v12050_v7  ;;  %v12018_v2 = vor.u32 %v13497_v26, %v12017_v1  ;;  %v4953_v38 = vrot.slane %v16524_v24, 6  ;;  %v12146_v45 = vor.u32 %v13529_v3, %v12145_v28  ;;  %v12274_v25 = vor.u32 %v13561_v22, %v12273_v49  ;;  %v12257_v32 = vld [vmem:[#allocation7 + $0xb60] sm:$0xf]  ;;  %v13557_v21 = vld [vmem:[#allocation7 + $0xb6c] sm:$0xf0] }
 0x40a   : > { %v5133_v6 = vmax.f32 %v5117_v53, 0.0  ;;  %v5043_v15 = vmax.f32 %v5041_v54, %v5042_v29  ;;  %v5049_v35 = vrot.slane %v5048_v36, 1  ;;  %v5134_v55 = vmax.f32 %v5118_v20, 0.0  ;;  %v11857_v9 = vld [vmem:[#allocation7 + $0x840] sm:$0xf] }
 0x40b   : > { %8374 = vmatpush.bf16.msrb.mxu0 %v12178_v34  ;;  %v11874_v62 = vor.u32 %v13461_v30, %v11873_v42  ;;  %v13457_v44 = vld [vmem:[#allocation7 + $0x84c] sm:$0xf0]  ;;  %v11985_v16 = vld [vmem:[#allocation7 + $0x940] sm:$0xf]  ;;  %v12002_v40 = vor.u32 %v13493_v48, %v12001_v0  ;;  %v12130_v61 = vor.u32 %v13525_v52, %v12129_v33  ;;  %v12258_v57 = vor.u32 %v13557_v21, %v12257_v32 }
 0x40c   : > { %8387 = vmatpush.bf16.msrb.mxu2 %v12306_v11  ;;  %v5119_v23 = vadd.f32 %v16457_v37, %v5043_v15  ;;  %v5050_v7 = vmax.f32 %v5048_v36, %v5049_v35  ;;  %v16530_v27 = vpack.c.bf16 %v5133_v6, %v5133_v6  ;;  %v13489_v47 = vld [vmem:[#allocation7 + $0x94c] sm:$0xf0]  ;;  %v12113_v13 = vld [vmem:[#allocation7 + $0xa40] sm:$0xf]  ;;  %v16533_v8 = vpack.c.bf16 %v5134_v55, %v5134_v55 }
 0x40d   : > { %8349 = vmatpush.bf16.msra.mxu1 %v11906_v60  ;;  %8362 = vmatpush.bf16.msra.mxu3 %v12034_v50  ;;  %v13521_v51 = vld [vmem:[#allocation7 + $0xa4c] sm:$0xf0]  ;;  %v16535_v19 = vld [vmem:[#allocation7 + $0xb40] sm:$0xf]  ;;  %v11858_v58 = vor.u32 %v13457_v44, %v11857_v9  ;;  %v11986_v26 = vor.u32 %v13489_v47, %v11985_v16 }
 0x40e   : > { %v5135_v34 = vmax.f32 %v5119_v23, 0.0  ;;  %v5120_v11 = vadd.f32 %v16469_v63, %v5050_v7  ;;  %v16537_v12 = vld [vmem:[#allocation7 + $0xb4c] sm:$0xf0]  ;;  %v11841_v50 = vld [vmem:[#allocation7 + $0x820] sm:$0xf]  ;;  %v12114_v20 = vor.u32 %v13521_v51, %v12113_v13 }
 0x40f   : > { %8375 = vmatpush.bf16.msrb.mxu0 %v12162_v14  ;;  %v13453_v59 = vld [vmem:[#allocation7 + $0x82c] sm:$0xf0]  ;;  %v11969_v54 = vld [vmem:[#allocation7 + $0x920] sm:$0xf]  ;;  %v12242_v49 = vor.u32 %v16537_v12, %v16535_v19 }
 0x410   : > { %8388 = vmatpush.bf16.msrb.mxu2 %v12290_v5  ;;  %v16540_v41 = vpack.c.bf16 %v5135_v34, %v5135_v34  ;;  %v5136_v60 = vmax.f32 %v5120_v11, 0.0  ;;  %v4968_v4 = vld.sshfl [vmem:[#allocation1] sm:$0xff pattern:$0x73625140]  ;;  %v12097_v28 = vld [vmem:[#allocation7 + $0xa20] sm:$0xf]  ;;  %v11842_v17 = vor.u32 %v13453_v59, %v11841_v50 }
 0x411   : > { %8350 = vmatpush.bf16.msra.mxu1 %v11890_v56  ;;  %8363 = vmatpush.bf16.msra.mxu3 %v12018_v2  ;;  %v13485_v10 = vld [vmem:[#allocation7 + $0x92c] sm:$0xf0]  ;;  %v5051_v14 = vsel %vm1892_vm4, %v4968_v4, -inf  ;;  %v4969_v5 = vld.sshfl [vmem:[#allocation1 + $0x8] sm:$0xff pattern:$0x73625140] }
 0x412   : > { %v16545_v1 = vpack.c.bf16 %v5136_v60, %v5136_v60  ;;  %v5052_v3 = vrot.slane %v5051_v14, 4  ;;  %v5058_v53 = vsel %vm1892_vm4, %v4969_v5, -inf  ;;  %4973 = vst [vmem:[#allocation1] ss:$4 sm:$0xff] %v4951_v46  ;;  %v13517_v29 = vld [vmem:[#allocation7 + $0xa2c] sm:$0xf0] }
 0x413   : > { %8376 = vmatpush.bf16.msrb.mxu0 %v12146_v45  ;;  %v5059_v36 = vrot.slane %v5058_v53, 4  ;;  %v4971_v56 = vld.sshfl [vmem:[#allocation1 + $0x20] sm:$0xff pattern:$0x73625140]  ;;  %v12225_v22 = vld [vmem:[#allocation7 + $0xb20] sm:$0xf]  ;;  %v12098_v21 = vor.u32 %v13517_v29, %v12097_v28 }
 0x414   : > { %8389 = vmatpush.bf16.msrb.mxu2 %v12274_v25  ;;  %8303 = vmatmul.bf16.vlgmr.msrb.gmra.mxu1 %v16530_v27  ;;  %v13549_v42 = vld [vmem:[#allocation7 + $0xb2c] sm:$0xf0]  ;;  %v11825_v2 = vld [vmem:[#allocation7 + $0x800] sm:$0xf]  ;;  %v5053_v30 = vmax.f32 %v5051_v14, %v5052_v3  ;;  %v5065_v0 = vsel %vm1892_vm4, %v4971_v56, -inf  ;;  %v11970_v25 = vor.u32 %v13485_v10, %v11969_v54 }
 0x415   : > { %8316 = vmatmul.bf16.vlgmr.msrb.gmra.mxu3 %v16533_v8  ;;  %8351 = vmatpush.bf16.msra.mxu1 %v11874_v62  ;;  %v13449_v6 = vld [vmem:[#allocation7 + $0x80c] sm:$0xf0]  ;;  %v4972_v15 = vld.sshfl [vmem:[#allocation1 + $0x28] sm:$0xff pattern:$0x73625140]  ;;  %v5060_v55 = vmax.f32 %v5058_v53, %v5059_v36  ;;  %v5066_v48 = vrot.slane %v5065_v0, 4  ;;  %v12226_v24 = vor.u32 %v13549_v42, %v12225_v22 }
 0x416   : > { %8364 = vmatpush.bf16.msra.mxu3 %v12002_v40  ;;  %8329 = vmatmul.bf16.vlgmr.msra.gmra.mxu0 %v16540_v41  ;;  %v11953_v46 = vld [vmem:[#allocation7 + $0x900] sm:$0xf]  ;;  %v13481_v35 = vld [vmem:[#allocation7 + $0x90c] sm:$0xf0]  ;;  %v5072_v33 = vsel %vm1892_vm4, %v4972_v15, -inf  ;;  %v5054_v52 = vrot.slane %v5053_v30, 2 }
 0x417   : > { %8377 = vmatpush.bf16.msrb.mxu0 %v12130_v61  ;;  %8342 = vmatmul.bf16.vlgmr.msra.gmra.mxu2 %v16545_v1  ;;  %v12449_v45 = vld [vmem:[#allocation7 + $0xce0] sm:$0xf]  ;;  %4976 = vst [vmem:[#allocation1 + $0x20] ss:$4 sm:$0xff] %v4953_v38  ;;  %v13605_v23 = vld [vmem:[#allocation7 + $0xcec] sm:$0xf0]  ;;  %v5067_v16 = vmax.f32 %v5065_v0, %v5066_v48  ;;  %v11826_v38 = vor.u32 %v13449_v6, %v11825_v2 }
 0x418   : > { %8390 = vmatpush.bf16.msrb.mxu2 %v12258_v57  ;;  %v12577_v7 = vld [vmem:[#allocation7 + $0xde0] sm:$0xf]  ;;  %v5073_v32 = vrot.slane %v5072_v33, 4  ;;  %v13637_v62 = vld [vmem:[#allocation7 + $0xdec] sm:$0xf0]  ;;  %v5061_v44 = vrot.slane %v5060_v55, 2  ;;  %v5055_v47 = vmax.f32 %v5053_v30, %v5054_v52  ;;  %v11954_v60 = vor.u32 %v13481_v35, %v11953_v46 }
 0x419   : > { %8352 = vmatpush.bf16.msra.mxu1 %v11858_v58  ;;  %v12081_v9 = vld [vmem:[#allocation7 + $0xa00] sm:$0xf]  ;;  %v13513_v40 = vld [vmem:[#allocation7 + $0xa0c] sm:$0xf0]  ;;  %v5068_v12 = vrot.slane %v5067_v16, 2  ;;  %v12450_v50 = vor.u32 %v13605_v23, %v12449_v45  ;;  %v12578_v54 = vor.u32 %v13637_v62, %v12577_v7 }
 0x41a   : > { %8365 = vmatpush.bf16.msra.mxu3 %v11986_v26  ;;  %v12209_v34 = vld [vmem:[#allocation7 + $0xb00] sm:$0xf]  ;;  %v13545_v11 = vld [vmem:[#allocation7 + $0xb0c] sm:$0xf0]  ;;  %v5074_v13 = vmax.f32 %v5072_v33, %v5073_v32  ;;  %v5062_v19 = vmax.f32 %v5060_v55, %v5061_v44  ;;  %v5056_v57 = vrot.slane %v5055_v47, 1  ;;  %v12082_v10 = vor.u32 %v13513_v40, %v12081_v9 }
 0x41b   : > { %8378 = vmatpush.bf16.msrb.mxu0 %v12114_v20  ;;  %v12705_v61 = vld [vmem:[#allocation7 + $0xee0] sm:$0xf]  ;;  %v13669_v51 = vld [vmem:[#allocation7 + $0xeec] sm:$0xf0]  ;;  %v5069_v28 = vmax.f32 %v5067_v16, %v5068_v12  ;;  %v12210_v56 = vor.u32 %v13545_v11, %v12209_v34 }
 0x41c   : > { %8391 = vmatpush.bf16.msrb.mxu2 %v12242_v49  ;;  %v12833_v59 = vld [vmem:[#allocation7 + $0xfe0] sm:$0xf]  ;;  %v13701_v4 = vld [vmem:[#allocation7 + $0xfec] sm:$0xf0]  ;;  %v5075_v58 = vrot.slane %v5074_v13, 2  ;;  %v5063_v14 = vrot.slane %v5062_v19, 1  ;;  %v12706_v3 = vor.u32 %v13669_v51, %v12705_v61  ;;  %v5057_v53 = vmax.f32 %v5055_v47, %v5056_v57 }
 0x41d   : > { %8353 = vmatpush.bf16.msra.mxu1 %v11842_v17  ;;  %v12433_v5 = vld [vmem:[#allocation7 + $0xcc0] sm:$0xf]  ;;  %v13601_v26 = vld [vmem:[#allocation7 + $0xccc] sm:$0xf0]  ;;  %v5070_v22 = vrot.slane %v5069_v28, 1  ;;  %v12834_v6 = vor.u32 %v13701_v4, %v12833_v59 }
 0x41e   : > { %8366 = vmatpush.bf16.msra.mxu3 %v11970_v25  ;;  %v12561_v20 = vld [vmem:[#allocation7 + $0xdc0] sm:$0xf]  ;;  %v13633_v29 = vld [vmem:[#allocation7 + $0xdcc] sm:$0xf0]  ;;  %v5076_v36 = vmax.f32 %v5074_v13, %v5075_v58  ;;  %v5064_v49 = vmax.f32 %v5062_v19, %v5063_v14  ;;  %v5121_v30 = vadd.f32 %v16457_v37, %v5057_v53  ;;  %v12434_v0 = vor.u32 %v13601_v26, %v12433_v5 }
 0x41f   : > { %8379 = vmatpush.bf16.msrb.mxu0 %v12098_v21  ;;  %v12689_v42 = vld [vmem:[#allocation7 + $0xec0] sm:$0xf]  ;;  %v13665_v2 = vld [vmem:[#allocation7 + $0xecc] sm:$0xf0]  ;;  %v12562_v45 = vor.u32 %v13633_v29, %v12561_v20  ;;  %v5071_v55 = vmax.f32 %v5069_v28, %v5070_v22 }
 0x420   : > { %8392 = vmatpush.bf16.msrb.mxu2 %v12226_v24  ;;  %v5077_v15 = vrot.slane %v5076_v36, 1  ;;  %v12817_v17 = vld [vmem:[#allocation7 + $0xfc0] sm:$0xf]  ;;  %v13697_v46 = vld [vmem:[#allocation7 + $0xfcc] sm:$0xf0]  ;;  %v5122_v35 = vadd.f32 %v16469_v63, %v5064_v49  ;;  %v5137_v25 = vmax.f32 %v5121_v30, 0.0  ;;  %v12690_v7 = vor.u32 %v13665_v2, %v12689_v42 }
 0x421   : > { %8354 = vmatpush.bf16.msra.mxu1 %v11826_v38  ;;  %v12417_v48 = vld [vmem:[#allocation7 + $0xca0] sm:$0xf]  ;;  %v13597_v33 = vld [vmem:[#allocation7 + $0xcac] sm:$0xf0]  ;;  %v5123_v62 = vadd.f32 %v16457_v37, %v5071_v55  ;;  %v12818_v9 = vor.u32 %v13697_v46, %v12817_v17 }
 0x422   : > { %8367 = vmatpush.bf16.msra.mxu3 %v11954_v60  ;;  %v5078_v23 = vmax.f32 %v5076_v36, %v5077_v15  ;;  %v12545_v52 = vld [vmem:[#allocation7 + $0xda0] sm:$0xf]  ;;  %v13629_v32 = vld [vmem:[#allocation7 + $0xdac] sm:$0xf0]  ;;  %v5138_v21 = vmax.f32 %v5122_v35, 0.0  ;;  %v16560_v40 = vpack.c.bf16 %v5137_v25, %v5137_v25  ;;  %v12418_v11 = vor.u32 %v13597_v33, %v12417_v48 }
 0x423   : > { %8380 = vmatpush.bf16.msrb.mxu0 %v12082_v10  ;;  %v12673_v44 = vld [vmem:[#allocation7 + $0xea0] sm:$0xf]  ;;  %v13661_v16 = vld [vmem:[#allocation7 + $0xeac] sm:$0xf0]  ;;  %v5139_v38 = vmax.f32 %v5123_v62, 0.0  ;;  %v12546_v61 = vor.u32 %v13629_v32, %v12545_v52 }
 0x424   : > { %8393 = vmatpush.bf16.msrb.mxu2 %v12210_v56  ;;  %v5124_v34 = vadd.f32 %v16469_v63, %v5078_v23  ;;  %v12801_v47 = vld [vmem:[#allocation7 + $0xfa0] sm:$0xf]  ;;  %v13693_v13 = vld [vmem:[#allocation7 + $0xfac] sm:$0xf0]  ;;  %v16563_v24 = vpack.c.bf16 %v5138_v21, %v5138_v21  ;;  %8355 = vmatmul.bf16.vlgmr.msra.gmra.mxu1 %v16560_v40  ;;  %v12674_v60 = vor.u32 %v13661_v16, %v12673_v44 }
 0x425   : > { %8399 = vmatpush.bf16.msrb.mxu1 %v12450_v50  ;;  %v12401_v51 = vld [vmem:[#allocation7 + $0xc80] sm:$0xf]  ;;  %v13593_v19 = vld [vmem:[#allocation7 + $0xc8c] sm:$0xf0]  ;;  %v16567_v4 = vpack.c.bf16 %v5139_v38, %v5139_v38  ;;  %v12802_v10 = vor.u32 %v13693_v13, %v12801_v47 }
 0x426   : > { %8412 = vmatpush.bf16.msrb.mxu3 %v12578_v54  ;;  %v5140_v12 = vmax.f32 %v5124_v34, 0.0  ;;  %v12529_v50 = vld [vmem:[#allocation7 + $0xd80] sm:$0xf]  ;;  %v13625_v59 = vld [vmem:[#allocation7 + $0xd8c] sm:$0xf0]  ;;  %v12402_v14 = vor.u32 %v13593_v19, %v12401_v51 }
 0x427   : > { %8425 = vmatpush.bf16.msra.mxu0 %v12706_v3  ;;  %8368 = vmatmul.bf16.vlgmr.msra.gmra.mxu3 %v16563_v24  ;;  %v12657_v57 = vld [vmem:[#allocation7 + $0xe80] sm:$0xf]  ;;  %v13657_v58 = vld [vmem:[#allocation7 + $0xe8c] sm:$0xf0]  ;;  %v12530_v28 = vor.u32 %v13625_v59, %v12529_v50 }
 0x428   : > { %8438 = vmatpush.bf16.msra.mxu2 %v12834_v6  ;;  %v16569_v54 = vpack.c.bf16 %v5140_v12, %v5140_v12  ;;  %v12785_v5 = vld [vmem:[#allocation7 + $0xf80] sm:$0xf]  ;;  %v13689_v26 = vld [vmem:[#allocation7 + $0xf8c] sm:$0xf0]  ;;  %8381 = vmatmul.bf16.vlgmr.msrb.gmra.mxu0 %v16567_v4  ;;  %v12658_v29 = vor.u32 %v13657_v58, %v12657_v57 }
 0x429   : > { %8400 = vmatpush.bf16.msrb.mxu1 %v12434_v0  ;;  %v12385_v3 = vld [vmem:[#allocation7 + $0xc60] sm:$0xf]  ;;  %v13589_v53 = vld [vmem:[#allocation7 + $0xc6c] sm:$0xf0]  ;;  %v12786_v6 = vor.u32 %v13689_v26, %v12785_v5 }
 0x42a   : > { %8413 = vmatpush.bf16.msrb.mxu3 %v12562_v45  ;;  %v12513_v20 = vld [vmem:[#allocation7 + $0xd60] sm:$0xf]  ;;  %8394 = vmatmul.bf16.vlgmr.msrb.gmra.mxu2 %v16569_v54  ;;  %v13621_v36 = vld [vmem:[#allocation7 + $0xd6c] sm:$0xf0]  ;;  %v12386_v30 = vor.u32 %v13589_v53, %v12385_v3 }
 0x42b   : > { %8426 = vmatpush.bf16.msra.mxu0 %v12690_v7  ;;  %v12641_v56 = vld [vmem:[#allocation7 + $0xe60] sm:$0xf]  ;;  %v13653_v49 = vld [vmem:[#allocation7 + $0xe6c] sm:$0xf0]  ;;  %v12514_v46 = vor.u32 %v13621_v36, %v12513_v20 }
 0x42c   : > { %8439 = vmatpush.bf16.msra.mxu2 %v12818_v9  ;;  %v12769_v22 = vld [vmem:[#allocation7 + $0xf60] sm:$0xf]  ;;  %v13685_v42 = vld [vmem:[#allocation7 + $0xf6c] sm:$0xf0]  ;;  %v12642_v55 = vor.u32 %v13653_v49, %v12641_v56 }
 0x42d   : > { %8401 = vmatpush.bf16.msrb.mxu1 %v12418_v11  ;;  %v12369_v2 = vld [vmem:[#allocation7 + $0xc40] sm:$0xf]  ;;  %v13585_v0 = vld [vmem:[#allocation7 + $0xc4c] sm:$0xf0]  ;;  %v12770_v9 = vor.u32 %v13685_v42, %v12769_v22  ;;  %v13219_v22 = vld [vmem:[#allocation7 + $0xe4] sm:$0xf] }
 0x42e   : > { %8414 = vmatpush.bf16.msrb.mxu3 %v12546_v61  ;;  %v12497_v15 = vld [vmem:[#allocation7 + $0xd40] sm:$0xf]  ;;  %v13617_v17 = vld [vmem:[#allocation7 + $0xd4c] sm:$0xf0]  ;;  %v12370_v44 = vor.u32 %v13585_v0, %v12369_v2  ;;  %v10915_v42 = vld [vmem:[#allocation7 + $0xf0] sm:$0xf0] }
 0x42f   : > { %8427 = vmatpush.bf16.msra.mxu0 %v12674_v60  ;;  %v12625_v35 = vld [vmem:[#allocation7 + $0xe40] sm:$0xf]  ;;  %v4974_v45 = vld.sshfl [vmem:[#allocation1] sm:$0xff pattern:$0x73625140]  ;;  %v12498_v47 = vor.u32 %v13617_v17, %v12497_v15 }
 0x430   : > { %8440 = vmatpush.bf16.msra.mxu2 %v12802_v10  ;;  %v13649_v48 = vld [vmem:[#allocation7 + $0xe4c] sm:$0xf0]  ;;  %v5079_v33 = vsel %vm1892_vm4, %v4974_v45, -inf  ;;  %v4975_v25 = vld.sshfl [vmem:[#allocation1 + $0x8] sm:$0xff pattern:$0x73625140] }
 0x431   : > { %8402 = vmatpush.bf16.msrb.mxu1 %v12402_v14  ;;  %v12753_v23 = vld [vmem:[#allocation7 + $0xf40] sm:$0xf]  ;;  %v13681_v7 = vld [vmem:[#allocation7 + $0xf4c] sm:$0xf0]  ;;  %v5080_v21 = vrot.slane %v5079_v33, 4  ;;  %v5086_v62 = vsel %vm1892_vm4, %v4975_v25, -inf  ;;  %v12626_v19 = vor.u32 %v13649_v48, %v12625_v35 }
 0x432   : > { %8415 = vmatpush.bf16.msrb.mxu3 %v12530_v28  ;;  %v12353_v52 = vld [vmem:[#allocation7 + $0xc20] sm:$0xf]  ;;  %v13581_v32 = vld [vmem:[#allocation7 + $0xc2c] sm:$0xf0]  ;;  %v5087_v34 = vrot.slane %v5086_v62, 4  ;;  %v12754_v28 = vor.u32 %v13681_v7, %v12753_v23 }
 0x433   : > { %8428 = vmatpush.bf16.msra.mxu0 %v12658_v29  ;;  %v12481_v16 = vld [vmem:[#allocation7 + $0xd20] sm:$0xf]  ;;  %v4977_v11 = vld.sshfl [vmem:[#allocation1 + $0x20] sm:$0xff pattern:$0x73625140]  ;;  %v5081_v38 = vmax.f32 %v5079_v33, %v5080_v21  ;;  %v12354_v3 = vor.u32 %v13581_v32, %v12353_v52 }
 0x434   : > { %8441 = vmatpush.bf16.msra.mxu2 %v12786_v6  ;;  %v13613_v13 = vld [vmem:[#allocation7 + $0xd2c] sm:$0xf0]  ;;  %v5093_v61 = vsel %vm1892_vm4, %v4977_v11, -inf  ;;  %v4978_v51 = vld.sshfl [vmem:[#allocation1 + $0x28] sm:$0xff pattern:$0x73625140]  ;;  %v5088_v50 = vmax.f32 %v5086_v62, %v5087_v34  ;;  %v10918_v62 = vor.u32 %v13219_v22, %v10915_v42 }
 0x435   : > { %8403 = vmatpush.bf16.msrb.mxu1 %v12386_v30  ;;  %v12609_v12 = vld [vmem:[#allocation7 + $0xe20] sm:$0xf]  ;;  %v13645_v60 = vld [vmem:[#allocation7 + $0xe2c] sm:$0xf0]  ;;  %v5094_v59 = vrot.slane %v5093_v61, 4  ;;  %v5100_v57 = vsel %vm1892_vm4, %v4978_v51, -inf  ;;  %v12482_v56 = vor.u32 %v13613_v13, %v12481_v16 }
 0x436   : > { %8416 = vmatpush.bf16.msrb.mxu3 %v12514_v46  ;;  %v12737_v58 = vld [vmem:[#allocation7 + $0xf20] sm:$0xf]  ;;  %v13677_v10 = vld [vmem:[#allocation7 + $0xf2c] sm:$0xf0]  ;;  %v5082_v5 = vrot.slane %v5081_v38, 2  ;;  %v5101_v26 = vrot.slane %v5100_v57, 4  ;;  %v12610_v30 = vor.u32 %v13645_v60, %v12609_v12 }
 0x437   : > { %8429 = vmatpush.bf16.msra.mxu0 %v12642_v55  ;;  %v12337_v14 = vld [vmem:[#allocation7 + $0xc00] sm:$0xf]  ;;  %v13577_v53 = vld [vmem:[#allocation7 + $0xc0c] sm:$0xf0]  ;;  %v5089_v29 = vrot.slane %v5088_v50, 2  ;;  %v5095_v36 = vmax.f32 %v5093_v61, %v5094_v59  ;;  %v12738_v33 = vor.u32 %v13677_v10, %v12737_v58 }
 0x438   : > { %8442 = vmatpush.bf16.msra.mxu2 %v12770_v9  ;;  %v12465_v20 = vld [vmem:[#allocation7 + $0xd00] sm:$0xf]  ;;  %v13609_v49 = vld [vmem:[#allocation7 + $0xd0c] sm:$0xf0]  ;;  %v5083_v2 = vmax.f32 %v5081_v38, %v5082_v5  ;;  %v5102_v6 = vmax.f32 %v5100_v57, %v5101_v26  ;;  %v13251_v0 = vld [vmem:[#allocation7 + $0x1e4] sm:$0xf]  ;;  %v12338_v25 = vor.u32 %v13577_v53, %v12337_v14 }
 0x439   : > { %8404 = vmatpush.bf16.msrb.mxu1 %v12370_v44  ;;  %v11043_v15 = vld [vmem:[#allocation7 + $0x1f0] sm:$0xf0]  ;;  %v5090_v17 = vmax.f32 %v5088_v50, %v5089_v29  ;;  %v5096_v46 = vrot.slane %v5095_v36, 2  ;;  %v12593_v35 = vld [vmem:[#allocation7 + $0xe00] sm:$0xf]  ;;  %v12466_v21 = vor.u32 %v13609_v49, %v12465_v20 }
 0x43a   : > { %8417 = vmatpush.bf16.msrb.mxu3 %v12498_v47  ;;  %v13641_v45 = vld [vmem:[#allocation7 + $0xe0c] sm:$0xf0]  ;;  %v5084_v55 = vrot.slane %v5083_v2, 1  ;;  %v5103_v48 = vrot.slane %v5102_v6, 2  ;;  %v13283_v7 = vld [vmem:[#allocation7 + $0x2e4] sm:$0xf]  ;;  %v11046_v47 = vor.u32 %v13251_v0, %v11043_v15 }
 0x43b   : > { %8430 = vmatpush.bf16.msra.mxu0 %v12626_v19  ;;  %v5091_v23 = vrot.slane %v5090_v17, 1  ;;  %v11171_v52 = vld [vmem:[#allocation7 + $0x2f0] sm:$0xf0]  ;;  %v5097_v32 = vmax.f32 %v5095_v36, %v5096_v46  ;;  %v12721_v9 = vld [vmem:[#allocation7 + $0xf00] sm:$0xf]  ;;  %v12594_v13 = vor.u32 %v13641_v45, %v12593_v35 }
 0x43c   : > { %8443 = vmatpush.bf16.msra.mxu2 %v12754_v28  ;;  %v13673_v44 = vld [vmem:[#allocation7 + $0xf0c] sm:$0xf0]  ;;  %v5085_v16 = vmax.f32 %v5083_v2, %v5084_v55  ;;  %v13315_v34 = vld [vmem:[#allocation7 + $0x3e4] sm:$0xf]  ;;  %v5104_v11 = vmax.f32 %v5102_v6, %v5103_v48  ;;  %v11299_v61 = vld [vmem:[#allocation7 + $0x3f0] sm:$0xf0]  ;;  %v11174_v60 = vor.u32 %v13283_v7, %v11171_v52 }
 0x43d   : > { %8405 = vmatpush.bf16.msrb.mxu1 %v12354_v3  ;;  %v5092_v38 = vmax.f32 %v5090_v17, %v5091_v23  ;;  %v5098_v51 = vrot.slane %v5097_v32, 1  ;;  %v13215_v19 = vld [vmem:[#allocation7 + $0xc4] sm:$0xf]  ;;  %v10899_v59 = vld [vmem:[#allocation7 + $0xd0] sm:$0xf0]  ;;  %v12722_v58 = vor.u32 %v13673_v44, %v12721_v9  ;;  %v11302_v53 = vor.u32 %v13315_v34, %v11299_v61 }
 0x43e   : > { %8418 = vmatpush.bf16.msrb.mxu3 %v12482_v56  ;;  %v5125_v12 = vadd.f32 %v16457_v37, %v5085_v16  ;;  %v5105_v50 = vrot.slane %v5104_v11, 1  ;;  %v13247_v57 = vld [vmem:[#allocation7 + $0x1c4] sm:$0xf]  ;;  %v11027_v5 = vld [vmem:[#allocation7 + $0x1d0] sm:$0xf0]  ;;  %v10902_v49 = vor.u32 %v13215_v19, %v10899_v59 }
 0x43f   : > { %8431 = vmatpush.bf16.msra.mxu0 %v12610_v30  ;;  %v5126_v10 = vadd.f32 %v16469_v63, %v5092_v38  ;;  %v5099_v14 = vmax.f32 %v5097_v32, %v5098_v51  ;;  %v13279_v26 = vld [vmem:[#allocation7 + $0x2c4] sm:$0xf]  ;;  %v11155_v28 = vld [vmem:[#allocation7 + $0x2d0] sm:$0xf0]  ;;  %v11030_v30 = vor.u32 %v13247_v57, %v11027_v5 }
 0x440   : > { %8444 = vmatpush.bf16.msra.mxu2 %v12738_v33  ;;  %v5141_v3 = vmax.f32 %v5125_v12, 0.0  ;;  %v5106_v20 = vmax.f32 %v5104_v11, %v5105_v50  ;;  %v13311_v29 = vld [vmem:[#allocation7 + $0x3c4] sm:$0xf]  ;;  %v11283_v22 = vld [vmem:[#allocation7 + $0x3d0] sm:$0xf0]  ;;  %v11158_v0 = vor.u32 %v13279_v26, %v11155_v28 }
 0x441   : > { %8406 = vmatpush.bf16.msrb.mxu1 %v12338_v25  ;;  %v5142_v36 = vmax.f32 %v5126_v10, 0.0  ;;  %v5127_v56 = vadd.f32 %v16457_v37, %v5099_v14  ;;  %v13211_v42 = vld [vmem:[#allocation7 + $0xa4] sm:$0xf]  ;;  %v10883_v15 = vld [vmem:[#allocation7 + $0xb0] sm:$0xf0] }
 0x442   : > { %8419 = vmatpush.bf16.msrb.mxu3 %v12466_v21  ;;  %v16580_v2 = vpack.c.bf16 %v5141_v3, %v5141_v3  ;;  %v5128_v6 = vadd.f32 %v16469_v63, %v5106_v20  ;;  %v13243_v17 = vld [vmem:[#allocation7 + $0x1a4] sm:$0xf]  ;;  %v11011_v46 = vld [vmem:[#allocation7 + $0x1b0] sm:$0xf0]  ;;  %v11286_v63 = vor.u32 %v13311_v29, %v11283_v22  ;;  %v10886_v25 = vor.u32 %v13211_v42, %v10883_v15 }
 0x443   : > { %8432 = vmatpush.bf16.msra.mxu0 %v12594_v13  ;;  %v16583_v35 = vpack.c.bf16 %v5142_v36, %v5142_v36  ;;  %v5143_v45 = vmax.f32 %v5127_v56, 0.0  ;;  %v13275_v55 = vld [vmem:[#allocation7 + $0x2a4] sm:$0xf]  ;;  %v11139_v48 = vld [vmem:[#allocation7 + $0x2b0] sm:$0xf0]  ;;  %v11014_v32 = vor.u32 %v13243_v17, %v11011_v46 }
 0x444   : > { %8445 = vmatpush.bf16.msra.mxu2 %v12722_v58  ;;  %8407 = vmatmul.bf16.vlgmr.msrb.gmra.mxu1 %v16580_v2  ;;  %v5144_v37 = vmax.f32 %v5128_v6, 0.0  ;;  %v13307_v23 = vld [vmem:[#allocation7 + $0x3a4] sm:$0xf]  ;;  %v11267_v7 = vld [vmem:[#allocation7 + $0x3b0] sm:$0xf0]  ;;  %v11142_v21 = vor.u32 %v13275_v55, %v11139_v48 }
 0x445   : > { %8451 = vmatpush.bf16.msra.mxu1 %v10918_v62  ;;  %8420 = vmatmul.bf16.vlgmr.msrb.gmra.mxu3 %v16583_v35  ;;  %v16587_v33 = vpack.c.bf16 %v5143_v45, %v5143_v45  ;;  %v13207_v62 = vld [vmem:[#allocation7 + $0x84] sm:$0xf]  ;;  %v10867_v9 = vld [vmem:[#allocation7 + $0x90] sm:$0xf0] }
 0x446   : > { %8464 = vmatpush.bf16.msra.mxu3 %v11046_v47  ;;  %v16589_v52 = vpack.c.bf16 %v5144_v37, %v5144_v37  ;;  %v13239_v44 = vld [vmem:[#allocation7 + $0x184] sm:$0xf]  ;;  %v10995_v16 = vld [vmem:[#allocation7 + $0x190] sm:$0xf0]  ;;  %v11270_v47 = vor.u32 %v13307_v23, %v11267_v7  ;;  %v10870_v13 = vor.u32 %v13207_v62, %v10867_v9 }
 0x447   : > { %8477 = vmatpush.bf16.msrb.mxu0 %v11174_v60  ;;  %v13271_v34 = vld [vmem:[#allocation7 + $0x284] sm:$0xf]  ;;  %v11123_v11 = vld [vmem:[#allocation7 + $0x290] sm:$0xf0]  ;;  %v10998_v51 = vor.u32 %v13239_v44, %v10995_v16 }
 0x448   : > { %8490 = vmatpush.bf16.msrb.mxu2 %v11302_v53  ;;  %8433 = vmatmul.bf16.vlgmr.msra.gmra.mxu0 %v16587_v33  ;;  %v13303_v38 = vld [vmem:[#allocation7 + $0x384] sm:$0xf]  ;;  %v11251_v61 = vld [vmem:[#allocation7 + $0x390] sm:$0xf0]  ;;  %v11126_v19 = vor.u32 %v13271_v34, %v11123_v11 }
 0x449   : > { %8452 = vmatpush.bf16.msra.mxu1 %v10902_v49  ;;  %8446 = vmatmul.bf16.vlgmr.msra.gmra.mxu2 %v16589_v52  ;;  %v13203_v12 = vld [vmem:[#allocation7 + $0x64] sm:$0xf]  ;;  %v10851_v60 = vld [vmem:[#allocation7 + $0x70] sm:$0xf0]  ;;  %v11254_v10 = vor.u32 %v13303_v38, %v11251_v61 }
 0x44a   : > { %8465 = vmatpush.bf16.msra.mxu3 %v11030_v30  ;;  %v13235_v50 = vld [vmem:[#allocation7 + $0x164] sm:$0xf]  ;;  %v10979_v59 = vld [vmem:[#allocation7 + $0x170] sm:$0xf0]  ;;  %v10854_v14 = vor.u32 %v13203_v12, %v10851_v60 }
 0x44b   : > { %8478 = vmatpush.bf16.msrb.mxu0 %v11158_v0  ;;  %v13267_v57 = vld [vmem:[#allocation7 + $0x264] sm:$0xf]  ;;  %v11107_v58 = vld [vmem:[#allocation7 + $0x270] sm:$0xf0]  ;;  %v10982_v28 = vor.u32 %v13235_v50, %v10979_v59 }
 0x44c   : > { %8491 = vmatpush.bf16.msrb.mxu2 %v11286_v63  ;;  %v13299_v5 = vld [vmem:[#allocation7 + $0x364] sm:$0xf]  ;;  %v11235_v26 = vld [vmem:[#allocation7 + $0x370] sm:$0xf0]  ;;  %v11110_v3 = vor.u32 %v13267_v57, %v11107_v58 }
 0x44d   : > { %8453 = vmatpush.bf16.msra.mxu1 %v10886_v25  ;;  %v13199_v53 = vld [vmem:[#allocation7 + $0x44] sm:$0xf]  ;;  %v10835_v20 = vld [vmem:[#allocation7 + $0x50] sm:$0xf0]  ;;  %v11238_v22 = vor.u32 %v13299_v5, %v11235_v26 }
 0x44e   : > { %8466 = vmatpush.bf16.msra.mxu3 %v11014_v32  ;;  %v13231_v29 = vld [vmem:[#allocation7 + $0x144] sm:$0xf]  ;;  %v10963_v36 = vld [vmem:[#allocation7 + $0x150] sm:$0xf0]  ;;  %v10838_v42 = vor.u32 %v13199_v53, %v10835_v20 }
 0x44f   : > { %8479 = vmatpush.bf16.msrb.mxu0 %v11142_v21  ;;  %v13263_v56 = vld [vmem:[#allocation7 + $0x244] sm:$0xf]  ;;  %v11091_v49 = vld [vmem:[#allocation7 + $0x250] sm:$0xf0]  ;;  %v10966_v0 = vor.u32 %v13231_v29, %v10963_v36 }
 0x450   : > { %8492 = vmatpush.bf16.msrb.mxu2 %v11270_v47  ;;  %v13295_v6 = vld [vmem:[#allocation7 + $0x344] sm:$0xf]  ;;  %v11219_v30 = vld [vmem:[#allocation7 + $0x350] sm:$0xf0]  ;;  %v11094_v15 = vor.u32 %v13263_v56, %v11091_v49 }
 0x451   : > { %8454 = vmatpush.bf16.msra.mxu1 %v10870_v13  ;;  %v13195_v17 = vld [vmem:[#allocation7 + $0x24] sm:$0xf]  ;;  %v10819_v46 = vld [vmem:[#allocation7 + $0x30] sm:$0xf0]  ;;  %v11222_v63 = vor.u32 %v13295_v6, %v11219_v30 }
 0x452   : > { %8467 = vmatpush.bf16.msra.mxu3 %v10998_v51  ;;  %v13227_v45 = vld [vmem:[#allocation7 + $0x124] sm:$0xf]  ;;  %v10947_v55 = vld [vmem:[#allocation7 + $0x130] sm:$0xf0]  ;;  %v10822_v25 = vor.u32 %v13195_v17, %v10819_v46 }
 0x453   : > { %8480 = vmatpush.bf16.msrb.mxu0 %v11126_v19  ;;  %v13259_v48 = vld [vmem:[#allocation7 + $0x224] sm:$0xf]  ;;  %v11075_v37 = vld [vmem:[#allocation7 + $0x230] sm:$0xf0]  ;;  %v10950_v21 = vor.u32 %v13227_v45, %v10947_v55 }
 0x454   : > { %8493 = vmatpush.bf16.msrb.mxu2 %v11254_v10  ;;  %v13291_v23 = vld [vmem:[#allocation7 + $0x324] sm:$0xf]  ;;  %v11203_v7 = vld [vmem:[#allocation7 + $0x330] sm:$0xf0]  ;;  %v11078_v62 = vor.u32 %v13259_v48, %v11075_v37 }
 0x455   : > { %8455 = vmatpush.bf16.msra.mxu1 %v10854_v14  ;;  %v13191_v32 = vld [vmem:[#allocation7 + $0x4] sm:$0xf]  ;;  %v10803_v9 = vld [vmem:[#allocation7 + $0x10] sm:$0xf0]  ;;  %v11206_v51 = vor.u32 %v13291_v23, %v11203_v7 }
 0x456   : > { %8468 = vmatpush.bf16.msra.mxu3 %v10982_v28  ;;  %v13223_v44 = vld [vmem:[#allocation7 + $0x104] sm:$0xf]  ;;  %v10931_v16 = vld [vmem:[#allocation7 + $0x110] sm:$0xf0]  ;;  %v10806_v19 = vor.u32 %v13191_v32, %v10803_v9 }
 0x457   : > { %8481 = vmatpush.bf16.msrb.mxu0 %v11110_v3  ;;  %v13347_v34 = vld [vmem:[#allocation7 + $0x4e4] sm:$0xf]  ;;  %v11427_v11 = vld [vmem:[#allocation7 + $0x4f0] sm:$0xf0]  ;;  %v10934_v50 = vor.u32 %v13223_v44, %v10931_v16 }
 0x458   : > { %8494 = vmatpush.bf16.msrb.mxu2 %v11238_v22  ;;  %v13379_v47 = vld [vmem:[#allocation7 + $0x5e4] sm:$0xf]  ;;  %v11555_v13 = vld [vmem:[#allocation7 + $0x5f0] sm:$0xf0]  ;;  %v11430_v59 = vor.u32 %v13347_v34, %v11427_v11 }
 0x459   : > { %8456 = vmatpush.bf16.msra.mxu1 %v10838_v42  ;;  %v13255_v38 = vld [vmem:[#allocation7 + $0x204] sm:$0xf]  ;;  %v11059_v61 = vld [vmem:[#allocation7 + $0x210] sm:$0xf0]  ;;  %v11558_v10 = vor.u32 %v13379_v47, %v11555_v13 }
 0x45a   : > { %8469 = vmatpush.bf16.msra.mxu3 %v10966_v0  ;;  %v13411_v12 = vld [vmem:[#allocation7 + $0x6e4] sm:$0xf]  ;;  %v11683_v60 = vld [vmem:[#allocation7 + $0x6f0] sm:$0xf0]  ;;  %v11062_v14 = vor.u32 %v13255_v38, %v11059_v61 }
 0x45b   : > { %8482 = vmatpush.bf16.msrb.mxu0 %v11094_v15  ;;  %v13287_v57 = vld [vmem:[#allocation7 + $0x304] sm:$0xf]  ;;  %v11187_v58 = vld [vmem:[#allocation7 + $0x310] sm:$0xf0]  ;;  %v11686_v3 = vor.u32 %v13411_v12, %v11683_v60 }
 0x45c   : > { %8495 = vmatpush.bf16.msrb.mxu2 %v11222_v63  ;;  %v13443_v5 = vld [vmem:[#allocation7 + $0x7e4] sm:$0xf]  ;;  %v11811_v26 = vld [vmem:[#allocation7 + $0x7f0] sm:$0xf0]  ;;  %v11190_v36 = vor.u32 %v13287_v57, %v11187_v58 }
 0x45d   : > { %8457 = vmatpush.bf16.msra.mxu1 %v10822_v25  ;;  %v13343_v28 = vld [vmem:[#allocation7 + $0x4c4] sm:$0xf]  ;;  %v11411_v53 = vld [vmem:[#allocation7 + $0x4d0] sm:$0xf0]  ;;  %v11814_v22 = vor.u32 %v13443_v5, %v11811_v26 }
 0x45e   : > { %8470 = vmatpush.bf16.msra.mxu3 %v10950_v21  ;;  %v13375_v20 = vld [vmem:[#allocation7 + $0x5c4] sm:$0xf]  ;;  %v11539_v29 = vld [vmem:[#allocation7 + $0x5d0] sm:$0xf0]  ;;  %v11414_v42 = vor.u32 %v13343_v28, %v11411_v53 }
 0x45f   : > { %8483 = vmatpush.bf16.msrb.mxu0 %v11078_v62  ;;  %v13407_v56 = vld [vmem:[#allocation7 + $0x6c4] sm:$0xf]  ;;  %v11667_v49 = vld [vmem:[#allocation7 + $0x6d0] sm:$0xf0]  ;;  %v11542_v6 = vor.u32 %v13375_v20, %v11539_v29 }
 0x460   : > { %8496 = vmatpush.bf16.msrb.mxu2 %v11206_v51  ;;  %v13439_v30 = vld [vmem:[#allocation7 + $0x7c4] sm:$0xf]  ;;  %v11795_v0 = vld [vmem:[#allocation7 + $0x7d0] sm:$0xf0]  ;;  %v11670_v17 = vor.u32 %v13407_v56, %v11667_v49 }
 0x461   : > { %8458 = vmatpush.bf16.msra.mxu1 %v10806_v19  ;;  %v13339_v15 = vld [vmem:[#allocation7 + $0x4a4] sm:$0xf]  ;;  %v11395_v46 = vld [vmem:[#allocation7 + $0x4b0] sm:$0xf0]  ;;  %v11798_v63 = vor.u32 %v13439_v30, %v11795_v0 }
 0x462   : > { %8471 = vmatpush.bf16.msra.mxu3 %v10934_v50  ;;  %v13371_v45 = vld [vmem:[#allocation7 + $0x5a4] sm:$0xf]  ;;  %v11523_v55 = vld [vmem:[#allocation7 + $0x5b0] sm:$0xf0]  ;;  %v11398_v25 = vor.u32 %v13339_v15, %v11395_v46 }
 0x463   : > { %8484 = vmatpush.bf16.msrb.mxu0 %v11062_v14  ;;  %v13403_v48 = vld [vmem:[#allocation7 + $0x6a4] sm:$0xf]  ;;  %v11651_v37 = vld [vmem:[#allocation7 + $0x6b0] sm:$0xf0]  ;;  %v11526_v23 = vor.u32 %v13371_v45, %v11523_v55 }
 0x464   : > { %8459 = vmatmul.bf16.vlgmr.msra.gmra.mxu1 %v16497_v31  ;;  %8497 = vmatpush.bf16.msrb.mxu2 %v11190_v36  ;;  %v13435_v7 = vld [vmem:[#allocation7 + $0x7a4] sm:$0xf]  ;;  %v11779_v32 = vld [vmem:[#allocation7 + $0x7b0] sm:$0xf0]  ;;  %v11654_v62 = vor.u32 %v13403_v48, %v11651_v37 }
 0x465   : > { %8503 = vmatpush.bf16.msrb.mxu1 %v11430_v59  ;;  %8472 = vmatmul.bf16.vlgmr.msra.gmra.mxu3 %v16501_v39  ;;  %v13335_v21 = vld [vmem:[#allocation7 + $0x484] sm:$0xf]  ;;  %v11379_v9 = vld [vmem:[#allocation7 + $0x490] sm:$0xf0]  ;;  %v11782_v47 = vor.u32 %v13435_v7, %v11779_v32 }
 0x466   : > { %8516 = vmatpush.bf16.msrb.mxu3 %v11558_v10  ;;  %8485 = vmatmul.bf16.vlgmr.msrb.gmra.mxu0 %v16506_v18  ;;  %v13367_v44 = vld [vmem:[#allocation7 + $0x584] sm:$0xf]  ;;  %v11507_v16 = vld [vmem:[#allocation7 + $0x590] sm:$0xf0]  ;;  %v11382_v13 = vor.u32 %v13335_v21, %v11379_v9 }
 0x467   : > { %8529 = vmatpush.bf16.msra.mxu0 %v11686_v3  ;;  %8498 = vmatmul.bf16.vlgmr.msrb.gmra.mxu2 %v16509_v43  ;;  %v13399_v34 = vld [vmem:[#allocation7 + $0x684] sm:$0xf]  ;;  %v11635_v11 = vld [vmem:[#allocation7 + $0x690] sm:$0xf0]  ;;  %v11510_v38 = vor.u32 %v13367_v44, %v11507_v16 }
 0x468   : > { %8542 = vmatpush.bf16.msra.mxu2 %v11814_v22  ;;  %v13431_v61 = vld [vmem:[#allocation7 + $0x784] sm:$0xf]  ;;  %v11763_v51 = vld [vmem:[#allocation7 + $0x790] sm:$0xf0]  ;;  %v11638_v12 = vor.u32 %v13399_v34, %v11635_v11 }
 0x469   : > { %8504 = vmatpush.bf16.msrb.mxu1 %v11414_v42  ;;  %v13331_v19 = vld [vmem:[#allocation7 + $0x464] sm:$0xf]  ;;  %v11363_v60 = vld [vmem:[#allocation7 + $0x470] sm:$0xf0]  ;;  %v11766_v10 = vor.u32 %v13431_v61, %v11763_v51 }
 0x46a   : > { %8517 = vmatpush.bf16.msrb.mxu3 %v11542_v6  ;;  %v13363_v50 = vld [vmem:[#allocation7 + $0x564] sm:$0xf]  ;;  %v11491_v59 = vld [vmem:[#allocation7 + $0x570] sm:$0xf0]  ;;  %v11366_v14 = vor.u32 %v13331_v19, %v11363_v60 }
 0x46b   : > { %8530 = vmatpush.bf16.msra.mxu0 %v11670_v17  ;;  %v13395_v57 = vld [vmem:[#allocation7 + $0x664] sm:$0xf]  ;;  %v11619_v58 = vld [vmem:[#allocation7 + $0x670] sm:$0xf0]  ;;  %v11494_v5 = vor.u32 %v13363_v50, %v11491_v59 }
 0x46c   : > { %8543 = vmatpush.bf16.msra.mxu2 %v11798_v63  ;;  %v13427_v26 = vld [vmem:[#allocation7 + $0x764] sm:$0xf]  ;;  %v11747_v28 = vld [vmem:[#allocation7 + $0x770] sm:$0xf0]  ;;  %v11622_v53 = vor.u32 %v13395_v57, %v11619_v58 }
 0x46d   : > { %8505 = vmatpush.bf16.msrb.mxu1 %v11398_v25  ;;  %v13327_v3 = vld [vmem:[#allocation7 + $0x444] sm:$0xf]  ;;  %v11347_v20 = vld [vmem:[#allocation7 + $0x450] sm:$0xf0]  ;;  %v11750_v22 = vor.u32 %v13427_v26, %v11747_v28 }
 0x46e   : > { %8518 = vmatpush.bf16.msrb.mxu3 %v11526_v23  ;;  %v13359_v29 = vld [vmem:[#allocation7 + $0x544] sm:$0xf]  ;;  %v11475_v36 = vld [vmem:[#allocation7 + $0x550] sm:$0xf0]  ;;  %v11350_v42 = vor.u32 %v13327_v3, %v11347_v20 }
 0x46f   : > { %8531 = vmatpush.bf16.msra.mxu0 %v11654_v62  ;;  %v13391_v56 = vld [vmem:[#allocation7 + $0x644] sm:$0xf]  ;;  %v11603_v49 = vld [vmem:[#allocation7 + $0x650] sm:$0xf0]  ;;  %v11478_v6 = vor.u32 %v13359_v29, %v11475_v36 }
 0x470   : > { %8544 = vmatpush.bf16.msra.mxu2 %v11782_v47  ;;  %v13423_v30 = vld [vmem:[#allocation7 + $0x744] sm:$0xf]  ;;  %v11731_v0 = vld [vmem:[#allocation7 + $0x750] sm:$0xf0]  ;;  %v11606_v17 = vor.u32 %v13391_v56, %v11603_v49 }
 0x471   : > { %8506 = vmatpush.bf16.msrb.mxu1 %v11382_v13  ;;  %v13323_v15 = vld [vmem:[#allocation7 + $0x424] sm:$0xf]  ;;  %v11331_v46 = vld [vmem:[#allocation7 + $0x430] sm:$0xf0]  ;;  %v11734_v63 = vor.u32 %v13423_v30, %v11731_v0 }
 0x472   : > { %8519 = vmatpush.bf16.msrb.mxu3 %v11510_v38  ;;  %v13355_v45 = vld [vmem:[#allocation7 + $0x524] sm:$0xf]  ;;  %v11459_v55 = vld [vmem:[#allocation7 + $0x530] sm:$0xf0]  ;;  %v11334_v23 = vor.u32 %v13323_v15, %v11331_v46 }
 0x473   : > { %8532 = vmatpush.bf16.msra.mxu0 %v11638_v12  ;;  %v13387_v48 = vld [vmem:[#allocation7 + $0x624] sm:$0xf]  ;;  %v11587_v37 = vld [vmem:[#allocation7 + $0x630] sm:$0xf0]  ;;  %v11462_v7 = vor.u32 %v13355_v45, %v11459_v55 }
 0x474   : > { %8545 = vmatpush.bf16.msra.mxu2 %v11766_v10  ;;  %v13419_v25 = vld [vmem:[#allocation7 + $0x724] sm:$0xf]  ;;  %v11715_v32 = vld [vmem:[#allocation7 + $0x730] sm:$0xf0]  ;;  %v11590_v9 = vor.u32 %v13387_v48, %v11587_v37 }
 0x475   : > { %8507 = vmatpush.bf16.msrb.mxu1 %v11366_v14  ;;  %v13319_v21 = vld [vmem:[#allocation7 + $0x404] sm:$0xf]  ;;  %v11315_v62 = vld [vmem:[#allocation7 + $0x410] sm:$0xf0]  ;;  %v11718_v38 = vor.u32 %v13419_v25, %v11715_v32 }
 0x476   : > { %8520 = vmatpush.bf16.msrb.mxu3 %v11494_v5  ;;  %v13351_v44 = vld [vmem:[#allocation7 + $0x504] sm:$0xf]  ;;  %v11443_v16 = vld [vmem:[#allocation7 + $0x510] sm:$0xf0]  ;;  %v11318_v19 = vor.u32 %v13319_v21, %v11315_v62 }
 0x477   : > { %8533 = vmatpush.bf16.msra.mxu0 %v11622_v53  ;;  %v13475_v34 = vld [vmem:[#allocation7 + $0x8e4] sm:$0xf]  ;;  %v11939_v11 = vld [vmem:[#allocation7 + $0x8f0] sm:$0xf0]  ;;  %v11446_v12 = vor.u32 %v13351_v44, %v11443_v16 }
 0x478   : > { %8546 = vmatpush.bf16.msra.mxu2 %v11750_v22  ;;  %v13507_v47 = vld [vmem:[#allocation7 + $0x9e4] sm:$0xf]  ;;  %v12067_v13 = vld [vmem:[#allocation7 + $0x9f0] sm:$0xf0]  ;;  %v11942_v59 = vor.u32 %v13475_v34, %v11939_v11 }
 0x479   : > { %8508 = vmatpush.bf16.msrb.mxu1 %v11350_v42  ;;  %v13383_v61 = vld [vmem:[#allocation7 + $0x604] sm:$0xf]  ;;  %v11571_v51 = vld [vmem:[#allocation7 + $0x610] sm:$0xf0]  ;;  %v12070_v57 = vor.u32 %v13507_v47, %v12067_v13 }
 0x47a   : > { %8521 = vmatpush.bf16.msrb.mxu3 %v11478_v6  ;;  %v13415_v60 = vld [vmem:[#allocation7 + $0x704] sm:$0xf]  ;;  %v11699_v50 = vld [vmem:[#allocation7 + $0x710] sm:$0xf0]  ;;  %v11574_v14 = vor.u32 %v13383_v61, %v11571_v51 }
 0x47b   : > { %8534 = vmatpush.bf16.msra.mxu0 %v11606_v17  ;;  %v13539_v58 = vld [vmem:[#allocation7 + $0xae4] sm:$0xf]  ;;  %v12195_v10 = vld [vmem:[#allocation7 + $0xaf0] sm:$0xf0]  ;;  %v11702_v28 = vor.u32 %v13415_v60, %v11699_v50 }
 0x47c   : > { %8547 = vmatpush.bf16.msra.mxu2 %v11734_v63  ;;  %v13571_v5 = vld [vmem:[#allocation7 + $0xbe4] sm:$0xf]  ;;  %v12323_v26 = vld [vmem:[#allocation7 + $0xbf0] sm:$0xf0]  ;;  %v12198_v20 = vor.u32 %v13539_v58, %v12195_v10 }
 0x47d   : > { %8509 = vmatpush.bf16.msrb.mxu1 %v11334_v23  ;;  %v13471_v3 = vld [vmem:[#allocation7 + $0x8c4] sm:$0xf]  ;;  %v11923_v53 = vld [vmem:[#allocation7 + $0x8d0] sm:$0xf0]  ;;  %v12326_v56 = vor.u32 %v13571_v5, %v12323_v26  ;;  %v16601_v23 = vld [vmem:[#allocation9] sm:$0xf] }
 0x47e   : > { %8522 = vmatpush.bf16.msrb.mxu3 %v11462_v7  ;;  %v13503_v29 = vld [vmem:[#allocation7 + $0x9c4] sm:$0xf]  ;;  %v12051_v36 = vld [vmem:[#allocation7 + $0x9d0] sm:$0xf0]  ;;  %v11926_v42 = vor.u32 %v13471_v3, %v11923_v53  ;;  %v8235_v47 = vperm.slane %v16601_v23, 0 }
 0x47f   : > { %8535 = vmatpush.bf16.msra.mxu0 %v11590_v9  ;;  %v13535_v49 = vld [vmem:[#allocation7 + $0xac4] sm:$0xf]  ;;  %v12179_v22 = vld [vmem:[#allocation7 + $0xad0] sm:$0xf0]  ;;  %v12054_v0 = vor.u32 %v13503_v29, %v12051_v36 }
 0x480   : > { %8548 = vmatpush.bf16.msra.mxu2 %v11718_v38  ;;  %v13567_v6 = vld [vmem:[#allocation7 + $0xbc4] sm:$0xf]  ;;  %v12307_v30 = vld [vmem:[#allocation7 + $0xbd0] sm:$0xf0]  ;;  %v12182_v46 = vor.u32 %v13535_v49, %v12179_v22 }
 0x481   : > { %8510 = vmatpush.bf16.msrb.mxu1 %v11318_v19  ;;  %v13467_v15 = vld [vmem:[#allocation7 + $0x8a4] sm:$0xf]  ;;  %v11907_v17 = vld [vmem:[#allocation7 + $0x8b0] sm:$0xf0]  ;;  %v12310_v48 = vor.u32 %v13567_v6, %v12307_v30  ;;  %v8252_v62 = vpop.f32.mrf.mxu1 }
 0x482   : > { %8523 = vmatpush.bf16.msrb.mxu3 %v11446_v12  ;;  %v13499_v45 = vld [vmem:[#allocation7 + $0x9a4] sm:$0xf]  ;;  %v12035_v55 = vld [vmem:[#allocation7 + $0x9b0] sm:$0xf0]  ;;  %v11910_v25 = vor.u32 %v13467_v15, %v11907_v17  ;;  %v8253_v5 = vadd.f32 %v8252_v62, %v8235_v47 }
 0x483   : > { %8536 = vmatpush.bf16.msra.mxu0 %v11574_v14  ;;  %v13531_v37 = vld [vmem:[#allocation7 + $0xaa4] sm:$0xf]  ;;  %v12163_v63 = vld [vmem:[#allocation7 + $0xab0] sm:$0xf0]  ;;  %v12038_v21 = vor.u32 %v13499_v45, %v12035_v55  ;;  %v8278_v38 = vpop.f32.mrf.mxu0 }
 0x484   : > { %8549 = vmatpush.bf16.msra.mxu2 %v11702_v28  ;;  %8511 = vmatmul.bf16.vlgmr.msrb.gmra.mxu1 %v16530_v27  ;;  %v13563_v7 = vld [vmem:[#allocation7 + $0xba4] sm:$0xf]  ;;  %v12291_v32 = vld [vmem:[#allocation7 + $0xbb0] sm:$0xf0]  ;;  %v12166_v16 = vor.u32 %v13531_v37, %v12163_v63 }
 0x485   : > { %8555 = vmatpush.bf16.msra.mxu1 %v11942_v59  ;;  %8524 = vmatmul.bf16.vlgmr.msrb.gmra.mxu3 %v16533_v8  ;;  %v13463_v9 = vld [vmem:[#allocation7 + $0x884] sm:$0xf]  ;;  %v11891_v44 = vld [vmem:[#allocation7 + $0x890] sm:$0xf0]  ;;  %v12294_v13 = vor.u32 %v13563_v7, %v12291_v32 }
 0x486   : > { %8568 = vmatpush.bf16.msra.mxu3 %v12070_v57  ;;  %8537 = vmatmul.bf16.vlgmr.msra.gmra.mxu0 %v16540_v41  ;;  %v13495_v34 = vld [vmem:[#allocation7 + $0x984] sm:$0xf]  ;;  %v12019_v11 = vld [vmem:[#allocation7 + $0x990] sm:$0xf0]  ;;  %v11894_v19 = vor.u32 %v13463_v9, %v11891_v44 }
 0x487   : > { %8581 = vmatpush.bf16.msrb.mxu0 %v12198_v20  ;;  %8550 = vmatmul.bf16.vlgmr.msra.gmra.mxu2 %v16545_v1  ;;  %v13527_v61 = vld [vmem:[#allocation7 + $0xa84] sm:$0xf]  ;;  %v12147_v51 = vld [vmem:[#allocation7 + $0xa90] sm:$0xf0]  ;;  %v12022_v50 = vor.u32 %v13495_v34, %v12019_v11  ;;  %v8265_v53 = vpop.f32.mrf.mxu3 }
 0x488   : > { %8594 = vmatpush.bf16.msrb.mxu2 %v12326_v56  ;;  %v13559_v12 = vld [vmem:[#allocation7 + $0xb84] sm:$0xf]  ;;  %v12275_v60 = vld [vmem:[#allocation7 + $0xb90] sm:$0xf0]  ;;  %v12150_v58 = vor.u32 %v13527_v61, %v12147_v51  ;;  %v8266_v56 = vadd.f32 %v8265_v53, %v8253_v5 }
 0x489   : > { %8556 = vmatpush.bf16.msra.mxu1 %v11926_v42  ;;  %v13459_v59 = vld [vmem:[#allocation7 + $0x864] sm:$0xf]  ;;  %v11875_v57 = vld [vmem:[#allocation7 + $0x870] sm:$0xf0]  ;;  %v12278_v26 = vor.u32 %v13559_v12, %v12275_v60  ;;  %v8254_v22 = vpop.f32.mrf.mxu1 }
 0x48a   : > { %8569 = vmatpush.bf16.msra.mxu3 %v12054_v0  ;;  %v13491_v10 = vld [vmem:[#allocation7 + $0x964] sm:$0xf]  ;;  %v12003_v14 = vld [vmem:[#allocation7 + $0x970] sm:$0xf0]  ;;  %v11878_v20 = vor.u32 %v13459_v59, %v11875_v57  ;;  %v8291_v30 = vpop.f32.mrf.mxu2 }
 0x48b   : > { %8582 = vmatpush.bf16.msrb.mxu0 %v12182_v46  ;;  %v13523_v28 = vld [vmem:[#allocation7 + $0xa64] sm:$0xf]  ;;  %v12131_v3 = vld [vmem:[#allocation7 + $0xa70] sm:$0xf0]  ;;  %v12006_v49 = vor.u32 %v13491_v10, %v12003_v14  ;;  %v8279_v46 = vadd.f32 %v8278_v38, %v8266_v56  ;;  %v8280_v55 = vpop.f32.mrf.mxu0 }
 0x48c   : > { %8595 = vmatpush.bf16.msrb.mxu2 %v12310_v48  ;;  %v13555_v29 = vld [vmem:[#allocation7 + $0xb64] sm:$0xf]  ;;  %v12259_v36 = vld [vmem:[#allocation7 + $0xb70] sm:$0xf0]  ;;  %v12134_v0 = vor.u32 %v13523_v28, %v12131_v3 }
 0x48d   : > { %8557 = vmatpush.bf16.msra.mxu1 %v11910_v25  ;;  %v13455_v42 = vld [vmem:[#allocation7 + $0x844] sm:$0xf]  ;;  %v11859_v6 = vld [vmem:[#allocation7 + $0x850] sm:$0xf0]  ;;  %v12262_v45 = vor.u32 %v13555_v29, %v12259_v36  ;;  %v8292_v32 = vadd.f32 %v8291_v30, %v8279_v46 }
 0x48e   : > { %8570 = vmatpush.bf16.msra.mxu3 %v12038_v21  ;;  %v13487_v15 = vld [vmem:[#allocation7 + $0x944] sm:$0xf]  ;;  %v11987_v17 = vld [vmem:[#allocation7 + $0x950] sm:$0xf0]  ;;  %v11862_v63 = vor.u32 %v13455_v42, %v11859_v6 }
 0x48f   : > { %8583 = vmatpush.bf16.msrb.mxu0 %v12166_v16  ;;  %v13519_v48 = vld [vmem:[#allocation7 + $0xa44] sm:$0xf]  ;;  %v12115_v37 = vld [vmem:[#allocation7 + $0xa50] sm:$0xf0]  ;;  %v11990_v21 = vor.u32 %v13487_v15, %v11987_v17  ;;  %v8267_v38 = vpop.f32.mrf.mxu3 }
 0x490   : > { %8596 = vmatpush.bf16.msrb.mxu2 %v12294_v13  ;;  %v13551_v25 = vld [vmem:[#allocation7 + $0xb44] sm:$0xf]  ;;  %v12243_v7 = vld [vmem:[#allocation7 + $0xb50] sm:$0xf0]  ;;  %v12118_v44 = vor.u32 %v13519_v48, %v12115_v37 }
 0x491   : > { %8558 = vmatpush.bf16.msra.mxu1 %v11894_v19  ;;  %v13451_v62 = vld [vmem:[#allocation7 + $0x824] sm:$0xf]  ;;  %v11843_v9 = vld [vmem:[#allocation7 + $0x830] sm:$0xf0]  ;;  %v12246_v11 = vor.u32 %v13551_v25, %v12243_v7 }
 0x492   : > { %8571 = vmatpush.bf16.msra.mxu3 %v12022_v50  ;;  %v13483_v16 = vld [vmem:[#allocation7 + $0x924] sm:$0xf]  ;;  %v11971_v34 = vld [vmem:[#allocation7 + $0x930] sm:$0xf0]  ;;  %v11846_v61 = vor.u32 %v13451_v62, %v11843_v9  ;;  %v8304_v50 = vpop.f32.mrf.mxu1  ;;  %v8293_v10 = vpop.f32.mrf.mxu2 }
 0x493   : > { %8584 = vmatpush.bf16.msrb.mxu0 %v12150_v58  ;;  %v13515_v47 = vld [vmem:[#allocation7 + $0xa24] sm:$0xf]  ;;  %v12099_v13 = vld [vmem:[#allocation7 + $0xa30] sm:$0xf0]  ;;  %v11974_v60 = vor.u32 %v13483_v16, %v11971_v34  ;;  %v8305_v14 = vadd.f32 %v8304_v50, %v8292_v32 }
 0x494   : > { %8597 = vmatpush.bf16.msrb.mxu2 %v12278_v26  ;;  %v13547_v51 = vld [vmem:[#allocation7 + $0xb24] sm:$0xf]  ;;  %v12227_v19 = vld [vmem:[#allocation7 + $0xb30] sm:$0xf0]  ;;  %v12102_v5 = vor.u32 %v13515_v47, %v12099_v13 }
 0x495   : > { %8559 = vmatpush.bf16.msra.mxu1 %v11878_v20  ;;  %v13447_v12 = vld [vmem:[#allocation7 + $0x804] sm:$0xf]  ;;  %v11827_v59 = vld [vmem:[#allocation7 + $0x810] sm:$0xf0]  ;;  %v12230_v53 = vor.u32 %v13547_v51, %v12227_v19  ;;  %v8330_v20 = vpop.f32.mrf.mxu0 }
 0x496   : > { %8572 = vmatpush.bf16.msra.mxu3 %v12006_v49  ;;  %v13479_v57 = vld [vmem:[#allocation7 + $0x904] sm:$0xf]  ;;  %v11955_v58 = vld [vmem:[#allocation7 + $0x910] sm:$0xf0]  ;;  %v11830_v49 = vor.u32 %v13447_v12, %v11827_v59 }
 0x497   : > { %8585 = vmatpush.bf16.msrb.mxu0 %v12134_v0  ;;  %v13603_v26 = vld [vmem:[#allocation7 + $0xce4] sm:$0xf]  ;;  %v12451_v28 = vld [vmem:[#allocation7 + $0xcf0] sm:$0xf0]  ;;  %v11958_v6 = vor.u32 %v13479_v57, %v11955_v58 }
 0x498   : > { %8598 = vmatpush.bf16.msrb.mxu2 %v12262_v45  ;;  %v13635_v3 = vld [vmem:[#allocation7 + $0xde4] sm:$0xf]  ;;  %v12579_v29 = vld [vmem:[#allocation7 + $0xdf0] sm:$0xf0]  ;;  %v12454_v30 = vor.u32 %v13603_v26, %v12451_v28  ;;  %v8317_v25 = vpop.f32.mrf.mxu3 }
 0x499   : > { %8560 = vmatpush.bf16.msra.mxu1 %v11862_v63  ;;  %v13511_v36 = vld [vmem:[#allocation7 + $0xa04] sm:$0xf]  ;;  %v12083_v56 = vld [vmem:[#allocation7 + $0xa10] sm:$0xf0]  ;;  %v12582_v17 = vor.u32 %v13635_v3, %v12579_v29  ;;  %v8318_v62 = vadd.f32 %v8317_v25, %v8305_v14 }
 0x49a   : > { %8573 = vmatpush.bf16.msra.mxu3 %v11990_v21  ;;  %v13543_v22 = vld [vmem:[#allocation7 + $0xb04] sm:$0xf]  ;;  %v12211_v42 = vld [vmem:[#allocation7 + $0xb10] sm:$0xf0]  ;;  %v12086_v46 = vor.u32 %v13511_v36, %v12083_v56 }
 0x49b   : > { %8586 = vmatpush.bf16.msrb.mxu0 %v12118_v44  ;;  %v13667_v0 = vld [vmem:[#allocation7 + $0xee4] sm:$0xf]  ;;  %v12707_v15 = vld [vmem:[#allocation7 + $0xef0] sm:$0xf0]  ;;  %v12214_v48 = vor.u32 %v13543_v22, %v12211_v42  ;;  %v8306_v44 = vpop.f32.mrf.mxu1  ;;  %v8331_v38 = vadd.f32 %v8330_v20, %v8318_v62 }
 0x49c   : > { %8599 = vmatpush.bf16.msrb.mxu2 %v12246_v11  ;;  %v13699_v45 = vld [vmem:[#allocation7 + $0xfe4] sm:$0xf]  ;;  %v12835_v55 = vld [vmem:[#allocation7 + $0xff0] sm:$0xf0]  ;;  %v12710_v7 = vor.u32 %v13667_v0, %v12707_v15 }
 0x49d   : > { %8561 = vmatpush.bf16.msra.mxu1 %v11846_v61  ;;  %v13599_v37 = vld [vmem:[#allocation7 + $0xcc4] sm:$0xf]  ;;  %v12435_v63 = vld [vmem:[#allocation7 + $0xcd0] sm:$0xf0]  ;;  %v12838_v9 = vor.u32 %v13699_v45, %v12835_v55  ;;  %v8343_v61 = vpop.f32.mrf.mxu2  ;;  %v8332_v19 = vpop.f32.mrf.mxu0 }
 0x49e   : > { %8574 = vmatpush.bf16.msra.mxu3 %v11974_v60  ;;  %v13631_v32 = vld [vmem:[#allocation7 + $0xdc4] sm:$0xf]  ;;  %v12563_v21 = vld [vmem:[#allocation7 + $0xdd0] sm:$0xf0]  ;;  %v12438_v11 = vor.u32 %v13599_v37, %v12435_v63  ;;  %v8344_v58 = vadd.f32 %v8343_v61, %v8331_v38 }
 0x49f   : > { %8587 = vmatpush.bf16.msrb.mxu0 %v12102_v5  ;;  %v13663_v16 = vld [vmem:[#allocation7 + $0xec4] sm:$0xf]  ;;  %v12691_v34 = vld [vmem:[#allocation7 + $0xed0] sm:$0xf0]  ;;  %v12566_v51 = vor.u32 %v13631_v32, %v12563_v21 }
 0x4a0   : > { %8600 = vmatpush.bf16.msrb.mxu2 %v12230_v53  ;;  %v13695_v47 = vld [vmem:[#allocation7 + $0xfc4] sm:$0xf]  ;;  %v12819_v13 = vld [vmem:[#allocation7 + $0xfd0] sm:$0xf0]  ;;  %v12694_v50 = vor.u32 %v13663_v16, %v12691_v34  ;;  %v8319_v36 = vpop.f32.mrf.mxu3 }
 0x4a1   : > { %8562 = vmatpush.bf16.msra.mxu1 %v11830_v49  ;;  %v13595_v12 = vld [vmem:[#allocation7 + $0xca4] sm:$0xf]  ;;  %v12419_v60 = vld [vmem:[#allocation7 + $0xcb0] sm:$0xf0]  ;;  %v12822_v10 = vor.u32 %v13695_v47, %v12819_v13 }
 0x4a2   : > { %8575 = vmatpush.bf16.msra.mxu3 %v11958_v6  ;;  %v13627_v59 = vld [vmem:[#allocation7 + $0xda4] sm:$0xf]  ;;  %v12547_v57 = vld [vmem:[#allocation7 + $0xdb0] sm:$0xf0]  ;;  %v12422_v26 = vor.u32 %v13595_v12, %v12419_v60 }
 0x4a3   : > { %8588 = vmatpush.bf16.msrb.mxu0 %v12086_v46  ;;  %v13659_v14 = vld [vmem:[#allocation7 + $0xea4] sm:$0xf]  ;;  %v12675_v5 = vld [vmem:[#allocation7 + $0xeb0] sm:$0xf0]  ;;  %v12550_v53 = vor.u32 %v13627_v59, %v12547_v57 }
 0x4a4   : > { %8601 = vmatpush.bf16.msrb.mxu2 %v12214_v48  ;;  %8563 = vmatmul.bf16.vlgmr.msra.gmra.mxu1 %v16560_v40  ;;  %v13691_v28 = vld [vmem:[#allocation7 + $0xfa4] sm:$0xf]  ;;  %v12803_v3 = vld [vmem:[#allocation7 + $0xfb0] sm:$0xf0]  ;;  %v12678_v56 = vor.u32 %v13659_v14, %v12675_v5 }
 0x4a5   : > { %8607 = vmatpush.bf16.msrb.mxu1 %v12454_v30  ;;  %8576 = vmatmul.bf16.vlgmr.msra.gmra.mxu3 %v16563_v24  ;;  %v13591_v20 = vld [vmem:[#allocation7 + $0xc84] sm:$0xf]  ;;  %v12403_v29 = vld [vmem:[#allocation7 + $0xc90] sm:$0xf0]  ;;  %v12806_v42 = vor.u32 %v13691_v28, %v12803_v3  ;;  %v8345_v46 = vpop.f32.mrf.mxu2  ;;  %v8382_v38 = vpop.f32.mrf.mxu0 }
 0x4a6   : > { %8620 = vmatpush.bf16.msrb.mxu3 %v12582_v17  ;;  %8589 = vmatmul.bf16.vlgmr.msrb.gmra.mxu0 %v16567_v4  ;;  %v13623_v49 = vld [vmem:[#allocation7 + $0xd84] sm:$0xf]  ;;  %v12531_v22 = vld [vmem:[#allocation7 + $0xd90] sm:$0xf0]  ;;  %v12406_v0 = vor.u32 %v13591_v20, %v12403_v29 }
 0x4a7   : > { %8633 = vmatpush.bf16.msra.mxu0 %v12710_v7  ;;  %8602 = vmatmul.bf16.vlgmr.msrb.gmra.mxu2 %v16569_v54  ;;  %v13655_v6 = vld [vmem:[#allocation7 + $0xe84] sm:$0xf]  ;;  %v12659_v30 = vld [vmem:[#allocation7 + $0xe90] sm:$0xf0]  ;;  %v12534_v45 = vor.u32 %v13623_v49, %v12531_v22  ;;  %v8356_v7 = vpop.f32.mrf.mxu1 }
 0x4a8   : > { %8646 = vmatpush.bf16.msra.mxu2 %v12838_v9  ;;  %v13687_v15 = vld [vmem:[#allocation7 + $0xf84] sm:$0xf]  ;;  %v12787_v17 = vld [vmem:[#allocation7 + $0xf90] sm:$0xf0]  ;;  %v12662_v37 = vor.u32 %v13655_v6, %v12659_v30  ;;  %v8357_v9 = vadd.f32 %v8356_v7, %v8344_v58  ;;  %v11049_v7 = vld [vmem:[#allocation7 + $0x1e8] sm:$0xf] }
 0x4a9   : > { %8608 = vmatpush.bf16.msrb.mxu1 %v12438_v11  ;;  %v13587_v55 = vld [vmem:[#allocation7 + $0xc64] sm:$0xf]  ;;  %v12387_v48 = vld [vmem:[#allocation7 + $0xc70] sm:$0xf0]  ;;  %v12790_v32 = vor.u32 %v13687_v15, %v12787_v17 }
 0x4aa   : > { %8621 = vmatpush.bf16.msrb.mxu3 %v12566_v51  ;;  %v13619_v63 = vld [vmem:[#allocation7 + $0xd64] sm:$0xf]  ;;  %v12515_v25 = vld [vmem:[#allocation7 + $0xd70] sm:$0xf0]  ;;  %v12390_v44 = vor.u32 %v13587_v55, %v12387_v48 }
 0x4ab   : > { %8634 = vmatpush.bf16.msra.mxu0 %v12694_v50  ;;  %v13651_v21 = vld [vmem:[#allocation7 + $0xe64] sm:$0xf]  ;;  %v12643_v62 = vld [vmem:[#allocation7 + $0xe70] sm:$0xf0]  ;;  %v12518_v11 = vor.u32 %v13619_v63, %v12515_v25  ;;  %v10921_v63 = vld [vmem:[#allocation7 + $0xe8] sm:$0xf] }
 0x4ac   : > { %8647 = vmatpush.bf16.msra.mxu2 %v12822_v10  ;;  %v13683_v16 = vld [vmem:[#allocation7 + $0xf64] sm:$0xf]  ;;  %v12771_v34 = vld [vmem:[#allocation7 + $0xf70] sm:$0xf0]  ;;  %v12646_v61 = vor.u32 %v13651_v21, %v12643_v62  ;;  %v13222_v25 = vld [vmem:[#allocation7 + $0xf4] sm:$0xf0] }
 0x4ad   : > { %8609 = vmatpush.bf16.msrb.mxu1 %v12422_v26  ;;  %v13583_v47 = vld [vmem:[#allocation7 + $0xc44] sm:$0xf]  ;;  %v12371_v13 = vld [vmem:[#allocation7 + $0xc50] sm:$0xf0]  ;;  %v12774_v12 = vor.u32 %v13683_v16, %v12771_v34  ;;  %v8369_v26 = vpop.f32.mrf.mxu3  ;;  %v8395_v15 = vpop.f32.mrf.mxu2  ;;  %v13254_v62 = vld [vmem:[#allocation7 + $0x1f4] sm:$0xf0] }
 0x4ae   : > { %8622 = vmatpush.bf16.msrb.mxu3 %v12550_v53  ;;  %v13615_v51 = vld [vmem:[#allocation7 + $0xd44] sm:$0xf]  ;;  %v12499_v19 = vld [vmem:[#allocation7 + $0xd50] sm:$0xf0]  ;;  %v12374_v59 = vor.u32 %v13583_v47, %v12371_v13  ;;  %v8370_v20 = vadd.f32 %v8369_v26, %v8357_v9  ;;  %v8384_v48 = vpop.f32.mrf.mxu0  ;;  %v10922_v13 = vor.u32 %v13222_v25, %v10921_v63  ;;  %v13210_v63 = vld [vmem:[#allocation7 + $0x94] sm:$0xf0] }
 0x4af   : > { %8635 = vmatpush.bf16.msra.mxu0 %v12678_v56  ;;  %v13647_v60 = vld [vmem:[#allocation7 + $0xe44] sm:$0xf]  ;;  %v12627_v50 = vld [vmem:[#allocation7 + $0xe50] sm:$0xf0]  ;;  %v12502_v10 = vor.u32 %v13615_v51, %v12499_v19  ;;  %v8358_v29 = vpop.f32.mrf.mxu1  ;;  %v11050_v19 = vor.u32 %v13254_v62, %v11049_v7  ;;  %v11001_v7 = vld [vmem:[#allocation7 + $0x188] sm:$0xf] }
 0x4b0   : > { %8648 = vmatpush.bf16.msra.mxu2 %v12806_v42  ;;  %v13679_v57 = vld [vmem:[#allocation7 + $0xf44] sm:$0xf]  ;;  %v12755_v58 = vld [vmem:[#allocation7 + $0xf50] sm:$0xf0]  ;;  %v12630_v28 = vor.u32 %v13647_v60, %v12627_v50  ;;  %v11305_v60 = vld [vmem:[#allocation7 + $0x3e8] sm:$0xf] }
 0x4b1   : > { %8610 = vmatpush.bf16.msrb.mxu1 %v12406_v0  ;;  %v13579_v14 = vld [vmem:[#allocation7 + $0xc24] sm:$0xf]  ;;  %v12355_v5 = vld [vmem:[#allocation7 + $0xc30] sm:$0xf0]  ;;  %v12758_v36 = vor.u32 %v13679_v57, %v12755_v58  ;;  %v8383_v0 = vadd.f32 %v8382_v38, %v8370_v20  ;;  %v11177_v38 = vld [vmem:[#allocation7 + $0x2e8] sm:$0xf] }
 0x4b2   : > { %8623 = vmatpush.bf16.msrb.mxu3 %v12534_v45  ;;  %v13611_v3 = vld [vmem:[#allocation7 + $0xd24] sm:$0xf]  ;;  %v12483_v53 = vld [vmem:[#allocation7 + $0xd30] sm:$0xf0]  ;;  %v12358_v22 = vor.u32 %v13579_v14, %v12355_v5  ;;  %v13318_v50 = vld [vmem:[#allocation7 + $0x3f4] sm:$0xf0] }
 0x4b3   : > { %8636 = vmatpush.bf16.msra.mxu0 %v12662_v37  ;;  %v13643_v56 = vld [vmem:[#allocation7 + $0xe24] sm:$0xf]  ;;  %v12611_v49 = vld [vmem:[#allocation7 + $0xe30] sm:$0xf0]  ;;  %v12486_v17 = vor.u32 %v13611_v3, %v12483_v53  ;;  %v10905_v57 = vld [vmem:[#allocation7 + $0xc8] sm:$0xf] }
 0x4b4   : > { %8649 = vmatpush.bf16.msra.mxu2 %v12790_v32  ;;  %v13675_v42 = vld [vmem:[#allocation7 + $0xf24] sm:$0xf]  ;;  %v12739_v6 = vld [vmem:[#allocation7 + $0xf30] sm:$0xf0]  ;;  %v12614_v37 = vor.u32 %v13643_v56, %v12611_v49  ;;  %v16608_v32 = vadd.f32 %v8395_v15, %v8383_v0  ;;  %v13218_v58 = vld [vmem:[#allocation7 + $0xd4] sm:$0xf0] }
 0x4b5   : > { %8611 = vmatpush.bf16.msrb.mxu1 %v12390_v44  ;;  %v13575_v30 = vld [vmem:[#allocation7 + $0xc04] sm:$0xf]  ;;  %v12339_v46 = vld [vmem:[#allocation7 + $0xc10] sm:$0xf0]  ;;  %v12742_v21 = vor.u32 %v13675_v42, %v12739_v6  ;;  %v8371_v51 = vpop.f32.mrf.mxu3  ;;  %v11033_v14 = vld [vmem:[#allocation7 + $0x1c8] sm:$0xf]  ;;  %v8397_v26 = vpop.f32.mrf.mxu2  ;;  %v10906_v20 = vor.u32 %v13218_v58, %v10905_v57 }
 0x4b6   : > { %8624 = vmatpush.bf16.msrb.mxu3 %v12518_v11  ;;  %v13607_v45 = vld [vmem:[#allocation7 + $0xd04] sm:$0xf]  ;;  %v12467_v55 = vld [vmem:[#allocation7 + $0xd10] sm:$0xf0]  ;;  %v12342_v16 = vor.u32 %v13575_v30, %v12339_v46  ;;  %v13250_v5 = vld [vmem:[#allocation7 + $0x1d4] sm:$0xf0] }
 0x4b7   : > { %8637 = vmatpush.bf16.msra.mxu0 %v12646_v61  ;;  %v13639_v9 = vld [vmem:[#allocation7 + $0xe04] sm:$0xf]  ;;  %v12595_v44 = vld [vmem:[#allocation7 + $0xe10] sm:$0xf0]  ;;  %v12470_v47 = vor.u32 %v13607_v45, %v12467_v55  ;;  %v13286_v61 = vld [vmem:[#allocation7 + $0x2f4] sm:$0xf0]  ;;  %v11034_v56 = vor.u32 %v13250_v5, %v11033_v14 }
 0x4b8   : > { %8650 = vmatpush.bf16.msra.mxu2 %v12774_v12  ;;  %v13671_v34 = vld [vmem:[#allocation7 + $0xf04] sm:$0xf]  ;;  %v12723_v11 = vld [vmem:[#allocation7 + $0xf10] sm:$0xf0]  ;;  %v12598_v12 = vor.u32 %v13639_v9, %v12595_v44  ;;  %v11161_v3 = vld [vmem:[#allocation7 + $0x2c8] sm:$0xf] }
 0x4b9   : > { %8612 = vmatpush.bf16.msrb.mxu1 %v12374_v59  ;;  %v12726_v59 = vor.u32 %v13671_v34, %v12723_v11  ;;  %v13282_v53 = vld [vmem:[#allocation7 + $0x2d4] sm:$0xf0]  ;;  %v11289_v29 = vld [vmem:[#allocation7 + $0x3c8] sm:$0xf] }
 0x4ba   : > { %8625 = vmatpush.bf16.msrb.mxu3 %v12502_v10  ;;  %v11178_v10 = vor.u32 %v13286_v61, %v11177_v38  ;;  %v10889_v49 = vld [vmem:[#allocation7 + $0xa8] sm:$0xf]  ;;  %v11162_v42 = vor.u32 %v13282_v53, %v11161_v3  ;;  %v13246_v30 = vld [vmem:[#allocation7 + $0x1b4] sm:$0xf0] }
 0x4bb   : > { %8638 = vmatpush.bf16.msra.mxu0 %v12630_v28  ;;  %v11306_v28 = vor.u32 %v13318_v50, %v11305_v60  ;;  %v11017_v6 = vld [vmem:[#allocation7 + $0x1a8] sm:$0xf]  ;;  %v13310_v55 = vld [vmem:[#allocation7 + $0x3b4] sm:$0xf0] }
 0x4bc   : > { %8651 = vmatpush.bf16.msra.mxu2 %v12758_v36  ;;  %v13314_v36 = vld [vmem:[#allocation7 + $0x3d4] sm:$0xf0]  ;;  %v11145_v15 = vld [vmem:[#allocation7 + $0x2a8] sm:$0xf]  ;;  %v11018_v48 = vor.u32 %v13246_v30, %v11017_v6 }
 0x4bd   : > { %8613 = vmatpush.bf16.msrb.mxu1 %v12358_v22  ;;  %v13214_v22 = vld [vmem:[#allocation7 + $0xb4] sm:$0xf0]  ;;  %v11290_v0 = vor.u32 %v13314_v36, %v11289_v29  ;;  %v11273_v45 = vld [vmem:[#allocation7 + $0x3a8] sm:$0xf] }
 0x4be   : > { %8626 = vmatpush.bf16.msrb.mxu3 %v12486_v17  ;;  %v13278_v17 = vld [vmem:[#allocation7 + $0x2b4] sm:$0xf0]  ;;  %v10890_v46 = vor.u32 %v13214_v22, %v10889_v49  ;;  %v11274_v62 = vor.u32 %v13310_v55, %v11273_v45  ;;  %v11129_v9 = vld [vmem:[#allocation7 + $0x288] sm:$0xf] }
 0x4bf   : > { %8639 = vmatpush.bf16.msra.mxu0 %v12614_v37  ;;  %v10873_v37 = vld [vmem:[#allocation7 + $0x88] sm:$0xf]  ;;  %v11146_v25 = vor.u32 %v13278_v17, %v11145_v15  ;;  %v13274_v44 = vld [vmem:[#allocation7 + $0x294] sm:$0xf0] }
 0x4c0   : > { %8652 = vmatpush.bf16.msra.mxu2 %v12742_v21  ;;  %v13242_v21 = vld [vmem:[#allocation7 + $0x194] sm:$0xf0]  ;;  %v10874_v34 = vor.u32 %v13210_v63, %v10873_v37  ;;  %v11257_v11 = vld [vmem:[#allocation7 + $0x388] sm:$0xf] }
 0x4c1   : > { %8614 = vmatpush.bf16.msrb.mxu1 %v12342_v16  ;;  %v8408_v16 = vpop.f32.mrf.mxu1  ;;  %v11002_v38 = vor.u32 %v13242_v21, %v11001_v7  ;;  %v10857_v61 = vld [vmem:[#allocation7 + $0x68] sm:$0xf]  ;;  %v13206_v51 = vld [vmem:[#allocation7 + $0x74] sm:$0xf0] }
 0x4c2   : > { %8627 = vmatpush.bf16.msrb.mxu3 %v12470_v47  ;;  %v13306_v47 = vld [vmem:[#allocation7 + $0x394] sm:$0xf0]  ;;  %v11113_v57 = vld [vmem:[#allocation7 + $0x268] sm:$0xf] }
 0x4c3   : > { %8640 = vmatpush.bf16.msra.mxu0 %v12598_v12  ;;  %v10985_v12 = vld [vmem:[#allocation7 + $0x168] sm:$0xf]  ;;  %v13238_v60 = vld [vmem:[#allocation7 + $0x174] sm:$0xf0] }
 0x4c4   : > { %8653 = vmatpush.bf16.msra.mxu2 %v12726_v59  ;;  %8615 = vmatmul.bf16.vlgmr.msrb.gmra.mxu1 %v16580_v2  ;;  %v11258_v59 = vor.u32 %v13306_v47, %v11257_v11  ;;  %v13270_v58 = vld [vmem:[#allocation7 + $0x274] sm:$0xf0]  ;;  %v11241_v14 = vld [vmem:[#allocation7 + $0x368] sm:$0xf]  ;;  %v10986_v26 = vor.u32 %v13238_v60, %v10985_v12 }
 0x4c5   : > { %8659 = vmatpush.bf16.msra.mxu1 %v10922_v13  ;;  %8628 = vmatmul.bf16.vlgmr.msrb.gmra.mxu3 %v16583_v35  ;;  %v8409_v13 = vadd.f32 %v8408_v16, %v16608_v32  ;;  %v8434_v50 = vpop.f32.mrf.mxu0  ;;  %v13302_v5 = vld [vmem:[#allocation7 + $0x374] sm:$0xf0]  ;;  %v11114_v3 = vor.u32 %v13270_v58, %v11113_v57  ;;  %v10969_v53 = vld [vmem:[#allocation7 + $0x148] sm:$0xf] }
 0x4c6   : > { %8672 = vmatpush.bf16.msra.mxu3 %v11050_v19  ;;  %8641 = vmatmul.bf16.vlgmr.msra.gmra.mxu0 %v16587_v33  ;;  %v11130_v19 = vor.u32 %v13274_v44, %v11129_v9  ;;  %v13202_v32 = vld [vmem:[#allocation7 + $0x54] sm:$0xf0]  ;;  %v11242_v36 = vor.u32 %v13302_v5, %v11241_v14  ;;  %v11225_v30 = vld [vmem:[#allocation7 + $0x348] sm:$0xf] }
 0x4c7   : > { %8685 = vmatpush.bf16.msrb.mxu0 %v11178_v10  ;;  %8654 = vmatmul.bf16.vlgmr.msra.gmra.mxu2 %v16589_v52  ;;  %v10858_v10 = vor.u32 %v13206_v51, %v10857_v61  ;;  %v13266_v49 = vld [vmem:[#allocation7 + $0x254] sm:$0xf0]  ;;  %v10825_v17 = vld [vmem:[#allocation7 + $0x28] sm:$0xf] }
 0x4c8   : > { %8698 = vmatpush.bf16.msrb.mxu2 %v11306_v28  ;;  %v10841_v28 = vld [vmem:[#allocation7 + $0x48] sm:$0xf]  ;;  %v8421_v29 = vpop.f32.mrf.mxu3  ;;  %v13230_v63 = vld [vmem:[#allocation7 + $0x134] sm:$0xf0] }
 0x4c9   : > { %8660 = vmatpush.bf16.msra.mxu1 %v10906_v20  ;;  %v13234_v20 = vld [vmem:[#allocation7 + $0x154] sm:$0xf0]  ;;  %v8422_v22 = vadd.f32 %v8421_v29, %v8409_v13  ;;  %v10842_v6 = vor.u32 %v13202_v32, %v10841_v28  ;;  %v10953_v37 = vld [vmem:[#allocation7 + $0x128] sm:$0xf] }
 0x4ca   : > { %8673 = vmatpush.bf16.msra.mxu3 %v11034_v56  ;;  %v11097_v56 = vld [vmem:[#allocation7 + $0x248] sm:$0xf]  ;;  %v10970_v15 = vor.u32 %v13234_v20, %v10969_v53  ;;  %v10954_v47 = vor.u32 %v13230_v63, %v10953_v37  ;;  %v13194_v13 = vld [vmem:[#allocation7 + $0x14] sm:$0xf0] }
 0x4cb   : > { %8686 = vmatpush.bf16.msrb.mxu0 %v11162_v42  ;;  %v8410_v42 = vpop.f32.mrf.mxu1  ;;  %v8435_v45 = vadd.f32 %v8434_v50, %v8422_v22  ;;  %v11081_v21 = vld [vmem:[#allocation7 + $0x228] sm:$0xf]  ;;  %v13226_v61 = vld [vmem:[#allocation7 + $0x114] sm:$0xf0] }
 0x4cc   : > { %8699 = vmatpush.bf16.msrb.mxu2 %v11290_v0  ;;  %v13298_v0 = vld [vmem:[#allocation7 + $0x354] sm:$0xf0]  ;;  %v8447_v55 = vpop.f32.mrf.mxu2  ;;  %v11209_v16 = vld [vmem:[#allocation7 + $0x328] sm:$0xf] }
 0x4cd   : > { %8661 = vmatpush.bf16.msra.mxu1 %v10890_v46  ;;  %v13198_v46 = vld [vmem:[#allocation7 + $0x34] sm:$0xf0]  ;;  %v11226_v7 = vor.u32 %v13298_v0, %v11225_v30  ;;  %v16615_v9 = vadd.f32 %v8447_v55, %v8435_v45  ;;  %v10809_v11 = vld [vmem:[#allocation7 + $0x8] sm:$0xf] }
 0x4ce   : > { %8674 = vmatpush.bf16.msra.mxu3 %v11018_v48  ;;  %v11098_v48 = vor.u32 %v13266_v49, %v11097_v56  ;;  %v10826_v44 = vor.u32 %v13198_v46, %v10825_v17  ;;  %v13350_v12 = vld [vmem:[#allocation7 + $0x4f4] sm:$0xf0]  ;;  %v11561_v60 = vld [vmem:[#allocation7 + $0x5e8] sm:$0xf]  ;;  %v10810_v14 = vor.u32 %v13194_v13, %v10809_v11 }
 0x4cf   : > { %8687 = vmatpush.bf16.msrb.mxu0 %v11146_v25  ;;  %v8436_v25 = vpop.f32.mrf.mxu0  ;;  %v13382_v57 = vld [vmem:[#allocation7 + $0x5f4] sm:$0xf0]  ;;  %v11065_v58 = vld [vmem:[#allocation7 + $0x208] sm:$0xf] }
 0x4d0   : > { %8700 = vmatpush.bf16.msrb.mxu2 %v11274_v62  ;;  %v13262_v62 = vld [vmem:[#allocation7 + $0x234] sm:$0xf0]  ;;  %v8423_v50 = vpop.f32.mrf.mxu3  ;;  %v11193_v5 = vld [vmem:[#allocation7 + $0x308] sm:$0xf]  ;;  %v11562_v29 = vor.u32 %v13382_v57, %v11561_v60 }
 0x4d1   : > { %8662 = vmatpush.bf16.msra.mxu1 %v10874_v34  ;;  %v13294_v34 = vld [vmem:[#allocation7 + $0x334] sm:$0xf0]  ;;  %v11082_v51 = vor.u32 %v13262_v62, %v11081_v21  ;;  %v11817_v56 = vld [vmem:[#allocation7 + $0x7e8] sm:$0xf] }
 0x4d2   : > { %8675 = vmatpush.bf16.msra.mxu3 %v11002_v38  ;;  %v10937_v38 = vld [vmem:[#allocation7 + $0x108] sm:$0xf]  ;;  %v13414_v53 = vld [vmem:[#allocation7 + $0x6f4] sm:$0xf0] }
 0x4d3   : > { %8688 = vmatpush.bf16.msrb.mxu0 %v11130_v19  ;;  %v11433_v19 = vld [vmem:[#allocation7 + $0x4e8] sm:$0xf]  ;;  %v10938_v28 = vor.u32 %v13226_v61, %v10937_v38  ;;  %v13446_v49 = vld [vmem:[#allocation7 + $0x7f4] sm:$0xf0] }
 0x4d4   : > { %8701 = vmatpush.bf16.msrb.mxu2 %v11258_v59  ;;  %v11210_v59 = vor.u32 %v13294_v34, %v11209_v16  ;;  %v11434_v32 = vor.u32 %v13350_v12, %v11433_v19  ;;  %v8449_v20 = vpop.f32.mrf.mxu2  ;;  %v11417_v42 = vld [vmem:[#allocation7 + $0x4c8] sm:$0xf]  ;;  %v11818_v17 = vor.u32 %v13446_v49, %v11817_v56  ;;  %v13410_v45 = vld [vmem:[#allocation7 + $0x6d4] sm:$0xf0] }
 0x4d5   : > { %8663 = vmatpush.bf16.msra.mxu1 %v10858_v10  ;;  %v13258_v10 = vld [vmem:[#allocation7 + $0x214] sm:$0xf0]  ;;  %v11545_v0 = vld [vmem:[#allocation7 + $0x5c8] sm:$0xf] }
 0x4d6   : > { %8676 = vmatpush.bf16.msra.mxu3 %v10986_v26  ;;  %v13290_v26 = vld [vmem:[#allocation7 + $0x314] sm:$0xf0]  ;;  %v11673_v46 = vld [vmem:[#allocation7 + $0x6c8] sm:$0xf] }
 0x4d7   : > { %8689 = vmatpush.bf16.msrb.mxu0 %v11114_v3  ;;  %v11689_v3 = vld [vmem:[#allocation7 + $0x6e8] sm:$0xf]  ;;  %v11194_v22 = vor.u32 %v13290_v26, %v11193_v5  ;;  %v13442_v37 = vld [vmem:[#allocation7 + $0x7d4] sm:$0xf0]  ;;  %v11674_v21 = vor.u32 %v13410_v45, %v11673_v46 }
 0x4d8   : > { %8702 = vmatpush.bf16.msrb.mxu2 %v11242_v36  ;;  %v11066_v36 = vor.u32 %v13258_v10, %v11065_v58  ;;  %v11690_v30 = vor.u32 %v13414_v53, %v11689_v3  ;;  %v11401_v25 = vld [vmem:[#allocation7 + $0x4a8] sm:$0xf]  ;;  %v13406_v11 = vld [vmem:[#allocation7 + $0x6b4] sm:$0xf0] }
 0x4d9   : > { %8664 = vmatpush.bf16.msra.mxu1 %v10842_v6  ;;  %v13346_v6 = vld [vmem:[#allocation7 + $0x4d4] sm:$0xf0]  ;;  %v11529_v62 = vld [vmem:[#allocation7 + $0x5a8] sm:$0xf] }
 0x4da   : > { %8677 = vmatpush.bf16.msra.mxu3 %v10970_v15  ;;  %v13378_v15 = vld [vmem:[#allocation7 + $0x5d4] sm:$0xf0]  ;;  %v11418_v55 = vor.u32 %v13346_v6, %v11417_v42  ;;  %v11657_v34 = vld [vmem:[#allocation7 + $0x6a8] sm:$0xf] }
 0x4db   : > { %8690 = vmatpush.bf16.msrb.mxu0 %v11098_v48  ;;  %v11801_v48 = vld [vmem:[#allocation7 + $0x7c8] sm:$0xf]  ;;  %v11546_v63 = vor.u32 %v13378_v15, %v11545_v0  ;;  %v13438_v38 = vld [vmem:[#allocation7 + $0x7b4] sm:$0xf0]  ;;  %v11658_v12 = vor.u32 %v13406_v11, %v11657_v34 }
 0x4dc   : > { %8703 = vmatpush.bf16.msrb.mxu2 %v11226_v7  ;;  %v13342_v7 = vld [vmem:[#allocation7 + $0x4b4] sm:$0xf0]  ;;  %v11802_v16 = vor.u32 %v13442_v37, %v11801_v48  ;;  %v11785_v13 = vld [vmem:[#allocation7 + $0x7a8] sm:$0xf] }
 0x4dd   : > { %8665 = vmatpush.bf16.msra.mxu1 %v10826_v44  ;;  %v13374_v44 = vld [vmem:[#allocation7 + $0x5b4] sm:$0xf0]  ;;  %v11513_v50 = vld [vmem:[#allocation7 + $0x588] sm:$0xf]  ;;  %v11786_v57 = vor.u32 %v13438_v38, %v11785_v13 }
 0x4de   : > { %8678 = vmatpush.bf16.msra.mxu3 %v10954_v47  ;;  %v11402_v47 = vor.u32 %v13342_v7, %v11401_v25  ;;  %v11530_v61 = vor.u32 %v13374_v44, %v11529_v62  ;;  %v13338_v19 = vld [vmem:[#allocation7 + $0x494] sm:$0xf0]  ;;  %v11641_v58 = vld [vmem:[#allocation7 + $0x688] sm:$0xf] }
 0x4df   : > { %8691 = vmatpush.bf16.msrb.mxu0 %v11082_v51  ;;  %v11385_v51 = vld [vmem:[#allocation7 + $0x488] sm:$0xf]  ;;  %v13402_v10 = vld [vmem:[#allocation7 + $0x694] sm:$0xf0] }
 0x4e0   : > { %8704 = vmatpush.bf16.msrb.mxu2 %v11210_v59  ;;  %v13370_v59 = vld [vmem:[#allocation7 + $0x594] sm:$0xf0]  ;;  %v11386_v5 = vor.u32 %v13338_v19, %v11385_v51  ;;  %v11369_v53 = vld [vmem:[#allocation7 + $0x468] sm:$0xf] }
 0x4e1   : > { %8666 = vmatpush.bf16.msra.mxu1 %v10810_v14  ;;  %v8460_v60 = vpop.f32.mrf.mxu1  ;;  %v8236_v14 = vperm.slane %v16601_v23, 1  ;;  %v11514_v3 = vor.u32 %v13370_v59, %v11513_v50  ;;  %v13334_v20 = vld [vmem:[#allocation7 + $0x474] sm:$0xf0]  ;;  %v11753_v23 = vld [vmem:[#allocation7 + $0x768] sm:$0xf] }
 0x4e2   : > { %8679 = vmatpush.bf16.msra.mxu3 %v10938_v28  ;;  %v11769_v28 = vld [vmem:[#allocation7 + $0x788] sm:$0xf]  ;;  %v13366_v56 = vld [vmem:[#allocation7 + $0x574] sm:$0xf0] }
 0x4e3   : > { %8692 = vmatpush.bf16.msrb.mxu0 %v11066_v36  ;;  %v8486_v26 = vpop.f32.mrf.mxu0  ;;  %v11497_v36 = vld [vmem:[#allocation7 + $0x568] sm:$0xf]  ;;  %v13398_v42 = vld [vmem:[#allocation7 + $0x674] sm:$0xf0]  ;;  %v8461_v6 = vadd.f32 %v8460_v60, %v8236_v14 }
 0x4e4   : > { %8705 = vmatpush.bf16.msrb.mxu2 %v11194_v22  ;;  %8667 = vmatmul.bf16.vlgmr.msra.gmra.mxu1 %v16497_v31  ;;  %v11625_v22 = vld [vmem:[#allocation7 + $0x668] sm:$0xf]  ;;  %v13430_v0 = vld [vmem:[#allocation7 + $0x774] sm:$0xf0]  ;;  %v11498_v15 = vor.u32 %v13366_v56, %v11497_v36 }
 0x4e5   : > { %8711 = vmatpush.bf16.msrb.mxu1 %v11434_v32  ;;  %8680 = vmatmul.bf16.vlgmr.msra.gmra.mxu3 %v16501_v39  ;;  %v13434_v32 = vld [vmem:[#allocation7 + $0x794] sm:$0xf0]  ;;  %v11353_v46 = vld [vmem:[#allocation7 + $0x448] sm:$0xf]  ;;  %v11626_v48 = vor.u32 %v13398_v42, %v11625_v22  ;;  %v11754_v7 = vor.u32 %v13430_v0, %v11753_v23 }
 0x4e6   : > { %8724 = vmatpush.bf16.msrb.mxu3 %v11562_v29  ;;  %8693 = vmatmul.bf16.vlgmr.msrb.gmra.mxu0 %v16506_v18  ;;  %v11642_v29 = vor.u32 %v13402_v10, %v11641_v58  ;;  %v11770_v49 = vor.u32 %v13434_v32, %v11769_v28  ;;  %v13330_v45 = vld [vmem:[#allocation7 + $0x454] sm:$0xf0]  ;;  %v11465_v60 = vld [vmem:[#allocation7 + $0x528] sm:$0xf] }
 0x4e7   : > { %8737 = vmatpush.bf16.msra.mxu0 %v11690_v30  ;;  %8706 = vmatmul.bf16.vlgmr.msrb.gmra.mxu2 %v16509_v43  ;;  %v11370_v30 = vor.u32 %v13334_v20, %v11369_v53  ;;  %v13362_v25 = vld [vmem:[#allocation7 + $0x554] sm:$0xf0]  ;;  %v11354_v34 = vor.u32 %v13330_v45, %v11353_v46  ;;  %v11721_v14 = vld [vmem:[#allocation7 + $0x728] sm:$0xf] }
 0x4e8   : > { %8750 = vmatpush.bf16.msra.mxu2 %v11818_v17  ;;  %v8473_v17 = vpop.f32.mrf.mxu3  ;;  %v13394_v62 = vld [vmem:[#allocation7 + $0x654] sm:$0xf0]  ;;  %v11449_v53 = vld [vmem:[#allocation7 + $0x508] sm:$0xf] }
 0x4e9   : > { %8712 = vmatpush.bf16.msrb.mxu1 %v11418_v55  ;;  %v8474_v55 = vadd.f32 %v8473_v17, %v8461_v6  ;;  %v8462_v37 = vpop.f32.mrf.mxu1  ;;  %v13426_v13 = vld [vmem:[#allocation7 + $0x754] sm:$0xf0]  ;;  %v11945_v36 = vld [vmem:[#allocation7 + $0x8e8] sm:$0xf] }
 0x4ea   : > { %8725 = vmatpush.bf16.msrb.mxu3 %v11546_v63  ;;  %v11481_v63 = vld [vmem:[#allocation7 + $0x548] sm:$0xf]  ;;  %v13326_v51 = vld [vmem:[#allocation7 + $0x434] sm:$0xf0] }
 0x4eb   : > { %8738 = vmatpush.bf16.msra.mxu0 %v11674_v21  ;;  %v11609_v21 = vld [vmem:[#allocation7 + $0x648] sm:$0xf]  ;;  %v8487_v44 = vadd.f32 %v8486_v26, %v8474_v55  ;;  %v8488_v11 = vpop.f32.mrf.mxu0  ;;  %v11482_v38 = vor.u32 %v13362_v25, %v11481_v63  ;;  %v13358_v50 = vld [vmem:[#allocation7 + $0x534] sm:$0xf0] }
 0x4ec   : > { %8751 = vmatpush.bf16.msra.mxu2 %v11802_v16  ;;  %v8499_v16 = vpop.f32.mrf.mxu2  ;;  %v13390_v58 = vld [vmem:[#allocation7 + $0x634] sm:$0xf0]  ;;  %v11321_v26 = vld [vmem:[#allocation7 + $0x408] sm:$0xf]  ;;  %v11466_v28 = vor.u32 %v13358_v50, %v11465_v60 }
 0x4ed   : > { %8713 = vmatpush.bf16.msrb.mxu1 %v11402_v47  ;;  %v11737_v47 = vld [vmem:[#allocation7 + $0x748] sm:$0xf]  ;;  %v16622_v19 = vadd.f32 %v8499_v16, %v8487_v44  ;;  %v13354_v20 = vld [vmem:[#allocation7 + $0x514] sm:$0xf0] }
 0x4ee   : > { %8726 = vmatpush.bf16.msrb.mxu3 %v11530_v61  ;;  %v11337_v61 = vld [vmem:[#allocation7 + $0x428] sm:$0xf]  ;;  %v11738_v59 = vor.u32 %v13426_v13, %v11737_v47  ;;  %v13478_v56 = vld [vmem:[#allocation7 + $0x8f4] sm:$0xf0]  ;;  %v11450_v46 = vor.u32 %v13354_v20, %v11449_v53 }
 0x4ef   : > { %8739 = vmatpush.bf16.msra.mxu0 %v11658_v12  ;;  %v11610_v12 = vor.u32 %v13394_v62, %v11609_v21  ;;  %v11338_v10 = vor.u32 %v13326_v51, %v11337_v61  ;;  %v13510_v42 = vld [vmem:[#allocation7 + $0x9f4] sm:$0xf0]  ;;  %v11577_v6 = vld [vmem:[#allocation7 + $0x608] sm:$0xf]  ;;  %v11946_v45 = vor.u32 %v13478_v56, %v11945_v36 }
 0x4f0   : > { %8752 = vmatpush.bf16.msra.mxu2 %v11786_v57  ;;  %v11593_v57 = vld [vmem:[#allocation7 + $0x628] sm:$0xf]  ;;  %v8475_v32 = vpop.f32.mrf.mxu3  ;;  %v13418_v17 = vld [vmem:[#allocation7 + $0x714] sm:$0xf0] }
 0x4f1   : > { %8714 = vmatpush.bf16.msrb.mxu1 %v11386_v5  ;;  %v13422_v5 = vld [vmem:[#allocation7 + $0x734] sm:$0xf0]  ;;  %v12201_v55 = vld [vmem:[#allocation7 + $0xae8] sm:$0xf] }
 0x4f2   : > { %8727 = vmatpush.bf16.msrb.mxu3 %v11514_v3  ;;  %v13322_v3 = vld [vmem:[#allocation7 + $0x414] sm:$0xf0]  ;;  %v11722_v22 = vor.u32 %v13422_v5, %v11721_v14  ;;  %v12329_v25 = vld [vmem:[#allocation7 + $0xbe8] sm:$0xf] }
 0x4f3   : > { %8740 = vmatpush.bf16.msra.mxu0 %v11642_v29  ;;  %v11594_v29 = vor.u32 %v13390_v58, %v11593_v57  ;;  %v11322_v0 = vor.u32 %v13322_v3, %v11321_v26  ;;  %v11929_v62 = vld [vmem:[#allocation7 + $0x8c8] sm:$0xf]  ;;  %v13474_v44 = vld [vmem:[#allocation7 + $0x8d4] sm:$0xf0] }
 0x4f4   : > { %8753 = vmatpush.bf16.msra.mxu2 %v11770_v49  ;;  %v12073_v49 = vld [vmem:[#allocation7 + $0x9e8] sm:$0xf]  ;;  %v8501_v23 = vpop.f32.mrf.mxu2  ;;  %v13506_v11 = vld [vmem:[#allocation7 + $0x9d4] sm:$0xf0]  ;;  %v11930_v61 = vor.u32 %v13474_v44, %v11929_v62 }
 0x4f5   : > { %8715 = vmatpush.bf16.msrb.mxu1 %v11370_v30  ;;  %v13386_v30 = vld [vmem:[#allocation7 + $0x614] sm:$0xf0]  ;;  %v12074_v37 = vor.u32 %v13510_v42, %v12073_v49  ;;  %v12185_v13 = vld [vmem:[#allocation7 + $0xac8] sm:$0xf] }
 0x4f6   : > { %8728 = vmatpush.bf16.msrb.mxu3 %v11498_v15  ;;  %v11705_v15 = vld [vmem:[#allocation7 + $0x708] sm:$0xf]  ;;  %v11578_v63 = vor.u32 %v13386_v30, %v11577_v6  ;;  %v13534_v26 = vld [vmem:[#allocation7 + $0xab4] sm:$0xf0] }
 0x4f7   : > { %8741 = vmatpush.bf16.msra.mxu0 %v11626_v48  ;;  %v13542_v48 = vld [vmem:[#allocation7 + $0xaf4] sm:$0xf0]  ;;  %v11706_v21 = vor.u32 %v13418_v17, %v11705_v15  ;;  %v12313_v51 = vld [vmem:[#allocation7 + $0xbc8] sm:$0xf] }
 0x4f8   : > { %8754 = vmatpush.bf16.msra.mxu2 %v11754_v7  ;;  %v13574_v7 = vld [vmem:[#allocation7 + $0xbf4] sm:$0xf0]  ;;  %v12202_v16 = vor.u32 %v13542_v48, %v12201_v55  ;;  %v11913_v50 = vld [vmem:[#allocation7 + $0x8a8] sm:$0xf] }
 0x4f9   : > { %8716 = vmatpush.bf16.msrb.mxu1 %v11354_v34  ;;  %v12057_v34 = vld [vmem:[#allocation7 + $0x9c8] sm:$0xf]  ;;  %v12330_v47 = vor.u32 %v13574_v7, %v12329_v25  ;;  %v13566_v3 = vld [vmem:[#allocation7 + $0xbb4] sm:$0xf0] }
 0x4fa   : > { %8729 = vmatpush.bf16.msrb.mxu3 %v11482_v38  ;;  %v13538_v38 = vld [vmem:[#allocation7 + $0xad4] sm:$0xf0]  ;;  %v12058_v60 = vor.u32 %v13506_v11, %v12057_v34  ;;  %v12041_v58 = vld [vmem:[#allocation7 + $0x9a8] sm:$0xf] }
 0x4fb   : > { %8742 = vmatpush.bf16.msra.mxu0 %v11610_v12  ;;  %v13570_v12 = vld [vmem:[#allocation7 + $0xbd4] sm:$0xf0]  ;;  %v12186_v57 = vor.u32 %v13538_v38, %v12185_v13  ;;  %v12169_v5 = vld [vmem:[#allocation7 + $0xaa8] sm:$0xf] }
 0x4fc   : > { %8755 = vmatpush.bf16.msra.mxu2 %v11738_v59  ;;  %v13470_v59 = vld [vmem:[#allocation7 + $0x8b4] sm:$0xf0]  ;;  %v12314_v14 = vor.u32 %v13570_v12, %v12313_v51  ;;  %v12297_v32 = vld [vmem:[#allocation7 + $0xba8] sm:$0xf]  ;;  %v12170_v36 = vor.u32 %v13534_v26, %v12169_v5 }
 0x4fd   : > { %8717 = vmatpush.bf16.msrb.mxu1 %v11338_v10  ;;  %v13502_v10 = vld [vmem:[#allocation7 + $0x9b4] sm:$0xf0]  ;;  %v11897_v20 = vld [vmem:[#allocation7 + $0x888] sm:$0xf]  ;;  %v12298_v42 = vor.u32 %v13566_v3, %v12297_v32 }
 0x4fe   : > { %8730 = vmatpush.bf16.msrb.mxu3 %v11466_v28  ;;  %v11914_v28 = vor.u32 %v13470_v59, %v11913_v50  ;;  %v12042_v53 = vor.u32 %v13502_v10, %v12041_v58  ;;  %v12025_v49 = vld [vmem:[#allocation7 + $0x988] sm:$0xf]  ;;  %v13530_v23 = vld [vmem:[#allocation7 + $0xa94] sm:$0xf0] }
 0x4ff   : > { %8743 = vmatpush.bf16.msra.mxu0 %v11594_v29  ;;  %v13466_v29 = vld [vmem:[#allocation7 + $0x894] sm:$0xf0]  ;;  %v12153_v30 = vld [vmem:[#allocation7 + $0xa88] sm:$0xf] }
 0x500   : > { %8756 = vmatpush.bf16.msra.mxu2 %v11722_v22  ;;  %v13498_v22 = vld [vmem:[#allocation7 + $0x994] sm:$0xf0]  ;;  %v12281_v17 = vld [vmem:[#allocation7 + $0xb88] sm:$0xf] }
 0x501   : > { %8718 = vmatpush.bf16.msrb.mxu1 %v11322_v0  ;;  %v8512_v56 = vpop.f32.mrf.mxu1  ;;  %v11898_v0 = vor.u32 %v13466_v29, %v11897_v20  ;;  %v11881_v55 = vld [vmem:[#allocation7 + $0x868] sm:$0xf]  ;;  %v13462_v48 = vld [vmem:[#allocation7 + $0x874] sm:$0xf0] }
 0x502   : > { %8731 = vmatpush.bf16.msrb.mxu3 %v11450_v46  ;;  %v8513_v6 = vadd.f32 %v8512_v56, %v16622_v19  ;;  %v13562_v46 = vld [vmem:[#allocation7 + $0xb94] sm:$0xf0]  ;;  %v11882_v19 = vor.u32 %v13462_v48, %v11881_v55  ;;  %v12265_v44 = vld [vmem:[#allocation7 + $0xb68] sm:$0xf] }
 0x503   : > { %8744 = vmatpush.bf16.msra.mxu0 %v11578_v63  ;;  %v8538_v15 = vpop.f32.mrf.mxu0  ;;  %v12009_v63 = vld [vmem:[#allocation7 + $0x968] sm:$0xf]  ;;  %v13494_v25 = vld [vmem:[#allocation7 + $0x974] sm:$0xf0]  ;;  %v12282_v7 = vor.u32 %v13562_v46, %v12281_v17 }
 0x504   : > { %8757 = vmatpush.bf16.msra.mxu2 %v11706_v21  ;;  %8719 = vmatmul.bf16.vlgmr.msrb.gmra.mxu1 %v16530_v27  ;;  %v12137_v21 = vld [vmem:[#allocation7 + $0xa68] sm:$0xf]  ;;  %v13526_v62 = vld [vmem:[#allocation7 + $0xa74] sm:$0xf0]  ;;  %v12010_v34 = vor.u32 %v13494_v25, %v12009_v63 }
 0x505   : > { %8763 = vmatpush.bf16.msra.mxu1 %v11946_v45  ;;  %8732 = vmatmul.bf16.vlgmr.msrb.gmra.mxu3 %v16533_v8  ;;  %v12026_v45 = vor.u32 %v13498_v22, %v12025_v49  ;;  %v13458_v13 = vld [vmem:[#allocation7 + $0x854] sm:$0xf0]  ;;  %v11993_v12 = vld [vmem:[#allocation7 + $0x948] sm:$0xf] }
 0x506   : > { %8776 = vmatpush.bf16.msra.mxu3 %v12074_v37  ;;  %8745 = vmatmul.bf16.vlgmr.msra.gmra.mxu0 %v16540_v41  ;;  %v12154_v37 = vor.u32 %v13530_v23, %v12153_v30  ;;  %v13522_v58 = vld [vmem:[#allocation7 + $0xa54] sm:$0xf0]  ;;  %v12249_v26 = vld [vmem:[#allocation7 + $0xb48] sm:$0xf] }
 0x507   : > { %8789 = vmatpush.bf16.msrb.mxu0 %v12202_v16  ;;  %8758 = vmatmul.bf16.vlgmr.msra.gmra.mxu2 %v16545_v1  ;;  %v13558_v16 = vld [vmem:[#allocation7 + $0xb74] sm:$0xf0]  ;;  %v11849_v3 = vld [vmem:[#allocation7 + $0x828] sm:$0xf] }
 0x508   : > { %8802 = vmatpush.bf16.msrb.mxu2 %v12330_v47  ;;  %v8525_v11 = vpop.f32.mrf.mxu3  ;;  %v11865_v47 = vld [vmem:[#allocation7 + $0x848] sm:$0xf]  ;;  %v12266_v50 = vor.u32 %v13558_v16, %v12265_v44  ;;  %v13486_v56 = vld [vmem:[#allocation7 + $0x934] sm:$0xf0] }
 0x509   : > { %8764 = vmatpush.bf16.msra.mxu1 %v11930_v61  ;;  %v8526_v38 = vadd.f32 %v8525_v11, %v8513_v6  ;;  %v12138_v61 = vor.u32 %v13526_v62, %v12137_v21  ;;  %v8514_v51 = vpop.f32.mrf.mxu1  ;;  %v12105_v22 = vld [vmem:[#allocation7 + $0xa28] sm:$0xf]  ;;  %v13550_v23 = vld [vmem:[#allocation7 + $0xb34] sm:$0xf0] }
 0x50a   : > { %8777 = vmatpush.bf16.msra.mxu3 %v12058_v60  ;;  %v13490_v60 = vld [vmem:[#allocation7 + $0x954] sm:$0xf0]  ;;  %v8551_v59 = vpop.f32.mrf.mxu2  ;;  %v12233_v30 = vld [vmem:[#allocation7 + $0xb28] sm:$0xf] }
 0x50b   : > { %8790 = vmatpush.bf16.msrb.mxu0 %v12186_v57  ;;  %v12121_v57 = vld [vmem:[#allocation7 + $0xa48] sm:$0xf]  ;;  %v8539_v10 = vadd.f32 %v8538_v15, %v8526_v38  ;;  %v8540_v5 = vpop.f32.mrf.mxu0  ;;  %v11994_v32 = vor.u32 %v13490_v60, %v11993_v12  ;;  %v13450_v46 = vld [vmem:[#allocation7 + $0x814] sm:$0xf0] }
 0x50c   : > { %8803 = vmatpush.bf16.msrb.mxu2 %v12314_v14  ;;  %v11866_v14 = vor.u32 %v13458_v13, %v11865_v47  ;;  %v12122_v29 = vor.u32 %v13522_v58, %v12121_v57  ;;  %v13482_v55 = vld [vmem:[#allocation7 + $0x914] sm:$0xf0]  ;;  %v12585_v25 = vld [vmem:[#allocation7 + $0xde8] sm:$0xf] }
 0x50d   : > { %8765 = vmatpush.bf16.msra.mxu1 %v11914_v28  ;;  %v13554_v28 = vld [vmem:[#allocation7 + $0xb54] sm:$0xf0]  ;;  %v16629_v20 = vadd.f32 %v8551_v59, %v8539_v10  ;;  %v12713_v38 = vld [vmem:[#allocation7 + $0xee8] sm:$0xf] }
 0x50e   : > { %8778 = vmatpush.bf16.msra.mxu3 %v12042_v53  ;;  %v13454_v53 = vld [vmem:[#allocation7 + $0x834] sm:$0xf0]  ;;  %v12250_v49 = vor.u32 %v13554_v28, %v12249_v26  ;;  %v12841_v60 = vld [vmem:[#allocation7 + $0xfe8] sm:$0xf] }
 0x50f   : > { %8791 = vmatpush.bf16.msrb.mxu0 %v12170_v36  ;;  %v11977_v36 = vld [vmem:[#allocation7 + $0x928] sm:$0xf]  ;;  %v11850_v6 = vor.u32 %v13454_v53, %v11849_v3  ;;  %v13606_v63 = vld [vmem:[#allocation7 + $0xcf4] sm:$0xf0] }
 0x510   : > { %8804 = vmatpush.bf16.msrb.mxu2 %v12298_v42  ;;  %v13518_v42 = vld [vmem:[#allocation7 + $0xa34] sm:$0xf0]  ;;  %v11978_v15 = vor.u32 %v13486_v56, %v11977_v36  ;;  %v8527_v17 = vpop.f32.mrf.mxu3  ;;  %v12441_v57 = vld [vmem:[#allocation7 + $0xcc8] sm:$0xf] }
 0x511   : > { %8766 = vmatpush.bf16.msra.mxu1 %v11898_v0  ;;  %v11833_v0 = vld [vmem:[#allocation7 + $0x808] sm:$0xf]  ;;  %v12106_v48 = vor.u32 %v13518_v42, %v12105_v22  ;;  %v13638_v62 = vld [vmem:[#allocation7 + $0xdf4] sm:$0xf0] }
 0x512   : > { %8779 = vmatpush.bf16.msra.mxu3 %v12026_v45  ;;  %v11961_v45 = vld [vmem:[#allocation7 + $0x908] sm:$0xf]  ;;  %v8553_v21 = vpop.f32.mrf.mxu2  ;;  %v13514_v44 = vld [vmem:[#allocation7 + $0xa14] sm:$0xf0]  ;;  %v11834_v16 = vor.u32 %v13450_v46, %v11833_v0  ;;  %v12586_v51 = vor.u32 %v13638_v62, %v12585_v25 }
 0x513   : > { %8792 = vmatpush.bf16.msrb.mxu0 %v12154_v37  ;;  %v12457_v37 = vld [vmem:[#allocation7 + $0xce8] sm:$0xf]  ;;  %v13546_v11 = vld [vmem:[#allocation7 + $0xb14] sm:$0xf0]  ;;  %v11962_v47 = vor.u32 %v13482_v55, %v11961_v45 }
 0x514   : > { %8805 = vmatpush.bf16.msrb.mxu2 %v12282_v7  ;;  %v12234_v7 = vor.u32 %v13550_v23, %v12233_v30  ;;  %v12458_v13 = vor.u32 %v13606_v63, %v12457_v37  ;;  %v13602_v58 = vld [vmem:[#allocation7 + $0xcd4] sm:$0xf0]  ;;  %v12697_v28 = vld [vmem:[#allocation7 + $0xec8] sm:$0xf] }
 0x515   : > { %8767 = vmatpush.bf16.msra.mxu1 %v11882_v19  ;;  %v12089_v19 = vld [vmem:[#allocation7 + $0xa08] sm:$0xf]  ;;  %v13634_v5 = vld [vmem:[#allocation7 + $0xdd4] sm:$0xf0]  ;;  %v12442_v3 = vor.u32 %v13602_v58, %v12441_v57 }
 0x516   : > { %8780 = vmatpush.bf16.msra.mxu3 %v12010_v34  ;;  %v12217_v34 = vld [vmem:[#allocation7 + $0xb08] sm:$0xf]  ;;  %v12090_v12 = vor.u32 %v13514_v44, %v12089_v19  ;;  %v13662_v0 = vld [vmem:[#allocation7 + $0xeb4] sm:$0xf0] }
 0x517   : > { %8793 = vmatpush.bf16.msrb.mxu0 %v12138_v61  ;;  %v13670_v61 = vld [vmem:[#allocation7 + $0xef4] sm:$0xf0]  ;;  %v12218_v59 = vor.u32 %v13546_v11, %v12217_v34  ;;  %v12825_v53 = vld [vmem:[#allocation7 + $0xfc8] sm:$0xf] }
 0x518   : > { %8806 = vmatpush.bf16.msrb.mxu2 %v12266_v50  ;;  %v13702_v50 = vld [vmem:[#allocation7 + $0xff4] sm:$0xf0]  ;;  %v12714_v10 = vor.u32 %v13670_v61, %v12713_v38  ;;  %v12425_v56 = vld [vmem:[#allocation7 + $0xca8] sm:$0xf] }
 0x519   : > { %8768 = vmatpush.bf16.msra.mxu1 %v11866_v14  ;;  %v12569_v14 = vld [vmem:[#allocation7 + $0xdc8] sm:$0xf]  ;;  %v12842_v26 = vor.u32 %v13702_v50, %v12841_v60  ;;  %v13694_v46 = vld [vmem:[#allocation7 + $0xfb4] sm:$0xf0] }
 0x51a   : > { %8781 = vmatpush.bf16.msra.mxu3 %v11994_v32  ;;  %v13666_v32 = vld [vmem:[#allocation7 + $0xed4] sm:$0xf0]  ;;  %v12570_v36 = vor.u32 %v13634_v5, %v12569_v14  ;;  %v12553_v42 = vld [vmem:[#allocation7 + $0xda8] sm:$0xf] }
 0x51b   : > { %8794 = vmatpush.bf16.msrb.mxu0 %v12122_v29  ;;  %v13698_v29 = vld [vmem:[#allocation7 + $0xfd4] sm:$0xf0]  ;;  %v12698_v22 = vor.u32 %v13666_v32, %v12697_v28  ;;  %v12681_v23 = vld [vmem:[#allocation7 + $0xea8] sm:$0xf] }
 0x51c   : > { %8807 = vmatpush.bf16.msrb.mxu2 %v12250_v49  ;;  %v13598_v49 = vld [vmem:[#allocation7 + $0xcb4] sm:$0xf0]  ;;  %v12826_v30 = vor.u32 %v13698_v29, %v12825_v53  ;;  %v12809_v17 = vld [vmem:[#allocation7 + $0xfa8] sm:$0xf]  ;;  %v12682_v37 = vor.u32 %v13662_v0, %v12681_v23 }
 0x51d   : > { %8769 = vmatpush.bf16.msra.mxu1 %v11850_v6  ;;  %v13630_v6 = vld [vmem:[#allocation7 + $0xdb4] sm:$0xf0]  ;;  %v12409_v55 = vld [vmem:[#allocation7 + $0xc88] sm:$0xf]  ;;  %v12810_v21 = vor.u32 %v13694_v46, %v12809_v17 }
 0x51e   : > { %8782 = vmatpush.bf16.msra.mxu3 %v11978_v15  ;;  %v12426_v15 = vor.u32 %v13598_v49, %v12425_v56  ;;  %v12554_v45 = vor.u32 %v13630_v6, %v12553_v42  ;;  %v12537_v25 = vld [vmem:[#allocation7 + $0xd88] sm:$0xf]  ;;  %v13658_v44 = vld [vmem:[#allocation7 + $0xe94] sm:$0xf0] }
 0x51f   : > { %8795 = vmatpush.bf16.msrb.mxu0 %v12106_v48  ;;  %v13594_v48 = vld [vmem:[#allocation7 + $0xc94] sm:$0xf0]  ;;  %v12665_v19 = vld [vmem:[#allocation7 + $0xe88] sm:$0xf] }
 0x520   : > { %8808 = vmatpush.bf16.msrb.mxu2 %v12234_v7  ;;  %v13626_v7 = vld [vmem:[#allocation7 + $0xd94] sm:$0xf0]  ;;  %v12793_v11 = vld [vmem:[#allocation7 + $0xf88] sm:$0xf] }
 0x521   : > { %8770 = vmatpush.bf16.msra.mxu1 %v11834_v16  ;;  %v8564_v63 = vpop.f32.mrf.mxu1  ;;  %v12410_v16 = vor.u32 %v13594_v48, %v12409_v55  ;;  %v12393_v38 = vld [vmem:[#allocation7 + $0xc68] sm:$0xf]  ;;  %v13590_v61 = vld [vmem:[#allocation7 + $0xc74] sm:$0xf0] }
 0x522   : > { %8783 = vmatpush.bf16.msra.mxu3 %v11962_v47  ;;  %v8565_v62 = vadd.f32 %v8564_v63, %v16629_v20  ;;  %v13690_v47 = vld [vmem:[#allocation7 + $0xf94] sm:$0xf0]  ;;  %v12394_v20 = vor.u32 %v13590_v61, %v12393_v38  ;;  %v12777_v58 = vld [vmem:[#allocation7 + $0xf68] sm:$0xf] }
 0x523   : > { %8796 = vmatpush.bf16.msrb.mxu0 %v12090_v12  ;;  %v8590_v34 = vpop.f32.mrf.mxu0  ;;  %v12521_v12 = vld [vmem:[#allocation7 + $0xd68] sm:$0xf]  ;;  %v13622_v60 = vld [vmem:[#allocation7 + $0xd74] sm:$0xf0]  ;;  %v12794_v50 = vor.u32 %v13690_v47, %v12793_v11 }
 0x524   : > { %8809 = vmatpush.bf16.msrb.mxu2 %v12218_v59  ;;  %8771 = vmatmul.bf16.vlgmr.msra.gmra.mxu1 %v16560_v40  ;;  %v12649_v59 = vld [vmem:[#allocation7 + $0xe68] sm:$0xf]  ;;  %v13654_v57 = vld [vmem:[#allocation7 + $0xe74] sm:$0xf0]  ;;  %v12522_v14 = vor.u32 %v13622_v60, %v12521_v12  ;;  %v10923_v12 = vld [vmem:[#allocation7 + $0xf8] sm:$0xf0] }
 0x525   : > { %8815 = vmatpush.bf16.msrb.mxu1 %v12458_v13  ;;  %8784 = vmatmul.bf16.vlgmr.msra.gmra.mxu3 %v16563_v24  ;;  %v12538_v13 = vor.u32 %v13626_v7, %v12537_v25  ;;  %v13586_v28 = vld [vmem:[#allocation7 + $0xc54] sm:$0xf0]  ;;  %v12505_v29 = vld [vmem:[#allocation7 + $0xd48] sm:$0xf]  ;;  %v13252_v60 = vld [vmem:[#allocation7 + $0x1ec] sm:$0xf] }
 0x526   : > { %8828 = vmatpush.bf16.msrb.mxu3 %v12586_v51  ;;  %8797 = vmatmul.bf16.vlgmr.msrb.gmra.mxu0 %v16567_v4  ;;  %v12666_v51 = vor.u32 %v13658_v44, %v12665_v19  ;;  %v13650_v42 = vld [vmem:[#allocation7 + $0xe54] sm:$0xf0]  ;;  %v12761_v0 = vld [vmem:[#allocation7 + $0xf48] sm:$0xf] }
 0x527   : > { %8841 = vmatpush.bf16.msra.mxu0 %v12714_v10  ;;  %8810 = vmatmul.bf16.vlgmr.msrb.gmra.mxu2 %v16569_v54  ;;  %v13686_v10 = vld [vmem:[#allocation7 + $0xf74] sm:$0xf0]  ;;  %v12361_v46 = vld [vmem:[#allocation7 + $0xc28] sm:$0xf] }
 0x528   : > { %8854 = vmatpush.bf16.msra.mxu2 %v12842_v26  ;;  %v8577_v5 = vpop.f32.mrf.mxu3  ;;  %v12377_v26 = vld [vmem:[#allocation7 + $0xc48] sm:$0xf]  ;;  %v12778_v56 = vor.u32 %v13686_v10, %v12777_v58  ;;  %v13614_v63 = vld [vmem:[#allocation7 + $0xd34] sm:$0xf0] }
 0x529   : > { %8816 = vmatpush.bf16.msrb.mxu1 %v12442_v3  ;;  %v8578_v32 = vadd.f32 %v8577_v5, %v8565_v62  ;;  %v12650_v3 = vor.u32 %v13654_v57, %v12649_v59  ;;  %v8566_v53 = vpop.f32.mrf.mxu1  ;;  %v12617_v7 = vld [vmem:[#allocation7 + $0xe28] sm:$0xf]  ;;  %v13678_v44 = vld [vmem:[#allocation7 + $0xf34] sm:$0xf0]  ;;  %v11051_v57 = vld [vmem:[#allocation7 + $0x1f8] sm:$0xf0] }
 0x52a   : > { %8829 = vmatpush.bf16.msrb.mxu3 %v12570_v36  ;;  %v13618_v36 = vld [vmem:[#allocation7 + $0xd54] sm:$0xf0]  ;;  %v8603_v49 = vpop.f32.mrf.mxu2  ;;  %v12745_v19 = vld [vmem:[#allocation7 + $0xf28] sm:$0xf]  ;;  %v11054_v53 = vor.u32 %v13252_v60, %v11051_v57  ;;  %v13240_v60 = vld [vmem:[#allocation7 + $0x18c] sm:$0xf] }
 0x52b   : > { %8842 = vmatpush.bf16.msra.mxu0 %v12698_v22  ;;  %v12633_v22 = vld [vmem:[#allocation7 + $0xe48] sm:$0xf]  ;;  %v8591_v6 = vadd.f32 %v8590_v34, %v8578_v32  ;;  %v8592_v23 = vpop.f32.mrf.mxu0  ;;  %v12506_v17 = vor.u32 %v13618_v36, %v12505_v29  ;;  %v13578_v47 = vld [vmem:[#allocation7 + $0xc14] sm:$0xf0]  ;;  %v13284_v32 = vld [vmem:[#allocation7 + $0x2ec] sm:$0xf] }
 0x52c   : > { %8855 = vmatpush.bf16.msra.mxu2 %v12826_v30  ;;  %v12378_v30 = vor.u32 %v13586_v28, %v12377_v26  ;;  %v12634_v48 = vor.u32 %v13650_v42, %v12633_v22  ;;  %v13610_v38 = vld [vmem:[#allocation7 + $0xd14] sm:$0xf0]  ;;  %v13316_v36 = vld [vmem:[#allocation7 + $0x3ec] sm:$0xf]  ;;  %v10907_v42 = vld [vmem:[#allocation7 + $0xd8] sm:$0xf0] }
 0x52d   : > { %8817 = vmatpush.bf16.msrb.mxu1 %v12426_v15  ;;  %v13682_v15 = vld [vmem:[#allocation7 + $0xf54] sm:$0xf0]  ;;  %v16636_v55 = vadd.f32 %v8603_v49, %v8591_v6  ;;  %v13216_v22 = vld [vmem:[#allocation7 + $0xcc] sm:$0xf]  ;;  %v11035_v23 = vld [vmem:[#allocation7 + $0x1d8] sm:$0xf0] }
 0x52e   : > { %8830 = vmatpush.bf16.msrb.mxu3 %v12554_v45  ;;  %v13582_v45 = vld [vmem:[#allocation7 + $0xc34] sm:$0xf0]  ;;  %v12762_v25 = vor.u32 %v13682_v15, %v12761_v0  ;;  %v13280_v15 = vld [vmem:[#allocation7 + $0x2cc] sm:$0xf] }
 0x52f   : > { %8843 = vmatpush.bf16.msra.mxu0 %v12682_v37  ;;  %v12489_v37 = vld [vmem:[#allocation7 + $0xd28] sm:$0xf]  ;;  %v12362_v62 = vor.u32 %v13582_v45, %v12361_v46  ;;  %v13642_v58 = vld [vmem:[#allocation7 + $0xe14] sm:$0xf0]  ;;  %v10910_v46 = vor.u32 %v13216_v22, %v10907_v42  ;;  %v13312_v45 = vld [vmem:[#allocation7 + $0x3cc] sm:$0xf] }
 0x530   : > { %8856 = vmatpush.bf16.msra.mxu2 %v12810_v21  ;;  %v13646_v21 = vld [vmem:[#allocation7 + $0xe34] sm:$0xf0]  ;;  %v12490_v34 = vor.u32 %v13614_v63, %v12489_v37  ;;  %v8579_v11 = vpop.f32.mrf.mxu3  ;;  %v13212_v63 = vld [vmem:[#allocation7 + $0xac] sm:$0xf]  ;;  %v11115_v22 = vld [vmem:[#allocation7 + $0x278] sm:$0xf0] }
 0x531   : > { %8818 = vmatpush.bf16.msrb.mxu1 %v12410_v16  ;;  %v12345_v16 = vld [vmem:[#allocation7 + $0xc08] sm:$0xf]  ;;  %v12618_v61 = vor.u32 %v13646_v21, %v12617_v7  ;;  %v13674_v5 = vld [vmem:[#allocation7 + $0xf14] sm:$0xf0]  ;;  %v13244_v21 = vld [vmem:[#allocation7 + $0x1ac] sm:$0xf] }
 0x532   : > { %8831 = vmatpush.bf16.msrb.mxu3 %v12538_v13  ;;  %v12473_v13 = vld [vmem:[#allocation7 + $0xd08] sm:$0xf]  ;;  %v8605_v59 = vpop.f32.mrf.mxu2  ;;  %v12346_v10 = vor.u32 %v13578_v47, %v12345_v16  ;;  %v11147_v16 = vld [vmem:[#allocation7 + $0x2b8] sm:$0xf0]  ;;  %v13308_v11 = vld [vmem:[#allocation7 + $0x3ac] sm:$0xf] }
 0x533   : > { %8844 = vmatpush.bf16.msra.mxu0 %v12666_v51  ;;  %v13220_v51 = vld [vmem:[#allocation7 + $0xec] sm:$0xf]  ;;  %v12474_v26 = vor.u32 %v13610_v38, %v12473_v13  ;;  %v11275_v47 = vld [vmem:[#allocation7 + $0x3b8] sm:$0xf0] }
 0x534   : > { %8857 = vmatpush.bf16.msra.mxu2 %v12794_v50  ;;  %v12746_v50 = vor.u32 %v13678_v44, %v12745_v19  ;;  %v10926_v28 = vor.u32 %v13220_v51, %v10923_v12  ;;  %v13276_v44 = vld [vmem:[#allocation7 + $0x2ac] sm:$0xf]  ;;  %v11278_v59 = vor.u32 %v13308_v11, %v11275_v47 }
 0x535   : > { %8819 = vmatpush.bf16.msrb.mxu1 %v12394_v20  ;;  %v12601_v20 = vld [vmem:[#allocation7 + $0xe08] sm:$0xf]  ;;  %v13208_v38 = vld [vmem:[#allocation7 + $0x8c] sm:$0xf]  ;;  %v11150_v51 = vor.u32 %v13276_v44, %v11147_v16 }
 0x536   : > { %8832 = vmatpush.bf16.msrb.mxu3 %v12522_v14  ;;  %v12729_v14 = vld [vmem:[#allocation7 + $0xf08] sm:$0xf]  ;;  %v12602_v29 = vor.u32 %v13642_v58, %v12601_v20  ;;  %v13272_v20 = vld [vmem:[#allocation7 + $0x28c] sm:$0xf]  ;;  %v11131_v58 = vld [vmem:[#allocation7 + $0x298] sm:$0xf0] }
 0x537   : > { %8845 = vmatpush.bf16.msra.mxu0 %v12650_v3  ;;  %v11179_v3 = vld [vmem:[#allocation7 + $0x2f8] sm:$0xf0]  ;;  %v12730_v49 = vor.u32 %v13674_v5, %v12729_v14  ;;  %v13304_v5 = vld [vmem:[#allocation7 + $0x38c] sm:$0xf] }
 0x538   : > { %8858 = vmatpush.bf16.msra.mxu2 %v12778_v56  ;;  %v11307_v56 = vld [vmem:[#allocation7 + $0x3f8] sm:$0xf0]  ;;  %v11182_v6 = vor.u32 %v13284_v32, %v11179_v3  ;;  %v13204_v32 = vld [vmem:[#allocation7 + $0x6c] sm:$0xf] }
 0x539   : > { %8820 = vmatpush.bf16.msrb.mxu1 %v12378_v30  ;;  %v13248_v30 = vld [vmem:[#allocation7 + $0x1cc] sm:$0xf]  ;;  %v11310_v0 = vor.u32 %v13316_v36, %v11307_v56  ;;  %v10859_v3 = vld [vmem:[#allocation7 + $0x78] sm:$0xf0] }
 0x53a   : > { %8833 = vmatpush.bf16.msrb.mxu3 %v12506_v17  ;;  %v11163_v17 = vld [vmem:[#allocation7 + $0x2d8] sm:$0xf0]  ;;  %v11038_v37 = vor.u32 %v13248_v30, %v11035_v23  ;;  %v13300_v42 = vld [vmem:[#allocation7 + $0x36c] sm:$0xf] }
 0x53b   : > { %8846 = vmatpush.bf16.msra.mxu0 %v12634_v48  ;;  %v11291_v48 = vld [vmem:[#allocation7 + $0x3d8] sm:$0xf0]  ;;  %v11166_v7 = vor.u32 %v13280_v15, %v11163_v17  ;;  %v13296_v16 = vld [vmem:[#allocation7 + $0x34c] sm:$0xf] }
 0x53c   : > { %8859 = vmatpush.bf16.msra.mxu2 %v12762_v25  ;;  %v10891_v25 = vld [vmem:[#allocation7 + $0xb8] sm:$0xf0]  ;;  %v11294_v19 = vor.u32 %v13312_v45, %v11291_v48  ;;  %v13232_v48 = vld [vmem:[#allocation7 + $0x14c] sm:$0xf] }
 0x53d   : > { %8821 = vmatpush.bf16.msrb.mxu1 %v12362_v62  ;;  %v11019_v62 = vld [vmem:[#allocation7 + $0x1b8] sm:$0xf0]  ;;  %v13196_v47 = vld [vmem:[#allocation7 + $0x2c] sm:$0xf] }
 0x53e   : > { %8834 = vmatpush.bf16.msrb.mxu3 %v12490_v34  ;;  %v10894_v34 = vor.u32 %v13212_v63, %v10891_v25  ;;  %v11022_v13 = vor.u32 %v13244_v21, %v11019_v62  ;;  %v10987_v36 = vld [vmem:[#allocation7 + $0x178] sm:$0xf0] }
 0x53f   : > { %8847 = vmatpush.bf16.msra.mxu0 %v12618_v61  ;;  %v10875_v61 = vld [vmem:[#allocation7 + $0x98] sm:$0xf0] }
 0x540   : > { %8860 = vmatpush.bf16.msra.mxu2 %v12746_v50  ;;  %v11003_v50 = vld [vmem:[#allocation7 + $0x198] sm:$0xf0] }
 0x541   : > { %8822 = vmatpush.bf16.msrb.mxu1 %v12346_v10  ;;  %v8616_v12 = vpop.f32.mrf.mxu1  ;;  %v10878_v10 = vor.u32 %v13208_v38, %v10875_v61  ;;  %v10843_v15 = vld [vmem:[#allocation7 + $0x58] sm:$0xf0] }
 0x542   : > { %8835 = vmatpush.bf16.msrb.mxu3 %v12474_v26  ;;  %v8617_v57 = vadd.f32 %v8616_v12, %v16636_v55  ;;  %v11259_v26 = vld [vmem:[#allocation7 + $0x398] sm:$0xf0]  ;;  %v10862_v55 = vor.u32 %v13204_v32, %v10859_v3  ;;  %v13224_v32 = vld [vmem:[#allocation7 + $0x10c] sm:$0xf] }
 0x543   : > { %8848 = vmatpush.bf16.msra.mxu0 %v12602_v29  ;;  %v8642_v14 = vpop.f32.mrf.mxu0  ;;  %v13236_v29 = vld [vmem:[#allocation7 + $0x16c] sm:$0xf]  ;;  %v11262_v56 = vor.u32 %v13304_v5, %v11259_v26  ;;  %v11099_v21 = vld [vmem:[#allocation7 + $0x258] sm:$0xf0] }
 0x544   : > { %8861 = vmatpush.bf16.msra.mxu2 %v12730_v49  ;;  %8823 = vmatmul.bf16.vlgmr.msrb.gmra.mxu1 %v16580_v2  ;;  %v13268_v49 = vld [vmem:[#allocation7 + $0x26c] sm:$0xf]  ;;  %v10990_v30 = vor.u32 %v13236_v29, %v10987_v36  ;;  %v10955_v12 = vld [vmem:[#allocation7 + $0x138] sm:$0xf0]  ;;  %v9075_v29 = vmax.f32 %v16615_v9, 0.0 }
 0x545   : > { %8867 = vmatpush.bf16.msra.mxu1 %v10926_v28  ;;  %8836 = vmatmul.bf16.vlgmr.msrb.gmra.mxu3 %v16583_v35  ;;  %v11006_v28 = vor.u32 %v13240_v60, %v11003_v50  ;;  %v13260_v60 = vld [vmem:[#allocation7 + $0x22c] sm:$0xf]  ;;  %v10811_v5 = vld [vmem:[#allocation7 + $0x18] sm:$0xf0] }
 0x546   : > { %8880 = vmatpush.bf16.msra.mxu3 %v11054_v53  ;;  %8849 = vmatmul.bf16.vlgmr.msra.gmra.mxu0 %v16587_v33  ;;  %v11134_v53 = vor.u32 %v13272_v20, %v11131_v58  ;;  %v11211_v20 = vld [vmem:[#allocation7 + $0x338] sm:$0xf0] }
 0x547   : > { %8893 = vmatpush.bf16.msrb.mxu0 %v11182_v6  ;;  %8862 = vmatmul.bf16.vlgmr.msra.gmra.mxu2 %v16589_v52  ;;  %v11243_v6 = vld [vmem:[#allocation7 + $0x378] sm:$0xf0] }
 0x548   : > { %8906 = vmatpush.bf16.msrb.mxu2 %v11310_v0  ;;  %v8629_v23 = vpop.f32.mrf.mxu3  ;;  %v13200_v0 = vld [vmem:[#allocation7 + $0x4c] sm:$0xf]  ;;  %v11246_v63 = vor.u32 %v13300_v42, %v11243_v6  ;;  %v10939_v3 = vld [vmem:[#allocation7 + $0x118] sm:$0xf0] }
 0x549   : > { %8868 = vmatpush.bf16.msra.mxu1 %v10910_v46  ;;  %v8630_v17 = vadd.f32 %v8629_v23, %v8617_v57  ;;  %v11118_v46 = vor.u32 %v13268_v49, %v11115_v22  ;;  %v8618_v45 = vpop.f32.mrf.mxu1  ;;  %v13292_v57 = vld [vmem:[#allocation7 + $0x32c] sm:$0xf]  ;;  %v11435_v49 = vld [vmem:[#allocation7 + $0x4f8] sm:$0xf0]  ;;  %v10942_v9 = vor.u32 %v13224_v32, %v10939_v3 }
 0x54a   : > { %8881 = vmatpush.bf16.msra.mxu3 %v11038_v37  ;;  %v10971_v37 = vld [vmem:[#allocation7 + $0x158] sm:$0xf0]  ;;  %v8655_v25 = vpop.f32.mrf.mxu2  ;;  %v13380_v22 = vld [vmem:[#allocation7 + $0x5ec] sm:$0xf] }
 0x54b   : > { %8894 = vmatpush.bf16.msrb.mxu0 %v11166_v7  ;;  %v13264_v7 = vld [vmem:[#allocation7 + $0x24c] sm:$0xf]  ;;  %v8643_v62 = vadd.f32 %v8642_v14, %v8630_v17  ;;  %v8644_v44 = vpop.f32.mrf.mxu0  ;;  %v10974_v11 = vor.u32 %v13232_v48, %v10971_v37  ;;  %v11563_v6 = vld [vmem:[#allocation7 + $0x5f8] sm:$0xf0] }
 0x54c   : > { %8907 = vmatpush.bf16.msrb.mxu2 %v11294_v19  ;;  %v10846_v19 = vor.u32 %v13200_v0, %v10843_v15  ;;  %v11102_v61 = vor.u32 %v13264_v7, %v11099_v21  ;;  %v13192_v14 = vld [vmem:[#allocation7 + $0xc] sm:$0xf]  ;;  %v11067_v23 = vld [vmem:[#allocation7 + $0x218] sm:$0xf0] }
 0x54d   : > { %8869 = vmatpush.bf16.msra.mxu1 %v10894_v34  ;;  %v11227_v34 = vld [vmem:[#allocation7 + $0x358] sm:$0xf0]  ;;  %v8656_v38 = vadd.f32 %v8655_v25, %v8643_v62  ;;  %v10814_v15 = vor.u32 %v13192_v14, %v10811_v5  ;;  %v13288_v17 = vld [vmem:[#allocation7 + $0x30c] sm:$0xf] }
 0x54e   : > { %8882 = vmatpush.bf16.msra.mxu3 %v11022_v13  ;;  %v10827_v13 = vld [vmem:[#allocation7 + $0x38] sm:$0xf0]  ;;  %v11230_v50 = vor.u32 %v13296_v16, %v11227_v34  ;;  %v13412_v48 = vld [vmem:[#allocation7 + $0x6ec] sm:$0xf] }
 0x54f   : > { %8895 = vmatpush.bf16.msrb.mxu0 %v11150_v51  ;;  %v13228_v51 = vld [vmem:[#allocation7 + $0x12c] sm:$0xf]  ;;  %v9076_v58 = vmax.f32 %v8656_v38, 0.0  ;;  %v11691_v37 = vld [vmem:[#allocation7 + $0x6f8] sm:$0xf0] }
 0x550   : > { %8908 = vmatpush.bf16.msrb.mxu2 %v11278_v59  ;;  %v11083_v59 = vld [vmem:[#allocation7 + $0x238] sm:$0xf0]  ;;  %v10958_v26 = vor.u32 %v13228_v51, %v10955_v12  ;;  %v13444_v7 = vld [vmem:[#allocation7 + $0x7ec] sm:$0xf]  ;;  %v11694_v16 = vor.u32 %v13412_v48, %v11691_v37 }
 0x551   : > { %8870 = vmatpush.bf16.msra.mxu1 %v10878_v10  ;;  %v10830_v10 = vor.u32 %v13196_v47, %v10827_v13  ;;  %v9083_v36 = vrot.slane %v9076_v58, 7  ;;  %v11819_v21 = vld [vmem:[#allocation7 + $0x7f8] sm:$0xf0]  ;;  %v13376_v34 = vld [vmem:[#allocation7 + $0x5cc] sm:$0xf] }
 0x552   : > { %8883 = vmatpush.bf16.msra.mxu3 %v11006_v28  ;;  %v8631_v28 = vpop.f32.mrf.mxu3  ;;  %v8657_v42 = vpop.f32.mrf.mxu2  ;;  %v11419_v44 = vld [vmem:[#allocation7 + $0x4d8] sm:$0xf0]  ;;  %v11822_v47 = vor.u32 %v13444_v7, %v11819_v21  ;;  %v13408_v13 = vld [vmem:[#allocation7 + $0x6cc] sm:$0xf] }
 0x553   : > { %8896 = vmatpush.bf16.msrb.mxu0 %v11134_v53  ;;  %v13348_v53 = vld [vmem:[#allocation7 + $0x4ec] sm:$0xf]  ;;  %v16645_v0 = vsel %vm605_vm0, %v9075_v29, %v9083_v36  ;;  %v11675_v38 = vld [vmem:[#allocation7 + $0x6d8] sm:$0xf0] }
 0x554   : > { %8909 = vmatpush.bf16.msrb.mxu2 %v11262_v56  ;;  %v11086_v56 = vor.u32 %v13260_v60, %v11083_v59  ;;  %v11438_v45 = vor.u32 %v13348_v53, %v11435_v49  ;;  %v13440_v51 = vld [vmem:[#allocation7 + $0x7cc] sm:$0xf]  ;;  %v11803_v12 = vld [vmem:[#allocation7 + $0x7d8] sm:$0xf0] }
 0x555   : > { %8871 = vmatpush.bf16.msra.mxu1 %v10862_v55  ;;  %v11214_v55 = vor.u32 %v13292_v57, %v11211_v20  ;;  %v11403_v59 = vld [vmem:[#allocation7 + $0x4b8] sm:$0xf0]  ;;  %v11678_v57 = vor.u32 %v13408_v13, %v11675_v38  ;;  %v13372_v20 = vld [vmem:[#allocation7 + $0x5ac] sm:$0xf] }
 0x556   : > { %8884 = vmatpush.bf16.msra.mxu3 %v10990_v30  ;;  %v13256_v30 = vld [vmem:[#allocation7 + $0x20c] sm:$0xf]  ;;  %v11531_v58 = vld [vmem:[#allocation7 + $0x5b8] sm:$0xf0] }
 0x557   : > { %8897 = vmatpush.bf16.msrb.mxu0 %v11118_v46  ;;  %v11195_v46 = vld [vmem:[#allocation7 + $0x318] sm:$0xf0]  ;;  %v11070_v25 = vor.u32 %v13256_v30, %v11067_v23  ;;  %v13404_v14 = vld [vmem:[#allocation7 + $0x6ac] sm:$0xf]  ;;  %v11534_v32 = vor.u32 %v13372_v20, %v11531_v58 }
 0x558   : > { %8910 = vmatpush.bf16.msrb.mxu2 %v11246_v63  ;;  %v11566_v63 = vor.u32 %v13380_v22, %v11563_v6  ;;  %v11198_v62 = vor.u32 %v13288_v17, %v11195_v46  ;;  %v11659_v5 = vld [vmem:[#allocation7 + $0x6b8] sm:$0xf0]  ;;  %v13336_v3 = vld [vmem:[#allocation7 + $0x48c] sm:$0xf] }
 0x559   : > { %8872 = vmatpush.bf16.msra.mxu1 %v10846_v19  ;;  %v13344_v19 = vld [vmem:[#allocation7 + $0x4cc] sm:$0xf]  ;;  %v11787_v28 = vld [vmem:[#allocation7 + $0x7b8] sm:$0xf0]  ;;  %v11662_v53 = vor.u32 %v13404_v14, %v11659_v5 }
 0x55a   : > { %8885 = vmatpush.bf16.msra.mxu3 %v10974_v11  ;;  %v11547_v11 = vld [vmem:[#allocation7 + $0x5d8] sm:$0xf0]  ;;  %v13368_v36 = vld [vmem:[#allocation7 + $0x58c] sm:$0xf] }
 0x55b   : > { %8898 = vmatpush.bf16.msrb.mxu0 %v11102_v61  ;;  %v11422_v61 = vor.u32 %v13344_v19, %v11419_v44  ;;  %v11550_v60 = vor.u32 %v13376_v34, %v11547_v11  ;;  %v13400_v49 = vld [vmem:[#allocation7 + $0x68c] sm:$0xf]  ;;  %v11643_v22 = vld [vmem:[#allocation7 + $0x698] sm:$0xf0] }
 0x55c   : > { %8911 = vmatpush.bf16.msrb.mxu2 %v11230_v50  ;;  %v13340_v50 = vld [vmem:[#allocation7 + $0x4ac] sm:$0xf]  ;;  %v11771_v23 = vld [vmem:[#allocation7 + $0x798] sm:$0xf0] }
 0x55d   : > { %8873 = vmatpush.bf16.msra.mxu1 %v10830_v10  ;;  %v11806_v10 = vor.u32 %v13440_v51, %v11803_v12  ;;  %v13432_v30 = vld [vmem:[#allocation7 + $0x78c] sm:$0xf]  ;;  %v11371_v46 = vld [vmem:[#allocation7 + $0x478] sm:$0xf0] }
 0x55e   : > { %8886 = vmatpush.bf16.msra.mxu3 %v10958_v26  ;;  %v11406_v26 = vor.u32 %v13340_v50, %v11403_v59  ;;  %v13332_v17 = vld [vmem:[#allocation7 + $0x46c] sm:$0xf]  ;;  %v11499_v48 = vld [vmem:[#allocation7 + $0x578] sm:$0xf0]  ;;  %v11774_v37 = vor.u32 %v13432_v30, %v11771_v23 }
 0x55f   : > { %8899 = vmatpush.bf16.msrb.mxu0 %v11086_v56  ;;  %v11515_v56 = vld [vmem:[#allocation7 + $0x598] sm:$0xf0]  ;;  %v11374_v21 = vor.u32 %v13332_v17, %v11371_v46  ;;  %v13328_v34 = vld [vmem:[#allocation7 + $0x44c] sm:$0xf] }
 0x560   : > { %8912 = vmatpush.bf16.msrb.mxu2 %v11214_v55  ;;  %v16651_v55 = vld [vmem:[#allocation9] sm:$0xf]  ;;  %v11755_v19 = vld [vmem:[#allocation7 + $0x778] sm:$0xf0]  ;;  %v13392_v50 = vld [vmem:[#allocation7 + $0x64c] sm:$0xf] }
 0x561   : > { %8874 = vmatpush.bf16.msra.mxu1 %v10814_v15  ;;  %v8668_v29 = vpop.f32.mrf.mxu1  ;;  %v11518_v15 = vor.u32 %v13368_v36, %v11515_v56  ;;  %v11355_v11 = vld [vmem:[#allocation7 + $0x458] sm:$0xf0]  ;;  %v13352_v30 = vld [vmem:[#allocation7 + $0x50c] sm:$0xf] }
 0x562   : > { %8887 = vmatpush.bf16.msra.mxu3 %v10942_v9  ;;  %v11646_v9 = vor.u32 %v13400_v49, %v11643_v22  ;;  %v11483_v51 = vld [vmem:[#allocation7 + $0x558] sm:$0xf0]  ;;  %v11358_v20 = vor.u32 %v13328_v34, %v11355_v11  ;;  %v13320_v22 = vld [vmem:[#allocation7 + $0x40c] sm:$0xf] }
 0x563   : > { %8900 = vmatpush.bf16.msrb.mxu0 %v11070_v25  ;;  %v8694_v6 = vpop.f32.mrf.mxu0  ;;  %v11627_v25 = vld [vmem:[#allocation7 + $0x678] sm:$0xf0]  ;;  %v13476_v17 = vld [vmem:[#allocation7 + $0x8ec] sm:$0xf] }
 0x564   : > { %8913 = vmatpush.bf16.msrb.mxu2 %v11198_v62  ;;  %8875 = vmatmul.bf16.vlgmr.msra.gmra.mxu1 %v16497_v31  ;;  %v13436_v31 = vld [vmem:[#allocation7 + $0x7ac] sm:$0xf]  ;;  %v11611_v59 = vld [vmem:[#allocation7 + $0x658] sm:$0xf0] }
 0x565   : > { %8919 = vmatpush.bf16.msrb.mxu1 %v11438_v45  ;;  %8888 = vmatmul.bf16.vlgmr.msra.gmra.mxu3 %v16501_v39  ;;  %v11387_v39 = vld [vmem:[#allocation7 + $0x498] sm:$0xf0]  ;;  %v13364_v45 = vld [vmem:[#allocation7 + $0x56c] sm:$0xf] }
 0x566   : > { %8932 = vmatpush.bf16.msrb.mxu3 %v11566_v63  ;;  %8901 = vmatmul.bf16.vlgmr.msrb.gmra.mxu0 %v16506_v18  ;;  %v11790_v18 = vor.u32 %v13436_v31, %v11787_v28  ;;  %v11390_v42 = vor.u32 %v13336_v3, %v11387_v39  ;;  %v13396_v63 = vld [vmem:[#allocation7 + $0x66c] sm:$0xf]  ;;  %v11502_v44 = vor.u32 %v13364_v45, %v11499_v48  ;;  %v11739_v14 = vld [vmem:[#allocation7 + $0x758] sm:$0xf0] }
 0x567   : > { %8945 = vmatpush.bf16.msra.mxu0 %v11694_v16  ;;  %8914 = vmatmul.bf16.vlgmr.msrb.gmra.mxu2 %v16509_v43  ;;  %v8237_v43 = vperm.slane %v16651_v55, 2  ;;  %v13428_v62 = vld [vmem:[#allocation7 + $0x76c] sm:$0xf]  ;;  %v11630_v13 = vor.u32 %v13396_v63, %v11627_v25  ;;  %v11339_v31 = vld [vmem:[#allocation7 + $0x438] sm:$0xf0] }
 0x568   : > { %8958 = vmatpush.bf16.msra.mxu2 %v11822_v47  ;;  %v8681_v16 = vpop.f32.mrf.mxu3  ;;  %v11758_v12 = vor.u32 %v13428_v62, %v11755_v19  ;;  %v13356_v3 = vld [vmem:[#allocation7 + $0x52c] sm:$0xf]  ;;  %v11467_v39 = vld [vmem:[#allocation7 + $0x538] sm:$0xf0] }
 0x569   : > { %8920 = vmatpush.bf16.msrb.mxu1 %v11422_v61  ;;  %v8669_v7 = vadd.f32 %v8668_v29, %v8237_v43  ;;  %v8670_v38 = vpop.f32.mrf.mxu1  ;;  %v13360_v61 = vld [vmem:[#allocation7 + $0x54c] sm:$0xf]  ;;  %v11595_v36 = vld [vmem:[#allocation7 + $0x638] sm:$0xf0]  ;;  %v11470_v43 = vor.u32 %v13356_v3, %v11467_v39 }
 0x56a   : > { %8933 = vmatpush.bf16.msrb.mxu3 %v11550_v60  ;;  %v8707_v60 = vpop.f32.mrf.mxu2  ;;  %v11486_v5 = vor.u32 %v13360_v61, %v11483_v51  ;;  %v13388_v29 = vld [vmem:[#allocation7 + $0x62c] sm:$0xf]  ;;  %v11723_v49 = vld [vmem:[#allocation7 + $0x738] sm:$0xf0] }
 0x56b   : > { %8946 = vmatpush.bf16.msra.mxu0 %v11678_v57  ;;  %v8682_v47 = vadd.f32 %v8681_v16, %v8669_v7  ;;  %v8696_v58 = vpop.f32.mrf.mxu0  ;;  %v11451_v23 = vld [vmem:[#allocation7 + $0x518] sm:$0xf0]  ;;  %v13384_v63 = vld [vmem:[#allocation7 + $0x60c] sm:$0xf] }
 0x56c   : > { %8959 = vmatpush.bf16.msra.mxu2 %v11806_v10  ;;  %v13424_v10 = vld [vmem:[#allocation7 + $0x74c] sm:$0xf]  ;;  %v11947_v46 = vld [vmem:[#allocation7 + $0x8f8] sm:$0xf0]  ;;  %v11454_v19 = vor.u32 %v13352_v30, %v11451_v23 }
 0x56d   : > { %8921 = vmatpush.bf16.msrb.mxu1 %v11406_v26  ;;  %v8695_v57 = vadd.f32 %v8694_v6, %v8682_v47  ;;  %v13324_v26 = vld [vmem:[#allocation7 + $0x42c] sm:$0xf]  ;;  %v11323_v6 = vld [vmem:[#allocation7 + $0x418] sm:$0xf0] }
 0x56e   : > { %8934 = vmatpush.bf16.msrb.mxu3 %v11534_v32  ;;  %v11614_v32 = vor.u32 %v13392_v50, %v11611_v59  ;;  %v11342_v56 = vor.u32 %v13324_v26, %v11339_v31  ;;  %v11579_v25 = vld [vmem:[#allocation7 + $0x618] sm:$0xf0]  ;;  %v11326_v7 = vor.u32 %v13320_v22, %v11323_v6  ;;  %v13540_v16 = vld [vmem:[#allocation7 + $0xaec] sm:$0xf] }
 0x56f   : > { %8947 = vmatpush.bf16.msra.mxu0 %v11662_v53  ;;  %v16654_v28 = vadd.f32 %v8707_v60, %v8695_v57  ;;  %v11742_v53 = vor.u32 %v13424_v10, %v11739_v14  ;;  %v11707_v62 = vld [vmem:[#allocation7 + $0x718] sm:$0xf0]  ;;  %v11582_v47 = vor.u32 %v13384_v63, %v11579_v25  ;;  %v13472_v51 = vld [vmem:[#allocation7 + $0x8cc] sm:$0xf] }
 0x570   : > { %8960 = vmatpush.bf16.msra.mxu2 %v11790_v18  ;;  %v13420_v18 = vld [vmem:[#allocation7 + $0x72c] sm:$0xf]  ;;  %v12203_v34 = vld [vmem:[#allocation7 + $0xaf8] sm:$0xf0] }
 0x571   : > { %8922 = vmatpush.bf16.msrb.mxu1 %v11390_v42  ;;  %v8683_v42 = vpop.f32.mrf.mxu3  ;;  %v11726_v45 = vor.u32 %v13420_v18, %v11723_v49  ;;  %v12331_v38 = vld [vmem:[#allocation7 + $0xbf8] sm:$0xf0]  ;;  %v12206_v60 = vor.u32 %v13540_v16, %v12203_v34  ;;  %v13504_v50 = vld [vmem:[#allocation7 + $0x9cc] sm:$0xf] }
 0x572   : > { %8935 = vmatpush.bf16.msrb.mxu3 %v11518_v15  ;;  %v11598_v15 = vor.u32 %v13388_v29, %v11595_v36  ;;  %v8709_v48 = vpop.f32.mrf.mxu2  ;;  %v12059_v59 = vld [vmem:[#allocation7 + $0x9d8] sm:$0xf0]  ;;  %v13568_v14 = vld [vmem:[#allocation7 + $0xbcc] sm:$0xf] }
 0x573   : > { %8948 = vmatpush.bf16.msra.mxu0 %v11646_v9  ;;  %v13508_v9 = vld [vmem:[#allocation7 + $0x9ec] sm:$0xf]  ;;  %v12187_v58 = vld [vmem:[#allocation7 + $0xad8] sm:$0xf0]  ;;  %v12062_v26 = vor.u32 %v13504_v50, %v12059_v59 }
 0x574   : > { %8961 = vmatpush.bf16.msra.mxu2 %v11774_v37  ;;  %v12075_v37 = vld [vmem:[#allocation7 + $0x9f8] sm:$0xf0]  ;;  %v13468_v31 = vld [vmem:[#allocation7 + $0x8ac] sm:$0xf] }
 0x575   : > { %8923 = vmatpush.bf16.msrb.mxu1 %v11374_v21  ;;  %v13416_v21 = vld [vmem:[#allocation7 + $0x70c] sm:$0xf]  ;;  %v12078_v11 = vor.u32 %v13508_v9, %v12075_v37  ;;  %v12299_v49 = vld [vmem:[#allocation7 + $0xbb8] sm:$0xf0] }
 0x576   : > { %8936 = vmatpush.bf16.msrb.mxu3 %v11502_v44  ;;  %v11950_v44 = vor.u32 %v13476_v17, %v11947_v46  ;;  %v11710_v61 = vor.u32 %v13416_v21, %v11707_v62  ;;  %v13500_v39 = vld [vmem:[#allocation7 + $0x9ac] sm:$0xf]  ;;  %v12027_v23 = vld [vmem:[#allocation7 + $0x998] sm:$0xf0] }
 0x577   : > { %8949 = vmatpush.bf16.msra.mxu0 %v11630_v13  ;;  %v13572_v13 = vld [vmem:[#allocation7 + $0xbec] sm:$0xf]  ;;  %v12155_v46 = vld [vmem:[#allocation7 + $0xa98] sm:$0xf0] }
 0x578   : > { %8962 = vmatpush.bf16.msra.mxu2 %v11758_v12  ;;  %v11931_v12 = vld [vmem:[#allocation7 + $0x8d8] sm:$0xf0]  ;;  %v12334_v57 = vor.u32 %v13572_v13, %v12331_v38  ;;  %v13532_v36 = vld [vmem:[#allocation7 + $0xaac] sm:$0xf] }
 0x579   : > { %8924 = vmatpush.bf16.msrb.mxu1 %v11358_v20  ;;  %v13536_v20 = vld [vmem:[#allocation7 + $0xacc] sm:$0xf]  ;;  %v11934_v10 = vor.u32 %v13472_v51, %v11931_v12  ;;  %v12283_v48 = vld [vmem:[#allocation7 + $0xb98] sm:$0xf0] }
 0x57a   : > { %8937 = vmatpush.bf16.msrb.mxu3 %v11486_v5  ;;  %v12315_v5 = vld [vmem:[#allocation7 + $0xbd8] sm:$0xf0]  ;;  %v12190_v3 = vor.u32 %v13536_v20, %v12187_v58  ;;  %v13496_v30 = vld [vmem:[#allocation7 + $0x98c] sm:$0xf] }
 0x57b   : > { %8950 = vmatpush.bf16.msra.mxu0 %v11614_v32  ;;  %v11915_v32 = vld [vmem:[#allocation7 + $0x8b8] sm:$0xf0]  ;;  %v12318_v29 = vor.u32 %v13568_v14, %v12315_v5  ;;  %v13528_v17 = vld [vmem:[#allocation7 + $0xa8c] sm:$0xf]  ;;  %v12030_v37 = vor.u32 %v13496_v30, %v12027_v23 }
 0x57c   : > { %8963 = vmatpush.bf16.msra.mxu2 %v11742_v53  ;;  %v12043_v53 = vld [vmem:[#allocation7 + $0x9b8] sm:$0xf0]  ;;  %v11918_v18 = vor.u32 %v13468_v31, %v11915_v32  ;;  %v13460_v63 = vld [vmem:[#allocation7 + $0x86c] sm:$0xf] }
 0x57d   : > { %8925 = vmatpush.bf16.msrb.mxu1 %v11342_v56  ;;  %v12171_v56 = vld [vmem:[#allocation7 + $0xab8] sm:$0xf0]  ;;  %v12046_v22 = vor.u32 %v13500_v39, %v12043_v53  ;;  %v13492_v21 = vld [vmem:[#allocation7 + $0x96c] sm:$0xf] }
 0x57e   : > { %8938 = vmatpush.bf16.msrb.mxu3 %v11470_v43  ;;  %v13464_v43 = vld [vmem:[#allocation7 + $0x88c] sm:$0xf]  ;;  %v12174_v42 = vor.u32 %v13532_v36, %v12171_v56  ;;  %v11883_v25 = vld [vmem:[#allocation7 + $0x878] sm:$0xf0] }
 0x57f   : > { %8951 = vmatpush.bf16.msra.mxu0 %v11598_v15  ;;  %v12011_v62 = vld [vmem:[#allocation7 + $0x978] sm:$0xf0]  ;;  %v13556_v34 = vld [vmem:[#allocation7 + $0xb6c] sm:$0xf] }
 0x580   : > { %8964 = vmatpush.bf16.msra.mxu2 %v11726_v45  ;;  %v13560_v45 = vld [vmem:[#allocation7 + $0xb8c] sm:$0xf]  ;;  %v12139_v16 = vld [vmem:[#allocation7 + $0xa78] sm:$0xf0] }
 0x581   : > { %8926 = vmatpush.bf16.msrb.mxu1 %v11326_v7  ;;  %v8720_v6 = vpop.f32.mrf.mxu1  ;;  %v12158_v7 = vor.u32 %v13528_v17, %v12155_v46  ;;  %v13456_v38 = vld [vmem:[#allocation7 + $0x84c] sm:$0xf]  ;;  %v11995_v59 = vld [vmem:[#allocation7 + $0x958] sm:$0xf0] }
 0x582   : > { %8939 = vmatpush.bf16.msrb.mxu3 %v11454_v19  ;;  %v8721_v15 = vadd.f32 %v8720_v6, %v16654_v28  ;;  %v12286_v19 = vor.u32 %v13560_v45, %v12283_v48  ;;  %v11886_v28 = vor.u32 %v13460_v63, %v11883_v25  ;;  %v13488_v50 = vld [vmem:[#allocation7 + $0x94c] sm:$0xf]  ;;  %v12251_v32 = vld [vmem:[#allocation7 + $0xb58] sm:$0xf0] }
 0x583   : > { %8952 = vmatpush.bf16.msra.mxu0 %v11582_v47  ;;  %v8746_v9 = vpop.f32.mrf.mxu0  ;;  %v12014_v47 = vor.u32 %v13492_v21, %v12011_v62  ;;  %v13520_v58 = vld [vmem:[#allocation7 + $0xa4c] sm:$0xf]  ;;  %v11851_v53 = vld [vmem:[#allocation7 + $0x838] sm:$0xf0] }
 0x584   : > { %8965 = vmatpush.bf16.msra.mxu2 %v11710_v61  ;;  %8927 = vmatmul.bf16.vlgmr.msrb.gmra.mxu1 %v16530_v27  ;;  %v13564_v27 = vld [vmem:[#allocation7 + $0xbac] sm:$0xf]  ;;  %v11867_v61 = vld [vmem:[#allocation7 + $0x858] sm:$0xf0] }
 0x585   : > { %8971 = vmatpush.bf16.msra.mxu1 %v11950_v44  ;;  %8940 = vmatmul.bf16.vlgmr.msrb.gmra.mxu3 %v16533_v8  ;;  %v11899_v8 = vld [vmem:[#allocation7 + $0x898] sm:$0xf0]  ;;  %v13524_v44 = vld [vmem:[#allocation7 + $0xa6c] sm:$0xf]  ;;  %v11870_v5 = vor.u32 %v13456_v38, %v11867_v61 }
 0x586   : > { %8984 = vmatpush.bf16.msra.mxu3 %v12078_v11  ;;  %8953 = vmatmul.bf16.vlgmr.msra.gmra.mxu0 %v16540_v41  ;;  %v12302_v41 = vor.u32 %v13564_v27, %v12299_v49  ;;  %v12267_v11 = vld [vmem:[#allocation7 + $0xb78] sm:$0xf0]  ;;  %v12142_v12 = vor.u32 %v13524_v44, %v12139_v16  ;;  %v13552_v31 = vld [vmem:[#allocation7 + $0xb4c] sm:$0xf] }
 0x587   : > { %8997 = vmatpush.bf16.msrb.mxu0 %v12206_v60  ;;  %8966 = vmatmul.bf16.vlgmr.msra.gmra.mxu2 %v16545_v1  ;;  %v11902_v1 = vor.u32 %v13464_v43, %v11899_v8  ;;  %v13452_v39 = vld [vmem:[#allocation7 + $0x82c] sm:$0xf]  ;;  %v12254_v27 = vor.u32 %v13552_v31, %v12251_v32  ;;  %v11963_v17 = vld [vmem:[#allocation7 + $0x918] sm:$0xf0] }
 0x588   : > { %9010 = vmatpush.bf16.msrb.mxu2 %v12334_v57  ;;  %v8733_v13 = vpop.f32.mrf.mxu3  ;;  %v12270_v57 = vor.u32 %v13556_v34, %v12267_v11  ;;  %v13484_v56 = vld [vmem:[#allocation7 + $0x92c] sm:$0xf]  ;;  %v11854_v43 = vor.u32 %v13452_v39, %v11851_v53  ;;  %v12587_v63 = vld [vmem:[#allocation7 + $0xdf8] sm:$0xf0] }
 0x589   : > { %8972 = vmatpush.bf16.msra.mxu1 %v11934_v10  ;;  %v8734_v51 = vadd.f32 %v8733_v13, %v8721_v15  ;;  %v8722_v60 = vpop.f32.mrf.mxu1  ;;  %v12123_v10 = vld [vmem:[#allocation7 + $0xa58] sm:$0xf0]  ;;  %v13516_v49 = vld [vmem:[#allocation7 + $0xa2c] sm:$0xf] }
 0x58a   : > { %8985 = vmatpush.bf16.msra.mxu3 %v12062_v26  ;;  %v8759_v20 = vpop.f32.mrf.mxu2  ;;  %v12126_v36 = vor.u32 %v13520_v58, %v12123_v10  ;;  %v13548_v8 = vld [vmem:[#allocation7 + $0xb2c] sm:$0xf]  ;;  %v12715_v34 = vld [vmem:[#allocation7 + $0xef8] sm:$0xf0] }
 0x58b   : > { %8998 = vmatpush.bf16.msrb.mxu0 %v12190_v3  ;;  %v8747_v14 = vadd.f32 %v8746_v9, %v8734_v51  ;;  %v8748_v26 = vpop.f32.mrf.mxu0  ;;  %v11998_v3 = vor.u32 %v13488_v50, %v11995_v59  ;;  %v13448_v6 = vld [vmem:[#allocation7 + $0x80c] sm:$0xf]  ;;  %v12459_v9 = vld [vmem:[#allocation7 + $0xcf8] sm:$0xf0] }
 0x58c   : > { %9011 = vmatpush.bf16.msrb.mxu2 %v12318_v29  ;;  %v13480_v15 = vld [vmem:[#allocation7 + $0x90c] sm:$0xf]  ;;  %v12843_v38 = vld [vmem:[#allocation7 + $0xff8] sm:$0xf0] }
 0x58d   : > { %8973 = vmatpush.bf16.msra.mxu1 %v11918_v18  ;;  %v16661_v29 = vadd.f32 %v8759_v20, %v8747_v14  ;;  %v11979_v18 = vld [vmem:[#allocation7 + $0x938] sm:$0xf0]  ;;  %v13636_v45 = vld [vmem:[#allocation7 + $0xdec] sm:$0xf]  ;;  %v11966_v44 = vor.u32 %v13480_v15, %v11963_v17 }
 0x58e   : > { %8986 = vmatpush.bf16.msra.mxu3 %v12046_v22  ;;  %v12107_v22 = vld [vmem:[#allocation7 + $0xa38] sm:$0xf0]  ;;  %v11982_v30 = vor.u32 %v13484_v56, %v11979_v18  ;;  %v13512_v25 = vld [vmem:[#allocation7 + $0xa0c] sm:$0xf]  ;;  %v12590_v11 = vor.u32 %v13636_v45, %v12587_v63 }
 0x58f   : > { %8999 = vmatpush.bf16.msrb.mxu0 %v12174_v42  ;;  %v12235_v42 = vld [vmem:[#allocation7 + $0xb38] sm:$0xf0]  ;;  %v12110_v46 = vor.u32 %v13516_v49, %v12107_v22  ;;  %v13544_v62 = vld [vmem:[#allocation7 + $0xb0c] sm:$0xf] }
 0x590   : > { %9012 = vmatpush.bf16.msrb.mxu2 %v12302_v41  ;;  %v8735_v23 = vpop.f32.mrf.mxu3  ;;  %v11835_v41 = vld [vmem:[#allocation7 + $0x818] sm:$0xf0]  ;;  %v12238_v48 = vor.u32 %v13548_v8, %v12235_v42  ;;  %v13700_v13 = vld [vmem:[#allocation7 + $0xfec] sm:$0xf] }
 0x591   : > { %8974 = vmatpush.bf16.msra.mxu1 %v11902_v1  ;;  %v13604_v1 = vld [vmem:[#allocation7 + $0xcec] sm:$0xf]  ;;  %v11838_v21 = vor.u32 %v13448_v6, %v11835_v41  ;;  %v12571_v59 = vld [vmem:[#allocation7 + $0xdd8] sm:$0xf0] }
 0x592   : > { %8987 = vmatpush.bf16.msra.mxu3 %v12030_v37  ;;  %v8761_v37 = vpop.f32.mrf.mxu2  ;;  %v12462_v16 = vor.u32 %v13604_v1, %v12459_v9  ;;  %v13600_v51 = vld [vmem:[#allocation7 + $0xccc] sm:$0xf]  ;;  %v12699_v58 = vld [vmem:[#allocation7 + $0xed8] sm:$0xf0] }
 0x593   : > { %9000 = vmatpush.bf16.msrb.mxu0 %v12158_v7  ;;  %v12091_v7 = vld [vmem:[#allocation7 + $0xa18] sm:$0xf0]  ;;  %v13632_v50 = vld [vmem:[#allocation7 + $0xdcc] sm:$0xf] }
 0x594   : > { %9013 = vmatpush.bf16.msrb.mxu2 %v12286_v19  ;;  %v12219_v19 = vld [vmem:[#allocation7 + $0xb18] sm:$0xf0]  ;;  %v13664_v20 = vld [vmem:[#allocation7 + $0xecc] sm:$0xf]  ;;  %v12574_v26 = vor.u32 %v13632_v50, %v12571_v59 }
 0x595   : > { %8975 = vmatpush.bf16.msra.mxu1 %v11886_v28  ;;  %v13668_v28 = vld [vmem:[#allocation7 + $0xeec] sm:$0xf]  ;;  %v12222_v61 = vor.u32 %v13544_v62, %v12219_v19  ;;  %v12427_v32 = vld [vmem:[#allocation7 + $0xcb8] sm:$0xf0] }
 0x596   : > { %8988 = vmatpush.bf16.msra.mxu3 %v12014_v47  ;;  %v12094_v47 = vor.u32 %v13512_v25, %v12091_v7  ;;  %v12718_v60 = vor.u32 %v13668_v28, %v12715_v34  ;;  %v13696_v14 = vld [vmem:[#allocation7 + $0xfcc] sm:$0xf]  ;;  %v12555_v53 = vld [vmem:[#allocation7 + $0xdb8] sm:$0xf0] }
 0x597   : > { %9001 = vmatpush.bf16.msrb.mxu0 %v12142_v12  ;;  %v12443_v12 = vld [vmem:[#allocation7 + $0xcd8] sm:$0xf0]  ;;  %v13596_v31 = vld [vmem:[#allocation7 + $0xcac] sm:$0xf] }
 0x598   : > { %9014 = vmatpush.bf16.msrb.mxu2 %v12270_v57  ;;  %v12846_v57 = vor.u32 %v13700_v13, %v12843_v38  ;;  %v12446_v10 = vor.u32 %v13600_v51, %v12443_v12  ;;  %v13628_v39 = vld [vmem:[#allocation7 + $0xdac] sm:$0xf]  ;;  %v12683_v18 = vld [vmem:[#allocation7 + $0xeb8] sm:$0xf0] }
 0x599   : > { %8976 = vmatpush.bf16.msra.mxu1 %v11870_v5  ;;  %v12827_v5 = vld [vmem:[#allocation7 + $0xfd8] sm:$0xf0]  ;;  %v13660_v56 = vld [vmem:[#allocation7 + $0xeac] sm:$0xf]  ;;  %v12558_v22 = vor.u32 %v13628_v39, %v12555_v53 }
 0x59a   : > { %8989 = vmatpush.bf16.msra.mxu3 %v11998_v3  ;;  %v12702_v3 = vor.u32 %v13664_v20, %v12699_v58  ;;  %v12811_v49 = vld [vmem:[#allocation7 + $0xfb8] sm:$0xf0]  ;;  %v12686_v8 = vor.u32 %v13660_v56, %v12683_v18  ;;  %v13624_v6 = vld [vmem:[#allocation7 + $0xd8c] sm:$0xf] }
 0x59b   : > { %9002 = vmatpush.bf16.msrb.mxu0 %v12126_v36  ;;  %v12830_v36 = vor.u32 %v13696_v14, %v12827_v5  ;;  %v13656_v41 = vld [vmem:[#allocation7 + $0xe8c] sm:$0xf]  ;;  %v12667_v15 = vld [vmem:[#allocation7 + $0xe98] sm:$0xf0] }
 0x59c   : > { %9015 = vmatpush.bf16.msrb.mxu2 %v12254_v27  ;;  %v12430_v27 = vor.u32 %v13596_v31, %v12427_v32  ;;  %v12795_v1 = vld [vmem:[#allocation7 + $0xf98] sm:$0xf0]  ;;  %v13588_v45 = vld [vmem:[#allocation7 + $0xc6c] sm:$0xf]  ;;  %v12670_v37 = vor.u32 %v13656_v41, %v12667_v15 }
 0x59d   : > { %8977 = vmatpush.bf16.msra.mxu1 %v11854_v43  ;;  %v13592_v43 = vld [vmem:[#allocation7 + $0xc8c] sm:$0xf]  ;;  %v12523_v25 = vld [vmem:[#allocation7 + $0xd78] sm:$0xf0] }
 0x59e   : > { %8990 = vmatpush.bf16.msra.mxu3 %v11982_v30  ;;  %v12539_v30 = vld [vmem:[#allocation7 + $0xd98] sm:$0xf0]  ;;  %v13620_v63 = vld [vmem:[#allocation7 + $0xd6c] sm:$0xf] }
 0x59f   : > { %9003 = vmatpush.bf16.msrb.mxu0 %v12110_v46  ;;  %v13688_v46 = vld [vmem:[#allocation7 + $0xf8c] sm:$0xf]  ;;  %v12542_v9 = vor.u32 %v13624_v6, %v12539_v30  ;;  %v12651_v62 = vld [vmem:[#allocation7 + $0xe78] sm:$0xf0] }
 0x5a0   : > { %9016 = vmatpush.bf16.msrb.mxu2 %v12238_v48  ;;  %v12395_v48 = vld [vmem:[#allocation7 + $0xc78] sm:$0xf0]  ;;  %v12798_v7 = vor.u32 %v13688_v46, %v12795_v1  ;;  %v13684_v19 = vld [vmem:[#allocation7 + $0xf6c] sm:$0xf] }
 0x5a1   : > { %8978 = vmatpush.bf16.msra.mxu1 %v11838_v21  ;;  %v8772_v42 = vpop.f32.mrf.mxu1  ;;  %v13652_v21 = vld [vmem:[#allocation7 + $0xe6c] sm:$0xf]  ;;  %v12507_v51 = vld [vmem:[#allocation7 + $0xd58] sm:$0xf0] }
 0x5a2   : > { %8991 = vmatpush.bf16.msra.mxu3 %v11966_v44  ;;  %v8773_v23 = vadd.f32 %v8772_v42, %v16661_v29  ;;  %v12398_v29 = vor.u32 %v13588_v45, %v12395_v48  ;;  %v12779_v44 = vld [vmem:[#allocation7 + $0xf78] sm:$0xf0]  ;;  %v13584_v34 = vld [vmem:[#allocation7 + $0xc4c] sm:$0xf]  ;;  %v12654_v13 = vor.u32 %v13652_v21, %v12651_v62 }
 0x5a3   : > { %9004 = vmatpush.bf16.msrb.mxu0 %v12094_v47  ;;  %v8798_v17 = vpop.f32.mrf.mxu0  ;;  %v12782_v12 = vor.u32 %v13684_v19, %v12779_v44  ;;  %v13648_v50 = vld [vmem:[#allocation7 + $0xe4c] sm:$0xf]  ;;  %v12635_v59 = vld [vmem:[#allocation7 + $0xe58] sm:$0xf0] }
 0x5a4   : > { %9017 = vmatpush.bf16.msrb.mxu2 %v12222_v61  ;;  %8979 = vmatmul.bf16.vlgmr.msra.gmra.mxu1 %v16560_v40  ;;  %v13692_v40 = vld [vmem:[#allocation7 + $0xfac] sm:$0xf]  ;;  %v12763_v14 = vld [vmem:[#allocation7 + $0xf58] sm:$0xf0] }
 0x5a5   : > { %9023 = vmatpush.bf16.msrb.mxu1 %v12462_v16  ;;  %8992 = vmatmul.bf16.vlgmr.msra.gmra.mxu3 %v16563_v24  ;;  %v12411_v24 = vld [vmem:[#allocation7 + $0xc98] sm:$0xf0]  ;;  %v12526_v16 = vor.u32 %v13620_v63, %v12523_v25  ;;  %v13616_v61 = vld [vmem:[#allocation7 + $0xd4c] sm:$0xf] }
 0x5a6   : > { %9036 = vmatpush.bf16.msrb.mxu3 %v12590_v11  ;;  %9005 = vmatmul.bf16.vlgmr.msrb.gmra.mxu0 %v16567_v4  ;;  %v12814_v4 = vor.u32 %v13692_v40, %v12811_v49  ;;  %v12379_v11 = vld [vmem:[#allocation7 + $0xc58] sm:$0xf0]  ;;  %v12510_v5 = vor.u32 %v13616_v61, %v12507_v51  ;;  %v13612_v39 = vld [vmem:[#allocation7 + $0xd2c] sm:$0xf] }
 0x5a7   : > { %9049 = vmatpush.bf16.msra.mxu0 %v12718_v60  ;;  %9018 = vmatmul.bf16.vlgmr.msrb.gmra.mxu2 %v16569_v54  ;;  %v12414_v54 = vor.u32 %v13592_v43, %v12411_v24  ;;  %v12382_v20 = vor.u32 %v13584_v34, %v12379_v11  ;;  %v12363_v31 = vld [vmem:[#allocation7 + $0xc38] sm:$0xf0]  ;;  %v13644_v56 = vld [vmem:[#allocation7 + $0xe2c] sm:$0xf] }
 0x5a8   : > { %9062 = vmatpush.bf16.msra.mxu2 %v12846_v57  ;;  %v8785_v28 = vpop.f32.mrf.mxu3  ;;  %v12491_v53 = vld [vmem:[#allocation7 + $0xd38] sm:$0xf0]  ;;  %v13676_v40 = vld [vmem:[#allocation7 + $0xf2c] sm:$0xf] }
 0x5a9   : > { %9024 = vmatpush.bf16.msrb.mxu1 %v12446_v10  ;;  %v8786_v47 = vadd.f32 %v8785_v28, %v8773_v23  ;;  %v8774_v38 = vpop.f32.mrf.mxu1  ;;  %v13680_v10 = vld [vmem:[#allocation7 + $0xf4c] sm:$0xf]  ;;  %v12619_v18 = vld [vmem:[#allocation7 + $0xe38] sm:$0xf0] }
 0x5aa   : > { %9037 = vmatpush.bf16.msrb.mxu3 %v12574_v26  ;;  %v8811_v60 = vpop.f32.mrf.mxu2  ;;  %v13580_v26 = vld [vmem:[#allocation7 + $0xc2c] sm:$0xf]  ;;  %v12747_v49 = vld [vmem:[#allocation7 + $0xf38] sm:$0xf0]  ;;  %v12622_v42 = vor.u32 %v13644_v56, %v12619_v18 }
 0x5ab   : > { %9050 = vmatpush.bf16.msra.mxu0 %v12702_v3  ;;  %v8799_v57 = vadd.f32 %v8798_v17, %v8786_v47  ;;  %v8800_v58 = vpop.f32.mrf.mxu0  ;;  %v12638_v3 = vor.u32 %v13648_v50, %v12635_v59  ;;  %v13576_v24 = vld [vmem:[#allocation7 + $0xc0c] sm:$0xf]  ;;  %v12475_v30 = vld [vmem:[#allocation7 + $0xd18] sm:$0xf0] }
 0x5ac   : > { %9063 = vmatpush.bf16.msra.mxu2 %v12830_v36  ;;  %v12766_v36 = vor.u32 %v13680_v10, %v12763_v14  ;;  %v13608_v6 = vld [vmem:[#allocation7 + $0xd0c] sm:$0xf]  ;;  %v12603_v15 = vld [vmem:[#allocation7 + $0xe18] sm:$0xf0] }
 0x5ad   : > { %9025 = vmatpush.bf16.msrb.mxu1 %v12430_v27  ;;  %v8812_v32 = vadd.f32 %v8811_v60, %v8799_v57  ;;  %v12366_v27 = vor.u32 %v13580_v26, %v12363_v31  ;;  %v13640_v41 = vld [vmem:[#allocation7 + $0xe0c] sm:$0xf]  ;;  %v12731_v46 = vld [vmem:[#allocation7 + $0xf18] sm:$0xf0]  ;;  %v12478_v1 = vor.u32 %v13608_v6, %v12475_v30 }
 0x5ae   : > { %9038 = vmatpush.bf16.msrb.mxu3 %v12558_v22  ;;  %v12494_v22 = vor.u32 %v13612_v39, %v12491_v53  ;;  %v13672_v17 = vld [vmem:[#allocation7 + $0xf0c] sm:$0xf] }
 0x5af   : > { %9051 = vmatpush.bf16.msra.mxu0 %v12686_v8  ;;  %v12347_v8 = vld [vmem:[#allocation7 + $0xc18] sm:$0xf0]  ;;  %v12734_v45 = vor.u32 %v13672_v17, %v12731_v46 }
 0x5b0   : > { %9064 = vmatpush.bf16.msra.mxu2 %v12814_v4  ;;  %v8787_v43 = vpop.f32.mrf.mxu3  ;;  %v12750_v4 = vor.u32 %v13676_v40, %v12747_v49 }
 0x5b1   : > { %9026 = vmatpush.bf16.msrb.mxu1 %v12414_v54  ;;  %v12350_v54 = vor.u32 %v13576_v24, %v12347_v8 }
 0x5b2   : > { %9039 = vmatpush.bf16.msrb.mxu3 %v12542_v9  ;;  %v8813_v23 = vpop.f32.mrf.mxu2  ;;  %v12606_v9 = vor.u32 %v13640_v41, %v12603_v15 }
 0x5b3   : > { %9052 = vmatpush.bf16.msra.mxu0 %v12670_v37 }
 0x5b4   : > { %9065 = vmatpush.bf16.msra.mxu2 %v12798_v7 }
 0x5b5   : > { %9027 = vmatpush.bf16.msrb.mxu1 %v12398_v29 }
 0x5b6   : > { %9040 = vmatpush.bf16.msrb.mxu3 %v12526_v16 }
 0x5b7   : > { %9053 = vmatpush.bf16.msra.mxu0 %v12654_v13 }
 0x5b8   : > { %9066 = vmatpush.bf16.msra.mxu2 %v12782_v12 }
 0x5b9   : > { %9028 = vmatpush.bf16.msrb.mxu1 %v12382_v20 }
 0x5ba   : > { %9041 = vmatpush.bf16.msrb.mxu3 %v12510_v5 }
 0x5bb   : > { %9054 = vmatpush.bf16.msra.mxu0 %v12638_v3 }
 0x5bc   : > { %9067 = vmatpush.bf16.msra.mxu2 %v12766_v36 }
 0x5bd   : > { %9029 = vmatpush.bf16.msrb.mxu1 %v12366_v27 }
 0x5be   : > { %9042 = vmatpush.bf16.msrb.mxu3 %v12494_v22 }
 0x5bf   : > { %9055 = vmatpush.bf16.msra.mxu0 %v12622_v42 }
 0x5c0   : > { %9068 = vmatpush.bf16.msra.mxu2 %v12750_v4 }
 0x5c1   : > { %9030 = vmatpush.bf16.msrb.mxu1 %v12350_v54  ;;  %v8824_v48 = vpop.f32.mrf.mxu1 }
 0x5c2   : > { %9043 = vmatpush.bf16.msrb.mxu3 %v12478_v1  ;;  %v8825_v37 = vadd.f32 %v8824_v48, %v8812_v32  ;;  %v9090_v1 = vlaneseq }
 0x5c3   : > { %9056 = vmatpush.bf16.msra.mxu0 %v12606_v9  ;;  %v8850_v63 = vpop.f32.mrf.mxu0 }
 0x5c4   : > { %9069 = vmatpush.bf16.msra.mxu2 %v12734_v45  ;;  %9031 = vmatmul.bf16.vlgmr.msrb.gmra.mxu1 %v16580_v2  ;;  %v8238_v2 = vperm.slane %v16651_v55, 3  ;;  %vm9092_vm0 = vcmp.lt.s32.totalorder %v9090_v1, 512 }
 0x5c5   : > { %9044 = vmatmul.bf16.vlgmr.msrb.gmra.mxu3 %v16583_v35 }
 0x5c6   : > { %9057 = vmatmul.bf16.vlgmr.msra.gmra.mxu0 %v16587_v33 }
 0x5c7   : > { %9070 = vmatmul.bf16.vlgmr.msra.gmra.mxu2 %v16589_v52 }
 0x5c8   : > { %v8837_v25 = vpop.f32.mrf.mxu3 }
 0x5c9   : > { %v8838_v7 = vadd.f32 %v8837_v25, %v8825_v37  ;;  %v8826_v21 = vpop.f32.mrf.mxu1 }
 0x5ca   : > { %v8863_v62 = vpop.f32.mrf.mxu2 }
 0x5cb   : > { %v8851_v29 = vadd.f32 %v8850_v63, %v8838_v7  ;;  %v8852_v19 = vpop.f32.mrf.mxu0 }
 0x5cd   : > { %v8864_v44 = vadd.f32 %v8863_v62, %v8851_v29 }
 0x5cf   : > { %v9077_v17 = vmax.f32 %v8864_v44, 0.0 }
 0x5d0   : > { %v8839_v16 = vpop.f32.mrf.mxu3 }
 0x5d1   : > { %v9084_v48 = vrot.slane %v9077_v17, 6 }
 0x5d2   : > { %v8865_v28 = vpop.f32.mrf.mxu2 }
 0x5e1   : > { %v8876_v34 = vpop.f32.mrf.mxu1 }
 0x5e2   : > { %v8877_v11 = vadd.f32 %v8876_v34, %v8238_v2 }
 0x5e3   : > { %v8902_v35 = vpop.f32.mrf.mxu0 }
 0x5e8   : > { %v8889_v33 = vpop.f32.mrf.mxu3 }
 0x5e9   : > { %v8890_v47 = vadd.f32 %v8889_v33, %v8877_v11  ;;  %v8878_v52 = vpop.f32.mrf.mxu1 }
 0x5ea   : > { %v8915_v13 = vpop.f32.mrf.mxu2 }
 0x5eb   : > { %v8903_v38 = vadd.f32 %v8902_v35, %v8890_v47  ;;  %v8904_v61 = vpop.f32.mrf.mxu0 }
 0x5ed   : > { %v8916_v51 = vadd.f32 %v8915_v13, %v8903_v38 }
 0x5f0   : > { %v8891_v12 = vpop.f32.mrf.mxu3 }
 0x5f2   : > { %v8917_v60 = vpop.f32.mrf.mxu2 }
 0x601   : > { %v8928_v50 = vpop.f32.mrf.mxu1 }
 0x602   : > { %v8929_v53 = vadd.f32 %v8928_v50, %v8916_v51 }
 0x603   : > { %v8954_v59 = vpop.f32.mrf.mxu0 }
 0x608   : > { %v8941_v57 = vpop.f32.mrf.mxu3 }
 0x609   : > { %v8930_v20 = vpop.f32.mrf.mxu1  ;;  %v8942_v36 = vadd.f32 %v8941_v57, %v8929_v53 }
 0x60a   : > { %v8967_v58 = vpop.f32.mrf.mxu2 }
 0x60b   : > { %v8956_v10 = vpop.f32.mrf.mxu0  ;;  %v8955_v27 = vadd.f32 %v8954_v59, %v8942_v36 }
 0x60d   : > { %v8968_v40 = vadd.f32 %v8967_v58, %v8955_v27 }
 0x610   : > { %v8943_v14 = vpop.f32.mrf.mxu3 }
 0x612   : > { %v8969_v5 = vpop.f32.mrf.mxu2 }
 0x621   : > { %v8980_v55 = vpop.f32.mrf.mxu1 }
 0x622   : > { %v8981_v49 = vadd.f32 %v8980_v55, %v8968_v40 }
 0x623   : > { %v9006_v26 = vpop.f32.mrf.mxu0 }
 0x628   : > { %v8993_v31 = vpop.f32.mrf.mxu3 }
 0x629   : > { %v8982_v32 = vpop.f32.mrf.mxu1  ;;  %v8994_v22 = vadd.f32 %v8993_v31, %v8981_v49 }
 0x62a   : > { %v9019_v3 = vpop.f32.mrf.mxu2 }
 0x62b   : > { %v9008_v39 = vpop.f32.mrf.mxu0  ;;  %v9007_v43 = vadd.f32 %v9006_v26, %v8994_v22 }
 0x62d   : > { %v9020_v42 = vadd.f32 %v9019_v3, %v9007_v43 }
 0x630   : > { %v8995_v56 = vpop.f32.mrf.mxu3 }
 0x632   : > { %v9021_v18 = vpop.f32.mrf.mxu2 }
 0x641   : > { %v9032_v24 = vpop.f32.mrf.mxu1 }
 0x642   : > { %v9033_v6 = vadd.f32 %v9032_v24, %v9020_v42 }
 0x643   : > { %v9058_v8 = vpop.f32.mrf.mxu0 }
 0x648   : > { %v9045_v30 = vpop.f32.mrf.mxu3 }
 0x649   : > { %v9046_v4 = vadd.f32 %v9045_v30, %v9033_v6  ;;  %v9034_v23 = vpop.f32.mrf.mxu1 }
 0x64a   : > { %v9071_v41 = vpop.f32.mrf.mxu2 }
 0x64b   : > { %v9059_v15 = vadd.f32 %v9058_v8, %v9046_v4  ;;  %v9060_v54 = vpop.f32.mrf.mxu0 }
 0x64d   : > { %v9072_v46 = vadd.f32 %v9071_v41, %v9059_v15 }
 0x64f   : > { %v9078_v9 = vmax.f32 %v9072_v46, 0.0 }
 0x650   : > { %v9047_v45 = vpop.f32.mrf.mxu3 }
 0x651   : > { %v9085_v37 = vrot.slane %v9078_v9, 5 }
 0x652   : > { %v9073_v63 = vpop.f32.mrf.mxu2 }
 0x653   : > { %v9087_v25 = vsel %vm2895_vm12, %v9084_v48, %v9085_v37 }
 0x654   : > { %v9088_v7 = vsel %vm1892_vm4, %v16645_v0, %v9087_v25 }
 0x655   : > { %9094 = vst.msk [vmem:[%s380_s21] sm:$0xf] %vm9092_vm0, %v9088_v7 }
 0x656 PF: > { %s21_s27 = sadd.s32 1, %s13939_s27  }
 0x657   : > { %p18_p7 = scmp.ge.s32.totalorder %s21_s27, 4  }
 0x659   :  { %20 = sbr.rel (!%p18_p7) target bundleno = 3 (0x3), region = 115 }
 0x65e   :  { %9114 = vsyncpa [#allocation3], 1 }
 0x65f   :  { %9116 = vsyncpa [#allocation3 + $0x1], 1 }
 0x660   :  { %9117 = vsyncpa [#allocation5], 1 }
 0x661   :  { %9118 = vsyncpa [#allocation8], 1 }

</bundles_post_ra>
